<compile_context>
chip_gen: v5e
topology: v5e:2x2
jax: 0.10.0
libtpu: 0.0.40
codegen_flags: <defaults>
</compile_context>

<pallas_src>
import functools

import jax
import jax.numpy as jnp
from jax.experimental import pallas as pl
from jax.experimental.pallas import tpu as pltpu

RGB_MAX = 255.0
DIV_FLOW = 20.0


# ----------------------------------------------------------------------------
# Pallas kernel: stride-1 "valid" conv expressed as KK x KK shifted matmuls.
#   x block  : one padded input row   (1, 1, WA, Cin)     DMA'd per (oh, kh)
#   w block  : all taps               (KK, KK, Cin, Cout) resident in VMEM
#   b block  : bias                   (1, Cout)
#   out block: one output row         (1, 1, OW, Cout)    accumulator-resident
# ----------------------------------------------------------------------------
def _conv_row_kernel(x_ref, w_ref, b_ref, o_ref, acc_ref, *,
                     num_taps, ow, negative_slope, scale):
    kh = pl.program_id(2)

    @pl.when(kh == 0)
    def _init():
        acc_ref[...] = jnp.zeros_like(acc_ref)

    for kw in range(num_taps):                    # static, small (1..4)
        xs = x_ref[0, 0, kw:kw + ow, :]           # (OW, Cin)   bf16
        ws = w_ref[kh, kw]                        # (Cin, Cout) bf16
        acc_ref[...] += jnp.dot(xs, ws, preferred_element_type=jnp.float32)

    @pl.when(kh == num_taps - 1)
    def _finalize():
        r = acc_ref[...] + b_ref[...]             # f32 (OW, Cout)
        if negative_slope is not None:            # fused LeakyReLU
            r = jnp.where(r >= 0, r, negative_slope * r)
        if scale is not None:                     # fused div_flow scale
            r = r * scale
        o_ref[0, 0] = r.astype(o_ref.dtype)


def _conv_pallas(X, W2, b, *, negative_slope, scale, out_dtype):
    """X: (N, HA, WA, Cin) bf16 'valid'-conv layout; W2: (KK, KK, Cin, Cout)."""
    N, HA, WA, Cin = X.shape
    KK = W2.shape[0]
    Cout = W2.shape[-1]
    OH = HA - KK + 1
    OW = WA - KK + 1

    Xb = X.astype(jnp.bfloat16)
    Wb = W2.astype(jnp.bfloat16)
    bb = b.reshape(1, Cout).astype(jnp.float32)

    # Per-layer VMEM budget (double-buffered blocks + resident weights + acc),
    # capped well under v7x's 64 MiB physical VMEM.
    x_blk = WA * Cin * 2
    o_blk = OW * Cout * jnp.dtype(out_dtype).itemsize
    w_blk = KK * KK * Cin * Cout * 2
    acc_b = OW * Cout * 4
    need = 2 * (x_blk + o_blk + w_blk) + acc_b + 2 * Cout * 4
    vmem_limit = int(min(max(2 * need, 16 << 20), 48 << 20))

    kernel = functools.partial(_conv_row_kernel, num_taps=KK, ow=OW,
                               negative_slope=negative_slope, scale=scale)

    return pl.pallas_call(
        kernel,
        out_shape=jax.ShapeDtypeStruct((N, OH, OW, Cout), out_dtype),
        grid_spec=pltpu.PrefetchScalarGridSpec(
            num_scalar_prefetch=0,
            grid=(N, OH, KK),
            in_specs=[
                # one padded input row: row index = oh + kh (block size 1 on H)
                pl.BlockSpec((1, 1, WA, Cin), lambda n, oh, kh: (n, oh + kh, 0, 0)),
                # full weights, resident (constant index map -> fetched once)
                pl.BlockSpec((KK, KK, Cin, Cout), lambda n, oh, kh: (0, 0, 0, 0)),
                pl.BlockSpec((1, Cout), lambda n, oh, kh: (0, 0)),
            ],
            out_specs=pl.BlockSpec((1, 1, OW, Cout), lambda n, oh, kh: (n, oh, 0, 0)),
            scratch_shapes=[pltpu.VMEM((OW, Cout), jnp.float32)],
        ),
        compiler_params=pltpu.CompilerParams(
            dimension_semantics=("parallel", "parallel", "arbitrary"),
            vmem_limit_bytes=vmem_limit,
        ),
    )(Xb, Wb, bb)


# ----------------------------------------------------------------------------
# Layer wrapper: rewrite every conv as a stride-1 "valid" conv.
#   stride 2, k > 1 : space-to-depth phase split (no k^2 HBM duplication)
#   stride 1        : plain spatial zero-pad
#   stride 2, k = 1 : spatial subsample + 1x1 matmul
# ----------------------------------------------------------------------------
def conv_layer(x, w, b, *, kernel_size, stride, negative_slope,
               scale=None, out_dtype=jnp.bfloat16):
    k = kernel_size
    assert w.shape[0] == k and w.shape[1] == k
    p = (k - 1) // 2
    N, H, W, Cin = x.shape
    Cout = w.shape[-1]

    if stride == 1:
        X = jnp.pad(x, ((0, 0), (p, p), (p, p), (0, 0)))
        W2 = w
    elif k == 1:                                   # 1x1, stride 2
        X = x[:, ::2, ::2, :]
        W2 = w.reshape(1, 1, Cin, Cout)
    else:                                          # k x k, stride 2 -> phase split
        OH = (H + 2 * p - k) // 2 + 1
        OW = (W + 2 * p - k) // 2 + 1
        KK = (k + 1) // 2
        HA = OH + KK - 1
        WA = OW + KK - 1
        xpad = jnp.pad(x, ((0, 0),
                           (p, 2 * HA - H - p),
                           (p, 2 * WA - W - p),
                           (0, 0)))
        X = (xpad.reshape(N, HA, 2, WA, 2, Cin)
                 .transpose(0, 1, 3, 2, 4, 5)
                 .reshape(N, HA, WA, 4 * Cin))
        wpad = jnp.pad(w, ((0, 2 * KK - k), (0, 2 * KK - k), (0, 0), (0, 0)))
        W2 = (wpad.reshape(KK, 2, KK, 2, Cin, Cout)
                  .transpose(0, 2, 1, 3, 4, 5)
                  .reshape(KK, KK, 4 * Cin, Cout))

    return _conv_pallas(X, W2, b, negative_slope=negative_slope,
                        scale=scale, out_dtype=out_dtype)


# ----------------------------------------------------------------------------
# Full forward pass
# ----------------------------------------------------------------------------
def flownet_encoder_forward(inputs, params, *, rgb_max=RGB_MAX,
                            div_flow=DIV_FLOW, training=False):
    """inputs: (B, 3, 2, H, W) float32 (same as the PyTorch module)."""
    inputs = inputs.astype(jnp.float32)
    B, C, F, H, W = inputs.shape
    # per-(batch, color) mean over frames + spatial, then normalize (tiny; XLA)
    mean = inputs.reshape(B, C, -1).mean(axis=-1).reshape(B, C, 1, 1, 1)
    x = (inputs - mean) / rgb_max
    x = jnp.concatenate([x[:, :, 0], x[:, :, 1]], axis=1)      # (B, 6, H, W)
    x = jnp.transpose(x, (0, 2, 3, 1)).astype(jnp.bfloat16)    # NHWC, bf16

    x = conv_layer(x, *params['convL1'],   kernel_size=7, stride=2, negative_slope=0.1)
    x = conv_layer(x, *params['convL2'],   kernel_size=5, stride=2, negative_slope=0.1)
    x = conv_layer(x, *params['convL3'],   kernel_size=5, stride=2, negative_slope=0.1)
    x = conv_layer(x, *params['convL4'],   kernel_size=1, stride=2, negative_slope=0.1)
    x = conv_layer(x, *params['convL4_1'], kernel_size=3, stride=1, negative_slope=0.1)
    x = conv_layer(x, *params['out'],      kernel_size=1, stride=2, negative_slope=None,
                   scale=None if training else div_flow, out_dtype=jnp.float32)

    # nearest-neighbour 2x upsample + NCHW transpose on a tiny tensor (XLA glue)
    x = jnp.repeat(jnp.repeat(x, 2, axis=1), 2, axis=2)
    flow4 = jnp.transpose(x, (0, 3, 1, 2))
    return flow4


# ----------------------------------------------------------------------------
# Parameters (deterministic synthetic init, HWIO weights)
# ----------------------------------------------------------------------------
def init_params(key):
    defs = {
        'convL1':   (7,   6,  64),
        'convL2':   (5,  64, 128),
        'convL3':   (5, 128, 256),
        'convL4':   (1, 256, 512),
        'convL4_1': (3, 512, 512),
        'out':      (1, 512, 128),
    }
    params = {}
    for name, (k, cin, cout) in defs.items():
        key, wk, bk = jax.random.split(key, 3)
        fan_in = k * k * cin
        bound = 1.0 / (fan_in ** 0.5)
        w = jax.random.uniform(wk, (k, k, cin, cout), jnp.float32, -bound, bound)
        b = jax.random.uniform(bk, (cout,), jnp.float32, -bound, bound)
        params[name] = (w, b)
    return params


# ----------------------------------------------------------------------------
# Pure-JAX f32 reference (sanity check)
# ----------------------------------------------------------------------------
def reference_forward(inputs, params, *, rgb_max=RGB_MAX, div_flow=DIV_FLOW):
    B, C, F, H, W = inputs.shape
    mean = inputs.reshape(B, C, -1).mean(axis=-1).reshape(B, C, 1, 1, 1)
    x = (inputs - mean) / rgb_max
    x = jnp.concatenate([x[:, :, 0], x[:, :, 1]], axis=1)

    def conv(x, w, b, stride, slope):
        k = w.shape[0]
        p = (k - 1) // 2
        y = jax.lax.conv_general_dilated(
            x, w, (stride, stride), [(p, p), (p, p)],
            dimension_numbers=('NCHW', 'HWIO', 'NCHW'))
        y = y + b.reshape(1, -1, 1, 1)
        if slope is not None:
            y = jnp.where(y >= 0, y, slope * y)
        return y

    x = conv(x, *params['convL1'], 2, 0.1)
    x = conv(x, *params['convL2'], 2, 0.1)
    x = conv(x, *params['convL3'], 2, 0.1)
    x = conv(x, *params['convL4'], 2, 0.1)
    x = conv(x, *params['convL4_1'], 1, 0.1)
    x = conv(x, *params['out'], 2, None)
    x = jnp.repeat(jnp.repeat(x, 2, axis=2), 2, axis=3)
    return x * div_flow


if __name__ == "__main__":
    key = jax.random.PRNGKey(0)
    pkey, xkey = jax.random.split(key)
    params = init_params(pkey)
    # (batch=2, rgb=3, frames=2, H=32, W=32), values in [0, rgb_max]
    inputs = jax.random.uniform(xkey, (2, 3, 2, 32, 32), jnp.float32, 0.0, 255.0)

    fwd = jax.jit(flownet_encoder_forward)
    out = jax.block_until_ready(fwd(inputs, params))

    assert out.shape == (2, 128, 2, 2), out.shape
    assert bool(jnp.all(jnp.isfinite(out)))

    ref = reference_forward(inputs, params)
    # bf16 MXU operands (f32 accumulation) over 6 layers, outputs scaled by
    # div_flow=20 -> slightly relaxed tolerance vs the pure-f32 reference.
    max_err = float(jnp.max(jnp.abs(out - ref)))
    assert bool(jnp.allclose(out, ref, rtol=2e-2, atol=5e-2)), max_err
    print("KERNEL_OK")
</pallas_src>

<mosaic_0001>
module attributes {stable_mosaic.version = 11 : i64} {
  func.func @_conv_row_kernel(%arg0: i32, %arg1: i32, %arg2: i32, %arg3: memref<1x1x19x24xbf16, #tpu.memory_space<vmem>>, %arg4: memref<4x4x24x64xbf16, #tpu.memory_space<vmem>>, %arg5: memref<1x64xf32, #tpu.memory_space<vmem>>, %arg6: memref<1x1x16x64xbf16, #tpu.memory_space<vmem>>, %arg7: memref<16x64xf32, #tpu.memory_space<vmem>>) attributes {dimension_semantics = [#tpu.dimension_semantics<parallel>, #tpu.dimension_semantics<parallel>, #tpu.dimension_semantics<arbitrary>], iteration_bounds = array<i64: 2, 16, 4>, scalar_prefetch = 0 : i64, scratch_operands = 1 : i64, tpu.core_type = #tpu.core_type<tc>, window_params = [{transform_indices = @transform_0, window_bounds = array<i64: 1, 1, 19, 24>}, {pipeline_mode = #tpu.pipeline_mode<synchronous>, transform_indices = @transform_1, window_bounds = array<i64: 4, 4, 24, 64>}, {pipeline_mode = #tpu.pipeline_mode<synchronous>, transform_indices = @transform_2, window_bounds = array<i64: 1, 64>}, {transform_indices = @transform_3, window_bounds = array<i64: 1, 1, 16, 64>}]} {
    %c0_i32 = arith.constant 0 : i32
    %0 = arith.cmpi eq, %arg2, %c0_i32 : i32
    %1 = arith.extui %0 : i1 to i32
    %c0_i32_0 = arith.constant 0 : i32
    %2 = arith.cmpi ne, %1, %c0_i32_0 : i32
    scf.if %2 {
      %cst_45 = arith.constant 0.000000e+00 : f32
      %42 = vector.broadcast %cst_45 : f32 to vector<16x64xf32>
      %c0_46 = arith.constant 0 : index
      %c0_47 = arith.constant 0 : index
      %43 = vector.load %arg7[%c0_46, %c0_47] : memref<16x64xf32, #tpu.memory_space<vmem>>, vector<16x64xf32>
      tpu.vector_store %arg7[%c0_46, %c0_47], %42 {strides = array<i32>} : memref<16x64xf32, #tpu.memory_space<vmem>>, vector<16x64xf32>,
    } else {
    }
    %c0 = arith.constant 0 : index
    %c0_1 = arith.constant 0 : index
    %c0_2 = arith.constant 0 : index
    %c0_3 = arith.constant 0 : index
    %3 = vector.load %arg3[%c0, %c0_1, %c0_2, %c0_3] : memref<1x1x19x24xbf16, #tpu.memory_space<vmem>>, vector<1x1x16x24xbf16>
    %4 = vector.shape_cast %3 : vector<1x1x16x24xbf16> to vector<16x24xbf16>
    %5 = arith.index_cast %arg2 : i32 to index
    %c0_4 = arith.constant 0 : index
    %c0_5 = arith.constant 0 : index
    %c0_6 = arith.constant 0 : index
    %6 = vector.load %arg4[%5, %c0_4, %c0_5, %c0_6] : memref<4x4x24x64xbf16, #tpu.memory_space<vmem>>, vector<1x1x24x64xbf16>
    %7 = vector.shape_cast %6 : vector<1x1x24x64xbf16> to vector<24x64xbf16>
    %c0_7 = arith.constant 0 : index
    %c0_8 = arith.constant 0 : index
    %8 = vector.load %arg7[%c0_7, %c0_8] : memref<16x64xf32, #tpu.memory_space<vmem>>, vector<16x64xf32>
    %cst = arith.constant dense<0.000000e+00> : vector<16x64xf32>
    %9 = tpu.matmul %4, %7, %cst {dimension_numbers = #tpu.dot_dimension_numbers<[1], [0], [0], [1], [0, 0, 1, 1], [], []>} : vector<16x24xbf16>, vector<24x64xbf16>, vector<16x64xf32> -> vector<16x64xf32>
    %10 = arith.addf %8, %9 : vector<16x64xf32>
    %c0_9 = arith.constant 0 : index
    %c0_10 = arith.constant 0 : index
    %11 = vector.load %arg7[%c0_9, %c0_10] : memref<16x64xf32, #tpu.memory_space<vmem>>, vector<16x64xf32>
    tpu.vector_store %arg7[%c0_9, %c0_10], %10 {strides = array<i32>} : memref<16x64xf32, #tpu.memory_space<vmem>>, vector<16x64xf32>,
    %c0_11 = arith.constant 0 : index
    %c0_12 = arith.constant 0 : index
    %c1 = arith.constant 1 : index
    %c0_13 = arith.constant 0 : index
    %12 = vector.load %arg3[%c0_11, %c0_12, %c1, %c0_13] : memref<1x1x19x24xbf16, #tpu.memory_space<vmem>>, vector<1x1x16x24xbf16>
    %13 = vector.shape_cast %12 : vector<1x1x16x24xbf16> to vector<16x24xbf16>
    %14 = arith.index_cast %arg2 : i32 to index
    %c1_14 = arith.constant 1 : index
    %c0_15 = arith.constant 0 : index
    %c0_16 = arith.constant 0 : index
    %15 = vector.load %arg4[%14, %c1_14, %c0_15, %c0_16] : memref<4x4x24x64xbf16, #tpu.memory_space<vmem>>, vector<1x1x24x64xbf16>
    %16 = vector.shape_cast %15 : vector<1x1x24x64xbf16> to vector<24x64xbf16>
    %c0_17 = arith.constant 0 : index
    %c0_18 = arith.constant 0 : index
    %17 = vector.load %arg7[%c0_17, %c0_18] : memref<16x64xf32, #tpu.memory_space<vmem>>, vector<16x64xf32>
    %cst_19 = arith.constant dense<0.000000e+00> : vector<16x64xf32>
    %18 = tpu.matmul %13, %16, %cst_19 {dimension_numbers = #tpu.dot_dimension_numbers<[1], [0], [0], [1], [0, 0, 1, 1], [], []>} : vector<16x24xbf16>, vector<24x64xbf16>, vector<16x64xf32> -> vector<16x64xf32>
    %19 = arith.addf %17, %18 : vector<16x64xf32>
    %c0_20 = arith.constant 0 : index
    %c0_21 = arith.constant 0 : index
    %20 = vector.load %arg7[%c0_20, %c0_21] : memref<16x64xf32, #tpu.memory_space<vmem>>, vector<16x64xf32>
    tpu.vector_store %arg7[%c0_20, %c0_21], %19 {strides = array<i32>} : memref<16x64xf32, #tpu.memory_space<vmem>>, vector<16x64xf32>,
    %c0_22 = arith.constant 0 : index
    %c0_23 = arith.constant 0 : index
    %c2 = arith.constant 2 : index
    %c0_24 = arith.constant 0 : index
    %21 = vector.load %arg3[%c0_22, %c0_23, %c2, %c0_24] : memref<1x1x19x24xbf16, #tpu.memory_space<vmem>>, vector<1x1x16x24xbf16>
    %22 = vector.shape_cast %21 : vector<1x1x16x24xbf16> to vector<16x24xbf16>
    %23 = arith.index_cast %arg2 : i32 to index
    %c2_25 = arith.constant 2 : index
    %c0_26 = arith.constant 0 : index
    %c0_27 = arith.constant 0 : index
    %24 = vector.load %arg4[%23, %c2_25, %c0_26, %c0_27] : memref<4x4x24x64xbf16, #tpu.memory_space<vmem>>, vector<1x1x24x64xbf16>
    %25 = vector.shape_cast %24 : vector<1x1x24x64xbf16> to vector<24x64xbf16>
    %c0_28 = arith.constant 0 : index
    %c0_29 = arith.constant 0 : index
    %26 = vector.load %arg7[%c0_28, %c0_29] : memref<16x64xf32, #tpu.memory_space<vmem>>, vector<16x64xf32>
    %cst_30 = arith.constant dense<0.000000e+00> : vector<16x64xf32>
    %27 = tpu.matmul %22, %25, %cst_30 {dimension_numbers = #tpu.dot_dimension_numbers<[1], [0], [0], [1], [0, 0, 1, 1], [], []>} : vector<16x24xbf16>, vector<24x64xbf16>, vector<16x64xf32> -> vector<16x64xf32>
    %28 = arith.addf %26, %27 : vector<16x64xf32>
    %c0_31 = arith.constant 0 : index
    %c0_32 = arith.constant 0 : index
    %29 = vector.load %arg7[%c0_31, %c0_32] : memref<16x64xf32, #tpu.memory_space<vmem>>, vector<16x64xf32>
    tpu.vector_store %arg7[%c0_31, %c0_32], %28 {strides = array<i32>} : memref<16x64xf32, #tpu.memory_space<vmem>>, vector<16x64xf32>,
    %c0_33 = arith.constant 0 : index
    %c0_34 = arith.constant 0 : index
    %c3 = arith.constant 3 : index
    %c0_35 = arith.constant 0 : index
    %30 = vector.load %arg3[%c0_33, %c0_34, %c3, %c0_35] : memref<1x1x19x24xbf16, #tpu.memory_space<vmem>>, vector<1x1x16x24xbf16>
    %31 = vector.shape_cast %30 : vector<1x1x16x24xbf16> to vector<16x24xbf16>
    %32 = arith.index_cast %arg2 : i32 to index
    %c3_36 = arith.constant 3 : index
    %c0_37 = arith.constant 0 : index
    %c0_38 = arith.constant 0 : index
    %33 = vector.load %arg4[%32, %c3_36, %c0_37, %c0_38] : memref<4x4x24x64xbf16, #tpu.memory_space<vmem>>, vector<1x1x24x64xbf16>
    %34 = vector.shape_cast %33 : vector<1x1x24x64xbf16> to vector<24x64xbf16>
    %c0_39 = arith.constant 0 : index
    %c0_40 = arith.constant 0 : index
    %35 = vector.load %arg7[%c0_39, %c0_40] : memref<16x64xf32, #tpu.memory_space<vmem>>, vector<16x64xf32>
    %cst_41 = arith.constant dense<0.000000e+00> : vector<16x64xf32>
    %36 = tpu.matmul %31, %34, %cst_41 {dimension_numbers = #tpu.dot_dimension_numbers<[1], [0], [0], [1], [0, 0, 1, 1], [], []>} : vector<16x24xbf16>, vector<24x64xbf16>, vector<16x64xf32> -> vector<16x64xf32>
    %37 = arith.addf %35, %36 : vector<16x64xf32>
    %c0_42 = arith.constant 0 : index
    %c0_43 = arith.constant 0 : index
    %38 = vector.load %arg7[%c0_42, %c0_43] : memref<16x64xf32, #tpu.memory_space<vmem>>, vector<16x64xf32>
    tpu.vector_store %arg7[%c0_42, %c0_43], %37 {strides = array<i32>} : memref<16x64xf32, #tpu.memory_space<vmem>>, vector<16x64xf32>,
    %c3_i32 = arith.constant 3 : i32
    %39 = arith.cmpi eq, %arg2, %c3_i32 : i32
    %40 = arith.extui %39 : i1 to i32
    %c0_i32_44 = arith.constant 0 : i32
    %41 = arith.cmpi ne, %40, %c0_i32_44 : i32
    scf.if %41 {
      %c0_45 = arith.constant 0 : index
      %c0_46 = arith.constant 0 : index
      %42 = vector.load %arg7[%c0_45, %c0_46] : memref<16x64xf32, #tpu.memory_space<vmem>>, vector<16x64xf32>
      %c0_47 = arith.constant 0 : index
      %c0_48 = arith.constant 0 : index
      %43 = vector.load %arg5[%c0_47, %c0_48] : memref<1x64xf32, #tpu.memory_space<vmem>>, vector<1x64xf32>
      %44 = vector.broadcast %43 : vector<1x64xf32> to vector<16x64xf32>
      %45 = arith.addf %42, %44 : vector<16x64xf32>
      %cst_49 = arith.constant 0.000000e+00 : f32
      %46 = vector.broadcast %cst_49 : f32 to vector<16x64xf32>
      %47 = arith.cmpf oge, %45, %46 : vector<16x64xf32>
      %cst_50 = arith.constant 1.000000e-01 : f32
      %48 = vector.broadcast %cst_50 : f32 to vector<16x64xf32>
      %49 = arith.mulf %48, %45 : vector<16x64xf32>
      %50 = arith.select %47, %45, %49 : vector<16x64xi1>, vector<16x64xf32>
      %51 = arith.truncf %50 : vector<16x64xf32> to vector<16x64xbf16>
      %c0_51 = arith.constant 0 : index
      %c0_52 = arith.constant 0 : index
      %c0_53 = arith.constant 0 : index
      %c0_54 = arith.constant 0 : index
      %52 = vector.load %arg6[%c0_51, %c0_52, %c0_53, %c0_54] : memref<1x1x16x64xbf16, #tpu.memory_space<vmem>>, vector<1x1x16x64xbf16>
      %53 = vector.shape_cast %52 : vector<1x1x16x64xbf16> to vector<16x64xbf16>
      %54 = vector.shape_cast %51 : vector<16x64xbf16> to vector<1x1x16x64xbf16>
      tpu.vector_store %arg6[%c0_51, %c0_52, %c0_53, %c0_54], %54 {strides = array<i32>} : memref<1x1x16x64xbf16, #tpu.memory_space<vmem>>, vector<1x1x16x64xbf16>,
    } else {
    }
    return
  }
  func.func @transform_0(%arg0: i32, %arg1: i32, %arg2: i32) -> (i32, i32, i32, i32) {
    %0 = arith.addi %arg1, %arg2 : i32
    %c0_i32 = arith.constant 0 : i32
    %c0_i32_0 = arith.constant 0 : i32
    %c0_i32_1 = arith.constant 0 : i32
    return %arg0, %0, %c0_i32, %c0_i32_0 : i32, i32, i32, i32
  }
  func.func @transform_1(%arg0: i32, %arg1: i32, %arg2: i32) -> (i32, i32, i32, i32) {
    %c0_i32 = arith.constant 0 : i32
    %c0_i32_0 = arith.constant 0 : i32
    %c0_i32_1 = arith.constant 0 : i32
    %c0_i32_2 = arith.constant 0 : i32
    %c0_i32_3 = arith.constant 0 : i32
    return %c0_i32, %c0_i32_0, %c0_i32_1, %c0_i32_2 : i32, i32, i32, i32
  }
  func.func @transform_2(%arg0: i32, %arg1: i32, %arg2: i32) -> (i32, i32) {
    %c0_i32 = arith.constant 0 : i32
    %c0_i32_0 = arith.constant 0 : i32
    %c0_i32_1 = arith.constant 0 : i32
    return %c0_i32, %c0_i32_0 : i32, i32
  }
  func.func @transform_3(%arg0: i32, %arg1: i32, %arg2: i32) -> (i32, i32, i32, i32) {
    %c0_i32 = arith.constant 0 : i32
    %c0_i32_0 = arith.constant 0 : i32
    %c0_i32_1 = arith.constant 0 : i32
    return %arg0, %arg1, %c0_i32, %c0_i32_0 : i32, i32, i32, i32
  }
}

module attributes {stable_mosaic.version = 11 : i64} {
  func.func @_conv_row_kernel(%arg0: i32, %arg1: i32, %arg2: i32, %arg3: memref<1x1x10x256xbf16, #tpu.memory_space<vmem>>, %arg4: memref<3x3x256x128xbf16, #tpu.memory_space<vmem>>, %arg5: memref<1x128xf32, #tpu.memory_space<vmem>>, %arg6: memref<1x1x8x128xbf16, #tpu.memory_space<vmem>>, %arg7: memref<8x128xf32, #tpu.memory_space<vmem>>) attributes {dimension_semantics = [#tpu.dimension_semantics<parallel>, #tpu.dimension_semantics<parallel>, #tpu.dimension_semantics<arbitrary>], iteration_bounds = array<i64: 2, 8, 3>, scalar_prefetch = 0 : i64, scratch_operands = 1 : i64, tpu.core_type = #tpu.core_type<tc>, window_params = [{transform_indices = @transform_0, window_bounds = array<i64: 1, 1, 10, 256>}, {pipeline_mode = #tpu.pipeline_mode<synchronous>, transform_indices = @transform_1, window_bounds = array<i64: 3, 3, 256, 128>}, {pipeline_mode = #tpu.pipeline_mode<synchronous>, transform_indices = @transform_2, window_bounds = array<i64: 1, 128>}, {transform_indices = @transform_3, window_bounds = array<i64: 1, 1, 8, 128>}]} {
    %c0_i32 = arith.constant 0 : i32
    %0 = arith.cmpi eq, %arg2, %c0_i32 : i32
    %1 = arith.extui %0 : i1 to i32
    %c0_i32_0 = arith.constant 0 : i32
    %2 = arith.cmpi ne, %1, %c0_i32_0 : i32
    scf.if %2 {
      %cst_34 = arith.constant 0.000000e+00 : f32
      %33 = vector.broadcast %cst_34 : f32 to vector<8x128xf32>
      %c0_35 = arith.constant 0 : index
      %c0_36 = arith.constant 0 : index
      %34 = vector.load %arg7[%c0_35, %c0_36] : memref<8x128xf32, #tpu.memory_space<vmem>>, vector<8x128xf32>
      tpu.vector_store %arg7[%c0_35, %c0_36], %33 {strides = array<i32>} : memref<8x128xf32, #tpu.memory_space<vmem>>, vector<8x128xf32>,
    } else {
    }
    %c0 = arith.constant 0 : index
    %c0_1 = arith.constant 0 : index
    %c0_2 = arith.constant 0 : index
    %c0_3 = arith.constant 0 : index
    %3 = vector.load %arg3[%c0, %c0_1, %c0_2, %c0_3] : memref<1x1x10x256xbf16, #tpu.memory_space<vmem>>, vector<1x1x8x256xbf16>
    %4 = vector.shape_cast %3 : vector<1x1x8x256xbf16> to vector<8x256xbf16>
    %5 = arith.index_cast %arg2 : i32 to index
    %c0_4 = arith.constant 0 : index
    %c0_5 = arith.constant 0 : index
    %c0_6 = arith.constant 0 : index
    %6 = vector.load %arg4[%5, %c0_4, %c0_5, %c0_6] : memref<3x3x256x128xbf16, #tpu.memory_space<vmem>>, vector<1x1x256x128xbf16>
    %7 = vector.shape_cast %6 : vector<1x1x256x128xbf16> to vector<256x128xbf16>
    %c0_7 = arith.constant 0 : index
    %c0_8 = arith.constant 0 : index
    %8 = vector.load %arg7[%c0_7, %c0_8] : memref<8x128xf32, #tpu.memory_space<vmem>>, vector<8x128xf32>
    %cst = arith.constant dense<0.000000e+00> : vector<8x128xf32>
    %9 = tpu.matmul %4, %7, %cst {dimension_numbers = #tpu.dot_dimension_numbers<[1], [0], [0], [1], [0, 0, 1, 1], [], []>} : vector<8x256xbf16>, vector<256x128xbf16>, vector<8x128xf32> -> vector<8x128xf32>
    %10 = arith.addf %8, %9 : vector<8x128xf32>
    %c0_9 = arith.constant 0 : index
    %c0_10 = arith.constant 0 : index
    %11 = vector.load %arg7[%c0_9, %c0_10] : memref<8x128xf32, #tpu.memory_space<vmem>>, vector<8x128xf32>
    tpu.vector_store %arg7[%c0_9, %c0_10], %10 {strides = array<i32>} : memref<8x128xf32, #tpu.memory_space<vmem>>, vector<8x128xf32>,
    %c0_11 = arith.constant 0 : index
    %c0_12 = arith.constant 0 : index
    %c1 = arith.constant 1 : index
    %c0_13 = arith.constant 0 : index
    %12 = vector.load %arg3[%c0_11, %c0_12, %c1, %c0_13] : memref<1x1x10x256xbf16, #tpu.memory_space<vmem>>, vector<1x1x8x256xbf16>
    %13 = vector.shape_cast %12 : vector<1x1x8x256xbf16> to vector<8x256xbf16>
    %14 = arith.index_cast %arg2 : i32 to index
    %c1_14 = arith.constant 1 : index
    %c0_15 = arith.constant 0 : index
    %c0_16 = arith.constant 0 : index
    %15 = vector.load %arg4[%14, %c1_14, %c0_15, %c0_16] : memref<3x3x256x128xbf16, #tpu.memory_space<vmem>>, vector<1x1x256x128xbf16>
    %16 = vector.shape_cast %15 : vector<1x1x256x128xbf16> to vector<256x128xbf16>
    %c0_17 = arith.constant 0 : index
    %c0_18 = arith.constant 0 : index
    %17 = vector.load %arg7[%c0_17, %c0_18] : memref<8x128xf32, #tpu.memory_space<vmem>>, vector<8x128xf32>
    %cst_19 = arith.constant dense<0.000000e+00> : vector<8x128xf32>
    %18 = tpu.matmul %13, %16, %cst_19 {dimension_numbers = #tpu.dot_dimension_numbers<[1], [0], [0], [1], [0, 0, 1, 1], [], []>} : vector<8x256xbf16>, vector<256x128xbf16>, vector<8x128xf32> -> vector<8x128xf32>
    %19 = arith.addf %17, %18 : vector<8x128xf32>
    %c0_20 = arith.constant 0 : index
    %c0_21 = arith.constant 0 : index
    %20 = vector.load %arg7[%c0_20, %c0_21] : memref<8x128xf32, #tpu.memory_space<vmem>>, vector<8x128xf32>
    tpu.vector_store %arg7[%c0_20, %c0_21], %19 {strides = array<i32>} : memref<8x128xf32, #tpu.memory_space<vmem>>, vector<8x128xf32>,
    %c0_22 = arith.constant 0 : index
    %c0_23 = arith.constant 0 : index
    %c2 = arith.constant 2 : index
    %c0_24 = arith.constant 0 : index
    %21 = vector.load %arg3[%c0_22, %c0_23, %c2, %c0_24] : memref<1x1x10x256xbf16, #tpu.memory_space<vmem>>, vector<1x1x8x256xbf16>
    %22 = vector.shape_cast %21 : vector<1x1x8x256xbf16> to vector<8x256xbf16>
    %23 = arith.index_cast %arg2 : i32 to index
    %c2_25 = arith.constant 2 : index
    %c0_26 = arith.constant 0 : index
    %c0_27 = arith.constant 0 : index
    %24 = vector.load %arg4[%23, %c2_25, %c0_26, %c0_27] : memref<3x3x256x128xbf16, #tpu.memory_space<vmem>>, vector<1x1x256x128xbf16>
    %25 = vector.shape_cast %24 : vector<1x1x256x128xbf16> to vector<256x128xbf16>
    %c0_28 = arith.constant 0 : index
    %c0_29 = arith.constant 0 : index
    %26 = vector.load %arg7[%c0_28, %c0_29] : memref<8x128xf32, #tpu.memory_space<vmem>>, vector<8x128xf32>
    %cst_30 = arith.constant dense<0.000000e+00> : vector<8x128xf32>
    %27 = tpu.matmul %22, %25, %cst_30 {dimension_numbers = #tpu.dot_dimension_numbers<[1], [0], [0], [1], [0, 0, 1, 1], [], []>} : vector<8x256xbf16>, vector<256x128xbf16>, vector<8x128xf32> -> vector<8x128xf32>
    %28 = arith.addf %26, %27 : vector<8x128xf32>
    %c0_31 = arith.constant 0 : index
    %c0_32 = arith.constant 0 : index
    %29 = vector.load %arg7[%c0_31, %c0_32] : memref<8x128xf32, #tpu.memory_space<vmem>>, vector<8x128xf32>
    tpu.vector_store %arg7[%c0_31, %c0_32], %28 {strides = array<i32>} : memref<8x128xf32, #tpu.memory_space<vmem>>, vector<8x128xf32>,
    %c2_i32 = arith.constant 2 : i32
    %30 = arith.cmpi eq, %arg2, %c2_i32 : i32
    %31 = arith.extui %30 : i1 to i32
    %c0_i32_33 = arith.constant 0 : i32
    %32 = arith.cmpi ne, %31, %c0_i32_33 : i32
    scf.if %32 {
      %c0_34 = arith.constant 0 : index
      %c0_35 = arith.constant 0 : index
      %33 = vector.load %arg7[%c0_34, %c0_35] : memref<8x128xf32, #tpu.memory_space<vmem>>, vector<8x128xf32>
      %c0_36 = arith.constant 0 : index
      %c0_37 = arith.constant 0 : index
      %34 = vector.load %arg5[%c0_36, %c0_37] : memref<1x128xf32, #tpu.memory_space<vmem>>, vector<1x128xf32>
      %35 = vector.broadcast %34 : vector<1x128xf32> to vector<8x128xf32>
      %36 = arith.addf %33, %35 : vector<8x128xf32>
      %cst_38 = arith.constant 0.000000e+00 : f32
      %37 = vector.broadcast %cst_38 : f32 to vector<8x128xf32>
      %38 = arith.cmpf oge, %36, %37 : vector<8x128xf32>
      %cst_39 = arith.constant 1.000000e-01 : f32
      %39 = vector.broadcast %cst_39 : f32 to vector<8x128xf32>
      %40 = arith.mulf %39, %36 : vector<8x128xf32>
      %41 = arith.select %38, %36, %40 : vector<8x128xi1>, vector<8x128xf32>
      %42 = arith.truncf %41 : vector<8x128xf32> to vector<8x128xbf16>
      %c0_40 = arith.constant 0 : index
      %c0_41 = arith.constant 0 : index
      %c0_42 = arith.constant 0 : index
      %c0_43 = arith.constant 0 : index
      %43 = vector.load %arg6[%c0_40, %c0_41, %c0_42, %c0_43] : memref<1x1x8x128xbf16, #tpu.memory_space<vmem>>, vector<1x1x8x128xbf16>
      %44 = vector.shape_cast %43 : vector<1x1x8x128xbf16> to vector<8x128xbf16>
      %45 = vector.shape_cast %42 : vector<8x128xbf16> to vector<1x1x8x128xbf16>
      tpu.vector_store %arg6[%c0_40, %c0_41, %c0_42, %c0_43], %45 {strides = array<i32>} : memref<1x1x8x128xbf16, #tpu.memory_space<vmem>>, vector<1x1x8x128xbf16>,
    } else {
    }
    return
  }
  func.func @transform_0(%arg0: i32, %arg1: i32, %arg2: i32) -> (i32, i32, i32, i32) {
    %0 = arith.addi %arg1, %arg2 : i32
    %c0_i32 = arith.constant 0 : i32
    %c0_i32_0 = arith.constant 0 : i32
    %c0_i32_1 = arith.constant 0 : i32
    return %arg0, %0, %c0_i32, %c0_i32_0 : i32, i32, i32, i32
  }
  func.func @transform_1(%arg0: i32, %arg1: i32, %arg2: i32) -> (i32, i32, i32, i32) {
    %c0_i32 = arith.constant 0 : i32
    %c0_i32_0 = arith.constant 0 : i32
    %c0_i32_1 = arith.constant 0 : i32
    %c0_i32_2 = arith.constant 0 : i32
    %c0_i32_3 = arith.constant 0 : i32
    return %c0_i32, %c0_i32_0, %c0_i32_1, %c0_i32_2 : i32, i32, i32, i32
  }
  func.func @transform_2(%arg0: i32, %arg1: i32, %arg2: i32) -> (i32, i32) {
    %c0_i32 = arith.constant 0 : i32
    %c0_i32_0 = arith.constant 0 : i32
    %c0_i32_1 = arith.constant 0 : i32
    return %c0_i32, %c0_i32_0 : i32, i32
  }
  func.func @transform_3(%arg0: i32, %arg1: i32, %arg2: i32) -> (i32, i32, i32, i32) {
    %c0_i32 = arith.constant 0 : i32
    %c0_i32_0 = arith.constant 0 : i32
    %c0_i32_1 = arith.constant 0 : i32
    return %arg0, %arg1, %c0_i32, %c0_i32_0 : i32, i32, i32, i32
  }
}

module attributes {stable_mosaic.version = 11 : i64} {
  func.func @_conv_row_kernel(%arg0: i32, %arg1: i32, %arg2: i32, %arg3: memref<1x1x6x512xbf16, #tpu.memory_space<vmem>>, %arg4: memref<3x3x512x256xbf16, #tpu.memory_space<vmem>>, %arg5: memref<1x256xf32, #tpu.memory_space<vmem>>, %arg6: memref<1x1x4x256xbf16, #tpu.memory_space<vmem>>, %arg7: memref<4x256xf32, #tpu.memory_space<vmem>>) attributes {dimension_semantics = [#tpu.dimension_semantics<parallel>, #tpu.dimension_semantics<parallel>, #tpu.dimension_semantics<arbitrary>], iteration_bounds = array<i64: 2, 4, 3>, scalar_prefetch = 0 : i64, scratch_operands = 1 : i64, tpu.core_type = #tpu.core_type<tc>, window_params = [{transform_indices = @transform_0, window_bounds = array<i64: 1, 1, 6, 512>}, {pipeline_mode = #tpu.pipeline_mode<synchronous>, transform_indices = @transform_1, window_bounds = array<i64: 3, 3, 512, 256>}, {pipeline_mode = #tpu.pipeline_mode<synchronous>, transform_indices = @transform_2, window_bounds = array<i64: 1, 256>}, {transform_indices = @transform_3, window_bounds = array<i64: 1, 1, 4, 256>}]} {
    %c0_i32 = arith.constant 0 : i32
    %0 = arith.cmpi eq, %arg2, %c0_i32 : i32
    %1 = arith.extui %0 : i1 to i32
    %c0_i32_0 = arith.constant 0 : i32
    %2 = arith.cmpi ne, %1, %c0_i32_0 : i32
    scf.if %2 {
      %cst_34 = arith.constant 0.000000e+00 : f32
      %33 = vector.broadcast %cst_34 : f32 to vector<4x256xf32>
      %c0_35 = arith.constant 0 : index
      %c0_36 = arith.constant 0 : index
      %34 = vector.load %arg7[%c0_35, %c0_36] : memref<4x256xf32, #tpu.memory_space<vmem>>, vector<4x256xf32>
      tpu.vector_store %arg7[%c0_35, %c0_36], %33 {strides = array<i32>} : memref<4x256xf32, #tpu.memory_space<vmem>>, vector<4x256xf32>,
    } else {
    }
    %c0 = arith.constant 0 : index
    %c0_1 = arith.constant 0 : index
    %c0_2 = arith.constant 0 : index
    %c0_3 = arith.constant 0 : index
    %3 = vector.load %arg3[%c0, %c0_1, %c0_2, %c0_3] : memref<1x1x6x512xbf16, #tpu.memory_space<vmem>>, vector<1x1x4x512xbf16>
    %4 = vector.shape_cast %3 : vector<1x1x4x512xbf16> to vector<4x512xbf16>
    %5 = arith.index_cast %arg2 : i32 to index
    %c0_4 = arith.constant 0 : index
    %c0_5 = arith.constant 0 : index
    %c0_6 = arith.constant 0 : index
    %6 = vector.load %arg4[%5, %c0_4, %c0_5, %c0_6] : memref<3x3x512x256xbf16, #tpu.memory_space<vmem>>, vector<1x1x512x256xbf16>
    %7 = vector.shape_cast %6 : vector<1x1x512x256xbf16> to vector<512x256xbf16>
    %c0_7 = arith.constant 0 : index
    %c0_8 = arith.constant 0 : index
    %8 = vector.load %arg7[%c0_7, %c0_8] : memref<4x256xf32, #tpu.memory_space<vmem>>, vector<4x256xf32>
    %cst = arith.constant dense<0.000000e+00> : vector<4x256xf32>
    %9 = tpu.matmul %4, %7, %cst {dimension_numbers = #tpu.dot_dimension_numbers<[1], [0], [0], [1], [0, 0, 1, 1], [], []>} : vector<4x512xbf16>, vector<512x256xbf16>, vector<4x256xf32> -> vector<4x256xf32>
    %10 = arith.addf %8, %9 : vector<4x256xf32>
    %c0_9 = arith.constant 0 : index
    %c0_10 = arith.constant 0 : index
    %11 = vector.load %arg7[%c0_9, %c0_10] : memref<4x256xf32, #tpu.memory_space<vmem>>, vector<4x256xf32>
    tpu.vector_store %arg7[%c0_9, %c0_10], %10 {strides = array<i32>} : memref<4x256xf32, #tpu.memory_space<vmem>>, vector<4x256xf32>,
    %c0_11 = arith.constant 0 : index
    %c0_12 = arith.constant 0 : index
    %c1 = arith.constant 1 : index
    %c0_13 = arith.constant 0 : index
    %12 = vector.load %arg3[%c0_11, %c0_12, %c1, %c0_13] : memref<1x1x6x512xbf16, #tpu.memory_space<vmem>>, vector<1x1x4x512xbf16>
    %13 = vector.shape_cast %12 : vector<1x1x4x512xbf16> to vector<4x512xbf16>
    %14 = arith.index_cast %arg2 : i32 to index
    %c1_14 = arith.constant 1 : index
    %c0_15 = arith.constant 0 : index
    %c0_16 = arith.constant 0 : index
    %15 = vector.load %arg4[%14, %c1_14, %c0_15, %c0_16] : memref<3x3x512x256xbf16, #tpu.memory_space<vmem>>, vector<1x1x512x256xbf16>
    %16 = vector.shape_cast %15 : vector<1x1x512x256xbf16> to vector<512x256xbf16>
    %c0_17 = arith.constant 0 : index
    %c0_18 = arith.constant 0 : index
    %17 = vector.load %arg7[%c0_17, %c0_18] : memref<4x256xf32, #tpu.memory_space<vmem>>, vector<4x256xf32>
    %cst_19 = arith.constant dense<0.000000e+00> : vector<4x256xf32>
    %18 = tpu.matmul %13, %16, %cst_19 {dimension_numbers = #tpu.dot_dimension_numbers<[1], [0], [0], [1], [0, 0, 1, 1], [], []>} : vector<4x512xbf16>, vector<512x256xbf16>, vector<4x256xf32> -> vector<4x256xf32>
    %19 = arith.addf %17, %18 : vector<4x256xf32>
    %c0_20 = arith.constant 0 : index
    %c0_21 = arith.constant 0 : index
    %20 = vector.load %arg7[%c0_20, %c0_21] : memref<4x256xf32, #tpu.memory_space<vmem>>, vector<4x256xf32>
    tpu.vector_store %arg7[%c0_20, %c0_21], %19 {strides = array<i32>} : memref<4x256xf32, #tpu.memory_space<vmem>>, vector<4x256xf32>,
    %c0_22 = arith.constant 0 : index
    %c0_23 = arith.constant 0 : index
    %c2 = arith.constant 2 : index
    %c0_24 = arith.constant 0 : index
    %21 = vector.load %arg3[%c0_22, %c0_23, %c2, %c0_24] : memref<1x1x6x512xbf16, #tpu.memory_space<vmem>>, vector<1x1x4x512xbf16>
    %22 = vector.shape_cast %21 : vector<1x1x4x512xbf16> to vector<4x512xbf16>
    %23 = arith.index_cast %arg2 : i32 to index
    %c2_25 = arith.constant 2 : index
    %c0_26 = arith.constant 0 : index
    %c0_27 = arith.constant 0 : index
    %24 = vector.load %arg4[%23, %c2_25, %c0_26, %c0_27] : memref<3x3x512x256xbf16, #tpu.memory_space<vmem>>, vector<1x1x512x256xbf16>
    %25 = vector.shape_cast %24 : vector<1x1x512x256xbf16> to vector<512x256xbf16>
    %c0_28 = arith.constant 0 : index
    %c0_29 = arith.constant 0 : index
    %26 = vector.load %arg7[%c0_28, %c0_29] : memref<4x256xf32, #tpu.memory_space<vmem>>, vector<4x256xf32>
    %cst_30 = arith.constant dense<0.000000e+00> : vector<4x256xf32>
    %27 = tpu.matmul %22, %25, %cst_30 {dimension_numbers = #tpu.dot_dimension_numbers<[1], [0], [0], [1], [0, 0, 1, 1], [], []>} : vector<4x512xbf16>, vector<512x256xbf16>, vector<4x256xf32> -> vector<4x256xf32>
    %28 = arith.addf %26, %27 : vector<4x256xf32>
    %c0_31 = arith.constant 0 : index
    %c0_32 = arith.constant 0 : index
    %29 = vector.load %arg7[%c0_31, %c0_32] : memref<4x256xf32, #tpu.memory_space<vmem>>, vector<4x256xf32>
    tpu.vector_store %arg7[%c0_31, %c0_32], %28 {strides = array<i32>} : memref<4x256xf32, #tpu.memory_space<vmem>>, vector<4x256xf32>,
    %c2_i32 = arith.constant 2 : i32
    %30 = arith.cmpi eq, %arg2, %c2_i32 : i32
    %31 = arith.extui %30 : i1 to i32
    %c0_i32_33 = arith.constant 0 : i32
    %32 = arith.cmpi ne, %31, %c0_i32_33 : i32
    scf.if %32 {
      %c0_34 = arith.constant 0 : index
      %c0_35 = arith.constant 0 : index
      %33 = vector.load %arg7[%c0_34, %c0_35] : memref<4x256xf32, #tpu.memory_space<vmem>>, vector<4x256xf32>
      %c0_36 = arith.constant 0 : index
      %c0_37 = arith.constant 0 : index
      %34 = vector.load %arg5[%c0_36, %c0_37] : memref<1x256xf32, #tpu.memory_space<vmem>>, vector<1x256xf32>
      %35 = vector.broadcast %34 : vector<1x256xf32> to vector<4x256xf32>
      %36 = arith.addf %33, %35 : vector<4x256xf32>
      %cst_38 = arith.constant 0.000000e+00 : f32
      %37 = vector.broadcast %cst_38 : f32 to vector<4x256xf32>
      %38 = arith.cmpf oge, %36, %37 : vector<4x256xf32>
      %cst_39 = arith.constant 1.000000e-01 : f32
      %39 = vector.broadcast %cst_39 : f32 to vector<4x256xf32>
      %40 = arith.mulf %39, %36 : vector<4x256xf32>
      %41 = arith.select %38, %36, %40 : vector<4x256xi1>, vector<4x256xf32>
      %42 = arith.truncf %41 : vector<4x256xf32> to vector<4x256xbf16>
      %c0_40 = arith.constant 0 : index
      %c0_41 = arith.constant 0 : index
      %c0_42 = arith.constant 0 : index
      %c0_43 = arith.constant 0 : index
      %43 = vector.load %arg6[%c0_40, %c0_41, %c0_42, %c0_43] : memref<1x1x4x256xbf16, #tpu.memory_space<vmem>>, vector<1x1x4x256xbf16>
      %44 = vector.shape_cast %43 : vector<1x1x4x256xbf16> to vector<4x256xbf16>
      %45 = vector.shape_cast %42 : vector<4x256xbf16> to vector<1x1x4x256xbf16>
      tpu.vector_store %arg6[%c0_40, %c0_41, %c0_42, %c0_43], %45 {strides = array<i32>} : memref<1x1x4x256xbf16, #tpu.memory_space<vmem>>, vector<1x1x4x256xbf16>,
    } else {
    }
    return
  }
  func.func @transform_0(%arg0: i32, %arg1: i32, %arg2: i32) -> (i32, i32, i32, i32) {
    %0 = arith.addi %arg1, %arg2 : i32
    %c0_i32 = arith.constant 0 : i32
    %c0_i32_0 = arith.constant 0 : i32
    %c0_i32_1 = arith.constant 0 : i32
    return %arg0, %0, %c0_i32, %c0_i32_0 : i32, i32, i32, i32
  }
  func.func @transform_1(%arg0: i32, %arg1: i32, %arg2: i32) -> (i32, i32, i32, i32) {
    %c0_i32 = arith.constant 0 : i32
    %c0_i32_0 = arith.constant 0 : i32
    %c0_i32_1 = arith.constant 0 : i32
    %c0_i32_2 = arith.constant 0 : i32
    %c0_i32_3 = arith.constant 0 : i32
    return %c0_i32, %c0_i32_0, %c0_i32_1, %c0_i32_2 : i32, i32, i32, i32
  }
  func.func @transform_2(%arg0: i32, %arg1: i32, %arg2: i32) -> (i32, i32) {
    %c0_i32 = arith.constant 0 : i32
    %c0_i32_0 = arith.constant 0 : i32
    %c0_i32_1 = arith.constant 0 : i32
    return %c0_i32, %c0_i32_0 : i32, i32
  }
  func.func @transform_3(%arg0: i32, %arg1: i32, %arg2: i32) -> (i32, i32, i32, i32) {
    %c0_i32 = arith.constant 0 : i32
    %c0_i32_0 = arith.constant 0 : i32
    %c0_i32_1 = arith.constant 0 : i32
    return %arg0, %arg1, %c0_i32, %c0_i32_0 : i32, i32, i32, i32
  }
}

module attributes {stable_mosaic.version = 11 : i64} {
  func.func @_conv_row_kernel(%arg0: i32, %arg1: i32, %arg2: i32, %arg3: memref<1x1x2x256xbf16, #tpu.memory_space<vmem>>, %arg4: memref<1x1x256x512xbf16, #tpu.memory_space<vmem>>, %arg5: memref<1x512xf32, #tpu.memory_space<vmem>>, %arg6: memref<1x1x2x512xbf16, #tpu.memory_space<vmem>>, %arg7: memref<2x512xf32, #tpu.memory_space<vmem>>) attributes {dimension_semantics = [#tpu.dimension_semantics<parallel>, #tpu.dimension_semantics<parallel>, #tpu.dimension_semantics<arbitrary>], iteration_bounds = array<i64: 2, 2, 1>, scalar_prefetch = 0 : i64, scratch_operands = 1 : i64, tpu.core_type = #tpu.core_type<tc>, window_params = [{transform_indices = @transform_0, window_bounds = array<i64: 1, 1, 2, 256>}, {pipeline_mode = #tpu.pipeline_mode<synchronous>, transform_indices = @transform_1, window_bounds = array<i64: 1, 1, 256, 512>}, {pipeline_mode = #tpu.pipeline_mode<synchronous>, transform_indices = @transform_2, window_bounds = array<i64: 1, 512>}, {transform_indices = @transform_3, window_bounds = array<i64: 1, 1, 2, 512>}]} {
    %c0_i32 = arith.constant 0 : i32
    %0 = arith.cmpi eq, %arg2, %c0_i32 : i32
    %1 = arith.extui %0 : i1 to i32
    %c0_i32_0 = arith.constant 0 : i32
    %2 = arith.cmpi ne, %1, %c0_i32_0 : i32
    scf.if %2 {
      %cst_13 = arith.constant 0.000000e+00 : f32
      %15 = vector.broadcast %cst_13 : f32 to vector<2x512xf32>
      %c0_14 = arith.constant 0 : index
      %c0_15 = arith.constant 0 : index
      %16 = vector.load %arg7[%c0_14, %c0_15] : memref<2x512xf32, #tpu.memory_space<vmem>>, vector<2x512xf32>
      tpu.vector_store %arg7[%c0_14, %c0_15], %15 {strides = array<i32>} : memref<2x512xf32, #tpu.memory_space<vmem>>, vector<2x512xf32>,
    } else {
    }
    %c0 = arith.constant 0 : index
    %c0_1 = arith.constant 0 : index
    %c0_2 = arith.constant 0 : index
    %c0_3 = arith.constant 0 : index
    %3 = vector.load %arg3[%c0, %c0_1, %c0_2, %c0_3] : memref<1x1x2x256xbf16, #tpu.memory_space<vmem>>, vector<1x1x2x256xbf16>
    %4 = vector.shape_cast %3 : vector<1x1x2x256xbf16> to vector<2x256xbf16>
    %5 = arith.index_cast %arg2 : i32 to index
    %c0_4 = arith.constant 0 : index
    %c0_5 = arith.constant 0 : index
    %c0_6 = arith.constant 0 : index
    %6 = vector.load %arg4[%5, %c0_4, %c0_5, %c0_6] : memref<1x1x256x512xbf16, #tpu.memory_space<vmem>>, vector<1x1x256x512xbf16>
    %7 = vector.shape_cast %6 : vector<1x1x256x512xbf16> to vector<256x512xbf16>
    %c0_7 = arith.constant 0 : index
    %c0_8 = arith.constant 0 : index
    %8 = vector.load %arg7[%c0_7, %c0_8] : memref<2x512xf32, #tpu.memory_space<vmem>>, vector<2x512xf32>
    %cst = arith.constant dense<0.000000e+00> : vector<2x512xf32>
    %9 = tpu.matmul %4, %7, %cst {dimension_numbers = #tpu.dot_dimension_numbers<[1], [0], [0], [1], [0, 0, 1, 1], [], []>} : vector<2x256xbf16>, vector<256x512xbf16>, vector<2x512xf32> -> vector<2x512xf32>
    %10 = arith.addf %8, %9 : vector<2x512xf32>
    %c0_9 = arith.constant 0 : index
    %c0_10 = arith.constant 0 : index
    %11 = vector.load %arg7[%c0_9, %c0_10] : memref<2x512xf32, #tpu.memory_space<vmem>>, vector<2x512xf32>
    tpu.vector_store %arg7[%c0_9, %c0_10], %10 {strides = array<i32>} : memref<2x512xf32, #tpu.memory_space<vmem>>, vector<2x512xf32>,
    %c0_i32_11 = arith.constant 0 : i32
    %12 = arith.cmpi eq, %arg2, %c0_i32_11 : i32
    %13 = arith.extui %12 : i1 to i32
    %c0_i32_12 = arith.constant 0 : i32
    %14 = arith.cmpi ne, %13, %c0_i32_12 : i32
    scf.if %14 {
      %c0_13 = arith.constant 0 : index
      %c0_14 = arith.constant 0 : index
      %15 = vector.load %arg7[%c0_13, %c0_14] : memref<2x512xf32, #tpu.memory_space<vmem>>, vector<2x512xf32>
      %c0_15 = arith.constant 0 : index
      %c0_16 = arith.constant 0 : index
      %16 = vector.load %arg5[%c0_15, %c0_16] : memref<1x512xf32, #tpu.memory_space<vmem>>, vector<1x512xf32>
      %17 = vector.broadcast %16 : vector<1x512xf32> to vector<2x512xf32>
      %18 = arith.addf %15, %17 : vector<2x512xf32>
      %cst_17 = arith.constant 0.000000e+00 : f32
      %19 = vector.broadcast %cst_17 : f32 to vector<2x512xf32>
      %20 = arith.cmpf oge, %18, %19 : vector<2x512xf32>
      %cst_18 = arith.constant 1.000000e-01 : f32
      %21 = vector.broadcast %cst_18 : f32 to vector<2x512xf32>
      %22 = arith.mulf %21, %18 : vector<2x512xf32>
      %23 = arith.select %20, %18, %22 : vector<2x512xi1>, vector<2x512xf32>
      %24 = arith.truncf %23 : vector<2x512xf32> to vector<2x512xbf16>
      %c0_19 = arith.constant 0 : index
      %c0_20 = arith.constant 0 : index
      %c0_21 = arith.constant 0 : index
      %c0_22 = arith.constant 0 : index
      %25 = vector.load %arg6[%c0_19, %c0_20, %c0_21, %c0_22] : memref<1x1x2x512xbf16, #tpu.memory_space<vmem>>, vector<1x1x2x512xbf16>
      %26 = vector.shape_cast %25 : vector<1x1x2x512xbf16> to vector<2x512xbf16>
      %27 = vector.shape_cast %24 : vector<2x512xbf16> to vector<1x1x2x512xbf16>
      tpu.vector_store %arg6[%c0_19, %c0_20, %c0_21, %c0_22], %27 {strides = array<i32>} : memref<1x1x2x512xbf16, #tpu.memory_space<vmem>>, vector<1x1x2x512xbf16>,
    } else {
    }
    return
  }
  func.func @transform_0(%arg0: i32, %arg1: i32, %arg2: i32) -> (i32, i32, i32, i32) {
    %0 = arith.addi %arg1, %arg2 : i32
    %c0_i32 = arith.constant 0 : i32
    %c0_i32_0 = arith.constant 0 : i32
    %c0_i32_1 = arith.constant 0 : i32
    return %arg0, %0, %c0_i32, %c0_i32_0 : i32, i32, i32, i32
  }
  func.func @transform_1(%arg0: i32, %arg1: i32, %arg2: i32) -> (i32, i32, i32, i32) {
    %c0_i32 = arith.constant 0 : i32
    %c0_i32_0 = arith.constant 0 : i32
    %c0_i32_1 = arith.constant 0 : i32
    %c0_i32_2 = arith.constant 0 : i32
    %c0_i32_3 = arith.constant 0 : i32
    return %c0_i32, %c0_i32_0, %c0_i32_1, %c0_i32_2 : i32, i32, i32, i32
  }
  func.func @transform_2(%arg0: i32, %arg1: i32, %arg2: i32) -> (i32, i32) {
    %c0_i32 = arith.constant 0 : i32
    %c0_i32_0 = arith.constant 0 : i32
    %c0_i32_1 = arith.constant 0 : i32
    return %c0_i32, %c0_i32_0 : i32, i32
  }
  func.func @transform_3(%arg0: i32, %arg1: i32, %arg2: i32) -> (i32, i32, i32, i32) {
    %c0_i32 = arith.constant 0 : i32
    %c0_i32_0 = arith.constant 0 : i32
    %c0_i32_1 = arith.constant 0 : i32
    return %arg0, %arg1, %c0_i32, %c0_i32_0 : i32, i32, i32, i32
  }
}

module attributes {stable_mosaic.version = 11 : i64} {
  func.func @_conv_row_kernel(%arg0: i32, %arg1: i32, %arg2: i32, %arg3: memref<1x1x4x512xbf16, #tpu.memory_space<vmem>>, %arg4: memref<3x3x512x512xbf16, #tpu.memory_space<vmem>>, %arg5: memref<1x512xf32, #tpu.memory_space<vmem>>, %arg6: memref<1x1x2x512xbf16, #tpu.memory_space<vmem>>, %arg7: memref<2x512xf32, #tpu.memory_space<vmem>>) attributes {dimension_semantics = [#tpu.dimension_semantics<parallel>, #tpu.dimension_semantics<parallel>, #tpu.dimension_semantics<arbitrary>], iteration_bounds = array<i64: 2, 2, 3>, scalar_prefetch = 0 : i64, scratch_operands = 1 : i64, tpu.core_type = #tpu.core_type<tc>, window_params = [{transform_indices = @transform_0, window_bounds = array<i64: 1, 1, 4, 512>}, {pipeline_mode = #tpu.pipeline_mode<synchronous>, transform_indices = @transform_1, window_bounds = array<i64: 3, 3, 512, 512>}, {pipeline_mode = #tpu.pipeline_mode<synchronous>, transform_indices = @transform_2, window_bounds = array<i64: 1, 512>}, {transform_indices = @transform_3, window_bounds = array<i64: 1, 1, 2, 512>}]} {
    %c0_i32 = arith.constant 0 : i32
    %0 = arith.cmpi eq, %arg2, %c0_i32 : i32
    %1 = arith.extui %0 : i1 to i32
    %c0_i32_0 = arith.constant 0 : i32
    %2 = arith.cmpi ne, %1, %c0_i32_0 : i32
    scf.if %2 {
      %cst_34 = arith.constant 0.000000e+00 : f32
      %33 = vector.broadcast %cst_34 : f32 to vector<2x512xf32>
      %c0_35 = arith.constant 0 : index
      %c0_36 = arith.constant 0 : index
      %34 = vector.load %arg7[%c0_35, %c0_36] : memref<2x512xf32, #tpu.memory_space<vmem>>, vector<2x512xf32>
      tpu.vector_store %arg7[%c0_35, %c0_36], %33 {strides = array<i32>} : memref<2x512xf32, #tpu.memory_space<vmem>>, vector<2x512xf32>,
    } else {
    }
    %c0 = arith.constant 0 : index
    %c0_1 = arith.constant 0 : index
    %c0_2 = arith.constant 0 : index
    %c0_3 = arith.constant 0 : index
    %3 = vector.load %arg3[%c0, %c0_1, %c0_2, %c0_3] : memref<1x1x4x512xbf16, #tpu.memory_space<vmem>>, vector<1x1x2x512xbf16>
    %4 = vector.shape_cast %3 : vector<1x1x2x512xbf16> to vector<2x512xbf16>
    %5 = arith.index_cast %arg2 : i32 to index
    %c0_4 = arith.constant 0 : index
    %c0_5 = arith.constant 0 : index
    %c0_6 = arith.constant 0 : index
    %6 = vector.load %arg4[%5, %c0_4, %c0_5, %c0_6] : memref<3x3x512x512xbf16, #tpu.memory_space<vmem>>, vector<1x1x512x512xbf16>
    %7 = vector.shape_cast %6 : vector<1x1x512x512xbf16> to vector<512x512xbf16>
    %c0_7 = arith.constant 0 : index
    %c0_8 = arith.constant 0 : index
    %8 = vector.load %arg7[%c0_7, %c0_8] : memref<2x512xf32, #tpu.memory_space<vmem>>, vector<2x512xf32>
    %cst = arith.constant dense<0.000000e+00> : vector<2x512xf32>
    %9 = tpu.matmul %4, %7, %cst {dimension_numbers = #tpu.dot_dimension_numbers<[1], [0], [0], [1], [0, 0, 1, 1], [], []>} : vector<2x512xbf16>, vector<512x512xbf16>, vector<2x512xf32> -> vector<2x512xf32>
    %10 = arith.addf %8, %9 : vector<2x512xf32>
    %c0_9 = arith.constant 0 : index
    %c0_10 = arith.constant 0 : index
    %11 = vector.load %arg7[%c0_9, %c0_10] : memref<2x512xf32, #tpu.memory_space<vmem>>, vector<2x512xf32>
    tpu.vector_store %arg7[%c0_9, %c0_10], %10 {strides = array<i32>} : memref<2x512xf32, #tpu.memory_space<vmem>>, vector<2x512xf32>,
    %c0_11 = arith.constant 0 : index
    %c0_12 = arith.constant 0 : index
    %c1 = arith.constant 1 : index
    %c0_13 = arith.constant 0 : index
    %12 = vector.load %arg3[%c0_11, %c0_12, %c1, %c0_13] : memref<1x1x4x512xbf16, #tpu.memory_space<vmem>>, vector<1x1x2x512xbf16>
    %13 = vector.shape_cast %12 : vector<1x1x2x512xbf16> to vector<2x512xbf16>
    %14 = arith.index_cast %arg2 : i32 to index
    %c1_14 = arith.constant 1 : index
    %c0_15 = arith.constant 0 : index
    %c0_16 = arith.constant 0 : index
    %15 = vector.load %arg4[%14, %c1_14, %c0_15, %c0_16] : memref<3x3x512x512xbf16, #tpu.memory_space<vmem>>, vector<1x1x512x512xbf16>
    %16 = vector.shape_cast %15 : vector<1x1x512x512xbf16> to vector<512x512xbf16>
    %c0_17 = arith.constant 0 : index
    %c0_18 = arith.constant 0 : index
    %17 = vector.load %arg7[%c0_17, %c0_18] : memref<2x512xf32, #tpu.memory_space<vmem>>, vector<2x512xf32>
    %cst_19 = arith.constant dense<0.000000e+00> : vector<2x512xf32>
    %18 = tpu.matmul %13, %16, %cst_19 {dimension_numbers = #tpu.dot_dimension_numbers<[1], [0], [0], [1], [0, 0, 1, 1], [], []>} : vector<2x512xbf16>, vector<512x512xbf16>, vector<2x512xf32> -> vector<2x512xf32>
    %19 = arith.addf %17, %18 : vector<2x512xf32>
    %c0_20 = arith.constant 0 : index
    %c0_21 = arith.constant 0 : index
    %20 = vector.load %arg7[%c0_20, %c0_21] : memref<2x512xf32, #tpu.memory_space<vmem>>, vector<2x512xf32>
    tpu.vector_store %arg7[%c0_20, %c0_21], %19 {strides = array<i32>} : memref<2x512xf32, #tpu.memory_space<vmem>>, vector<2x512xf32>,
    %c0_22 = arith.constant 0 : index
    %c0_23 = arith.constant 0 : index
    %c2 = arith.constant 2 : index
    %c0_24 = arith.constant 0 : index
    %21 = vector.load %arg3[%c0_22, %c0_23, %c2, %c0_24] : memref<1x1x4x512xbf16, #tpu.memory_space<vmem>>, vector<1x1x2x512xbf16>
    %22 = vector.shape_cast %21 : vector<1x1x2x512xbf16> to vector<2x512xbf16>
    %23 = arith.index_cast %arg2 : i32 to index
    %c2_25 = arith.constant 2 : index
    %c0_26 = arith.constant 0 : index
    %c0_27 = arith.constant 0 : index
    %24 = vector.load %arg4[%23, %c2_25, %c0_26, %c0_27] : memref<3x3x512x512xbf16, #tpu.memory_space<vmem>>, vector<1x1x512x512xbf16>
    %25 = vector.shape_cast %24 : vector<1x1x512x512xbf16> to vector<512x512xbf16>
    %c0_28 = arith.constant 0 : index
    %c0_29 = arith.constant 0 : index
    %26 = vector.load %arg7[%c0_28, %c0_29] : memref<2x512xf32, #tpu.memory_space<vmem>>, vector<2x512xf32>
    %cst_30 = arith.constant dense<0.000000e+00> : vector<2x512xf32>
    %27 = tpu.matmul %22, %25, %cst_30 {dimension_numbers = #tpu.dot_dimension_numbers<[1], [0], [0], [1], [0, 0, 1, 1], [], []>} : vector<2x512xbf16>, vector<512x512xbf16>, vector<2x512xf32> -> vector<2x512xf32>
    %28 = arith.addf %26, %27 : vector<2x512xf32>
    %c0_31 = arith.constant 0 : index
    %c0_32 = arith.constant 0 : index
    %29 = vector.load %arg7[%c0_31, %c0_32] : memref<2x512xf32, #tpu.memory_space<vmem>>, vector<2x512xf32>
    tpu.vector_store %arg7[%c0_31, %c0_32], %28 {strides = array<i32>} : memref<2x512xf32, #tpu.memory_space<vmem>>, vector<2x512xf32>,
    %c2_i32 = arith.constant 2 : i32
    %30 = arith.cmpi eq, %arg2, %c2_i32 : i32
    %31 = arith.extui %30 : i1 to i32
    %c0_i32_33 = arith.constant 0 : i32
    %32 = arith.cmpi ne, %31, %c0_i32_33 : i32
    scf.if %32 {
      %c0_34 = arith.constant 0 : index
      %c0_35 = arith.constant 0 : index
      %33 = vector.load %arg7[%c0_34, %c0_35] : memref<2x512xf32, #tpu.memory_space<vmem>>, vector<2x512xf32>
      %c0_36 = arith.constant 0 : index
      %c0_37 = arith.constant 0 : index
      %34 = vector.load %arg5[%c0_36, %c0_37] : memref<1x512xf32, #tpu.memory_space<vmem>>, vector<1x512xf32>
      %35 = vector.broadcast %34 : vector<1x512xf32> to vector<2x512xf32>
      %36 = arith.addf %33, %35 : vector<2x512xf32>
      %cst_38 = arith.constant 0.000000e+00 : f32
      %37 = vector.broadcast %cst_38 : f32 to vector<2x512xf32>
      %38 = arith.cmpf oge, %36, %37 : vector<2x512xf32>
      %cst_39 = arith.constant 1.000000e-01 : f32
      %39 = vector.broadcast %cst_39 : f32 to vector<2x512xf32>
      %40 = arith.mulf %39, %36 : vector<2x512xf32>
      %41 = arith.select %38, %36, %40 : vector<2x512xi1>, vector<2x512xf32>
      %42 = arith.truncf %41 : vector<2x512xf32> to vector<2x512xbf16>
      %c0_40 = arith.constant 0 : index
      %c0_41 = arith.constant 0 : index
      %c0_42 = arith.constant 0 : index
      %c0_43 = arith.constant 0 : index
      %43 = vector.load %arg6[%c0_40, %c0_41, %c0_42, %c0_43] : memref<1x1x2x512xbf16, #tpu.memory_space<vmem>>, vector<1x1x2x512xbf16>
      %44 = vector.shape_cast %43 : vector<1x1x2x512xbf16> to vector<2x512xbf16>
      %45 = vector.shape_cast %42 : vector<2x512xbf16> to vector<1x1x2x512xbf16>
      tpu.vector_store %arg6[%c0_40, %c0_41, %c0_42, %c0_43], %45 {strides = array<i32>} : memref<1x1x2x512xbf16, #tpu.memory_space<vmem>>, vector<1x1x2x512xbf16>,
    } else {
    }
    return
  }
  func.func @transform_0(%arg0: i32, %arg1: i32, %arg2: i32) -> (i32, i32, i32, i32) {
    %0 = arith.addi %arg1, %arg2 : i32
    %c0_i32 = arith.constant 0 : i32
    %c0_i32_0 = arith.constant 0 : i32
    %c0_i32_1 = arith.constant 0 : i32
    return %arg0, %0, %c0_i32, %c0_i32_0 : i32, i32, i32, i32
  }
  func.func @transform_1(%arg0: i32, %arg1: i32, %arg2: i32) -> (i32, i32, i32, i32) {
    %c0_i32 = arith.constant 0 : i32
    %c0_i32_0 = arith.constant 0 : i32
    %c0_i32_1 = arith.constant 0 : i32
    %c0_i32_2 = arith.constant 0 : i32
    %c0_i32_3 = arith.constant 0 : i32
    return %c0_i32, %c0_i32_0, %c0_i32_1, %c0_i32_2 : i32, i32, i32, i32
  }
  func.func @transform_2(%arg0: i32, %arg1: i32, %arg2: i32) -> (i32, i32) {
    %c0_i32 = arith.constant 0 : i32
    %c0_i32_0 = arith.constant 0 : i32
    %c0_i32_1 = arith.constant 0 : i32
    return %c0_i32, %c0_i32_0 : i32, i32
  }
  func.func @transform_3(%arg0: i32, %arg1: i32, %arg2: i32) -> (i32, i32, i32, i32) {
    %c0_i32 = arith.constant 0 : i32
    %c0_i32_0 = arith.constant 0 : i32
    %c0_i32_1 = arith.constant 0 : i32
    return %arg0, %arg1, %c0_i32, %c0_i32_0 : i32, i32, i32, i32
  }
}

module attributes {stable_mosaic.version = 11 : i64} {
  func.func @_conv_row_kernel(%arg0: i32, %arg1: i32, %arg2: i32, %arg3: memref<1x1x1x512xbf16, #tpu.memory_space<vmem>>, %arg4: memref<1x1x512x128xbf16, #tpu.memory_space<vmem>>, %arg5: memref<1x128xf32, #tpu.memory_space<vmem>>, %arg6: memref<1x1x1x128xf32, #tpu.memory_space<vmem>>, %arg7: memref<1x128xf32, #tpu.memory_space<vmem>>) attributes {dimension_semantics = [#tpu.dimension_semantics<parallel>, #tpu.dimension_semantics<parallel>, #tpu.dimension_semantics<arbitrary>], iteration_bounds = array<i64: 2, 1, 1>, scalar_prefetch = 0 : i64, scratch_operands = 1 : i64, tpu.core_type = #tpu.core_type<tc>, window_params = [{transform_indices = @transform_0, window_bounds = array<i64: 1, 1, 1, 512>}, {pipeline_mode = #tpu.pipeline_mode<synchronous>, transform_indices = @transform_1, window_bounds = array<i64: 1, 1, 512, 128>}, {pipeline_mode = #tpu.pipeline_mode<synchronous>, transform_indices = @transform_2, window_bounds = array<i64: 1, 128>}, {transform_indices = @transform_3, window_bounds = array<i64: 1, 1, 1, 128>}]} {
    %c0_i32 = arith.constant 0 : i32
    %0 = arith.cmpi eq, %arg2, %c0_i32 : i32
    %1 = arith.extui %0 : i1 to i32
    %c0_i32_0 = arith.constant 0 : i32
    %2 = arith.cmpi ne, %1, %c0_i32_0 : i32
    scf.if %2 {
      %cst_13 = arith.constant 0.000000e+00 : f32
      %15 = vector.broadcast %cst_13 : f32 to vector<1x128xf32>
      %c0_14 = arith.constant 0 : index
      %c0_15 = arith.constant 0 : index
      %16 = vector.load %arg7[%c0_14, %c0_15] : memref<1x128xf32, #tpu.memory_space<vmem>>, vector<1x128xf32>
      tpu.vector_store %arg7[%c0_14, %c0_15], %15 {strides = array<i32>} : memref<1x128xf32, #tpu.memory_space<vmem>>, vector<1x128xf32>,
    } else {
    }
    %c0 = arith.constant 0 : index
    %c0_1 = arith.constant 0 : index
    %c0_2 = arith.constant 0 : index
    %c0_3 = arith.constant 0 : index
    %3 = vector.load %arg3[%c0, %c0_1, %c0_2, %c0_3] : memref<1x1x1x512xbf16, #tpu.memory_space<vmem>>, vector<1x1x1x512xbf16>
    %4 = vector.shape_cast %3 : vector<1x1x1x512xbf16> to vector<1x512xbf16>
    %5 = arith.index_cast %arg2 : i32 to index
    %c0_4 = arith.constant 0 : index
    %c0_5 = arith.constant 0 : index
    %c0_6 = arith.constant 0 : index
    %6 = vector.load %arg4[%5, %c0_4, %c0_5, %c0_6] : memref<1x1x512x128xbf16, #tpu.memory_space<vmem>>, vector<1x1x512x128xbf16>
    %7 = vector.shape_cast %6 : vector<1x1x512x128xbf16> to vector<512x128xbf16>
    %c0_7 = arith.constant 0 : index
    %c0_8 = arith.constant 0 : index
    %8 = vector.load %arg7[%c0_7, %c0_8] : memref<1x128xf32, #tpu.memory_space<vmem>>, vector<1x128xf32>
    %cst = arith.constant dense<0.000000e+00> : vector<1x128xf32>
    %9 = tpu.matmul %4, %7, %cst {dimension_numbers = #tpu.dot_dimension_numbers<[1], [0], [0], [1], [0, 0, 1, 1], [], []>} : vector<1x512xbf16>, vector<512x128xbf16>, vector<1x128xf32> -> vector<1x128xf32>
    %10 = arith.addf %8, %9 : vector<1x128xf32>
    %c0_9 = arith.constant 0 : index
    %c0_10 = arith.constant 0 : index
    %11 = vector.load %arg7[%c0_9, %c0_10] : memref<1x128xf32, #tpu.memory_space<vmem>>, vector<1x128xf32>
    tpu.vector_store %arg7[%c0_9, %c0_10], %10 {strides = array<i32>} : memref<1x128xf32, #tpu.memory_space<vmem>>, vector<1x128xf32>,
    %c0_i32_11 = arith.constant 0 : i32
    %12 = arith.cmpi eq, %arg2, %c0_i32_11 : i32
    %13 = arith.extui %12 : i1 to i32
    %c0_i32_12 = arith.constant 0 : i32
    %14 = arith.cmpi ne, %13, %c0_i32_12 : i32
    scf.if %14 {
      %c0_13 = arith.constant 0 : index
      %c0_14 = arith.constant 0 : index
      %15 = vector.load %arg7[%c0_13, %c0_14] : memref<1x128xf32, #tpu.memory_space<vmem>>, vector<1x128xf32>
      %c0_15 = arith.constant 0 : index
      %c0_16 = arith.constant 0 : index
      %16 = vector.load %arg5[%c0_15, %c0_16] : memref<1x128xf32, #tpu.memory_space<vmem>>, vector<1x128xf32>
      %17 = arith.addf %15, %16 : vector<1x128xf32>
      %cst_17 = arith.constant 2.000000e+01 : f32
      %18 = vector.broadcast %cst_17 : f32 to vector<1x128xf32>
      %19 = arith.mulf %17, %18 : vector<1x128xf32>
      %c0_18 = arith.constant 0 : index
      %c0_19 = arith.constant 0 : index
      %c0_20 = arith.constant 0 : index
      %c0_21 = arith.constant 0 : index
      %20 = vector.load %arg6[%c0_18, %c0_19, %c0_20, %c0_21] : memref<1x1x1x128xf32, #tpu.memory_space<vmem>>, vector<1x1x1x128xf32>
      %21 = vector.shape_cast %20 : vector<1x1x1x128xf32> to vector<1x128xf32>
      %22 = vector.shape_cast %19 : vector<1x128xf32> to vector<1x1x1x128xf32>
      tpu.vector_store %arg6[%c0_18, %c0_19, %c0_20, %c0_21], %22 {strides = array<i32>} : memref<1x1x1x128xf32, #tpu.memory_space<vmem>>, vector<1x1x1x128xf32>,
    } else {
    }
    return
  }
  func.func @transform_0(%arg0: i32, %arg1: i32, %arg2: i32) -> (i32, i32, i32, i32) {
    %0 = arith.addi %arg1, %arg2 : i32
    %c0_i32 = arith.constant 0 : i32
    %c0_i32_0 = arith.constant 0 : i32
    %c0_i32_1 = arith.constant 0 : i32
    return %arg0, %0, %c0_i32, %c0_i32_0 : i32, i32, i32, i32
  }
  func.func @transform_1(%arg0: i32, %arg1: i32, %arg2: i32) -> (i32, i32, i32, i32) {
    %c0_i32 = arith.constant 0 : i32
    %c0_i32_0 = arith.constant 0 : i32
    %c0_i32_1 = arith.constant 0 : i32
    %c0_i32_2 = arith.constant 0 : i32
    %c0_i32_3 = arith.constant 0 : i32
    return %c0_i32, %c0_i32_0, %c0_i32_1, %c0_i32_2 : i32, i32, i32, i32
  }
  func.func @transform_2(%arg0: i32, %arg1: i32, %arg2: i32) -> (i32, i32) {
    %c0_i32 = arith.constant 0 : i32
    %c0_i32_0 = arith.constant 0 : i32
    %c0_i32_1 = arith.constant 0 : i32
    return %c0_i32, %c0_i32_0 : i32, i32
  }
  func.func @transform_3(%arg0: i32, %arg1: i32, %arg2: i32) -> (i32, i32, i32, i32) {
    %c0_i32 = arith.constant 0 : i32
    %c0_i32_0 = arith.constant 0 : i32
    %c0_i32_1 = arith.constant 0 : i32
    return %arg0, %arg1, %c0_i32, %c0_i32_0 : i32, i32, i32, i32
  }
}

</mosaic_0001>

<bundles_post_ra>
// kernel: flownet_encoder_forward.6
= control target key start
LH: loop header
LB: loop body
LE: loop exit
PB: predicated region body
PF: predicated region fallthrough
CT: control target
= control target key end

     0   :  { %s817_s12 = smov 0   ;;  %s819_s13 = smov 0   ;;  %s942_s0 = inlined_call_operand.vmem [shape: bf16[2,19,19,24], index: 0, kind: input, shape index: {}]   ;;  %s943_s1 = inlined_call_operand.vmem [shape: bf16[4,4,24,64], index: 1, kind: input, shape index: {}]   ;;  %s944_s2 = inlined_call_operand.vmem [shape: f32[1,64], index: 2, kind: input, shape index: {}]   ;;  %s945_s3 = inlined_call_operand.vmem [shape: bf16[2,16,16,64], index: 3, kind: output, shape index: {}]  }
   0x1   :  { %s821_s14 = smov 0   ;;  %s823_s15 = smov 0  }
   0x2   :  { %s825_s16 = smov 0   ;;  %s827_s17 = smov 0  }
   0x3   :  { %s829_s18 = smov 0  }
   0x4 LB: > { %s25_s19 = sadd.s32 1, %s782_s15  ;;  %s28_s20 = sadd.s32 1, %s786_s16  ;;  %s794_s18 = sphi %s829_s18, %s13_s18   ;;  %s790_s17 = sphi %s827_s17, %s951_s17   ;;  %s786_s16 = sphi %s825_s16, %s950_s16   ;;  %s782_s15 = sphi %s823_s15, %s949_s15   ;;  %s778_s14 = sphi %s821_s14, %s948_s14   ;;  %s774_s13 = sphi %s819_s13, %s947_s13   ;;  %s770_s12 = sphi %s817_s12, %s946_s12  }
   0x5   : > { %p26_p0 = scmp.ge.s32.totalorder %s25_s19, 4  ;;  %p613_p1 = scmp.ge.s32.totalorder %s794_s18, 1 }
   0x6   : > { %p168_p2 = scmp.lt.s32.totalorder %s794_s18, 129  ;;  %s32_s21 = sadd.s32 1, %s790_s17 }
   0x7   : > { %s953_s19 = smov (%p26_p0, %s25_s19), 0  ;;  %s955_s20 = smov (!%p26_p0, %s28_s20), %s786_s16 }
   0x8   : > { %p169_p3 = pnand %p613_p1, %p168_p2  ;;  %p30_p4 = scmp.ge.s32.totalorder %s955_s20, 16 }
   0x9   : > { %s201_s22 = sadd.s32 (!%p169_p3), %s770_s12, %s774_s13  ;;  %p202_p6 = scmp.lt.s32.totalorder (!%p169_p3), %s778_s14, 1 }
   0xa   : > { %s957_s20 = smov (%p30_p4, %s955_s20), 0  ;;  %s959_s21 = smov (!%p30_p4, %s32_s21), %s790_s17 }
   0xb   : > { %p34_p5 = scmp.ge.s32.totalorder %s959_s21, 2  ;;  %172 = sbr.rel (%p169_p3) target bundleno = 225 (0xe1), region = 32 }
   0xc   : > { %p204_p7 = scmp.lt.s32.totalorder (!%p169_p3), %s201_s22, 18  ;;  %p214_p8 = scmp.lt.s32.totalorder (!%p169_p3), %s774_s13, 15 }
   0xd   : > { %s961_s21 = smov (%p34_p5, %s959_s21), 0  ;;  %p618_p9 = scmp.ne.s32.totalorder (!%p169_p3), %s770_s12, 0 }
  0x10   : > { %s963_s14 = smov (!%p202_p6, %s778_s14), 1  ;;  %s965_s22 = smov (!%p204_p7, %s201_s22), 18 }
  0x11   : > { %s681_s23 = smul.u32 57, %s963_s14  ;;  %s616_s25 = sshll.u32 %s963_s14, 5 }
  0x12   : > { %s680_s24 = smul.u32 3, %s965_s22  ;;  %s967_s13 = smov (!%p214_p8, %s774_s13), 15 }
  0x13   : > { %s615_s28 = sshll.u32 %s967_s13, 1  ;;  %225 = sbr.rel (%p618_p9) target bundleno = 27 (0x1b), region = 36 }
  0x14   : > { %s208_s26 = sadd.s32 %s681_s23, %s680_s24  ;;  %s218_s5 = sadd.s32 %s616_s25, %s615_s28 }
  0x15   : > { %s614_s27 = sshll.u32 %s208_s26, 2  ;;  %s617_s6 = sshll.u32 %s218_s5, 2 }
  0x16   : > { %s870_s4 = scalar_lea.vmem %s942_s0, %s614_s27  ;;  %s875_s9 = scalar_lea.vmem %s945_s3, %s617_s6 }
  0x18   : > { %vm226_vm0 = vcmask 523264   ;;  %v796_v0 = vmov 0.0  }
  0x19   : > { %227 = vst.msk [vmem:[#allocation2] sm:$0xff] %vm226_vm0, %v796_v0 }
  0x1a   : > { %228 = vst.msk [vmem:[#allocation2 + $0x8] sm:$0xff] %vm226_vm0, %v796_v0 }
  0x1b PF: > { %s672_s10 = smul.u32 48, %s770_s12  ;;  %v674_v1 = vld [vmem:[%s870_s4] sm:$0xff]  ;;  %v282_v2 = vld [vmem:[%s870_s4 + $0x8] sm:$0x1]  ;;  %vm257_vm1 = vcmask 1043456   ;;  %vm364_vm3 = vcmask 1046528  }
  0x1c   : > { %v648_v3 = vld [vmem:[%s870_s4] sm:$0xe]  ;;  %v296_v4 = vunpack.c.l.b16 %v282_v2  ;;  %v303_v5 = vshll.u32 %v674_v1, 16  ;;  %v676_v6 = vld [vmem:[%s870_s4] sm:$0xf0]  ;;  %v301_v10 = vshrl.u32 %v674_v1, 16 }
  0x1d   : > { %s885_s14 = scalar_lea.vmem %s943_s1, %s672_s10  ;;  %v347_v7 = vld [vmem:[%s870_s4 + $0x8] sm:$0x1]  ;;  %v649_v18 = vor.u32 %v676_v6, %v648_v3  ;;  %v661_v20 = vld [vmem:[%s870_s4] sm:$0xe]  ;;  %v678_v25 = vld [vmem:[%s870_s4] sm:$0xf0] }
  0x1e   : > { %v236_v8 = vld [vmem:[%s885_s14 + $0x8] sm:$0xf]  ;;  %v632_v9 = vld [vmem:[%s885_s14 + $0x14] sm:$0xf]  ;;  %v361_v11 = vunpack.c.l.b16 %v347_v7  ;;  %v645_v14 = vld [vmem:[%s885_s14 + $0x20] sm:$0xf]  ;;  %v298_v15 = vpack.c.b16 %v296_v4, %v296_v4  ;;  %v662_v33 = vor.u32 %v678_v25, %v661_v20 }
  0x1f   : > { %v249_v12 = vunpack.c.l.b16 %v236_v8  ;;  %v317_v13 = vunpack.c.l.b16 %v632_v9  ;;  %v305_v16 = vrot.slane %v303_v5, 1  ;;  %v373_v17 = vunpack.c.l.b16 %v645_v14  ;;  %v658_v19 = vld [vmem:[%s885_s14 + $0x2c] sm:$0xf]  ;;  %v403_v26 = vld [vmem:[%s870_s4 + $0x8] sm:$0x3]  ;;  %v673_v34 = vld [vmem:[%s885_s14] sm:$0xff] }
  0x20   : > { %v308_v23 = vshll.u32 %v298_v15, 16  ;;  %v363_v24 = vpack.c.b16 %v361_v11, %v361_v11  ;;  %vm299_vm2 = vsmask.f32 7424  ;;  %v443_v28 = vunpack.c.l.b16 %v658_v19  ;;  %v675_v35 = vld [vmem:[%s885_s14 + $0xc] sm:$0xff]  ;;  %v677_v40 = vld [vmem:[%s885_s14 + $0x18] sm:$0xff]  ;;  %v671_v48 = vld [vmem:[%s870_s4] sm:$0xff] }
  0x21   : > { %v251_v21 = vpack.c.b16 %v249_v12, %v249_v12  ;;  %v319_v22 = vpack.c.b16 %v317_v13, %v317_v13  ;;  %v375_v27 = vpack.c.b16 %v373_v17, %v373_v17  ;;  %v417_v29 = vunpack.c.l.b16 %v403_v26  ;;  %v679_v52 = vld [vmem:[%s885_s14 + $0x24] sm:$0xff]  ;;  %p668_p10 = scmp.ne.s32.totalorder %s770_s12, 3 }
  0x22   : > { %v306_v32 = vor.u32 %v305_v16, %v301_v10  ;;  %v310_v37 = vrot.slane %v308_v23, 1  ;;  %v445_v38 = vpack.c.b16 %v443_v28, %v443_v28  ;;  %v365_v41 = vrot.slane %v649_v18, 1  ;;  %v237_v59 = vld [vmem:[#allocation2] sm:$0xff]  ;;  %v238_v62 = vld [vmem:[#allocation2 + $0x8] sm:$0xff] }
  0x23   : > { %v259_v30 = vsel %vm257_vm1, %v251_v21, 0  ;;  %v325_v31 = vsel %vm257_vm1, %v319_v22, 0  ;;  %v381_v36 = vsel %vm257_vm1, %v375_v27, 0  ;;  %v419_v39 = vpack.c.b16 %v417_v29, %v417_v29 }
  0x24   : > { %267 = vmatpush.bf16.msra.mxu0 %v259_v30  ;;  %333 = vmatpush.bf16.msra.mxu1 %v325_v31  ;;  %v366_v42 = vrot.slane %v363_v24, 1  ;;  %v422_v43 = vshrl.u32 %v662_v33, 16  ;;  %v425_v44 = vshll.u32 %v662_v33, 16  ;;  %v451_v45 = vsel %vm257_vm1, %v445_v38, 0 }
  0x25   : > { %389 = vmatpush.bf16.msra.mxu2 %v381_v36  ;;  %v430_v46 = vshrl.u32 %v419_v39, 16  ;;  %v433_v47 = vshll.u32 %v419_v39, 16  ;;  %459 = vmatpush.bf16.msra.mxu3 %v451_v45  ;;  %vm253_vm4 = vcmask 195584   ;;  %v311_v51 = vsel %vm299_vm2, %v306_v32, %v310_v37 }
  0x26   : > { %v424_v49 = vrot.slane %v422_v43, 1  ;;  %v427_v50 = vrot.slane %v425_v44, 2  ;;  %v367_v55 = vsel %vm364_vm3, %v365_v41, %v366_v42  ;;  %vm420_vm5 = vsmask.f32 6400 }
  0x27   : > { %v432_v53 = vrot.slane %v430_v46, 1  ;;  %v435_v54 = vrot.slane %v433_v47, 2  ;;  %vm277_vm6 = vcmask 523264  }
  0x28   : > { %268 = vmatpush.bf16.msra.mxu0 %v673_v34  ;;  %334 = vmatpush.bf16.msra.mxu1 %v675_v35  ;;  %v428_v56 = vor.u32 %v427_v50, %v424_v49 }
  0x29   : > { %390 = vmatpush.bf16.msra.mxu2 %v677_v40  ;;  %v436_v57 = vor.u32 %v435_v54, %v432_v53  ;;  %460 = vmatpush.bf16.msra.mxu3 %v679_v52 }
  0x2b   : > { %628 = vmatmul.msk.bf16.vlgmr.msra.gmra.mxu0 %vm253_vm4, %v671_v48  ;;  %641 = vmatmul.msk.bf16.vlgmr.msra.gmra.mxu1 %vm253_vm4, %v311_v51  ;;  %v437_v58 = vsel %vm420_vm5, %v428_v56, %v436_v57 }
  0x2c   : > { %654 = vmatmul.msk.bf16.vlgmr.msra.gmra.mxu2 %vm253_vm4, %v367_v55  ;;  %667 = vmatmul.msk.bf16.vlgmr.msra.gmra.mxu3 %vm253_vm4, %v437_v58 }
  0xa8   : > { %v270_v60 = vpop.f32.mrf.mxu0  ;;  %v336_v63 = vpop.f32.mrf.mxu1 }
  0xa9   : > { %v275_v61 = vadd.f32 %v270_v60, %v237_v59 }
  0xab   : > { %278 = vst.msk [vmem:[#allocation2] sm:$0xff] %vm277_vm6, %v275_v61 }
  0xaf   : > { %v392_v6 = vpop.f32.mrf.mxu2  ;;  %v462_v12 = vpop.f32.mrf.mxu3 }
  0xb0   : > { %v272_v0 = vpop.f32.mrf.mxu0  ;;  %v338_v5 = vpop.f32.mrf.mxu1 }
  0xb1   : > { %v276_v1 = vadd.f32 %v272_v0, %v238_v62 }
  0xb2   : > { %v289_v2 = vld [vmem:[#allocation2] sm:$0xff] }
  0xb3   : > { %v341_v3 = vadd.f32 %v336_v63, %v289_v2  ;;  %279 = vst.msk [vmem:[#allocation2 + $0x8] sm:$0xff] %vm277_vm6, %v276_v1 }
  0xb5   : > { %343 = vst.msk [vmem:[#allocation2] sm:$0xff] %vm277_vm6, %v341_v3 }
  0xb7   : > { %v394_v11 = vpop.f32.mrf.mxu2  ;;  %v464_v17 = vpop.f32.mrf.mxu3 }
  0xba   : > { %v290_v4 = vld [vmem:[#allocation2 + $0x8] sm:$0xff] }
  0xbb   : > { %v342_v7 = vadd.f32 %v338_v5, %v290_v4 }
  0xbc   : > { %v354_v8 = vld [vmem:[#allocation2] sm:$0xff] }
  0xbd   : > { %344 = vst.msk [vmem:[#allocation2 + $0x8] sm:$0xff] %vm277_vm6, %v342_v7  ;;  %v397_v9 = vadd.f32 %v392_v6, %v354_v8 }
  0xbf   : > { %399 = vst.msk [vmem:[#allocation2] sm:$0xff] %vm277_vm6, %v397_v9 }
  0xc4   : > { %v355_v10 = vld [vmem:[#allocation2 + $0x8] sm:$0xff] }
  0xc5   : > { %v398_v13 = vadd.f32 %v394_v11, %v355_v10 }
  0xc6   : > { %v410_v14 = vld [vmem:[#allocation2] sm:$0xff] }
  0xc7   : > { %400 = vst.msk [vmem:[#allocation2 + $0x8] sm:$0xff] %vm277_vm6, %v398_v13  ;;  %v467_v15 = vadd.f32 %v462_v12, %v410_v14 }
  0xc9   : > { %469 = vst.msk [vmem:[#allocation2] sm:$0xff] %vm277_vm6, %v467_v15 }
  0xcd   : > { %474 = sbr.rel (%p668_p10) target bundleno = 225 (0xe1), region = 40 }
  0xce   : > { %v411_v16 = vld [vmem:[#allocation2 + $0x8] sm:$0xff] }
  0xcf   : > { %v468_v18 = vadd.f32 %v464_v17, %v411_v16 }
  0xd1   : > { %470 = vst.msk [vmem:[#allocation2 + $0x8] sm:$0xff] %vm277_vm6, %v468_v18 }
  0xd2   : > { %v475_v19 = vld [vmem:[#allocation2] sm:$0xff]  ;;  %vm491_vm9 = vcmask 519168  }
  0xd3   : > { %v739_v20 = vld [vmem:[%s944_s2] ss:$0 sm:$0xff] }
  0xd4   : > { %v481_v22 = vadd.f32 %v739_v20, %v475_v19 }
  0xd6   : > { %vm483_vm7 = vcmp.ge.f32.partialorder %v481_v22, 0.0  ;;  %v485_v24 = vmul.f32 0.1, %v481_v22 }
  0xd8   : > { %v476_v21 = vld [vmem:[#allocation2 + $0x8] sm:$0xff]  ;;  %v487_v26 = vsel %vm483_vm7, %v481_v22, %v485_v24 }
  0xd9   : > { %v482_v23 = vadd.f32 %v739_v20, %v476_v21  ;;  %v489_v28 = vpack.c.bf16 %v487_v26, %v487_v26 }
  0xdb   : > { %vm484_vm8 = vcmp.ge.f32.partialorder %v482_v23, 0.0  ;;  %v486_v25 = vmul.f32 0.1, %v482_v23  ;;  %492 = vst.msk [vmem:[%s875_s9] sm:$0xf] %vm491_vm9, %v489_v28 }
  0xdd   : > { %v488_v27 = vsel %vm484_vm8, %v482_v23, %v486_v25 }
  0xde   : > { %v490_v29 = vpack.c.bf16 %v488_v27, %v488_v27 }
  0xe0   : > { %493 = vst.msk [vmem:[%s875_s9 + $0x4] sm:$0xf] %vm491_vm9, %v490_v29 }
  0xe1 PF: > { %s13_s18 = sadd.s32 1, %s794_s18   ;;  %s946_s12 = smov %s782_s15 }
  0xe2   : > { %p10_p11 = scmp.ge.s32.totalorder %s13_s18, 130   ;;  %s947_s13 = smov %s786_s16 }
  0xe3   : > { %s948_s14 = smov %s790_s17  ;;  %s949_s15 = smov %s953_s19 }
  0xe4   : > { %s950_s16 = smov %s957_s20  ;;  %s951_s17 = smov %s961_s21 }
  0xe5   :  { %12 = sbr.rel (!%p10_p11) target bundleno = 4 (0x4), region = 74 }

// kernel: flownet_encoder_forward.7
= control target key start
LH: loop header
LB: loop body
LE: loop exit
PB: predicated region body
PF: predicated region fallthrough
CT: control target
= control target key end

     0   :  { %s1349_s12 = smov 0   ;;  %s1351_s13 = smov 0   ;;  %s1499_s0 = inlined_call_operand.vmem [shape: bf16[2,10,10,256], index: 0, kind: input, shape index: {}]   ;;  %s1500_s1 = inlined_call_operand.vmem [shape: bf16[3,3,256,128], index: 1, kind: input, shape index: {}]   ;;  %s1501_s2 = inlined_call_operand.vmem [shape: f32[1,128], index: 2, kind: input, shape index: {}]   ;;  %s1502_s3 = inlined_call_operand.vmem [shape: bf16[2,8,8,128], index: 3, kind: output, shape index: {}]  }
   0x1   :  { %s1353_s14 = smov 0   ;;  %s1355_s15 = smov 0  }
   0x2   :  { %s1357_s16 = smov 0   ;;  %s1359_s17 = smov 0  }
   0x3   :  { %s1361_s18 = smov 0  }
   0x4 LB: > { %s25_s19 = sadd.s32 1, %s1314_s15  ;;  %s28_s20 = sadd.s32 1, %s1318_s16  ;;  %s1326_s18 = sphi %s1361_s18, %s13_s18   ;;  %s1322_s17 = sphi %s1359_s17, %s1508_s17   ;;  %s1318_s16 = sphi %s1357_s16, %s1507_s16   ;;  %s1314_s15 = sphi %s1355_s15, %s1506_s15   ;;  %s1310_s14 = sphi %s1353_s14, %s1505_s14   ;;  %s1306_s13 = sphi %s1351_s13, %s1504_s13   ;;  %s1302_s12 = sphi %s1349_s12, %s1503_s12  }
   0x5   : > { %p26_p0 = scmp.ge.s32.totalorder %s25_s19, 3  ;;  %p876_p1 = scmp.ge.s32.totalorder %s1326_s18, 1 }
   0x6   : > { %p168_p2 = scmp.lt.s32.totalorder %s1326_s18, 49  ;;  %s32_s21 = sadd.s32 1, %s1322_s17 }
   0x7   : > { %s1510_s19 = smov (%p26_p0, %s25_s19), 0  ;;  %s1512_s20 = smov (!%p26_p0, %s28_s20), %s1318_s16 }
   0x8   : > { %p169_p3 = pnand %p876_p1, %p168_p2  ;;  %p30_p4 = scmp.ge.s32.totalorder %s1512_s20, 8 }
   0x9   : > { %s200_s22 = sadd.s32 (!%p169_p3), %s1302_s12, %s1306_s13  ;;  %p201_p6 = scmp.lt.s32.totalorder (!%p169_p3), %s1310_s14, 1 }
   0xa   : > { %s1514_s20 = smov (%p30_p4, %s1512_s20), 0  ;;  %s1516_s21 = smov (!%p30_p4, %s32_s21), %s1322_s17 }
   0xb   : > { %p34_p5 = scmp.ge.s32.totalorder %s1516_s21, 2  ;;  %172 = sbr.rel (%p169_p3) target bundleno = 243 (0xf3), region = 32 }
   0xc   : > { %p203_p7 = scmp.lt.s32.totalorder (!%p169_p3), %s200_s22, 9  ;;  %p213_p8 = scmp.lt.s32.totalorder (!%p169_p3), %s1306_s13, 7 }
   0xd   : > { %s1518_s21 = smov (%p34_p5, %s1516_s21), 0  ;;  %p881_p9 = scmp.ne.s32.totalorder (!%p169_p3), %s1302_s12, 0 }
  0x10   : > { %s1520_s14 = smov (!%p201_p6, %s1310_s14), 1  ;;  %s1522_s22 = smov (!%p203_p7, %s200_s22), 9 }
  0x11   : > { %s1213_s23 = smul.u32 40, %s1520_s14  ;;  %s877_s24 = sshll.u32 %s1522_s22, 2 }
  0x12   : > { %s879_s30 = sshll.u32 %s1520_s14, 3  ;;  %s1524_s13 = smov (!%p213_p8, %s1306_s13), 7 }
  0x13   : > { %s207_s25 = sadd.s32 %s1213_s23, %s877_s24  ;;  %s216_s4 = sadd.s32 %s879_s30, %s1524_s13 }
  0x14   : > { %s878_s26 = sshll.u32 %s207_s25, 2  ;;  %s880_s5 = sshll.u32 %s216_s4, 2 }
  0x15   : > { %s1401_s29 = scalar_lea.vmem %s1499_s0, %s878_s26  ;;  %s1407_s8 = scalar_lea.vmem %s1502_s3, %s880_s5 }
  0x16   : > { %222 = sbr.rel (%p881_p9) target bundleno = 29 (0x1d), region = 36 }
  0x1b   : > { %v1328_v0 = vmov 0.0  }
  0x1c   : > { %223 = vst [vmem:[#allocation2] sm:$0xff] %v1328_v0 }
  0x1d PF: > { %s1160_s9 = smul.u32 384, %s1302_s12  ;;  %v982_v21 = vld [vmem:[%s1401_s29] sm:$0xf]  ;;  %v1178_v22 = vld [vmem:[%s1401_s29 + $0x4] sm:$0x10]  ;;  %p1157_p10 = scmp.ne.s32.totalorder %s1302_s12, 2 }
  0x1e   : > { %v1177_v23 = vld [vmem:[%s1401_s29 + $0x4] sm:$0xf]  ;;  %v984_v24 = vld [vmem:[%s1401_s29 + $0x8] sm:$0x10]  ;;  %v983_v29 = vor.u32 %v1178_v22, %v982_v21 }
  0x1f   : > { %s1414_s14 = scalar_lea.vmem %s1500_s1, %s1160_s9  ;;  %v987_v30 = vor.u32 %v1177_v23, %v984_v24  ;;  %v224_v33 = vld [vmem:[%s1401_s29] sm:$0xff] }
  0x20   : > { %v1168_v1 = vld [vmem:[%s1414_s14 + $0x38] sm:$0xff]  ;;  %v1167_v3 = vld [vmem:[%s1414_s14 + $0x30] sm:$0xff]  ;;  %v1166_v9 = vld [vmem:[%s1414_s14 + $0x28] sm:$0xff]  ;;  %v441_v36 = vshll.u32 %v983_v29, 16  ;;  %v262_v38 = vunpack.c.l.b16 %v224_v33  ;;  %v263_v39 = vunpack.c.h.b16 %v224_v33  ;;  %v439_v46 = vshrl.u32 %v983_v29, 16 }
  0x21   : > { %v1176_v2 = vld [vmem:[%s1414_s14 + $0x78] sm:$0xff]  ;;  %364 = vmatpush.bf16.msra.mxu0 %v1168_v1  ;;  %v1175_v4 = vld [vmem:[%s1414_s14 + $0x70] sm:$0xff]  ;;  %v1174_v10 = vld [vmem:[%s1414_s14 + $0x68] sm:$0xff]  ;;  %v448_v37 = vshll.u32 %v987_v30, 16  ;;  %v446_v48 = vshrl.u32 %v987_v30, 16 }
  0x22   : > { %377 = vmatpush.bf16.msra.mxu1 %v1176_v2  ;;  %v1186_v5 = vld [vmem:[%s1414_s14 + $0xb8] sm:$0xff]  ;;  %v1185_v7 = vld [vmem:[%s1414_s14 + $0xb0] sm:$0xff]  ;;  %v1184_v11 = vld [vmem:[%s1414_s14 + $0xa8] sm:$0xff]  ;;  %v443_v47 = vrot.slane %v441_v36, 1  ;;  %v264_v50 = vpack.c.b16 %v262_v38, %v262_v38  ;;  %v265_v51 = vpack.c.b16 %v263_v39, %v263_v39 }
  0x23   : > { %v1194_v6 = vld [vmem:[%s1414_s14 + $0xf8] sm:$0xff]  ;;  %550 = vmatpush.bf16.msra.mxu2 %v1186_v5  ;;  %v1193_v8 = vld [vmem:[%s1414_s14 + $0xf0] sm:$0xff]  ;;  %v1192_v12 = vld [vmem:[%s1414_s14 + $0xe8] sm:$0xff]  ;;  %v450_v49 = vrot.slane %v448_v37, 1 }
  0x24   : > { %563 = vmatpush.bf16.msra.mxu3 %v1194_v6  ;;  %v1165_v13 = vld [vmem:[%s1414_s14 + $0x20] sm:$0xff]  ;;  %v1164_v17 = vld [vmem:[%s1414_s14 + $0x18] sm:$0xff]  ;;  %v1163_v25 = vld [vmem:[%s1414_s14 + $0x10] sm:$0xff]  ;;  %v444_v54 = vor.u32 %v443_v47, %v439_v46 }
  0x25   : > { %365 = vmatpush.bf16.msra.mxu0 %v1167_v3  ;;  %v1173_v14 = vld [vmem:[%s1414_s14 + $0x60] sm:$0xff]  ;;  %v1172_v18 = vld [vmem:[%s1414_s14 + $0x58] sm:$0xff]  ;;  %v1171_v26 = vld [vmem:[%s1414_s14 + $0x50] sm:$0xff]  ;;  %v451_v55 = vor.u32 %v450_v49, %v446_v48 }
  0x26   : > { %378 = vmatpush.bf16.msra.mxu1 %v1175_v4  ;;  %v1183_v15 = vld [vmem:[%s1414_s14 + $0xa0] sm:$0xff]  ;;  %v1182_v19 = vld [vmem:[%s1414_s14 + $0x98] sm:$0xff]  ;;  %v1181_v27 = vld [vmem:[%s1414_s14 + $0x90] sm:$0xff] }
  0x27   : > { %551 = vmatpush.bf16.msra.mxu2 %v1185_v7  ;;  %v1191_v16 = vld [vmem:[%s1414_s14 + $0xe0] sm:$0xff]  ;;  %v1190_v20 = vld [vmem:[%s1414_s14 + $0xd8] sm:$0xff]  ;;  %v1189_v28 = vld [vmem:[%s1414_s14 + $0xd0] sm:$0xff] }
  0x28   : > { %564 = vmatpush.bf16.msra.mxu3 %v1193_v8  ;;  %v1162_v31 = vld [vmem:[%s1414_s14 + $0x8] sm:$0xff]  ;;  %v1161_v40 = vld [vmem:[%s1414_s14] sm:$0xff]  ;;  %v1204_v42 = vld [vmem:[%s1414_s14 + $0x138] sm:$0xff] }
  0x29   : > { %366 = vmatpush.bf16.msra.mxu0 %v1166_v9  ;;  %v1170_v32 = vld [vmem:[%s1414_s14 + $0x48] sm:$0xff]  ;;  %v1169_v41 = vld [vmem:[%s1414_s14 + $0x40] sm:$0xff]  ;;  %v1212_v43 = vld [vmem:[%s1414_s14 + $0x178] sm:$0xff] }
  0x2a   : > { %379 = vmatpush.bf16.msra.mxu1 %v1174_v10  ;;  %v1180_v34 = vld [vmem:[%s1414_s14 + $0x88] sm:$0xff]  ;;  %v1179_v44 = vld [vmem:[%s1414_s14 + $0x80] sm:$0xff]  ;;  %v1203_v52 = vld [vmem:[%s1414_s14 + $0x130] sm:$0xff] }
  0x2b   : > { %552 = vmatpush.bf16.msra.mxu2 %v1184_v11  ;;  %v1188_v35 = vld [vmem:[%s1414_s14 + $0xc8] sm:$0xff]  ;;  %v1187_v45 = vld [vmem:[%s1414_s14 + $0xc0] sm:$0xff]  ;;  %v1211_v53 = vld [vmem:[%s1414_s14 + $0x170] sm:$0xff] }
  0x2c   : > { %565 = vmatpush.bf16.msra.mxu3 %v1192_v12  ;;  %v1202_v56 = vld [vmem:[%s1414_s14 + $0x128] sm:$0xff]  ;;  %v1201_v58 = vld [vmem:[%s1414_s14 + $0x120] sm:$0xff]  ;;  %v1200_v60 = vld [vmem:[%s1414_s14 + $0x118] sm:$0xff] }
  0x2d   : > { %367 = vmatpush.bf16.msra.mxu0 %v1165_v13  ;;  %v1210_v57 = vld [vmem:[%s1414_s14 + $0x168] sm:$0xff]  ;;  %v1209_v59 = vld [vmem:[%s1414_s14 + $0x160] sm:$0xff]  ;;  %v1208_v61 = vld [vmem:[%s1414_s14 + $0x158] sm:$0xff] }
  0x2e   : > { %380 = vmatpush.bf16.msra.mxu1 %v1173_v14  ;;  %v1199_v62 = vld [vmem:[%s1414_s14 + $0x110] sm:$0xff]  ;;  %v1198_v0 = vld [vmem:[%s1414_s14 + $0x108] sm:$0xff]  ;;  %v1087_v2 = vld [vmem:[%s1401_s29] sm:$0xe] }
  0x2f   : > { %553 = vmatpush.bf16.msra.mxu2 %v1183_v15  ;;  %v1207_v63 = vld [vmem:[%s1414_s14 + $0x150] sm:$0xff]  ;;  %v1206_v1 = vld [vmem:[%s1414_s14 + $0x148] sm:$0xff]  ;;  %v1195_v4 = vld [vmem:[%s1401_s29 + $0x4] sm:$0xe] }
  0x30   : > { %566 = vmatpush.bf16.msra.mxu3 %v1191_v16  ;;  %v1196_v3 = vld [vmem:[%s1401_s29 + $0x4] sm:$0x10]  ;;  %v1089_v5 = vld [vmem:[%s1401_s29 + $0x8] sm:$0x10]  ;;  %v1197_v8 = vld [vmem:[%s1414_s14 + $0x100] sm:$0xff] }
  0x31   : > { %368 = vmatpush.bf16.msra.mxu0 %v1164_v17  ;;  %v1088_v6 = vor.u32 %v1196_v3, %v1087_v2  ;;  %v1092_v7 = vor.u32 %v1195_v4, %v1089_v5  ;;  %v1205_v9 = vld [vmem:[%s1414_s14 + $0x140] sm:$0xff] }
  0x32   : > { %381 = vmatpush.bf16.msra.mxu1 %v1172_v18  ;;  %v260_v21 = vld [vmem:[#allocation2] sm:$0xff] }
  0x33   : > { %554 = vmatpush.bf16.msra.mxu2 %v1182_v19  ;;  %v624_v10 = vrot.slane %v1088_v6, 1  ;;  %v625_v11 = vrot.slane %v1092_v7, 1 }
  0x34   : > { %567 = vmatpush.bf16.msra.mxu3 %v1190_v20 }
  0x35   : > { %369 = vmatpush.bf16.msra.mxu0 %v1163_v25 }
  0x36   : > { %382 = vmatpush.bf16.msra.mxu1 %v1171_v26 }
  0x37   : > { %555 = vmatpush.bf16.msra.mxu2 %v1181_v27 }
  0x38   : > { %568 = vmatpush.bf16.msra.mxu3 %v1189_v28 }
  0x39   : > { %370 = vmatpush.bf16.msra.mxu0 %v1162_v31 }
  0x3a   : > { %383 = vmatpush.bf16.msra.mxu1 %v1170_v32 }
  0x3b   : > { %556 = vmatpush.bf16.msra.mxu2 %v1180_v34 }
  0x3c   : > { %569 = vmatpush.bf16.msra.mxu3 %v1188_v35 }
  0x3d   : > { %371 = vmatpush.bf16.msra.mxu0 %v1161_v40 }
  0x3e   : > { %384 = vmatpush.bf16.msra.mxu1 %v1169_v41 }
  0x3f   : > { %557 = vmatpush.bf16.msra.mxu2 %v1179_v44 }
  0x40   : > { %570 = vmatpush.bf16.msra.mxu3 %v1187_v45  ;;  %372 = vmatmul.bf16.vlgmr.msra.gmra.mxu0 %v264_v50 }
  0x41   : > { %724 = vmatpush.bf16.msrb.mxu0 %v1204_v42  ;;  %385 = vmatmul.bf16.vlgmr.msra.gmra.mxu1 %v265_v51 }
  0x42   : > { %737 = vmatpush.bf16.msrb.mxu1 %v1212_v43  ;;  %558 = vmatmul.bf16.vlgmr.msra.gmra.mxu2 %v444_v54 }
  0x43   : > { %571 = vmatmul.bf16.vlgmr.msra.gmra.mxu3 %v451_v55 }
  0x45   : > { %725 = vmatpush.bf16.msrb.mxu0 %v1203_v52 }
  0x46   : > { %738 = vmatpush.bf16.msrb.mxu1 %v1211_v53 }
  0x49   : > { %726 = vmatpush.bf16.msrb.mxu0 %v1202_v56 }
  0x4a   : > { %739 = vmatpush.bf16.msrb.mxu1 %v1210_v57 }
  0x4d   : > { %727 = vmatpush.bf16.msrb.mxu0 %v1201_v58 }
  0x4e   : > { %740 = vmatpush.bf16.msrb.mxu1 %v1209_v59 }
  0x51   : > { %728 = vmatpush.bf16.msrb.mxu0 %v1200_v60 }
  0x52   : > { %741 = vmatpush.bf16.msrb.mxu1 %v1208_v61 }
  0x55   : > { %729 = vmatpush.bf16.msrb.mxu0 %v1199_v62 }
  0x56   : > { %742 = vmatpush.bf16.msrb.mxu1 %v1207_v63 }
  0x59   : > { %730 = vmatpush.bf16.msrb.mxu0 %v1198_v0 }
  0x5a   : > { %743 = vmatpush.bf16.msrb.mxu1 %v1206_v1 }
  0x5d   : > { %731 = vmatpush.bf16.msrb.mxu0 %v1197_v8 }
  0x5e   : > { %744 = vmatpush.bf16.msrb.mxu1 %v1205_v9 }
  0x60   : > { %732 = vmatmul.bf16.vlgmr.msrb.gmra.mxu0 %v624_v10 }
  0x61   : > { %745 = vmatmul.bf16.vlgmr.msrb.gmra.mxu1 %v625_v11 }
  0xbd   : > { %v373_v12 = vpop.f32.mrf.mxu0 }
  0xbe   : > { %v386_v13 = vpop.f32.mrf.mxu1 }
  0xbf   : > { %v387_v20 = vadd.f32 %v386_v13, %v373_v12 }
  0xc1   : > { %v390_v22 = vadd.f32 %v387_v20, %v260_v21 }
  0xc5   : > { %v375_v14 = vpop.f32.mrf.mxu0  ;;  %v559_v16 = vpop.f32.mrf.mxu2 }
  0xc6   : > { %v388_v15 = vpop.f32.mrf.mxu1  ;;  %v572_v17 = vpop.f32.mrf.mxu3 }
  0xc7   : > { %v573_v23 = vadd.f32 %v572_v17, %v559_v16 }
  0xc9   : > { %v576_v26 = vadd.f32 %v573_v23, %v390_v22 }
  0xcd   : > { %v561_v18 = vpop.f32.mrf.mxu2 }
  0xce   : > { %v574_v19 = vpop.f32.mrf.mxu3 }
  0xdd   : > { %v733_v24 = vpop.f32.mrf.mxu0 }
  0xde   : > { %v746_v25 = vpop.f32.mrf.mxu1 }
  0xdf   : > { %v747_v27 = vadd.f32 %v746_v25, %v733_v24 }
  0xe1   : > { %v750_v28 = vadd.f32 %v747_v27, %v576_v26 }
  0xe2   : > { %755 = sbr.rel (%p1157_p10) target bundleno = 243 (0xf3), region = 40 }
  0xe3   : > { %751 = vst [vmem:[#allocation2] sm:$0xff] %v750_v28 }
  0xe5   : > { %v735_v29 = vpop.f32.mrf.mxu0 }
  0xe6   : > { %v748_v30 = vpop.f32.mrf.mxu1 }
  0xe7   : > { %v1271_v32 = vld [vmem:[%s1501_s2] ss:$0 sm:$0xff] }
  0xea   : > { %v756_v31 = vld [vmem:[#allocation2] sm:$0xff] }
  0xeb   : > { %v761_v33 = vadd.f32 %v1271_v32, %v756_v31 }
  0xed   : > { %vm762_vm0 = vcmp.ge.f32.partialorder %v761_v33, 0.0  ;;  %v763_v34 = vmul.f32 0.1, %v761_v33 }
  0xef   : > { %v764_v35 = vsel %vm762_vm0, %v761_v33, %v763_v34 }
  0xf0   : > { %v765_v36 = vpack.c.bf16 %v764_v35, %v764_v35 }
  0xf2   : > { %766 = vst [vmem:[%s1407_s8] sm:$0xf] %v765_v36 }
  0xf3 PF: > { %s13_s18 = sadd.s32 1, %s1326_s18   ;;  %s1503_s12 = smov %s1314_s15 }
  0xf4   : > { %p10_p11 = scmp.ge.s32.totalorder %s13_s18, 50   ;;  %s1504_s13 = smov %s1318_s16 }
  0xf5   : > { %s1505_s14 = smov %s1322_s17  ;;  %s1506_s15 = smov %s1510_s19 }
  0xf6   : > { %s1507_s16 = smov %s1514_s20  ;;  %s1508_s17 = smov %s1518_s21 }
  0xf7   :  { %12 = sbr.rel (!%p10_p11) target bundleno = 4 (0x4), region = 73 }

// kernel: flownet_encoder_forward.8
= control target key start
LH: loop header
LB: loop body
LE: loop exit
PB: predicated region body
PF: predicated region fallthrough
CT: control target
= control target key end

     0   :  { %s3187_s12 = smov 0   ;;  %s3189_s13 = smov 0   ;;  %s3750_s0 = inlined_call_operand.vmem [shape: bf16[2,6,6,512], index: 0, kind: input, shape index: {}]   ;;  %s3751_s1 = inlined_call_operand.vmem [shape: bf16[3,3,512,256], index: 1, kind: input, shape index: {}]   ;;  %s3752_s2 = inlined_call_operand.vmem [shape: f32[1,256], index: 2, kind: input, shape index: {}]   ;;  %s3753_s3 = inlined_call_operand.vmem [shape: bf16[2,4,4,256], index: 3, kind: output, shape index: {}]  }
   0x1   :  { %s3191_s14 = smov 0   ;;  %s3193_s15 = smov 0  }
   0x2   :  { %s3195_s16 = smov 0   ;;  %s3197_s17 = smov 0  }
   0x3   :  { %s3199_s18 = smov 0  }
   0x4 LB: > { %s25_s19 = sadd.s32 1, %s3152_s15  ;;  %s28_s20 = sadd.s32 1, %s3156_s16  ;;  %s3164_s18 = sphi %s3199_s18, %s13_s18   ;;  %s3160_s17 = sphi %s3197_s17, %s3759_s17   ;;  %s3156_s16 = sphi %s3195_s16, %s3758_s16   ;;  %s3152_s15 = sphi %s3193_s15, %s3757_s15   ;;  %s3148_s14 = sphi %s3191_s14, %s3756_s14   ;;  %s3144_s13 = sphi %s3189_s13, %s3755_s13   ;;  %s3140_s12 = sphi %s3187_s12, %s3754_s12  }
   0x5   : > { %p26_p0 = scmp.ge.s32.totalorder %s25_s19, 3  ;;  %p1950_p1 = scmp.ge.s32.totalorder %s3164_s18, 1 }
   0x6   : > { %p168_p2 = scmp.lt.s32.totalorder %s3164_s18, 25  ;;  %s32_s21 = sadd.s32 1, %s3160_s17 }
   0x7   : > { %s3761_s19 = smov (%p26_p0, %s25_s19), 0  ;;  %s3763_s20 = smov (!%p26_p0, %s28_s20), %s3156_s16 }
   0x8   : > { %p169_p3 = pnand %p1950_p1, %p168_p2  ;;  %p30_p4 = scmp.ge.s32.totalorder %s3763_s20, 4 }
   0x9   : > { %s201_s22 = sadd.s32 (!%p169_p3), %s3140_s12, %s3144_s13  ;;  %p202_p6 = scmp.lt.s32.totalorder (!%p169_p3), %s3148_s14, 1 }
   0xa   : > { %s3765_s20 = smov (%p30_p4, %s3763_s20), 0  ;;  %s3767_s21 = smov (!%p30_p4, %s32_s21), %s3160_s17 }
   0xb   : > { %p34_p5 = scmp.ge.s32.totalorder %s3767_s21, 2  ;;  %172 = sbr.rel (%p169_p3) target bundleno = 396 (0x18c), region = 32 }
   0xc   : > { %p204_p7 = scmp.lt.s32.totalorder (!%p169_p3), %s201_s22, 5  ;;  %p214_p8 = scmp.lt.s32.totalorder (!%p169_p3), %s3144_s13, 3 }
   0xd   : > { %s3769_s21 = smov (%p34_p5, %s3767_s21), 0  ;;  %p1956_p9 = scmp.ne.s32.totalorder (!%p169_p3), %s3140_s12, 0 }
  0x10   : > { %s3771_s14 = smov (!%p202_p6, %s3148_s14), 1  ;;  %s3773_s22 = smov (!%p204_p7, %s201_s22), 5 }
  0x11   : > { %s3052_s23 = smul.u32 24, %s3771_s14  ;;  %s1951_s24 = sshll.u32 %s3773_s22, 2 }
  0x12   : > { %s1954_s30 = sshll.u32 %s3771_s14, 3  ;;  %s3775_s13 = smov (!%p214_p8, %s3144_s13), 3 }
  0x13   : > { %s208_s25 = sadd.s32 %s3052_s23, %s1951_s24  ;;  %s1953_s4 = sshll.u32 %s3775_s13, 1 }
  0x14   : > { %s1952_s26 = sshll.u32 %s208_s25, 2  ;;  %s218_s5 = sadd.s32 %s1954_s30, %s1953_s4 }
  0x15   : > { %s3239_s29 = scalar_lea.vmem %s3750_s0, %s1952_s26  ;;  %s1955_s6 = sshll.u32 %s218_s5, 1 }
  0x16   : > { %s3245_s9 = scalar_lea.vmem %s3753_s3, %s1955_s6  ;;  %224 = sbr.rel (%p1956_p9) target bundleno = 29 (0x1d), region = 36 }
  0x1b   : > { %v3166_v0 = vmov 0.0  }
  0x1c   : > { %225 = vst [vmem:[#allocation2] sm:$0xff] %v3166_v0 }
  0x1d PF: > { %s2859_s10 = smul.u32 1536, %s3140_s12  ;;  %vm737_vm0 = vcmask 1043456   ;;  %p2856_p10 = scmp.ne.s32.totalorder %s3140_s12, 2 }
  0x1f   : > { %s3252_s14 = scalar_lea.vmem %s3751_s1, %s2859_s10 }
  0x20   : > { %v2016_v1 = vld [vmem:[%s3252_s14 + $0x70] sm:$0xf]  ;;  %v2875_v2 = vld [vmem:[%s3252_s14 + $0x74] sm:$0xf0]  ;;  %v2008_v12 = vld [vmem:[%s3252_s14 + $0x60] sm:$0xf] }
  0x21   : > { %v2080_v3 = vld [vmem:[%s3252_s14 + $0xf0] sm:$0xf]  ;;  %v2017_v4 = vor.u32 %v2875_v2, %v2016_v1  ;;  %v2891_v5 = vld [vmem:[%s3252_s14 + $0xf4] sm:$0xf0]  ;;  %v2873_v14 = vld [vmem:[%s3252_s14 + $0x64] sm:$0xf0] }
  0x22   : > { %v2144_v6 = vld [vmem:[%s3252_s14 + $0x170] sm:$0xf]  ;;  %v2907_v7 = vld [vmem:[%s3252_s14 + $0x174] sm:$0xf0]  ;;  %v2081_v8 = vor.u32 %v2891_v5, %v2080_v3  ;;  %v2072_v15 = vld [vmem:[%s3252_s14 + $0xe0] sm:$0xf]  ;;  %v2009_v17 = vor.u32 %v2873_v14, %v2008_v12 }
  0x23   : > { %v2145_v9 = vor.u32 %v2907_v7, %v2144_v6  ;;  %v2208_v10 = vld [vmem:[%s3252_s14 + $0x1f0] sm:$0xf]  ;;  %v2923_v11 = vld [vmem:[%s3252_s14 + $0x1f4] sm:$0xf0]  ;;  %630 = vmatpush.bf16.msra.mxu0 %v2017_v4  ;;  %v2889_v16 = vld [vmem:[%s3252_s14 + $0xe4] sm:$0xf0] }
  0x24   : > { %v2209_v13 = vor.u32 %v2923_v11, %v2208_v10  ;;  %643 = vmatpush.bf16.msra.mxu1 %v2081_v8  ;;  %v2073_v18 = vor.u32 %v2889_v16, %v2072_v15  ;;  %v2136_v19 = vld [vmem:[%s3252_s14 + $0x160] sm:$0xf]  ;;  %v2905_v20 = vld [vmem:[%s3252_s14 + $0x164] sm:$0xf0]  ;;  %v2000_v24 = vld [vmem:[%s3252_s14 + $0x50] sm:$0xf] }
  0x25   : > { %656 = vmatpush.bf16.msra.mxu2 %v2145_v9  ;;  %v2200_v21 = vld [vmem:[%s3252_s14 + $0x1e0] sm:$0xf]  ;;  %v2137_v22 = vor.u32 %v2905_v20, %v2136_v19  ;;  %v2921_v23 = vld [vmem:[%s3252_s14 + $0x1e4] sm:$0xf0]  ;;  %v2871_v25 = vld [vmem:[%s3252_s14 + $0x54] sm:$0xf0] }
  0x26   : > { %669 = vmatpush.bf16.msra.mxu3 %v2209_v13  ;;  %v2201_v26 = vor.u32 %v2921_v23, %v2200_v21  ;;  %v2064_v27 = vld [vmem:[%s3252_s14 + $0xd0] sm:$0xf]  ;;  %v2887_v28 = vld [vmem:[%s3252_s14 + $0xd4] sm:$0xf0]  ;;  %v2001_v30 = vor.u32 %v2871_v25, %v2000_v24  ;;  %v1992_v36 = vld [vmem:[%s3252_s14 + $0x40] sm:$0xf] }
  0x27   : > { %v2128_v29 = vld [vmem:[%s3252_s14 + $0x150] sm:$0xf]  ;;  %631 = vmatpush.bf16.msra.mxu0 %v2009_v17  ;;  %v2903_v31 = vld [vmem:[%s3252_s14 + $0x154] sm:$0xf0]  ;;  %v2065_v34 = vor.u32 %v2887_v28, %v2064_v27  ;;  %v2869_v37 = vld [vmem:[%s3252_s14 + $0x44] sm:$0xf0] }
  0x28   : > { %v2192_v32 = vld [vmem:[%s3252_s14 + $0x1d0] sm:$0xf]  ;;  %v2919_v33 = vld [vmem:[%s3252_s14 + $0x1d4] sm:$0xf0]  ;;  %644 = vmatpush.bf16.msra.mxu1 %v2073_v18  ;;  %v2129_v35 = vor.u32 %v2903_v31, %v2128_v29  ;;  %v2056_v38 = vld [vmem:[%s3252_s14 + $0xc0] sm:$0xf]  ;;  %v1993_v45 = vor.u32 %v2869_v37, %v1992_v36 }
  0x29   : > { %657 = vmatpush.bf16.msra.mxu2 %v2137_v22  ;;  %v2193_v39 = vor.u32 %v2919_v33, %v2192_v32  ;;  %v2885_v40 = vld [vmem:[%s3252_s14 + $0xc4] sm:$0xf0]  ;;  %v2120_v41 = vld [vmem:[%s3252_s14 + $0x140] sm:$0xf]  ;;  %v1984_v48 = vld [vmem:[%s3252_s14 + $0x30] sm:$0xf] }
  0x2a   : > { %670 = vmatpush.bf16.msra.mxu3 %v2201_v26  ;;  %v2901_v42 = vld [vmem:[%s3252_s14 + $0x144] sm:$0xf0]  ;;  %v2184_v43 = vld [vmem:[%s3252_s14 + $0x1c0] sm:$0xf]  ;;  %v2057_v46 = vor.u32 %v2885_v40, %v2056_v38  ;;  %v2867_v49 = vld [vmem:[%s3252_s14 + $0x34] sm:$0xf0] }
  0x2b   : > { %v2917_v44 = vld [vmem:[%s3252_s14 + $0x1c4] sm:$0xf0]  ;;  %632 = vmatpush.bf16.msra.mxu0 %v2001_v30  ;;  %v2121_v47 = vor.u32 %v2901_v42, %v2120_v41  ;;  %v2048_v50 = vld [vmem:[%s3252_s14 + $0xb0] sm:$0xf]  ;;  %v2883_v52 = vld [vmem:[%s3252_s14 + $0xb4] sm:$0xf0]  ;;  %v1985_v57 = vor.u32 %v2867_v49, %v1984_v48 }
  0x2c   : > { %645 = vmatpush.bf16.msra.mxu1 %v2065_v34  ;;  %v2185_v51 = vor.u32 %v2917_v44, %v2184_v43  ;;  %v2112_v53 = vld [vmem:[%s3252_s14 + $0x130] sm:$0xf]  ;;  %v2899_v54 = vld [vmem:[%s3252_s14 + $0x134] sm:$0xf0]  ;;  %v2049_v58 = vor.u32 %v2883_v52, %v2048_v50  ;;  %v1976_v60 = vld [vmem:[%s3252_s14 + $0x20] sm:$0xf] }
  0x2d   : > { %658 = vmatpush.bf16.msra.mxu2 %v2129_v35  ;;  %v2176_v55 = vld [vmem:[%s3252_s14 + $0x1b0] sm:$0xf]  ;;  %v2915_v56 = vld [vmem:[%s3252_s14 + $0x1b4] sm:$0xf0]  ;;  %v2113_v59 = vor.u32 %v2899_v54, %v2112_v53  ;;  %v2865_v61 = vld [vmem:[%s3252_s14 + $0x24] sm:$0xf0] }
  0x2e   : > { %671 = vmatpush.bf16.msra.mxu3 %v2193_v39  ;;  %v2040_v62 = vld [vmem:[%s3252_s14 + $0xa0] sm:$0xf]  ;;  %v2177_v63 = vor.u32 %v2915_v56, %v2176_v55  ;;  %v2881_v0 = vld [vmem:[%s3252_s14 + $0xa4] sm:$0xf0]  ;;  %v1977_v5 = vor.u32 %v2865_v61, %v1976_v60  ;;  %v1968_v8 = vld [vmem:[%s3252_s14 + $0x10] sm:$0xf] }
  0x2f   : > { %633 = vmatpush.bf16.msra.mxu0 %v1993_v45  ;;  %v2104_v1 = vld [vmem:[%s3252_s14 + $0x120] sm:$0xf]  ;;  %v2897_v2 = vld [vmem:[%s3252_s14 + $0x124] sm:$0xf0]  ;;  %v2041_v6 = vor.u32 %v2881_v0, %v2040_v62  ;;  %v2863_v9 = vld [vmem:[%s3252_s14 + $0x14] sm:$0xf0] }
  0x30   : > { %646 = vmatpush.bf16.msra.mxu1 %v2057_v46  ;;  %v2168_v3 = vld [vmem:[%s3252_s14 + $0x1a0] sm:$0xf]  ;;  %v2913_v4 = vld [vmem:[%s3252_s14 + $0x1a4] sm:$0xf0]  ;;  %v2105_v7 = vor.u32 %v2897_v2, %v2104_v1  ;;  %v2032_v10 = vld [vmem:[%s3252_s14 + $0x90] sm:$0xf]  ;;  %v1969_v17 = vor.u32 %v2863_v9, %v1968_v8 }
  0x31   : > { %659 = vmatpush.bf16.msra.mxu2 %v2121_v47  ;;  %v2169_v11 = vor.u32 %v2913_v4, %v2168_v3  ;;  %v2879_v12 = vld [vmem:[%s3252_s14 + $0x94] sm:$0xf0]  ;;  %v2096_v13 = vld [vmem:[%s3252_s14 + $0x110] sm:$0xf]  ;;  %v1960_v18 = vld [vmem:[%s3252_s14] sm:$0xf] }
  0x32   : > { %672 = vmatpush.bf16.msra.mxu3 %v2185_v51  ;;  %v2895_v14 = vld [vmem:[%s3252_s14 + $0x114] sm:$0xf0]  ;;  %v2160_v15 = vld [vmem:[%s3252_s14 + $0x190] sm:$0xf]  ;;  %v2861_v19 = vld [vmem:[%s3252_s14 + $0x4] sm:$0xf0]  ;;  %v2033_v20 = vor.u32 %v2879_v12, %v2032_v10 }
  0x33   : > { %634 = vmatpush.bf16.msra.mxu0 %v1985_v57  ;;  %v2911_v16 = vld [vmem:[%s3252_s14 + $0x194] sm:$0xf0]  ;;  %v2097_v21 = vor.u32 %v2895_v14, %v2096_v13  ;;  %v2024_v22 = vld [vmem:[%s3252_s14 + $0x80] sm:$0xf]  ;;  %v2877_v23 = vld [vmem:[%s3252_s14 + $0x84] sm:$0xf0]  ;;  %v1961_v32 = vor.u32 %v2861_v19, %v1960_v18 }
  0x34   : > { %647 = vmatpush.bf16.msra.mxu1 %v2049_v58  ;;  %v2088_v24 = vld [vmem:[%s3252_s14 + $0x100] sm:$0xf]  ;;  %v2161_v25 = vor.u32 %v2911_v16, %v2160_v15  ;;  %v2893_v26 = vld [vmem:[%s3252_s14 + $0x104] sm:$0xf0]  ;;  %v2874_v29 = vld [vmem:[%s3252_s14 + $0x74] sm:$0xf]  ;;  %v2025_v36 = vor.u32 %v2877_v23, %v2024_v22 }
  0x35   : > { %660 = vmatpush.bf16.msra.mxu2 %v2113_v59  ;;  %v2152_v27 = vld [vmem:[%s3252_s14 + $0x180] sm:$0xf]  ;;  %v2909_v28 = vld [vmem:[%s3252_s14 + $0x184] sm:$0xf0]  ;;  %v2018_v30 = vld [vmem:[%s3252_s14 + $0x78] sm:$0xf0]  ;;  %v2089_v37 = vor.u32 %v2893_v26, %v2088_v24 }
  0x36   : > { %673 = vmatpush.bf16.msra.mxu3 %v2177_v63  ;;  %v2890_v31 = vld [vmem:[%s3252_s14 + $0xf4] sm:$0xf]  ;;  %v2082_v33 = vld [vmem:[%s3252_s14 + $0xf8] sm:$0xf0]  ;;  %v2153_v40 = vor.u32 %v2909_v28, %v2152_v27  ;;  %v2021_v41 = vor.u32 %v2874_v29, %v2018_v30  ;;  %v2872_v44 = vld [vmem:[%s3252_s14 + $0x64] sm:$0xf] }
  0x37   : > { %635 = vmatpush.bf16.msra.mxu0 %v1977_v5  ;;  %v2906_v34 = vld [vmem:[%s3252_s14 + $0x174] sm:$0xf]  ;;  %v2146_v35 = vld [vmem:[%s3252_s14 + $0x178] sm:$0xf0]  ;;  %v2085_v42 = vor.u32 %v2890_v31, %v2082_v33  ;;  %v2010_v45 = vld [vmem:[%s3252_s14 + $0x68] sm:$0xf0] }
  0x38   : > { %648 = vmatpush.bf16.msra.mxu1 %v2041_v6  ;;  %v2922_v38 = vld [vmem:[%s3252_s14 + $0x1f4] sm:$0xf]  ;;  %v2210_v39 = vld [vmem:[%s3252_s14 + $0x1f8] sm:$0xf0]  ;;  %v2149_v43 = vor.u32 %v2906_v34, %v2146_v35  ;;  %v2888_v46 = vld [vmem:[%s3252_s14 + $0xe4] sm:$0xf]  ;;  %v2013_v54 = vor.u32 %v2872_v44, %v2010_v45 }
  0x39   : > { %661 = vmatpush.bf16.msra.mxu2 %v2105_v7  ;;  %v2213_v47 = vor.u32 %v2922_v38, %v2210_v39  ;;  %v2074_v48 = vld [vmem:[%s3252_s14 + $0xe8] sm:$0xf0]  ;;  %v2904_v49 = vld [vmem:[%s3252_s14 + $0x164] sm:$0xf]  ;;  %v2870_v55 = vld [vmem:[%s3252_s14 + $0x54] sm:$0xf] }
  0x3a   : > { %674 = vmatpush.bf16.msra.mxu3 %v2169_v11  ;;  %v2138_v50 = vld [vmem:[%s3252_s14 + $0x168] sm:$0xf0]  ;;  %v2920_v51 = vld [vmem:[%s3252_s14 + $0x1e4] sm:$0xf]  ;;  %v2077_v58 = vor.u32 %v2888_v46, %v2074_v48  ;;  %v2002_v60 = vld [vmem:[%s3252_s14 + $0x58] sm:$0xf0] }
  0x3b   : > { %636 = vmatpush.bf16.msra.mxu0 %v1969_v17  ;;  %v2202_v52 = vld [vmem:[%s3252_s14 + $0x1e8] sm:$0xf0]  ;;  %v2141_v59 = vor.u32 %v2904_v49, %v2138_v50  ;;  %v2886_v61 = vld [vmem:[%s3252_s14 + $0xd4] sm:$0xf]  ;;  %v2066_v62 = vld [vmem:[%s3252_s14 + $0xd8] sm:$0xf0]  ;;  %v2005_v9 = vor.u32 %v2870_v55, %v2002_v60 }
  0x3c   : > { %649 = vmatpush.bf16.msra.mxu1 %v2033_v20  ;;  %v227_v53 = vld [vmem:[%s3239_s29 + $0x8] sm:$0x33]  ;;  %v2205_v63 = vor.u32 %v2920_v51, %v2202_v52  ;;  %v2902_v0 = vld [vmem:[%s3252_s14 + $0x154] sm:$0xf]  ;;  %v2130_v1 = vld [vmem:[%s3252_s14 + $0x158] sm:$0xf0]  ;;  %v2069_v10 = vor.u32 %v2886_v61, %v2066_v62 }
  0x3d   : > { %662 = vmatpush.bf16.msra.mxu2 %v2097_v21  ;;  %v300_v56 = vunpack.c.l.b16 %v227_v53  ;;  %v301_v57 = vunpack.c.h.b16 %v227_v53  ;;  %v226_v3 = vld [vmem:[%s3239_s29] sm:$0x33]  ;;  %v2918_v4 = vld [vmem:[%s3252_s14 + $0x1d4] sm:$0xf]  ;;  %v2194_v5 = vld [vmem:[%s3252_s14 + $0x1d8] sm:$0xf0]  ;;  %v2133_v11 = vor.u32 %v2902_v0, %v2130_v1 }
  0x3e   : > { %675 = vmatpush.bf16.msra.mxu3 %v2161_v25  ;;  %v298_v7 = vunpack.c.l.b16 %v226_v3  ;;  %v299_v8 = vunpack.c.h.b16 %v226_v3  ;;  %v2868_v12 = vld [vmem:[%s3252_s14 + $0x44] sm:$0xf]  ;;  %v1994_v13 = vld [vmem:[%s3252_s14 + $0x48] sm:$0xf0]  ;;  %v2197_v17 = vor.u32 %v2918_v4, %v2194_v5  ;;  %v2866_v26 = vld [vmem:[%s3252_s14 + $0x34] sm:$0xf] }
  0x3f   : > { %637 = vmatpush.bf16.msra.mxu0 %v1961_v32  ;;  %v3341_v2 = vpack.c.b16 %v300_v56, %v300_v56  ;;  %v3346_v6 = vpack.c.b16 %v301_v57, %v301_v57  ;;  %v2884_v14 = vld [vmem:[%s3252_s14 + $0xc4] sm:$0xf]  ;;  %v2058_v18 = vld [vmem:[%s3252_s14 + $0xc8] sm:$0xf0]  ;;  %v1997_v23 = vor.u32 %v2868_v12, %v1994_v13  ;;  %v1986_v27 = vld [vmem:[%s3252_s14 + $0x38] sm:$0xf0] }
  0x40   : > { %650 = vmatpush.bf16.msra.mxu1 %v2025_v36  ;;  %v3352_v15 = vpack.c.b16 %v298_v7, %v298_v7  ;;  %v3354_v16 = vpack.c.b16 %v299_v8, %v299_v8  ;;  %v2900_v19 = vld [vmem:[%s3252_s14 + $0x144] sm:$0xf]  ;;  %v2122_v20 = vld [vmem:[%s3252_s14 + $0x148] sm:$0xf0]  ;;  %v2061_v24 = vor.u32 %v2884_v14, %v2058_v18  ;;  %v2882_v28 = vld [vmem:[%s3252_s14 + $0xb4] sm:$0xf]  ;;  %v1989_v35 = vor.u32 %v2866_v26, %v1986_v27 }
  0x41   : > { %663 = vmatpush.bf16.msra.mxu2 %v2089_v37  ;;  %v2916_v21 = vld [vmem:[%s3252_s14 + $0x1c4] sm:$0xf]  ;;  %v2186_v22 = vld [vmem:[%s3252_s14 + $0x1c8] sm:$0xf0]  ;;  %v2125_v25 = vor.u32 %v2900_v19, %v2122_v20  ;;  %v2050_v30 = vld [vmem:[%s3252_s14 + $0xb8] sm:$0xf0] }
  0x42   : > { %676 = vmatpush.bf16.msra.mxu3 %v2153_v40  ;;  %638 = vmatmul.bf16.vlgmr.msra.gmra.mxu0 %v3352_v15  ;;  %v2189_v29 = vor.u32 %v2916_v21, %v2186_v22  ;;  %v2898_v31 = vld [vmem:[%s3252_s14 + $0x134] sm:$0xf]  ;;  %v2114_v32 = vld [vmem:[%s3252_s14 + $0x138] sm:$0xf0]  ;;  %v2053_v36 = vor.u32 %v2882_v28, %v2050_v30  ;;  %v2864_v38 = vld [vmem:[%s3252_s14 + $0x24] sm:$0xf] }
  0x43   : > { %682 = vmatpush.bf16.msrb.mxu0 %v2021_v41  ;;  %651 = vmatmul.bf16.vlgmr.msra.gmra.mxu1 %v3354_v16  ;;  %v2914_v33 = vld [vmem:[%s3252_s14 + $0x1b4] sm:$0xf]  ;;  %v2178_v34 = vld [vmem:[%s3252_s14 + $0x1b8] sm:$0xf0]  ;;  %v2117_v37 = vor.u32 %v2898_v31, %v2114_v32  ;;  %v1978_v39 = vld [vmem:[%s3252_s14 + $0x28] sm:$0xf0] }
  0x44   : > { %695 = vmatpush.bf16.msrb.mxu1 %v2085_v42  ;;  %664 = vmatmul.bf16.vlgmr.msra.gmra.mxu2 %v3341_v2  ;;  %v2880_v40 = vld [vmem:[%s3252_s14 + $0xa4] sm:$0xf]  ;;  %v2181_v41 = vor.u32 %v2914_v33, %v2178_v34  ;;  %v2042_v42 = vld [vmem:[%s3252_s14 + $0xa8] sm:$0xf0]  ;;  %v2862_v50 = vld [vmem:[%s3252_s14 + $0x14] sm:$0xf] }
  0x45   : > { %708 = vmatpush.bf16.msrb.mxu2 %v2149_v43  ;;  %677 = vmatmul.bf16.vlgmr.msra.gmra.mxu3 %v3346_v6  ;;  %v2896_v43 = vld [vmem:[%s3252_s14 + $0x124] sm:$0xf]  ;;  %v2106_v44 = vld [vmem:[%s3252_s14 + $0x128] sm:$0xf0]  ;;  %v2045_v48 = vor.u32 %v2880_v40, %v2042_v42  ;;  %v1970_v51 = vld [vmem:[%s3252_s14 + $0x18] sm:$0xf0] }
  0x46   : > { %721 = vmatpush.bf16.msrb.mxu3 %v2213_v47  ;;  %v2912_v45 = vld [vmem:[%s3252_s14 + $0x1a4] sm:$0xf]  ;;  %v2170_v46 = vld [vmem:[%s3252_s14 + $0x1a8] sm:$0xf0]  ;;  %v1981_v47 = vor.u32 %v2864_v38, %v1978_v39  ;;  %v2109_v49 = vor.u32 %v2896_v43, %v2106_v44  ;;  %v2878_v52 = vld [vmem:[%s3252_s14 + $0x94] sm:$0xf] }
  0x47   : > { %683 = vmatpush.bf16.msrb.mxu0 %v2013_v54  ;;  %v2173_v53 = vor.u32 %v2912_v45, %v2170_v46  ;;  %v2034_v54 = vld [vmem:[%s3252_s14 + $0x98] sm:$0xf0]  ;;  %v2894_v55 = vld [vmem:[%s3252_s14 + $0x114] sm:$0xf]  ;;  %v2860_v60 = vld [vmem:[%s3252_s14 + $0x4] sm:$0xf] }
  0x48   : > { %696 = vmatpush.bf16.msrb.mxu1 %v2077_v58  ;;  %v2098_v56 = vld [vmem:[%s3252_s14 + $0x118] sm:$0xf0]  ;;  %v2910_v57 = vld [vmem:[%s3252_s14 + $0x194] sm:$0xf]  ;;  %v1962_v61 = vld [vmem:[%s3252_s14 + $0x8] sm:$0xf0]  ;;  %v2037_v62 = vor.u32 %v2878_v52, %v2034_v54 }
  0x49   : > { %709 = vmatpush.bf16.msrb.mxu2 %v2141_v59  ;;  %v2162_v58 = vld [vmem:[%s3252_s14 + $0x198] sm:$0xf0]  ;;  %v1973_v59 = vor.u32 %v2862_v50, %v1970_v51  ;;  %v2876_v0 = vld [vmem:[%s3252_s14 + $0x84] sm:$0xf]  ;;  %v2026_v1 = vld [vmem:[%s3252_s14 + $0x88] sm:$0xf0]  ;;  %v1965_v12 = vor.u32 %v2860_v60, %v1962_v61 }
  0x4a   : > { %722 = vmatpush.bf16.msrb.mxu3 %v2205_v63  ;;  %v2101_v63 = vor.u32 %v2894_v55, %v2098_v56  ;;  %v2892_v3 = vld [vmem:[%s3252_s14 + $0x104] sm:$0xf]  ;;  %v2165_v4 = vor.u32 %v2910_v57, %v2162_v58  ;;  %v2090_v5 = vld [vmem:[%s3252_s14 + $0x108] sm:$0xf0]  ;;  %v2955_v13 = vld [vmem:[%s3252_s14 + $0x2f4] sm:$0xf0]  ;;  %v2029_v18 = vor.u32 %v2876_v0, %v2026_v1 }
  0x4b   : > { %684 = vmatpush.bf16.msrb.mxu0 %v2005_v9  ;;  %v2908_v7 = vld [vmem:[%s3252_s14 + $0x184] sm:$0xf]  ;;  %v2154_v8 = vld [vmem:[%s3252_s14 + $0x188] sm:$0xf0]  ;;  %v2337_v9 = vld [vmem:[%s3252_s14 + $0x270] sm:$0xf]  ;;  %v2093_v19 = vor.u32 %v2892_v3, %v2090_v5 }
  0x4c   : > { %697 = vmatpush.bf16.msrb.mxu1 %v2069_v10  ;;  %v2939_v10 = vld [vmem:[%s3252_s14 + $0x274] sm:$0xf0]  ;;  %v2465_v14 = vld [vmem:[%s3252_s14 + $0x370] sm:$0xf]  ;;  %v2157_v22 = vor.u32 %v2908_v7, %v2154_v8  ;;  %v2329_v26 = vld [vmem:[%s3252_s14 + $0x260] sm:$0xf] }
  0x4d   : > { %710 = vmatpush.bf16.msrb.mxu2 %v2133_v11  ;;  %v2401_v11 = vld [vmem:[%s3252_s14 + $0x2f0] sm:$0xf]  ;;  %v2987_v21 = vld [vmem:[%s3252_s14 + $0x3f4] sm:$0xf0]  ;;  %v2937_v27 = vld [vmem:[%s3252_s14 + $0x264] sm:$0xf0] }
  0x4e   : > { %723 = vmatpush.bf16.msrb.mxu3 %v2197_v17  ;;  %v2971_v17 = vld [vmem:[%s3252_s14 + $0x374] sm:$0xf0]  ;;  %v2529_v20 = vld [vmem:[%s3252_s14 + $0x3f0] sm:$0xf]  ;;  %v2393_v28 = vld [vmem:[%s3252_s14 + $0x2e0] sm:$0xf] }
  0x4f   : > { %685 = vmatpush.bf16.msrb.mxu0 %v1997_v23  ;;  %v2338_v23 = vor.u32 %v2939_v10, %v2337_v9  ;;  %v2953_v30 = vld [vmem:[%s3252_s14 + $0x2e4] sm:$0xf0]  ;;  %v2457_v31 = vld [vmem:[%s3252_s14 + $0x360] sm:$0xf]  ;;  %v2321_v38 = vld [vmem:[%s3252_s14 + $0x250] sm:$0xf] }
  0x50   : > { %698 = vmatpush.bf16.msrb.mxu1 %v2061_v24  ;;  %v2402_v24 = vor.u32 %v2955_v13, %v2401_v11  ;;  %v2969_v32 = vld [vmem:[%s3252_s14 + $0x364] sm:$0xf0]  ;;  %v2521_v33 = vld [vmem:[%s3252_s14 + $0x3e0] sm:$0xf]  ;;  %v2935_v39 = vld [vmem:[%s3252_s14 + $0x254] sm:$0xf0] }
  0x51   : > { %711 = vmatpush.bf16.msrb.mxu2 %v2125_v25  ;;  %v2466_v25 = vor.u32 %v2971_v17, %v2465_v14  ;;  %v2985_v34 = vld [vmem:[%s3252_s14 + $0x3e4] sm:$0xf0]  ;;  %v2385_v40 = vld [vmem:[%s3252_s14 + $0x2d0] sm:$0xf]  ;;  %v2951_v42 = vld [vmem:[%s3252_s14 + $0x2d4] sm:$0xf0] }
  0x52   : > { %724 = vmatpush.bf16.msrb.mxu3 %v2189_v29  ;;  %v2530_v29 = vor.u32 %v2987_v21, %v2529_v20  ;;  %v2449_v43 = vld [vmem:[%s3252_s14 + $0x350] sm:$0xf]  ;;  %v2967_v44 = vld [vmem:[%s3252_s14 + $0x354] sm:$0xf0]  ;;  %v2377_v50 = vld [vmem:[%s3252_s14 + $0x2c0] sm:$0xf] }
  0x53   : > { %686 = vmatpush.bf16.msrb.mxu0 %v1989_v35  ;;  %v2330_v35 = vor.u32 %v2937_v27, %v2329_v26  ;;  %v2513_v45 = vld [vmem:[%s3252_s14 + $0x3d0] sm:$0xf]  ;;  %v2983_v46 = vld [vmem:[%s3252_s14 + $0x3d4] sm:$0xf0]  ;;  %v2949_v51 = vld [vmem:[%s3252_s14 + $0x2c4] sm:$0xf0] }
  0x54   : > { %699 = vmatpush.bf16.msrb.mxu1 %v2053_v36  ;;  %v2394_v36 = vor.u32 %v2953_v30, %v2393_v28  ;;  %v2441_v52 = vld [vmem:[%s3252_s14 + $0x340] sm:$0xf]  ;;  %v2981_v54 = vld [vmem:[%s3252_s14 + $0x3c4] sm:$0xf0]  ;;  %v2378_v56 = vor.u32 %v2949_v51, %v2377_v50  ;;  %v2305_v58 = vld [vmem:[%s3252_s14 + $0x230] sm:$0xf] }
  0x55   : > { %712 = vmatpush.bf16.msrb.mxu2 %v2117_v37  ;;  %v2458_v37 = vor.u32 %v2969_v32, %v2457_v31  ;;  %v2369_v60 = vld [vmem:[%s3252_s14 + $0x2b0] sm:$0xf]  ;;  %v2963_v0 = vld [vmem:[%s3252_s14 + $0x334] sm:$0xf0]  ;;  %v743_v5 = vld [vmem:[%s3239_s29 + $0x8] sm:$0x77] }
  0x56   : > { %725 = vmatpush.bf16.msrb.mxu3 %v2181_v41  ;;  %v2522_v41 = vor.u32 %v2985_v34, %v2521_v33  ;;  %v2497_v1 = vld [vmem:[%s3252_s14 + $0x3b0] sm:$0xf]  ;;  %v2979_v3 = vld [vmem:[%s3252_s14 + $0x3b4] sm:$0xf0]  ;;  %v2297_v9 = vld [vmem:[%s3252_s14 + $0x220] sm:$0xf]  ;;  %v817_v13 = vunpack.c.h.b16 %v743_v5 }
  0x57   : > { %687 = vmatpush.bf16.msrb.mxu0 %v1981_v47  ;;  %v2386_v47 = vor.u32 %v2951_v42, %v2385_v40  ;;  %v2929_v10 = vld [vmem:[%s3252_s14 + $0x224] sm:$0xf0]  ;;  %v2361_v11 = vld [vmem:[%s3252_s14 + $0x2a0] sm:$0xf]  ;;  %v2498_v14 = vor.u32 %v2979_v3, %v2497_v1  ;;  %v2353_v26 = vld [vmem:[%s3252_s14 + $0x290] sm:$0xf] }
  0x58   : > { %700 = vmatpush.bf16.msrb.mxu1 %v2045_v48  ;;  %v2450_v48 = vor.u32 %v2967_v44, %v2449_v43  ;;  %v2945_v17 = vld [vmem:[%s3252_s14 + $0x2a4] sm:$0xf0]  ;;  %v2489_v20 = vld [vmem:[%s3252_s14 + $0x3a0] sm:$0xf]  ;;  %v2943_v32 = vld [vmem:[%s3252_s14 + $0x294] sm:$0xf0] }
  0x59   : > { %713 = vmatpush.bf16.msrb.mxu2 %v2109_v49  ;;  %v2313_v49 = vld [vmem:[%s3252_s14 + $0x240] sm:$0xf]  ;;  %v2977_v21 = vld [vmem:[%s3252_s14 + $0x3a4] sm:$0xf0]  ;;  %v2362_v30 = vor.u32 %v2945_v17, %v2361_v11  ;;  %v2417_v33 = vld [vmem:[%s3252_s14 + $0x310] sm:$0xf] }
  0x5a   : > { %726 = vmatpush.bf16.msrb.mxu3 %v2173_v53  ;;  %v2965_v53 = vld [vmem:[%s3252_s14 + $0x344] sm:$0xf0]  ;;  %v2959_v34 = vld [vmem:[%s3252_s14 + $0x314] sm:$0xf0]  ;;  %v2345_v43 = vld [vmem:[%s3252_s14 + $0x280] sm:$0xf] }
  0x5b   : > { %688 = vmatpush.bf16.msrb.mxu0 %v1973_v59  ;;  %v2442_v57 = vor.u32 %v2965_v53, %v2441_v52  ;;  %v2931_v59 = vld [vmem:[%s3252_s14 + $0x234] sm:$0xf0]  ;;  %v2925_v42 = vld [vmem:[%s3252_s14 + $0x204] sm:$0xf0]  ;;  %v2938_v53 = vld [vmem:[%s3252_s14 + $0x274] sm:$0xf] }
  0x5c   : > { %701 = vmatpush.bf16.msrb.mxu1 %v2037_v62  ;;  %v2947_v62 = vld [vmem:[%s3252_s14 + $0x2b4] sm:$0xf0]  ;;  %v2941_v44 = vld [vmem:[%s3252_s14 + $0x284] sm:$0xf0]  ;;  %v2531_v1 = vld [vmem:[%s3252_s14 + $0x3f8] sm:$0xf0] }
  0x5d   : > { %714 = vmatpush.bf16.msrb.mxu2 %v2101_v63  ;;  %v2433_v63 = vld [vmem:[%s3252_s14 + $0x330] sm:$0xf]  ;;  %v2370_v7 = vor.u32 %v2947_v62, %v2369_v60  ;;  %v2973_v50 = vld [vmem:[%s3252_s14 + $0x384] sm:$0xf0]  ;;  %v2986_v62 = vld [vmem:[%s3252_s14 + $0x3f4] sm:$0xf] }
  0x5e   : > { %727 = vmatpush.bf16.msrb.mxu3 %v2165_v4  ;;  %v2306_v4 = vor.u32 %v2931_v59, %v2305_v58  ;;  %v2434_v8 = vor.u32 %v2963_v0, %v2433_v63  ;;  %v2970_v58 = vld [vmem:[%s3252_s14 + $0x374] sm:$0xf]  ;;  %v2346_v59 = vor.u32 %v2941_v44, %v2345_v43  ;;  %v2331_v17 = vld [vmem:[%s3252_s14 + $0x268] sm:$0xf0]  ;;  %v2932_v44 = vld [vmem:[%s3252_s14 + $0x244] sm:$0xf] }
  0x5f   : > { %689 = vmatpush.bf16.msrb.mxu0 %v1965_v12  ;;  %v816_v12 = vunpack.c.l.b16 %v743_v5 }
  0x60   : > { %702 = vmatpush.bf16.msrb.mxu1 %v2029_v18  ;;  %v2425_v18 = vld [vmem:[%s3252_s14 + $0x320] sm:$0xf] }
  0x61   : > { %715 = vmatpush.bf16.msrb.mxu2 %v2093_v19  ;;  %v2961_v19 = vld [vmem:[%s3252_s14 + $0x324] sm:$0xf0]  ;;  %v3453_v27 = vpack.c.b16 %v816_v12, %v816_v12 }
  0x62   : > { %728 = vmatpush.bf16.msrb.mxu3 %v2157_v22  ;;  %690 = vmatmul.bf16.vlgmr.msrb.gmra.mxu0 %v3352_v15  ;;  %v2514_v15 = vor.u32 %v2983_v46, %v2513_v45  ;;  %v742_v22 = vld [vmem:[%s3239_s29] sm:$0x77]  ;;  %v2426_v31 = vor.u32 %v2961_v19, %v2425_v18  ;;  %v2534_v19 = vor.u32 %v2986_v62, %v2531_v1  ;;  %v2299_v1 = vld [vmem:[%s3252_s14 + $0x228] sm:$0xf0] }
  0x63   : > { %1174 = vmatpush.bf16.msra.mxu0 %v2338_v23  ;;  %703 = vmatmul.bf16.vlgmr.msrb.gmra.mxu1 %v3354_v16  ;;  %v2505_v16 = vld [vmem:[%s3252_s14 + $0x3c0] sm:$0xf]  ;;  %v2298_v23 = vor.u32 %v2929_v10, %v2297_v9  ;;  %v814_v28 = vunpack.c.l.b16 %v742_v22  ;;  %v837_v63 = vshrl.u32 %v3453_v27, 16  ;;  %v2952_v18 = vld [vmem:[%s3252_s14 + $0x2e4] sm:$0xf] }
  0x64   : > { %1187 = vmatpush.bf16.msra.mxu1 %v2402_v24  ;;  %716 = vmatmul.bf16.vlgmr.msrb.gmra.mxu2 %v3341_v2  ;;  %v2322_v2 = vor.u32 %v2935_v39, %v2321_v38  ;;  %v2506_v61 = vor.u32 %v2981_v54, %v2505_v16  ;;  %v2289_v24 = vld [vmem:[%s3252_s14 + $0x210] sm:$0xf]  ;;  %v2975_v38 = vld [vmem:[%s3252_s14 + $0x394] sm:$0xf0]  ;;  %v2281_v39 = vld [vmem:[%s3252_s14 + $0x200] sm:$0xf] }
  0x65   : > { %1200 = vmatpush.bf16.msra.mxu2 %v2466_v25  ;;  %729 = vmatmul.bf16.vlgmr.msrb.gmra.mxu3 %v3346_v6  ;;  %v2933_v6 = vld [vmem:[%s3252_s14 + $0x244] sm:$0xf0]  ;;  %v2927_v25 = vld [vmem:[%s3252_s14 + $0x214] sm:$0xf0]  ;;  %v3463_v40 = vpack.c.b16 %v814_v28, %v814_v28  ;;  %v2409_v46 = vld [vmem:[%s3252_s14 + $0x300] sm:$0xf] }
  0x66   : > { %1213 = vmatpush.bf16.msra.mxu3 %v2530_v29  ;;  %v2314_v55 = vor.u32 %v2933_v6, %v2313_v49  ;;  %v815_v29 = vunpack.c.h.b16 %v742_v22  ;;  %v2290_v45 = vor.u32 %v2927_v25, %v2289_v24  ;;  %v2418_v49 = vor.u32 %v2959_v34, %v2417_v33  ;;  %v2473_v6 = vld [vmem:[%s3252_s14 + $0x380] sm:$0xf]  ;;  %v2339_v16 = vld [vmem:[%s3252_s14 + $0x278] sm:$0xf0]  ;;  %v2459_v22 = vld [vmem:[%s3252_s14 + $0x368] sm:$0xf0] }
  0x67   : > { %1175 = vmatpush.bf16.msra.mxu0 %v2330_v35  ;;  %v3458_v35 = vpack.c.b16 %v817_v13, %v817_v13  ;;  %v825_v51 = vshll.u32 %v3463_v40, 16  ;;  %v823_v5 = vshrl.u32 %v3463_v40, 16  ;;  %v2342_v9 = vor.u32 %v2938_v53, %v2339_v16  ;;  %v2984_v24 = vld [vmem:[%s3252_s14 + $0x3e4] sm:$0xf]  ;;  %v2523_v25 = vld [vmem:[%s3252_s14 + $0x3e8] sm:$0xf0] }
  0x68   : > { %1188 = vmatpush.bf16.msra.mxu1 %v2394_v36  ;;  %v2490_v36 = vor.u32 %v2977_v21, %v2489_v20  ;;  %v2395_v20 = vld [vmem:[%s3252_s14 + $0x2e8] sm:$0xf0]  ;;  %v2968_v21 = vld [vmem:[%s3252_s14 + $0x364] sm:$0xf]  ;;  %v2323_v33 = vld [vmem:[%s3252_s14 + $0x258] sm:$0xf0] }
  0x69   : > { %1201 = vmatpush.bf16.msra.mxu2 %v2458_v37  ;;  %v2481_v37 = vld [vmem:[%s3252_s14 + $0x390] sm:$0xf]  ;;  %v844_v3 = vshrl.u32 %v3458_v35, 16  ;;  %v2950_v34 = vld [vmem:[%s3252_s14 + $0x2d4] sm:$0xf] }
  0x6a   : > { %1214 = vmatpush.bf16.msra.mxu3 %v2522_v41  ;;  %v3465_v41 = vpack.c.b16 %v815_v29, %v815_v29  ;;  %v2482_v52 = vor.u32 %v2975_v38, %v2481_v37  ;;  %v2966_v37 = vld [vmem:[%s3252_s14 + $0x354] sm:$0xf]  ;;  %v2451_v38 = vld [vmem:[%s3252_s14 + $0x358] sm:$0xf0] }
  0x6b   : > { %1176 = vmatpush.bf16.msra.mxu0 %v2322_v2  ;;  %v2957_v2 = vld [vmem:[%s3252_s14 + $0x304] sm:$0xf0]  ;;  %v2515_v40 = vld [vmem:[%s3252_s14 + $0x3d8] sm:$0xf0]  ;;  %v2454_v43 = vor.u32 %v2966_v37, %v2451_v38  ;;  %v2930_v53 = vld [vmem:[%s3252_s14 + $0x234] sm:$0xf] }
  0x6c   : > { %1189 = vmatpush.bf16.msra.mxu1 %v2386_v47  ;;  %v839_v47 = vshll.u32 %v3453_v27, 16  ;;  %v832_v54 = vshll.u32 %v3465_v41, 16  ;;  %v2410_v60 = vor.u32 %v2957_v2, %v2409_v46  ;;  %v830_v10 = vshrl.u32 %v3465_v41, 16  ;;  %v2948_v46 = vld [vmem:[%s3252_s14 + $0x2c4] sm:$0xf] }
  0x6d   : > { %1202 = vmatpush.bf16.msra.mxu2 %v2450_v48  ;;  %v2354_v48 = vor.u32 %v2943_v32, %v2353_v26  ;;  %v2934_v32 = vld [vmem:[%s3252_s14 + $0x254] sm:$0xf]  ;;  %v2307_v16 = vld [vmem:[%s3252_s14 + $0x238] sm:$0xf0]  ;;  %v2411_v38 = vld [vmem:[%s3252_s14 + $0x308] sm:$0xf0] }
  0x6e   : > { %1215 = vmatpush.bf16.msra.mxu3 %v2514_v15  ;;  %v846_v15 = vshll.u32 %v3458_v35, 16  ;;  %v841_v0 = vrot.slane %v839_v47, 1  ;;  %v834_v11 = vrot.slane %v832_v54, 1  ;;  %v2526_v35 = vor.u32 %v2984_v24, %v2523_v25  ;;  %v2379_v47 = vld [vmem:[%s3252_s14 + $0x2c8] sm:$0xf0] }
  0x6f   : > { %1177 = vmatpush.bf16.msra.mxu0 %v2314_v55  ;;  %v2282_v55 = vor.u32 %v2925_v42, %v2281_v39  ;;  %v2982_v39 = vld [vmem:[%s3252_s14 + $0x3d4] sm:$0xf]  ;;  %v2326_v41 = vor.u32 %v2934_v32, %v2323_v33  ;;  %v2483_v25 = vld [vmem:[%s3252_s14 + $0x398] sm:$0xf0] }
  0x70   : > { %1190 = vmatpush.bf16.msra.mxu1 %v2378_v56  ;;  %v2954_v56 = vld [vmem:[%s3252_s14 + $0x2f4] sm:$0xf]  ;;  %v3504_v29 = vor.u32 %v834_v11, %v830_v10  ;;  %v2518_v2 = vor.u32 %v2982_v39, %v2515_v40  ;;  %v2491_v10 = vld [vmem:[%s3252_s14 + $0x3a8] sm:$0xf0]  ;;  %v2972_v39 = vld [vmem:[%s3252_s14 + $0x384] sm:$0xf] }
  0x71   : > { %1203 = vmatpush.bf16.msra.mxu2 %v2442_v57  ;;  %v2403_v57 = vld [vmem:[%s3252_s14 + $0x2f8] sm:$0xf0]  ;;  %v2946_v54 = vld [vmem:[%s3252_s14 + $0x2b4] sm:$0xf]  ;;  %v2475_v40 = vld [vmem:[%s3252_s14 + $0x388] sm:$0xf0] }
  0x72   : > { %1216 = vmatpush.bf16.msra.mxu3 %v2506_v61  ;;  %v2467_v61 = vld [vmem:[%s3252_s14 + $0x378] sm:$0xf0]  ;;  %v2406_v12 = vor.u32 %v2954_v56, %v2403_v57  ;;  %v2962_v57 = vld [vmem:[%s3252_s14 + $0x334] sm:$0xf] }
  0x73   : > { %1178 = vmatpush.bf16.msra.mxu0 %v2306_v4  ;;  %v848_v4 = vrot.slane %v846_v15, 1  ;;  %v2470_v13 = vor.u32 %v2970_v58, %v2467_v61  ;;  %v2371_v56 = vld [vmem:[%s3252_s14 + $0x2b8] sm:$0xf0]  ;;  %v2310_v61 = vor.u32 %v2930_v53, %v2307_v16  ;;  %v2974_v24 = vld [vmem:[%s3252_s14 + $0x394] sm:$0xf] }
  0x74   : > { %1191 = vmatpush.bf16.msra.mxu1 %v2370_v7  ;;  %v827_v7 = vrot.slane %v825_v51, 1  ;;  %v2382_v51 = vor.u32 %v2948_v46, %v2379_v47  ;;  %v2435_v58 = vld [vmem:[%s3252_s14 + $0x338] sm:$0xf0]  ;;  %v2374_v62 = vor.u32 %v2946_v54, %v2371_v56  ;;  %v2486_v37 = vor.u32 %v2974_v24, %v2483_v25  ;;  %v2786_v46 = vld [vmem:[%s3252_s14 + $0x570] sm:$0xf] }
  0x75   : > { %1204 = vmatpush.bf16.msra.mxu2 %v2434_v8  ;;  %v2474_v8 = vor.u32 %v2973_v50, %v2473_v6  ;;  %v3500_v26 = vor.u32 %v848_v4, %v844_v3  ;;  %v2980_v6 = vld [vmem:[%s3252_s14 + $0x3c4] sm:$0xf]  ;;  %v2507_v50 = vld [vmem:[%s3252_s14 + $0x3c8] sm:$0xf0]  ;;  %v2650_v53 = vld [vmem:[%s3252_s14 + $0x460] sm:$0xf] }
  0x76   : > { %1217 = vmatpush.bf16.msra.mxu3 %v2498_v14  ;;  %v2936_v14 = vld [vmem:[%s3252_s14 + $0x264] sm:$0xf]  ;;  %v3502_v27 = vor.u32 %v827_v7, %v823_v5  ;;  %v2363_v5 = vld [vmem:[%s3252_s14 + $0x2a8] sm:$0xf0]  ;;  %v3001_v16 = vld [vmem:[%s3252_s14 + $0x464] sm:$0xf0] }
  0x77   : > { %1179 = vmatpush.bf16.msra.mxu0 %v2298_v23  ;;  %v3496_v23 = vor.u32 %v841_v0, %v837_v63  ;;  %v2334_v28 = vor.u32 %v2936_v14, %v2331_v17  ;;  %v2438_v63 = vor.u32 %v2962_v57, %v2435_v58  ;;  %v2928_v0 = vld [vmem:[%s3252_s14 + $0x224] sm:$0xf]  ;;  %v2926_v14 = vld [vmem:[%s3252_s14 + $0x214] sm:$0xf]  ;;  %v2291_v17 = vld [vmem:[%s3252_s14 + $0x218] sm:$0xf0] }
  0x78   : > { %1192 = vmatpush.bf16.msra.mxu1 %v2362_v30  ;;  %v2398_v30 = vor.u32 %v2952_v18, %v2395_v20  ;;  %v2944_v3 = vld [vmem:[%s3252_s14 + $0x2a4] sm:$0xf]  ;;  %v2302_v11 = vor.u32 %v2928_v0, %v2299_v1  ;;  %v2942_v18 = vld [vmem:[%s3252_s14 + $0x294] sm:$0xf]  ;;  %v2355_v20 = vld [vmem:[%s3252_s14 + $0x298] sm:$0xf0] }
  0x79   : > { %1205 = vmatpush.bf16.msra.mxu2 %v2426_v31  ;;  %v2462_v31 = vor.u32 %v2968_v21, %v2459_v22  ;;  %v2960_v7 = vld [vmem:[%s3252_s14 + $0x324] sm:$0xf]  ;;  %v2958_v21 = vld [vmem:[%s3252_s14 + $0x314] sm:$0xf]  ;;  %v2419_v22 = vld [vmem:[%s3252_s14 + $0x318] sm:$0xf0]  ;;  %v2358_v32 = vor.u32 %v2942_v18, %v2355_v20 }
  0x7a   : > { %1218 = vmatpush.bf16.msra.mxu3 %v2490_v36  ;;  %v2387_v36 = vld [vmem:[%s3252_s14 + $0x2d8] sm:$0xf0]  ;;  %v2422_v33 = vor.u32 %v2958_v21, %v2419_v22  ;;  %v2714_v54 = vld [vmem:[%s3252_s14 + $0x4e0] sm:$0xf]  ;;  %v3017_v56 = vld [vmem:[%s3252_s14 + $0x4e4] sm:$0xf0] }
  0x7b   : > { %1180 = vmatpush.bf16.msra.mxu0 %v2290_v45  ;;  %v2390_v42 = vor.u32 %v2950_v34, %v2387_v36  ;;  %v2315_v45 = vld [vmem:[%s3252_s14 + $0x248] sm:$0xf0]  ;;  %v2940_v34 = vld [vmem:[%s3252_s14 + $0x284] sm:$0xf]  ;;  %v2778_v57 = vld [vmem:[%s3252_s14 + $0x560] sm:$0xf] }
  0x7c   : > { %1193 = vmatpush.bf16.msra.mxu1 %v2354_v48  ;;  %v2964_v48 = vld [vmem:[%s3252_s14 + $0x344] sm:$0xf]  ;;  %v2318_v15 = vor.u32 %v2932_v44, %v2315_v45  ;;  %v3019_v45 = vld [vmem:[%s3252_s14 + $0x4f4] sm:$0xf0]  ;;  %v3033_v58 = vld [vmem:[%s3252_s14 + $0x564] sm:$0xf0] }
  0x7d   : > { %1206 = vmatpush.bf16.msra.mxu2 %v2418_v49  ;;  %v2443_v49 = vld [vmem:[%s3252_s14 + $0x348] sm:$0xf0]  ;;  %v2956_v36 = vld [vmem:[%s3252_s14 + $0x304] sm:$0xf]  ;;  %v2642_v0 = vld [vmem:[%s3252_s14 + $0x450] sm:$0xf] }
  0x7e   : > { %1219 = vmatpush.bf16.msra.mxu3 %v2482_v52  ;;  %v2446_v52 = vor.u32 %v2964_v48, %v2443_v49  ;;  %v2414_v48 = vor.u32 %v2956_v36, %v2411_v38  ;;  %v2850_v49 = vld [vmem:[%s3252_s14 + $0x5f0] sm:$0xf]  ;;  %v2999_v1 = vld [vmem:[%s3252_s14 + $0x454] sm:$0xf0]  ;;  %v2762_v18 = vld [vmem:[%s3252_s14 + $0x540] sm:$0xf] }
  0x7f   : > { %1181 = vmatpush.bf16.msra.mxu0 %v2282_v55  ;;  %v2510_v55 = vor.u32 %v2980_v6, %v2507_v50  ;;  %v3051_v6 = vld [vmem:[%s3252_s14 + $0x5f4] sm:$0xf0]  ;;  %v2478_v50 = vor.u32 %v2972_v39, %v2475_v40  ;;  %v3045_v20 = vld [vmem:[%s3252_s14 + $0x5c4] sm:$0xf0]  ;;  %v2626_v25 = vld [vmem:[%s3252_s14 + $0x430] sm:$0xf] }
  0x80   : > { %1194 = vmatpush.bf16.msra.mxu1 %v2346_v59  ;;  %v2978_v59 = vld [vmem:[%s3252_s14 + $0x3b4] sm:$0xf]  ;;  %v3043_v36 = vld [vmem:[%s3252_s14 + $0x5b4] sm:$0xf0]  ;;  %v2618_v40 = vld [vmem:[%s3252_s14 + $0x420] sm:$0xf] }
  0x81   : > { %1207 = vmatpush.bf16.msra.mxu2 %v2410_v60  ;;  %v2499_v60 = vld [vmem:[%s3252_s14 + $0x3b8] sm:$0xf0] }
  0x82   : > { %1220 = vmatpush.bf16.msra.mxu3 %v2474_v8  ;;  %1182 = vmatmul.bf16.vlgmr.msra.gmra.mxu0 %v3502_v27  ;;  %v2502_v4 = vor.u32 %v2978_v59, %v2499_v60  ;;  %v2427_v8 = vld [vmem:[%s3252_s14 + $0x328] sm:$0xf0]  ;;  %v2842_v59 = vld [vmem:[%s3252_s14 + $0x5e0] sm:$0xf]  ;;  %v3049_v60 = vld [vmem:[%s3252_s14 + $0x5e4] sm:$0xf0] }
  0x83   : > { %1226 = vmatpush.bf16.msrb.mxu0 %v2342_v9  ;;  %1195 = vmatmul.bf16.vlgmr.msra.gmra.mxu1 %v3504_v29  ;;  %v2976_v9 = vld [vmem:[%s3252_s14 + $0x3a4] sm:$0xf] }
  0x84   : > { %1239 = vmatpush.bf16.msrb.mxu1 %v2406_v12  ;;  %1208 = vmatmul.bf16.vlgmr.msra.gmra.mxu2 %v3496_v23  ;;  %v2366_v12 = vor.u32 %v2944_v3, %v2363_v5  ;;  %v2706_v3 = vld [vmem:[%s3252_s14 + $0x4d0] sm:$0xf]  ;;  %v3015_v5 = vld [vmem:[%s3252_s14 + $0x4d4] sm:$0xf0] }
  0x85   : > { %1252 = vmatpush.bf16.msrb.mxu2 %v2470_v13  ;;  %1221 = vmatmul.bf16.vlgmr.msra.gmra.mxu3 %v3500_v26  ;;  %v2430_v13 = vor.u32 %v2960_v7, %v2427_v8  ;;  %v2770_v7 = vld [vmem:[%s3252_s14 + $0x550] sm:$0xf]  ;;  %v3031_v8 = vld [vmem:[%s3252_s14 + $0x554] sm:$0xf0] }
  0x86   : > { %1265 = vmatpush.bf16.msrb.mxu3 %v2534_v19  ;;  %v2494_v19 = vor.u32 %v2976_v9, %v2491_v10  ;;  %v2834_v9 = vld [vmem:[%s3252_s14 + $0x5d0] sm:$0xf]  ;;  %v3047_v10 = vld [vmem:[%s3252_s14 + $0x5d4] sm:$0xf0] }
  0x87   : > { %1227 = vmatpush.bf16.msrb.mxu0 %v2334_v28  ;;  %v2294_v28 = vor.u32 %v2926_v14, %v2291_v17  ;;  %v2698_v14 = vld [vmem:[%s3252_s14 + $0x4c0] sm:$0xf]  ;;  %v3013_v17 = vld [vmem:[%s3252_s14 + $0x4c4] sm:$0xf0] }
  0x88   : > { %1240 = vmatpush.bf16.msrb.mxu1 %v2398_v30  ;;  %v2924_v30 = vld [vmem:[%s3252_s14 + $0x204] sm:$0xf]  ;;  %v2699_v22 = vor.u32 %v3013_v17, %v2698_v14  ;;  %v2724_v17 = vld [vmem:[%s3252_s14 + $0x4f8] sm:$0xf0] }
  0x89   : > { %1253 = vmatpush.bf16.msrb.mxu2 %v2462_v31  ;;  %v2283_v31 = vld [vmem:[%s3252_s14 + $0x208] sm:$0xf0] }
  0x8a   : > { %1266 = vmatpush.bf16.msrb.mxu3 %v2526_v35  ;;  %v2347_v35 = vld [vmem:[%s3252_s14 + $0x288] sm:$0xf0]  ;;  %v2286_v44 = vor.u32 %v2924_v30, %v2283_v31  ;;  %v2690_v30 = vld [vmem:[%s3252_s14 + $0x4b0] sm:$0xf] }
  0x8b   : > { %1228 = vmatpush.bf16.msrb.mxu0 %v2326_v41  ;;  %v2658_v41 = vld [vmem:[%s3252_s14 + $0x470] sm:$0xf]  ;;  %v2350_v47 = vor.u32 %v2940_v34, %v2347_v35  ;;  %v3027_v34 = vld [vmem:[%s3252_s14 + $0x534] sm:$0xf0] }
  0x8c   : > { %1241 = vmatpush.bf16.msrb.mxu1 %v2390_v42  ;;  %v3003_v42 = vld [vmem:[%s3252_s14 + $0x474] sm:$0xf0]  ;;  %v2818_v35 = vld [vmem:[%s3252_s14 + $0x5b0] sm:$0xf] }
  0x8d   : > { %1254 = vmatpush.bf16.msrb.mxu2 %v2454_v43  ;;  %v2722_v43 = vld [vmem:[%s3252_s14 + $0x4f0] sm:$0xf] }
  0x8e   : > { %1267 = vmatpush.bf16.msrb.mxu3 %v2518_v2  ;;  %v3035_v2 = vld [vmem:[%s3252_s14 + $0x574] sm:$0xf0] }
  0x8f   : > { %1229 = vmatpush.bf16.msrb.mxu0 %v2318_v15  ;;  %v2659_v15 = vor.u32 %v3003_v42, %v2658_v41  ;;  %v2993_v41 = vld [vmem:[%s3252_s14 + $0x424] sm:$0xf0]  ;;  %v2682_v42 = vld [vmem:[%s3252_s14 + $0x4a0] sm:$0xf] }
  0x90   : > { %1242 = vmatpush.bf16.msrb.mxu1 %v2382_v51  ;;  %v2723_v51 = vor.u32 %v3019_v45, %v2722_v43  ;;  %v2819_v43 = vor.u32 %v3043_v36, %v2818_v35  ;;  %v2746_v45 = vld [vmem:[%s3252_s14 + $0x520] sm:$0xf]  ;;  %v2652_v35 = vld [vmem:[%s3252_s14 + $0x468] sm:$0xf0]  ;;  %v3016_v36 = vld [vmem:[%s3252_s14 + $0x4e4] sm:$0xf] }
  0x91   : > { %1255 = vmatpush.bf16.msrb.mxu2 %v2446_v52  ;;  %v2787_v52 = vor.u32 %v3035_v2, %v2786_v46  ;;  %v3025_v46 = vld [vmem:[%s3252_s14 + $0x524] sm:$0xf0]  ;;  %v2810_v2 = vld [vmem:[%s3252_s14 + $0x5a0] sm:$0xf] }
  0x92   : > { %1268 = vmatpush.bf16.msrb.mxu3 %v2510_v55  ;;  %v2851_v55 = vor.u32 %v3051_v6, %v2850_v49  ;;  %v2610_v49 = vld [vmem:[%s3252_s14 + $0x410] sm:$0xf]  ;;  %v2991_v6 = vld [vmem:[%s3252_s14 + $0x414] sm:$0xf0] }
  0x93   : > { %1230 = vmatpush.bf16.msrb.mxu0 %v2310_v61  ;;  %v2651_v61 = vor.u32 %v3001_v16, %v2650_v53  ;;  %v1286_v53 = vld [vmem:[%s3239_s29 + $0x8] sm:$0x66] }
  0x94   : > { %1243 = vmatpush.bf16.msrb.mxu1 %v2374_v62  ;;  %v2715_v62 = vor.u32 %v3017_v56, %v2714_v54  ;;  %v2738_v54 = vld [vmem:[%s3252_s14 + $0x510] sm:$0xf]  ;;  %v1285_v56 = vld [vmem:[%s3239_s29] sm:$0x66] }
  0x95   : > { %1256 = vmatpush.bf16.msrb.mxu2 %v2438_v63  ;;  %v2779_v63 = vor.u32 %v3033_v58, %v2778_v57  ;;  %v2802_v57 = vld [vmem:[%s3252_s14 + $0x590] sm:$0xf]  ;;  %v3039_v58 = vld [vmem:[%s3252_s14 + $0x594] sm:$0xf0] }
  0x96   : > { %1269 = vmatpush.bf16.msrb.mxu3 %v2502_v4  ;;  %v2843_v4 = vor.u32 %v3049_v60, %v2842_v59  ;;  %v2611_v59 = vor.u32 %v2991_v6, %v2610_v49  ;;  %v2602_v60 = vld [vmem:[%s3252_s14 + $0x400] sm:$0xf]  ;;  %v2998_v49 = vld [vmem:[%s3252_s14 + $0x454] sm:$0xf]  ;;  %v2644_v6 = vld [vmem:[%s3252_s14 + $0x458] sm:$0xf0] }
  0x97   : > { %1231 = vmatpush.bf16.msrb.mxu0 %v2302_v11  ;;  %v2707_v11 = vor.u32 %v3015_v5, %v2706_v3  ;;  %v3005_v3 = vld [vmem:[%s3252_s14 + $0x484] sm:$0xf0]  ;;  %v1360_v5 = vunpack.c.h.b16 %v1286_v53 }
  0x98   : > { %1244 = vmatpush.bf16.msrb.mxu1 %v2366_v12  ;;  %v2771_v12 = vor.u32 %v3031_v8, %v2770_v7  ;;  %v1357_v7 = vunpack.c.l.b16 %v1285_v56  ;;  %v2803_v8 = vor.u32 %v3039_v58, %v2802_v57  ;;  %v2996_v58 = vld [vmem:[%s3252_s14 + $0x444] sm:$0xf] }
  0x99   : > { %1257 = vmatpush.bf16.msrb.mxu2 %v2430_v13  ;;  %v2634_v13 = vld [vmem:[%s3252_s14 + $0x440] sm:$0xf] }
  0x9a   : > { %1270 = vmatpush.bf16.msrb.mxu3 %v2494_v19  ;;  %v3029_v19 = vld [vmem:[%s3252_s14 + $0x544] sm:$0xf0] }
  0x9b   : > { %1232 = vmatpush.bf16.msrb.mxu0 %v2294_v28  ;;  %v2763_v24 = vor.u32 %v3029_v19, %v2762_v18  ;;  %v2995_v28 = vld [vmem:[%s3252_s14 + $0x434] sm:$0xf0]  ;;  %v3034_v18 = vld [vmem:[%s3252_s14 + $0x574] sm:$0xf]  ;;  %v2788_v19 = vld [vmem:[%s3252_s14 + $0x578] sm:$0xf0] }
  0x9c   : > { %1245 = vmatpush.bf16.msrb.mxu1 %v2358_v32  ;;  %v3011_v32 = vld [vmem:[%s3252_s14 + $0x4b4] sm:$0xf0] }
  0x9d   : > { %1258 = vmatpush.bf16.msrb.mxu2 %v2422_v33  ;;  %v2754_v33 = vld [vmem:[%s3252_s14 + $0x530] sm:$0xf]  ;;  %v2691_v38 = vor.u32 %v3011_v32, %v2690_v30 }
  0x9e   : > { %1271 = vmatpush.bf16.msrb.mxu3 %v2486_v37  ;;  %v2627_v37 = vor.u32 %v2995_v28, %v2626_v25  ;;  %v2755_v39 = vor.u32 %v3027_v34, %v2754_v33  ;;  %v3640_v25 = vpack.c.b16 %v1357_v7, %v1357_v7  ;;  %v2791_v34 = vor.u32 %v3034_v18, %v2788_v19 }
  0x9f   : > { %1233 = vmatpush.bf16.msrb.mxu0 %v2286_v44  ;;  %v3009_v44 = vld [vmem:[%s3252_s14 + $0x4a4] sm:$0xf0] }
  0xa0   : > { %1246 = vmatpush.bf16.msrb.mxu1 %v2350_v47  ;;  %v3041_v47 = vld [vmem:[%s3252_s14 + $0x5a4] sm:$0xf0] }
  0xa1   : > { %1259 = vmatpush.bf16.msrb.mxu2 %v2414_v48  ;;  %v2619_v48 = vor.u32 %v2993_v41, %v2618_v40  ;;  %v2811_v16 = vor.u32 %v3041_v47, %v2810_v2  ;;  %v2780_v40 = vld [vmem:[%s3252_s14 + $0x568] sm:$0xf0] }
  0xa2   : > { %1272 = vmatpush.bf16.msrb.mxu3 %v2478_v50  ;;  %1234 = vmatmul.bf16.vlgmr.msrb.gmra.mxu0 %v3502_v27  ;;  %v2835_v27 = vor.u32 %v3047_v10, %v2834_v9  ;;  %v2683_v50 = vor.u32 %v3009_v44, %v2682_v42  ;;  %v3021_v9 = vld [vmem:[%s3252_s14 + $0x504] sm:$0xf0]  ;;  %v2794_v10 = vld [vmem:[%s3252_s14 + $0x580] sm:$0xf]  ;;  %v3048_v42 = vld [vmem:[%s3252_s14 + $0x5e4] sm:$0xf] }
  0xa3   : > { %1693 = vmatpush.bf16.msra.mxu0 %v2659_v15  ;;  %1247 = vmatmul.bf16.vlgmr.msrb.gmra.mxu1 %v3504_v29  ;;  %v2826_v29 = vld [vmem:[%s3252_s14 + $0x5c0] sm:$0xf]  ;;  %v2747_v15 = vor.u32 %v3025_v46, %v2746_v45  ;;  %v1365_v45 = vrot.slane %v3640_v25, 1 }
  0xa4   : > { %1706 = vmatpush.bf16.msra.mxu1 %v2723_v51  ;;  %1260 = vmatmul.bf16.vlgmr.msrb.gmra.mxu2 %v3496_v23  ;;  %v2643_v23 = vor.u32 %v2999_v1, %v2642_v0  ;;  %v2827_v31 = vor.u32 %v3045_v20, %v2826_v29  ;;  %v2674_v51 = vld [vmem:[%s3252_s14 + $0x490] sm:$0xf]  ;;  %v2666_v1 = vld [vmem:[%s3252_s14 + $0x480] sm:$0xf] }
  0xa5   : > { %1719 = vmatpush.bf16.msra.mxu2 %v2787_v52  ;;  %1273 = vmatmul.bf16.vlgmr.msrb.gmra.mxu3 %v3500_v26  ;;  %v2997_v26 = vld [vmem:[%s3252_s14 + $0x444] sm:$0xf0]  ;;  %v3007_v52 = vld [vmem:[%s3252_s14 + $0x494] sm:$0xf0] }
  0xa6   : > { %1732 = vmatpush.bf16.msra.mxu3 %v2851_v55  ;;  %v2635_v21 = vor.u32 %v2997_v26, %v2634_v13  ;;  %v3023_v55 = vld [vmem:[%s3252_s14 + $0x514] sm:$0xf0]  ;;  %v2660_v13 = vld [vmem:[%s3252_s14 + $0x478] sm:$0xf0]  ;;  %v3018_v26 = vld [vmem:[%s3252_s14 + $0x4f4] sm:$0xf] }
  0xa7   : > { %1694 = vmatpush.bf16.msra.mxu0 %v2651_v61  ;;  %v2989_v61 = vld [vmem:[%s3252_s14 + $0x404] sm:$0xf0]  ;;  %v2739_v0 = vor.u32 %v3023_v55, %v2738_v54  ;;  %v2727_v33 = vor.u32 %v3018_v26, %v2724_v17  ;;  %v2836_v54 = vld [vmem:[%s3252_s14 + $0x5d8] sm:$0xf0]  ;;  %v2647_v55 = vor.u32 %v2998_v49, %v2644_v6  ;;  %v3042_v26 = vld [vmem:[%s3252_s14 + $0x5b4] sm:$0xf] }
  0xa8   : > { %1707 = vmatpush.bf16.msra.mxu1 %v2715_v62  ;;  %v1359_v62 = vunpack.c.l.b16 %v1286_v53  ;;  %v2603_v14 = vor.u32 %v2989_v61, %v2602_v60  ;;  %v2772_v53 = vld [vmem:[%s3252_s14 + $0x558] sm:$0xf0]  ;;  %v3012_v60 = vld [vmem:[%s3252_s14 + $0x4c4] sm:$0xf] }
  0xa9   : > { %1720 = vmatpush.bf16.msra.mxu2 %v2779_v63  ;;  %v2675_v63 = vor.u32 %v3007_v52, %v2674_v51  ;;  %v2708_v51 = vld [vmem:[%s3252_s14 + $0x4d8] sm:$0xf0]  ;;  %v3030_v52 = vld [vmem:[%s3252_s14 + $0x554] sm:$0xf] }
  0xaa   : > { %1733 = vmatpush.bf16.msra.mxu3 %v2843_v4  ;;  %v2730_v4 = vld [vmem:[%s3252_s14 + $0x500] sm:$0xf]  ;;  %v3634_v29 = vpack.c.b16 %v1359_v62, %v1359_v62  ;;  %v2775_v57 = vor.u32 %v3030_v52, %v2772_v53  ;;  %v2700_v62 = vld [vmem:[%s3252_s14 + $0x4c8] sm:$0xf0]  ;;  %v2676_v6 = vld [vmem:[%s3252_s14 + $0x498] sm:$0xf0] }
  0xab   : > { %1695 = vmatpush.bf16.msra.mxu0 %v2643_v23  ;;  %v3037_v23 = vld [vmem:[%s3252_s14 + $0x584] sm:$0xf0]  ;;  %v2731_v20 = vor.u32 %v3021_v9, %v2730_v4  ;;  %v2628_v9 = vld [vmem:[%s3252_s14 + $0x438] sm:$0xf0]  ;;  %v3038_v52 = vld [vmem:[%s3252_s14 + $0x594] sm:$0xf] }
  0xac   : > { %1708 = vmatpush.bf16.msra.mxu1 %v2707_v11  ;;  %v1358_v11 = vunpack.c.h.b16 %v1285_v56  ;;  %v2795_v28 = vor.u32 %v3037_v23, %v2794_v10  ;;  %v1367_v41 = vrot.slane %v3634_v29, 1  ;;  %v3010_v10 = vld [vmem:[%s3252_s14 + $0x4b4] sm:$0xf]  ;;  %v2804_v53 = vld [vmem:[%s3252_s14 + $0x598] sm:$0xf0] }
  0xad   : > { %1721 = vmatpush.bf16.msra.mxu2 %v2771_v12  ;;  %v3002_v12 = vld [vmem:[%s3252_s14 + $0x474] sm:$0xf] }
  0xae   : > { %1734 = vmatpush.bf16.msra.mxu3 %v2835_v27  ;;  %v2667_v27 = vor.u32 %v3005_v3, %v2666_v1  ;;  %v2663_v30 = vor.u32 %v3002_v12, %v2660_v13  ;;  %v3643_v32 = vpack.c.b16 %v1358_v11, %v1358_v11  ;;  %v3044_v1 = vld [vmem:[%s3252_s14 + $0x5c4] sm:$0xf]  ;;  %v2828_v3 = vld [vmem:[%s3252_s14 + $0x5c8] sm:$0xf0]  ;;  %v2692_v11 = vld [vmem:[%s3252_s14 + $0x4b8] sm:$0xf0] }
  0xaf   : > { %1696 = vmatpush.bf16.msra.mxu0 %v2635_v21  ;;  %v3050_v21 = vld [vmem:[%s3252_s14 + $0x5f4] sm:$0xf]  ;;  %v2831_v23 = vor.u32 %v3044_v1, %v2828_v3  ;;  %v2756_v13 = vld [vmem:[%s3252_s14 + $0x538] sm:$0xf0]  ;;  %v2695_v18 = vor.u32 %v3010_v10, %v2692_v11  ;;  %v2732_v1 = vld [vmem:[%s3252_s14 + $0x508] sm:$0xf0] }
  0xb0   : > { %1709 = vmatpush.bf16.msra.mxu1 %v2699_v22  ;;  %v2852_v22 = vld [vmem:[%s3252_s14 + $0x5f8] sm:$0xf0]  ;;  %v1366_v2 = vrot.slane %v3643_v32, 1  ;;  %v3026_v12 = vld [vmem:[%s3252_s14 + $0x534] sm:$0xf] }
  0xb1   : > { %1722 = vmatpush.bf16.msra.mxu2 %v2763_v24  ;;  %v3638_v24 = vpack.c.b16 %v1360_v5, %v1360_v5  ;;  %v2703_v5 = vor.u32 %v3012_v60, %v2700_v62  ;;  %v2759_v19 = vor.u32 %v3026_v12, %v2756_v13  ;;  %v3004_v60 = vld [vmem:[%s3252_s14 + $0x484] sm:$0xf]  ;;  %v2807_v62 = vor.u32 %v3038_v52, %v2804_v53 }
  0xb2   : > { %1735 = vmatpush.bf16.msra.mxu3 %v2827_v31  ;;  %v3000_v31 = vld [vmem:[%s3252_s14 + $0x464] sm:$0xf] }
  0xb3   : > { %1697 = vmatpush.bf16.msra.mxu0 %v2627_v37  ;;  %v2716_v37 = vld [vmem:[%s3252_s14 + $0x4e8] sm:$0xf0]  ;;  %v1368_v44 = vrot.slane %v3638_v24, 1  ;;  %v2655_v46 = vor.u32 %v3000_v31, %v2652_v35  ;;  %v3036_v3 = vld [vmem:[%s3252_s14 + $0x584] sm:$0xf] }
  0xb4   : > { %1710 = vmatpush.bf16.msra.mxu1 %v2691_v38  ;;  %v2855_v38 = vor.u32 %v3050_v21, %v2852_v22  ;;  %v2719_v47 = vor.u32 %v3016_v36, %v2716_v37  ;;  %v2620_v21 = vld [vmem:[%s3252_s14 + $0x428] sm:$0xf0]  ;;  %v3008_v22 = vld [vmem:[%s3252_s14 + $0x4a4] sm:$0xf] }
  0xb5   : > { %1723 = vmatpush.bf16.msra.mxu2 %v2755_v39  ;;  %v3032_v39 = vld [vmem:[%s3252_s14 + $0x564] sm:$0xf]  ;;  %v2684_v31 = vld [vmem:[%s3252_s14 + $0x4a8] sm:$0xf0] }
  0xb6   : > { %1736 = vmatpush.bf16.msra.mxu3 %v2819_v43  ;;  %v2844_v43 = vld [vmem:[%s3252_s14 + $0x5e8] sm:$0xf0]  ;;  %v3040_v36 = vld [vmem:[%s3252_s14 + $0x5a4] sm:$0xf] }
  0xb7   : > { %1698 = vmatpush.bf16.msra.mxu0 %v2619_v48  ;;  %v2783_v48 = vor.u32 %v3032_v39, %v2780_v40  ;;  %v2812_v37 = vld [vmem:[%s3252_s14 + $0x5a8] sm:$0xf0] }
  0xb8   : > { %1711 = vmatpush.bf16.msra.mxu1 %v2683_v50  ;;  %v3014_v50 = vld [vmem:[%s3252_s14 + $0x4d4] sm:$0xf]  ;;  %v2815_v49 = vor.u32 %v3040_v36, %v2812_v37 }
  0xb9   : > { %1724 = vmatpush.bf16.msra.mxu2 %v2747_v15  ;;  %v2847_v15 = vor.u32 %v3048_v42, %v2844_v43  ;;  %v2711_v56 = vor.u32 %v3014_v50, %v2708_v51  ;;  %v2687_v42 = vor.u32 %v3008_v22, %v2684_v31  ;;  %v3022_v50 = vld [vmem:[%s3252_s14 + $0x514] sm:$0xf] }
  0xba   : > { %1737 = vmatpush.bf16.msra.mxu3 %v2811_v16  ;;  %v3046_v16 = vld [vmem:[%s3252_s14 + $0x5d4] sm:$0xf] }
  0xbb   : > { %1699 = vmatpush.bf16.msra.mxu0 %v2611_v59  ;;  %v2636_v59 = vld [vmem:[%s3252_s14 + $0x448] sm:$0xf0]  ;;  %v2839_v61 = vor.u32 %v3046_v16, %v2836_v54 }
  0xbc   : > { %1712 = vmatpush.bf16.msra.mxu1 %v2675_v63  ;;  %v3028_v63 = vld [vmem:[%s3252_s14 + $0x544] sm:$0xf]  ;;  %v2639_v4 = vor.u32 %v2996_v58, %v2636_v59  ;;  %v2604_v59 = vld [vmem:[%s3252_s14 + $0x408] sm:$0xf0] }
  0xbd   : > { %1725 = vmatpush.bf16.msra.mxu2 %v2739_v0  ;;  %v2764_v0 = vld [vmem:[%s3252_s14 + $0x548] sm:$0xf0]  ;;  %v2988_v58 = vld [vmem:[%s3252_s14 + $0x404] sm:$0xf] }
  0xbe   : > { %1738 = vmatpush.bf16.msra.mxu3 %v2803_v8  ;;  %v2767_v7 = vor.u32 %v3028_v63, %v2764_v0  ;;  %v2994_v8 = vld [vmem:[%s3252_s14 + $0x434] sm:$0xf]  ;;  %v2668_v63 = vld [vmem:[%s3252_s14 + $0x488] sm:$0xf0]  ;;  %v3020_v0 = vld [vmem:[%s3252_s14 + $0x504] sm:$0xf] }
  0xbf   : > { %1700 = vmatpush.bf16.msra.mxu0 %v2603_v14  ;;  %v2820_v14 = vld [vmem:[%s3252_s14 + $0x5b8] sm:$0xf0]  ;;  %v639_v17 = vpop.f32.mrf.mxu0 }
  0xc0   : > { %1713 = vmatpush.bf16.msra.mxu1 %v2667_v27  ;;  %v2631_v27 = vor.u32 %v2994_v8, %v2628_v9  ;;  %v2671_v8 = vor.u32 %v3004_v60, %v2668_v63  ;;  %v2735_v9 = vor.u32 %v3020_v0, %v2732_v1 }
  0xc1   : > { %1726 = vmatpush.bf16.msra.mxu2 %v2731_v20  ;;  %v2992_v20 = vld [vmem:[%s3252_s14 + $0x424] sm:$0xf] }
  0xc2   : > { %1739 = vmatpush.bf16.msra.mxu3 %v2795_v28  ;;  %1701 = vmatmul.bf16.vlgmr.msra.gmra.mxu0 %v1365_v45  ;;  %v652_v28 = vpop.f32.mrf.mxu1  ;;  %v2623_v39 = vor.u32 %v2992_v20, %v2620_v21 }
  0xc3   : > { %1745 = vmatpush.bf16.msrb.mxu0 %v2663_v30  ;;  %1714 = vmatmul.bf16.vlgmr.msra.gmra.mxu1 %v1366_v2  ;;  %v2823_v30 = vor.u32 %v3042_v26, %v2820_v14  ;;  %v653_v35 = vadd.f32 %v652_v28, %v639_v17 }
  0xc4   : > { %1758 = vmatpush.bf16.msrb.mxu1 %v2727_v33  ;;  %1727 = vmatmul.bf16.vlgmr.msra.gmra.mxu2 %v1367_v41  ;;  %v3024_v33 = vld [vmem:[%s3252_s14 + $0x524] sm:$0xf] }
  0xc5   : > { %1771 = vmatpush.bf16.msrb.mxu2 %v2791_v34  ;;  %1740 = vmatmul.bf16.vlgmr.msra.gmra.mxu3 %v1368_v44  ;;  %v2748_v34 = vld [vmem:[%s3252_s14 + $0x528] sm:$0xf0] }
  0xc6   : > { %1784 = vmatpush.bf16.msrb.mxu3 %v2855_v38  ;;  %v2751_v43 = vor.u32 %v3024_v33, %v2748_v34 }
  0xc7   : > { %1746 = vmatpush.bf16.msrb.mxu0 %v2655_v46  ;;  %v665_v38 = vpop.f32.mrf.mxu2  ;;  %v2990_v46 = vld [vmem:[%s3252_s14 + $0x414] sm:$0xf] }
  0xc8   : > { %1759 = vmatpush.bf16.msrb.mxu1 %v2719_v47  ;;  %v666_v40 = vadd.f32 %v665_v38, %v653_v35  ;;  %v2612_v47 = vld [vmem:[%s3252_s14 + $0x418] sm:$0xf0]  ;;  %v678_v51 = vpop.f32.mrf.mxu3 }
  0xc9   : > { %1772 = vmatpush.bf16.msrb.mxu2 %v2783_v48  ;;  %v3006_v48 = vld [vmem:[%s3252_s14 + $0x494] sm:$0xf]  ;;  %v2615_v54 = vor.u32 %v2990_v46, %v2612_v47 }
  0xca   : > { %1785 = vmatpush.bf16.msrb.mxu3 %v2847_v15  ;;  %v2740_v15 = vld [vmem:[%s3252_s14 + $0x518] sm:$0xf0]  ;;  %v679_v16 = vadd.f32 %v678_v51, %v666_v40  ;;  %v295_v40 = vld [vmem:[#allocation2] sm:$0xff] }
  0xcb   : > { %1747 = vmatpush.bf16.msrb.mxu0 %v2647_v55  ;;  %v641_v55 = vpop.f32.mrf.mxu0 }
  0xcc   : > { %1760 = vmatpush.bf16.msrb.mxu1 %v2711_v56  ;;  %v2679_v56 = vor.u32 %v3006_v48, %v2676_v6 }
  0xcd   : > { %1773 = vmatpush.bf16.msrb.mxu2 %v2775_v57  ;;  %v2743_v57 = vor.u32 %v3022_v50, %v2740_v15 }
  0xce   : > { %1786 = vmatpush.bf16.msrb.mxu3 %v2839_v61  ;;  %v654_v61 = vpop.f32.mrf.mxu1 }
  0xcf   : > { %1748 = vmatpush.bf16.msrb.mxu0 %v2639_v4  ;;  %v2796_v4 = vld [vmem:[%s3252_s14 + $0x588] sm:$0xf0] }
  0xd0   : > { %1761 = vmatpush.bf16.msrb.mxu1 %v2703_v5  ;;  %v667_v5 = vpop.f32.mrf.mxu2  ;;  %v2799_v10 = vor.u32 %v3036_v3, %v2796_v4 }
  0xd1   : > { %1774 = vmatpush.bf16.msrb.mxu2 %v2767_v7  ;;  %v2607_v7 = vor.u32 %v2988_v58, %v2604_v59 }
  0xd2   : > { %1787 = vmatpush.bf16.msrb.mxu3 %v2831_v23  ;;  %v680_v23 = vpop.f32.mrf.mxu3 }
  0xd3   : > { %1749 = vmatpush.bf16.msrb.mxu0 %v2631_v27 }
  0xd4   : > { %1762 = vmatpush.bf16.msrb.mxu1 %v2695_v18 }
  0xd5   : > { %1775 = vmatpush.bf16.msrb.mxu2 %v2759_v19 }
  0xd6   : > { %1788 = vmatpush.bf16.msrb.mxu3 %v2823_v30 }
  0xd7   : > { %1750 = vmatpush.bf16.msrb.mxu0 %v2623_v39 }
  0xd8   : > { %1763 = vmatpush.bf16.msrb.mxu1 %v2687_v42 }
  0xd9   : > { %1776 = vmatpush.bf16.msrb.mxu2 %v2751_v43 }
  0xda   : > { %1789 = vmatpush.bf16.msrb.mxu3 %v2815_v49 }
  0xdb   : > { %1751 = vmatpush.bf16.msrb.mxu0 %v2615_v54 }
  0xdc   : > { %1764 = vmatpush.bf16.msrb.mxu1 %v2679_v56 }
  0xdd   : > { %1777 = vmatpush.bf16.msrb.mxu2 %v2743_v57 }
  0xde   : > { %1790 = vmatpush.bf16.msrb.mxu3 %v2807_v62 }
  0xdf   : > { %1752 = vmatpush.bf16.msrb.mxu0 %v2607_v7  ;;  %v691_v11 = vpop.f32.mrf.mxu0 }
  0xe0   : > { %1765 = vmatpush.bf16.msrb.mxu1 %v2671_v8  ;;  %v704_v12 = vpop.f32.mrf.mxu1 }
  0xe1   : > { %1778 = vmatpush.bf16.msrb.mxu2 %v2735_v9  ;;  %v705_v13 = vadd.f32 %v704_v12, %v691_v11 }
  0xe2   : > { %1791 = vmatpush.bf16.msrb.mxu3 %v2799_v10  ;;  %1753 = vmatmul.bf16.vlgmr.msrb.gmra.mxu0 %v1365_v45 }
  0xe3   : > { %1766 = vmatmul.bf16.vlgmr.msrb.gmra.mxu1 %v1366_v2 }
  0xe4   : > { %1779 = vmatmul.bf16.vlgmr.msrb.gmra.mxu2 %v1367_v41 }
  0xe5   : > { %1792 = vmatmul.bf16.vlgmr.msrb.gmra.mxu3 %v1368_v44 }
  0xe7   : > { %v717_v26 = vpop.f32.mrf.mxu2  ;;  %v693_v18 = vpop.f32.mrf.mxu0 }
  0xe8   : > { %v718_v14 = vadd.f32 %v717_v26, %v705_v13  ;;  %v730_v27 = vpop.f32.mrf.mxu3  ;;  %v706_v25 = vpop.f32.mrf.mxu1 }
  0xea   : > { %v731_v17 = vadd.f32 %v730_v27, %v718_v14 }
  0xec   : > { %v736_v45 = vrot.slane %v731_v17, 4 }
  0xee   : > { %v738_v32 = vsel %vm737_vm0, %v679_v16, %v736_v45 }
  0xef   : > { %v719_v2 = vpop.f32.mrf.mxu2  ;;  %v740_v48 = vadd.f32 %v738_v32, %v295_v40 }
  0xf0   : > { %v732_v19 = vpop.f32.mrf.mxu3 }
  0xff   : > { %v1183_v29 = vpop.f32.mrf.mxu0 }
 0x100   : > { %v1196_v41 = vpop.f32.mrf.mxu1 }
 0x101   : > { %v1197_v20 = vadd.f32 %v1196_v41, %v1183_v29 }
 0x107   : > { %v1209_v24 = vpop.f32.mrf.mxu2  ;;  %v1185_v28 = vpop.f32.mrf.mxu0 }
 0x108   : > { %v1210_v44 = vadd.f32 %v1209_v24, %v1197_v20  ;;  %v1222_v21 = vpop.f32.mrf.mxu3  ;;  %v1198_v30 = vpop.f32.mrf.mxu1 }
 0x10a   : > { %v1223_v22 = vadd.f32 %v1222_v21, %v1210_v44 }
 0x10f   : > { %v1211_v31 = vpop.f32.mrf.mxu2 }
 0x110   : > { %v1224_v33 = vpop.f32.mrf.mxu3 }
 0x11f   : > { %v1235_v34 = vpop.f32.mrf.mxu0 }
 0x120   : > { %v1248_v35 = vpop.f32.mrf.mxu1 }
 0x121   : > { %v1249_v36 = vadd.f32 %v1248_v35, %v1235_v34 }
 0x127   : > { %v1261_v37 = vpop.f32.mrf.mxu2  ;;  %v1237_v43 = vpop.f32.mrf.mxu0 }
 0x128   : > { %v1262_v38 = vadd.f32 %v1261_v37, %v1249_v36  ;;  %v1274_v39 = vpop.f32.mrf.mxu3  ;;  %v1250_v46 = vpop.f32.mrf.mxu1 }
 0x12a   : > { %v1275_v42 = vadd.f32 %v1274_v39, %v1262_v38 }
 0x12c   : > { %v1280_v47 = vrot.slane %v1275_v42, 4 }
 0x12e   : > { %v1281_v49 = vsel %vm737_vm0, %v1223_v22, %v1280_v47 }
 0x12f   : > { %v1283_v6 = vadd.f32 %v1281_v49, %v740_v48  ;;  %v1263_v50 = vpop.f32.mrf.mxu2 }
 0x130   : > { %v1276_v15 = vpop.f32.mrf.mxu3 }
 0x13f   : > { %v1702_v51 = vpop.f32.mrf.mxu0 }
 0x140   : > { %v1715_v52 = vpop.f32.mrf.mxu1 }
 0x141   : > { %v1716_v60 = vadd.f32 %v1715_v52, %v1702_v51 }
 0x147   : > { %v1728_v53 = vpop.f32.mrf.mxu2  ;;  %v1704_v54 = vpop.f32.mrf.mxu0 }
 0x148   : > { %v1741_v16 = vpop.f32.mrf.mxu3  ;;  %v1717_v55 = vpop.f32.mrf.mxu1  ;;  %v1729_v63 = vadd.f32 %v1728_v53, %v1716_v60 }
 0x14a   : > { %v1742_v7 = vadd.f32 %v1741_v16, %v1729_v63 }
 0x14f   : > { %v1730_v56 = vpop.f32.mrf.mxu2 }
 0x150   : > { %v1743_v57 = vpop.f32.mrf.mxu3 }
 0x15f   : > { %v1754_v58 = vpop.f32.mrf.mxu0 }
 0x160   : > { %v1767_v59 = vpop.f32.mrf.mxu1 }
 0x161   : > { %v1768_v61 = vadd.f32 %v1767_v59, %v1754_v58 }
 0x167   : > { %v1780_v62 = vpop.f32.mrf.mxu2  ;;  %v1756_v3 = vpop.f32.mrf.mxu0 }
 0x168   : > { %v1781_v0 = vadd.f32 %v1780_v62, %v1768_v61  ;;  %v1793_v1 = vpop.f32.mrf.mxu3  ;;  %v1769_v4 = vpop.f32.mrf.mxu1 }
 0x16a   : > { %v1794_v5 = vadd.f32 %v1793_v1, %v1781_v0 }
 0x16c   : > { %v1799_v8 = vrot.slane %v1794_v5, 4 }
 0x16d   : > { %1807 = sbr.rel (%p2856_p10) target bundleno = 396 (0x18c), region = 40 }
 0x16e   : > { %v1800_v9 = vsel %vm737_vm0, %v1742_v7, %v1799_v8 }
 0x16f   : > { %v1802_v10 = vadd.f32 %v1800_v9, %v1283_v6  ;;  %v1782_v23 = vpop.f32.mrf.mxu2 }
 0x170   : > { %v1795_v11 = vpop.f32.mrf.mxu3 }
 0x171   : > { %1803 = vst [vmem:[#allocation2] sm:$0xff] %v1802_v10 }
 0x172   : > { %v1809_v12 = vld [vmem:[%s3752_s2] sm:$0x3]  ;;  %vm1829_vm2 = vcmask 1041408  }
 0x173   : > { %v1811_v13 = vperm.slane %v1809_v12, 0  ;;  %v1812_v26 = vperm.slane %v1809_v12, 1 }
 0x175   : > { %v1813_v27 = vrot.slane %v1812_v26, 4 }
 0x177   : > { %v1814_v17 = vsel %vm737_vm0, %v1811_v13, %v1813_v27 }
 0x178   : > { %v1808_v14 = vld [vmem:[#allocation2] sm:$0xff] }
 0x179   : > { %v1816_v18 = vadd.f32 %v1814_v17, %v1808_v14 }
 0x17b   : > { %vm1817_vm1 = vcmp.ge.f32.partialorder %v1816_v18, 0.0  ;;  %v1818_v25 = vmul.f32 0.1, %v1816_v18 }
 0x17d   : > { %v1819_v45 = vsel %vm1817_vm1, %v1816_v18, %v1818_v25 }
 0x17e   : > { %1821 = vst [vmem:[#allocation1] ss:$2 sm:$0xff] %v1819_v45 }
 0x185   : > { %v1822_v32 = vld.sshfl [vmem:[#allocation1] sm:$0xff pattern:$0x75316420]  ;;  %v1823_v2 = vld.sshfl [vmem:[#allocation1 + $0x8] sm:$0xff pattern:$0x75316420] }
 0x186   : > { %v1826_v19 = vpack.c.bf16 %v1823_v2, %v1822_v32 }
 0x188   : > { %v1828_v29 = vrot.slane %v1826_v19, 2 }
 0x18a   : > { %v1832_v41 = vsel %vm1829_vm2, %v1826_v19, %v1828_v29 }
 0x18b   : > { %1834 = vst [vmem:[%s3245_s9] sm:$0xf] %v1832_v41 }
 0x18c PF: > { %s13_s18 = sadd.s32 1, %s3164_s18   ;;  %s3754_s12 = smov %s3152_s15 }
 0x18d   : > { %p10_p11 = scmp.ge.s32.totalorder %s13_s18, 26   ;;  %s3755_s13 = smov %s3156_s16 }
 0x18e   : > { %s3756_s14 = smov %s3160_s17  ;;  %s3757_s15 = smov %s3761_s19 }
 0x18f   : > { %s3758_s16 = smov %s3765_s20  ;;  %s3759_s17 = smov %s3769_s21 }
 0x190   :  { %12 = sbr.rel (!%p10_p11) target bundleno = 4 (0x4), region = 73 }

// kernel: flownet_encoder_forward.9
= control target key start
LH: loop header
LB: loop body
LE: loop exit
PB: predicated region body
PF: predicated region fallthrough
CT: control target
= control target key end

     0   :  { %s1307_s12 = smov 0   ;;  %s1309_s13 = smov 0   ;;  %s1773_s0 = inlined_call_operand.vmem [shape: bf16[2,2,2,256], index: 0, kind: input, shape index: {}]   ;;  %s1774_s1 = inlined_call_operand.vmem [shape: bf16[1,1,256,512], index: 1, kind: input, shape index: {}]   ;;  %s1775_s2 = inlined_call_operand.vmem [shape: f32[1,512], index: 2, kind: input, shape index: {}]   ;;  %s1776_s3 = inlined_call_operand.vmem [shape: bf16[2,2,2,512], index: 3, kind: output, shape index: {}]  }
   0x1   :  { %s1311_s14 = smov 0   ;;  %s1313_s15 = smov 0  }
   0x2   :  { %s1315_s16 = smov 0  }
   0x3 LB: > { %s28_s17 = sadd.s32 1, %s1277_s14  ;;  %s32_s18 = sadd.s32 1, %s1281_s15  ;;  %s1285_s16 = sphi %s1315_s16, %s13_s16   ;;  %s1281_s15 = sphi %s1313_s15, %s1780_s15   ;;  %s1277_s14 = sphi %s1311_s14, %s1779_s14   ;;  %s1273_s13 = sphi %s1309_s13, %s1778_s13   ;;  %s1269_s12 = sphi %s1307_s12, %s1777_s12  }
   0x4   : > { %p30_p0 = scmp.ge.s32.totalorder %s28_s17, 2  ;;  %p880_p1 = scmp.ge.s32.totalorder %s1285_s16, 1 }
   0x5   : > { %p167_p2 = scmp.lt.s32.totalorder %s1285_s16, 5 }
   0x6   : > { %s1782_s17 = smov (%p30_p0, %s28_s17), 0  ;;  %s1784_s18 = smov (!%p30_p0, %s32_s18), %s1281_s15 }
   0x7   : > { %p168_p3 = pnand %p880_p1, %p167_p2  ;;  %p34_p4 = scmp.ge.s32.totalorder %s1784_s18, 2 }
   0x8   : > { %p199_p5 = scmp.lt.s32.totalorder (!%p168_p3), %s1273_s13, 1  ;;  %p201_p6 = scmp.lt.s32.totalorder (!%p168_p3), %s1269_s12, 1 }
   0x9   : > { %s1786_s18 = smov (%p34_p4, %s1784_s18), 0  ;;  %171 = sbr.rel (%p168_p3) target bundleno = 241 (0xf1), region = 32 }
   0xe   : > { %v999_v0 = vld [vmem:[%s1774_s1 + $0xe0] sm:$0xf]  ;;  %v1173_v1 = vld [vmem:[%s1774_s1 + $0xec] sm:$0xf0]  ;;  %v1171_v5 = vld [vmem:[%s1774_s1 + $0xe4] sm:$0xf] }
   0xf   : > { %v1127_v2 = vld [vmem:[%s1774_s1 + $0x1e0] sm:$0xf]  ;;  %v1000_v3 = vor.u32 %v1173_v1, %v999_v0  ;;  %v1205_v4 = vld [vmem:[%s1774_s1 + $0x1ec] sm:$0xf0]  ;;  %v1001_v6 = vld [vmem:[%s1774_s1 + $0xf0] sm:$0xf0] }
  0x10   : > { %v1128_v7 = vor.u32 %v1205_v4, %v1127_v2  ;;  %v1004_v8 = vor.u32 %v1171_v5, %v1001_v6  ;;  %v1203_v9 = vld [vmem:[%s1774_s1 + $0x1e4] sm:$0xf]  ;;  %v1129_v10 = vld [vmem:[%s1774_s1 + $0x1f0] sm:$0xf0]  ;;  %v983_v11 = vld [vmem:[%s1774_s1 + $0xc0] sm:$0xf] }
  0x11   : > { %616 = vmatpush.bf16.msra.mxu0 %v1000_v3  ;;  %v1132_v12 = vor.u32 %v1203_v9, %v1129_v10  ;;  %v1169_v13 = vld [vmem:[%s1774_s1 + $0xcc] sm:$0xf0]  ;;  %v1111_v14 = vld [vmem:[%s1774_s1 + $0x1c0] sm:$0xf]  ;;  %v1167_v18 = vld [vmem:[%s1774_s1 + $0xc4] sm:$0xf] }
  0x12   : > { %v1201_v15 = vld [vmem:[%s1774_s1 + $0x1cc] sm:$0xf0]  ;;  %629 = vmatpush.bf16.msra.mxu1 %v1128_v7  ;;  %642 = vmatpush.bf16.msra.mxu2 %v1004_v8  ;;  %v984_v16 = vor.u32 %v1169_v13, %v983_v11  ;;  %v985_v19 = vld [vmem:[%s1774_s1 + $0xd0] sm:$0xf0]  ;;  %v1199_v20 = vld [vmem:[%s1774_s1 + $0x1c4] sm:$0xf] }
  0x13   : > { %v1112_v17 = vor.u32 %v1201_v15, %v1111_v14  ;;  %655 = vmatpush.bf16.msra.mxu3 %v1132_v12  ;;  %v988_v21 = vor.u32 %v1167_v18, %v985_v19  ;;  %v1113_v22 = vld [vmem:[%s1774_s1 + $0x1d0] sm:$0xf0]  ;;  %v967_v23 = vld [vmem:[%s1774_s1 + $0xa0] sm:$0xf]  ;;  %v1165_v24 = vld [vmem:[%s1774_s1 + $0xac] sm:$0xf0] }
  0x14   : > { %v1116_v25 = vor.u32 %v1199_v20, %v1113_v22  ;;  %v1095_v26 = vld [vmem:[%s1774_s1 + $0x1a0] sm:$0xf]  ;;  %v1197_v27 = vld [vmem:[%s1774_s1 + $0x1ac] sm:$0xf0]  ;;  %v1163_v28 = vld [vmem:[%s1774_s1 + $0xa4] sm:$0xf]  ;;  %v968_v29 = vor.u32 %v1165_v24, %v967_v23 }
  0x15   : > { %617 = vmatpush.bf16.msra.mxu0 %v984_v16  ;;  %v969_v30 = vld [vmem:[%s1774_s1 + $0xb0] sm:$0xf0]  ;;  %v1195_v31 = vld [vmem:[%s1774_s1 + $0x1a4] sm:$0xf]  ;;  %v1096_v33 = vor.u32 %v1197_v27, %v1095_v26  ;;  %v951_v35 = vld [vmem:[%s1774_s1 + $0x80] sm:$0xf] }
  0x16   : > { %v1097_v32 = vld [vmem:[%s1774_s1 + $0x1b0] sm:$0xf0]  ;;  %630 = vmatpush.bf16.msra.mxu1 %v1112_v17  ;;  %643 = vmatpush.bf16.msra.mxu2 %v988_v21  ;;  %v972_v34 = vor.u32 %v1163_v28, %v969_v30  ;;  %v1161_v36 = vld [vmem:[%s1774_s1 + $0x8c] sm:$0xf0]  ;;  %v1079_v37 = vld [vmem:[%s1774_s1 + $0x180] sm:$0xf] }
  0x17   : > { %656 = vmatpush.bf16.msra.mxu3 %v1116_v25  ;;  %v1100_v38 = vor.u32 %v1195_v31, %v1097_v32  ;;  %v1193_v39 = vld [vmem:[%s1774_s1 + $0x18c] sm:$0xf0]  ;;  %v1159_v40 = vld [vmem:[%s1774_s1 + $0x84] sm:$0xf]  ;;  %v953_v41 = vld [vmem:[%s1774_s1 + $0x90] sm:$0xf0]  ;;  %v952_v44 = vor.u32 %v1161_v36, %v951_v35 }
  0x18   : > { %v1191_v42 = vld [vmem:[%s1774_s1 + $0x184] sm:$0xf]  ;;  %v1081_v43 = vld [vmem:[%s1774_s1 + $0x190] sm:$0xf0]  ;;  %v1080_v45 = vor.u32 %v1193_v39, %v1079_v37  ;;  %v956_v46 = vor.u32 %v1159_v40, %v953_v41  ;;  %v935_v47 = vld [vmem:[%s1774_s1 + $0x60] sm:$0xf] }
  0x19   : > { %618 = vmatpush.bf16.msra.mxu0 %v968_v29  ;;  %v1157_v48 = vld [vmem:[%s1774_s1 + $0x6c] sm:$0xf0]  ;;  %v1063_v49 = vld [vmem:[%s1774_s1 + $0x160] sm:$0xf]  ;;  %v1084_v50 = vor.u32 %v1191_v42, %v1081_v43  ;;  %v1155_v52 = vld [vmem:[%s1774_s1 + $0x64] sm:$0xf] }
  0x1a   : > { %631 = vmatpush.bf16.msra.mxu1 %v1096_v33  ;;  %644 = vmatpush.bf16.msra.mxu2 %v972_v34  ;;  %v1189_v51 = vld [vmem:[%s1774_s1 + $0x16c] sm:$0xf0]  ;;  %v937_v53 = vld [vmem:[%s1774_s1 + $0x70] sm:$0xf0]  ;;  %v1187_v54 = vld [vmem:[%s1774_s1 + $0x164] sm:$0xf]  ;;  %v936_v56 = vor.u32 %v1157_v48, %v935_v47 }
  0x1b   : > { %657 = vmatpush.bf16.msra.mxu3 %v1100_v38  ;;  %v1065_v55 = vld [vmem:[%s1774_s1 + $0x170] sm:$0xf0]  ;;  %v1064_v57 = vor.u32 %v1189_v51, %v1063_v49  ;;  %v940_v58 = vor.u32 %v1155_v52, %v937_v53  ;;  %v919_v59 = vld [vmem:[%s1774_s1 + $0x40] sm:$0xf]  ;;  %v1153_v60 = vld [vmem:[%s1774_s1 + $0x4c] sm:$0xf0] }
  0x1c   : > { %v1047_v61 = vld [vmem:[%s1774_s1 + $0x140] sm:$0xf]  ;;  %v1068_v62 = vor.u32 %v1187_v54, %v1065_v55  ;;  %v1185_v63 = vld [vmem:[%s1774_s1 + $0x14c] sm:$0xf0]  ;;  %v1151_v0 = vld [vmem:[%s1774_s1 + $0x44] sm:$0xf]  ;;  %v920_v4 = vor.u32 %v1153_v60, %v919_v59 }
  0x1d   : > { %619 = vmatpush.bf16.msra.mxu0 %v952_v44  ;;  %v921_v1 = vld [vmem:[%s1774_s1 + $0x50] sm:$0xf0]  ;;  %v1183_v2 = vld [vmem:[%s1774_s1 + $0x144] sm:$0xf]  ;;  %v1048_v5 = vor.u32 %v1185_v63, %v1047_v61  ;;  %v903_v7 = vld [vmem:[%s1774_s1 + $0x20] sm:$0xf] }
  0x1e   : > { %632 = vmatpush.bf16.msra.mxu1 %v1080_v45  ;;  %645 = vmatpush.bf16.msra.mxu2 %v956_v46  ;;  %v1049_v3 = vld [vmem:[%s1774_s1 + $0x150] sm:$0xf0]  ;;  %v924_v6 = vor.u32 %v1151_v0, %v921_v1  ;;  %v1149_v8 = vld [vmem:[%s1774_s1 + $0x2c] sm:$0xf0]  ;;  %v1031_v9 = vld [vmem:[%s1774_s1 + $0x120] sm:$0xf] }
  0x1f   : > { %658 = vmatpush.bf16.msra.mxu3 %v1084_v50  ;;  %v1052_v10 = vor.u32 %v1183_v2, %v1049_v3  ;;  %v1181_v11 = vld [vmem:[%s1774_s1 + $0x12c] sm:$0xf0]  ;;  %v1147_v12 = vld [vmem:[%s1774_s1 + $0x24] sm:$0xf]  ;;  %v905_v13 = vld [vmem:[%s1774_s1 + $0x30] sm:$0xf0]  ;;  %v904_v16 = vor.u32 %v1149_v8, %v903_v7 }
  0x20   : > { %v1179_v14 = vld [vmem:[%s1774_s1 + $0x124] sm:$0xf]  ;;  %v1033_v15 = vld [vmem:[%s1774_s1 + $0x130] sm:$0xf0]  ;;  %v887_v17 = vld [vmem:[%s1774_s1] sm:$0xf]  ;;  %v1032_v20 = vor.u32 %v1181_v11, %v1031_v9  ;;  %v908_v21 = vor.u32 %v1147_v12, %v905_v13 }
  0x21   : > { %620 = vmatpush.bf16.msra.mxu0 %v936_v56  ;;  %v1145_v18 = vld [vmem:[%s1774_s1 + $0xc] sm:$0xf0]  ;;  %v1015_v19 = vld [vmem:[%s1774_s1 + $0x100] sm:$0xf]  ;;  %v1143_v23 = vld [vmem:[%s1774_s1 + $0x4] sm:$0xf]  ;;  %v1036_v25 = vor.u32 %v1179_v14, %v1033_v15 }
  0x22   : > { %633 = vmatpush.bf16.msra.mxu1 %v1064_v57  ;;  %646 = vmatpush.bf16.msra.mxu2 %v940_v58  ;;  %v1177_v22 = vld [vmem:[%s1774_s1 + $0x10c] sm:$0xf0]  ;;  %v889_v24 = vld [vmem:[%s1774_s1 + $0x10] sm:$0xf0]  ;;  %v1175_v26 = vld [vmem:[%s1774_s1 + $0x104] sm:$0xf]  ;;  %v888_v31 = vor.u32 %v1145_v18, %v887_v17 }
  0x23   : > { %659 = vmatpush.bf16.msra.mxu3 %v1068_v62  ;;  %v1017_v27 = vld [vmem:[%s1774_s1 + $0x110] sm:$0xf0]  ;;  %v1007_v28 = vld [vmem:[%s1774_s1 + $0xe8] sm:$0xf]  ;;  %v1174_v29 = vld [vmem:[%s1774_s1 + $0xf4] sm:$0xf0]  ;;  %v1016_v35 = vor.u32 %v1177_v22, %v1015_v19  ;;  %v892_v36 = vor.u32 %v1143_v23, %v889_v24 }
  0x24   : > { %v1135_v30 = vld [vmem:[%s1774_s1 + $0x1e8] sm:$0xf]  ;;  %v1206_v32 = vld [vmem:[%s1774_s1 + $0x1f4] sm:$0xf0]  ;;  %v1172_v33 = vld [vmem:[%s1774_s1 + $0xec] sm:$0xf]  ;;  %v1020_v39 = vor.u32 %v1175_v26, %v1017_v27  ;;  %v1008_v40 = vor.u32 %v1174_v29, %v1007_v28 }
  0x25   : > { %621 = vmatpush.bf16.msra.mxu0 %v920_v4  ;;  %v1009_v34 = vld [vmem:[%s1774_s1 + $0xf8] sm:$0xf0]  ;;  %v1204_v37 = vld [vmem:[%s1774_s1 + $0x1ec] sm:$0xf]  ;;  %s1788_s13 = smov (!%p199_p5, %s1273_s13), 1  ;;  %s1790_s12 = smov (!%p201_p6, %s1269_s12), 1  ;;  %v1136_v43 = vor.u32 %v1206_v32, %v1135_v30 }
  0x26   : > { %634 = vmatpush.bf16.msra.mxu1 %v1048_v5  ;;  %647 = vmatpush.bf16.msra.mxu2 %v924_v6  ;;  %v1137_v38 = vld [vmem:[%s1774_s1 + $0x1f8] sm:$0xf0]  ;;  %v991_v41 = vld [vmem:[%s1774_s1 + $0xc8] sm:$0xf]  ;;  %v1170_v42 = vld [vmem:[%s1774_s1 + $0xd4] sm:$0xf0]  ;;  %v1012_v44 = vor.u32 %v1172_v33, %v1009_v34 }
  0x27   : > { %660 = vmatpush.bf16.msra.mxu3 %v1052_v10  ;;  %v1119_v45 = vld [vmem:[%s1774_s1 + $0x1c8] sm:$0xf]  ;;  %v1202_v46 = vld [vmem:[%s1774_s1 + $0x1d4] sm:$0xf0]  ;;  %s882_s4 = sshll.u32 %s1788_s13, 2  ;;  %s884_s5 = sshll.u32 %s1788_s13, 3  ;;  %v1140_v47 = vor.u32 %v1204_v37, %v1137_v38  ;;  %v992_v52 = vor.u32 %v1170_v42, %v991_v41 }
  0x28   : > { %v1168_v48 = vld [vmem:[%s1774_s1 + $0xcc] sm:$0xf]  ;;  %v993_v49 = vld [vmem:[%s1774_s1 + $0xd8] sm:$0xf0]  ;;  %s881_s10 = sshll.u32 %s1790_s12, 1  ;;  %s883_s11 = sshll.u32 %s1790_s12, 2  ;;  %v1120_v55 = vor.u32 %v1202_v46, %v1119_v45 }
  0x29   : > { %622 = vmatpush.bf16.msra.mxu0 %v904_v16  ;;  %v1200_v50 = vld [vmem:[%s1774_s1 + $0x1cc] sm:$0xf]  ;;  %v1121_v51 = vld [vmem:[%s1774_s1 + $0x1d8] sm:$0xf0]  ;;  %s205_s22 = sadd.s32 %s882_s4, %s881_s10  ;;  %s1587_s23 = sadd.s32 %s884_s5, %s883_s11  ;;  %v975_v53 = vld [vmem:[%s1774_s1 + $0xa8] sm:$0xf]  ;;  %v996_v56 = vor.u32 %v1168_v48, %v993_v49 }
  0x2a   : > { %635 = vmatpush.bf16.msra.mxu1 %v1032_v20  ;;  %648 = vmatpush.bf16.msra.mxu2 %v908_v21  ;;  %s206_s12 = scalar_lea.vmem %s1773_s0, %s205_s22  ;;  %v1166_v54 = vld [vmem:[%s1774_s1 + $0xb4] sm:$0xf0]  ;;  %v1103_v58 = vld [vmem:[%s1774_s1 + $0x1a8] sm:$0xf]  ;;  %v1124_v60 = vor.u32 %v1200_v50, %v1121_v51  ;;  %v1164_v61 = vld [vmem:[%s1774_s1 + $0xac] sm:$0xf]  ;;  %s215_s13 = scalar_lea.vmem %s1776_s3, %s1587_s23 }
  0x2b   : > { %661 = vmatpush.bf16.msra.mxu3 %v1036_v25  ;;  %v221_v57 = vld [vmem:[%s206_s12] sm:$0x3]  ;;  %v1198_v59 = vld [vmem:[%s1774_s1 + $0x1b4] sm:$0xf0]  ;;  %v977_v62 = vld [vmem:[%s1774_s1 + $0xb8] sm:$0xf0]  ;;  %v976_v63 = vor.u32 %v1166_v54, %v975_v53 }
  0x2c   : > { %291 = vst [vmem:[#allocation1] ss:$9 sm:$0xff] %v221_v57  ;;  %v1196_v0 = vld [vmem:[%s1774_s1 + $0x1ac] sm:$0xf]  ;;  %v1105_v1 = vld [vmem:[%s1774_s1 + $0x1b8] sm:$0xf0]  ;;  %v1104_v2 = vor.u32 %v1198_v59, %v1103_v58  ;;  %v980_v3 = vor.u32 %v1164_v61, %v977_v62 }
  0x2d   : > { %623 = vmatpush.bf16.msra.mxu0 %v888_v31  ;;  %v959_v4 = vld [vmem:[%s1774_s1 + $0x88] sm:$0xf]  ;;  %v1162_v5 = vld [vmem:[%s1774_s1 + $0x94] sm:$0xf0]  ;;  %v1160_v8 = vld [vmem:[%s1774_s1 + $0x8c] sm:$0xf]  ;;  %v1108_v10 = vor.u32 %v1196_v0, %v1105_v1 }
  0x2e   : > { %636 = vmatpush.bf16.msra.mxu1 %v1016_v35  ;;  %649 = vmatpush.bf16.msra.mxu2 %v892_v36  ;;  %v1087_v6 = vld [vmem:[%s1774_s1 + $0x188] sm:$0xf]  ;;  %v1194_v7 = vld [vmem:[%s1774_s1 + $0x194] sm:$0xf0]  ;;  %v961_v9 = vld [vmem:[%s1774_s1 + $0x98] sm:$0xf0]  ;;  %v960_v12 = vor.u32 %v1162_v5, %v959_v4 }
  0x2f   : > { %662 = vmatpush.bf16.msra.mxu3 %v1020_v39  ;;  %v1192_v11 = vld [vmem:[%s1774_s1 + $0x18c] sm:$0xf]  ;;  %v1089_v13 = vld [vmem:[%s1774_s1 + $0x198] sm:$0xf0]  ;;  %v943_v14 = vld [vmem:[%s1774_s1 + $0x68] sm:$0xf]  ;;  %v1088_v18 = vor.u32 %v1194_v7, %v1087_v6  ;;  %v964_v19 = vor.u32 %v1160_v8, %v961_v9 }
  0x30   : > { %v1158_v15 = vld [vmem:[%s1774_s1 + $0x74] sm:$0xf0]  ;;  %v1071_v20 = vld [vmem:[%s1774_s1 + $0x168] sm:$0xf]  ;;  %v1156_v22 = vld [vmem:[%s1774_s1 + $0x6c] sm:$0xf]  ;;  %v1092_v24 = vor.u32 %v1192_v11, %v1089_v13 }
  0x31   : > { %668 = vmatpush.bf16.msrb.mxu0 %v1008_v40  ;;  %v1190_v21 = vld [vmem:[%s1774_s1 + $0x174] sm:$0xf0]  ;;  %v945_v23 = vld [vmem:[%s1774_s1 + $0x78] sm:$0xf0]  ;;  %v944_v25 = vor.u32 %v1158_v15, %v943_v14  ;;  %v1188_v26 = vld [vmem:[%s1774_s1 + $0x16c] sm:$0xf] }
  0x32   : > { %681 = vmatpush.bf16.msrb.mxu1 %v1136_v43  ;;  %694 = vmatpush.bf16.msrb.mxu2 %v1012_v44  ;;  %v1073_v27 = vld [vmem:[%s1774_s1 + $0x178] sm:$0xf0]  ;;  %v1072_v28 = vor.u32 %v1190_v21, %v1071_v20  ;;  %v948_v29 = vor.u32 %v1156_v22, %v945_v23  ;;  %v927_v30 = vld [vmem:[%s1774_s1 + $0x48] sm:$0xf]  ;;  %v1154_v31 = vld [vmem:[%s1774_s1 + $0x54] sm:$0xf0] }
  0x33   : > { %707 = vmatpush.bf16.msrb.mxu3 %v1140_v47  ;;  %v1646_v16 = vld [vmem:[#allocation1] sm:$0xff]  ;;  %v1648_v17 = vld [vmem:[#allocation1 + $0x9] sm:$0xff]  ;;  %v1186_v33 = vld [vmem:[%s1774_s1 + $0x154] sm:$0xf0]  ;;  %v1076_v36 = vor.u32 %v1188_v26, %v1073_v27  ;;  %v928_v37 = vor.u32 %v1154_v31, %v927_v30  ;;  %vm729_vm0 = vcmask 1045508   ;;  %vm727_vm1 = vcmask 1041408  }
  0x34   : > { %650 = vmatmul.bf16.vlgmr.msra.gmra.mxu2 %v1646_v16  ;;  %663 = vmatmul.bf16.vlgmr.msra.gmra.mxu3 %v1648_v17  ;;  %v1055_v32 = vld [vmem:[%s1774_s1 + $0x148] sm:$0xf]  ;;  %v1152_v34 = vld [vmem:[%s1774_s1 + $0x4c] sm:$0xf]  ;;  %v929_v35 = vld [vmem:[%s1774_s1 + $0x58] sm:$0xf0] }
  0x35   : > { %669 = vmatpush.bf16.msrb.mxu0 %v992_v52  ;;  %637 = vmatmul.bf16.vlgmr.msra.gmra.mxu1 %v1648_v17  ;;  %v1184_v38 = vld [vmem:[%s1774_s1 + $0x14c] sm:$0xf]  ;;  %v1057_v39 = vld [vmem:[%s1774_s1 + $0x158] sm:$0xf0]  ;;  %v1056_v40 = vor.u32 %v1186_v33, %v1055_v32  ;;  %v932_v41 = vor.u32 %v1152_v34, %v929_v35  ;;  %v911_v42 = vld [vmem:[%s1774_s1 + $0x28] sm:$0xf] }
  0x36   : > { %682 = vmatpush.bf16.msrb.mxu1 %v1120_v55  ;;  %695 = vmatpush.bf16.msrb.mxu2 %v996_v56  ;;  %v1150_v43 = vld [vmem:[%s1774_s1 + $0x34] sm:$0xf0]  ;;  %v1039_v44 = vld [vmem:[%s1774_s1 + $0x128] sm:$0xf]  ;;  %v1148_v46 = vld [vmem:[%s1774_s1 + $0x2c] sm:$0xf]  ;;  %v1060_v48 = vor.u32 %v1184_v38, %v1057_v39 }
  0x37   : > { %708 = vmatpush.bf16.msrb.mxu3 %v1124_v60  ;;  %624 = vmatmul.bf16.vlgmr.msra.gmra.mxu0 %v1646_v16  ;;  %v1182_v45 = vld [vmem:[%s1774_s1 + $0x134] sm:$0xf0]  ;;  %v913_v47 = vld [vmem:[%s1774_s1 + $0x38] sm:$0xf0]  ;;  %v912_v49 = vor.u32 %v1150_v43, %v911_v42  ;;  %v1180_v50 = vld [vmem:[%s1774_s1 + $0x12c] sm:$0xf] }
  0x38   : > { %v1041_v51 = vld [vmem:[%s1774_s1 + $0x138] sm:$0xf0]  ;;  %v1040_v52 = vor.u32 %v1182_v45, %v1039_v44  ;;  %v916_v53 = vor.u32 %v1148_v46, %v913_v47  ;;  %v895_v54 = vld [vmem:[%s1774_s1 + $0x8] sm:$0xf]  ;;  %v1146_v55 = vld [vmem:[%s1774_s1 + $0x14] sm:$0xf0] }
  0x39   : > { %670 = vmatpush.bf16.msrb.mxu0 %v976_v63  ;;  %v1023_v56 = vld [vmem:[%s1774_s1 + $0x108] sm:$0xf]  ;;  %v1178_v57 = vld [vmem:[%s1774_s1 + $0x114] sm:$0xf0]  ;;  %v1144_v58 = vld [vmem:[%s1774_s1 + $0xc] sm:$0xf]  ;;  %v1044_v60 = vor.u32 %v1180_v50, %v1041_v51  ;;  %v896_v61 = vor.u32 %v1146_v55, %v895_v54 }
  0x3a   : > { %683 = vmatpush.bf16.msrb.mxu1 %v1104_v2  ;;  %696 = vmatpush.bf16.msrb.mxu2 %v980_v3  ;;  %v897_v59 = vld [vmem:[%s1774_s1 + $0x18] sm:$0xf0]  ;;  %v1176_v62 = vld [vmem:[%s1774_s1 + $0x10c] sm:$0xf]  ;;  %v1024_v0 = vor.u32 %v1178_v57, %v1023_v56  ;;  %v740_v11 = vld [vmem:[%s1775_s2] sm:$0xf] }
  0x3b   : > { %709 = vmatpush.bf16.msrb.mxu3 %v1108_v10  ;;  %v1025_v63 = vld [vmem:[%s1774_s1 + $0x118] sm:$0xf0]  ;;  %v900_v1 = vor.u32 %v1144_v58, %v897_v59  ;;  %v743_v13 = vperm.slane %v740_v11, 1  ;;  %v744_v15 = vperm.slane %v740_v11, 2  ;;  %vm731_vm2 = vcmask 1043456  }
  0x3c   : > { %v1028_v2 = vor.u32 %v1176_v62, %v1025_v63  ;;  %vm774_vm4 = vcmask 1040384   ;;  %vm778_vm5 = vcmask 1042434  }
  0x3d   : > { %671 = vmatpush.bf16.msrb.mxu0 %v960_v12  ;;  %v747_v21 = vrot.slane %v744_v15, 4 }
  0x3e   : > { %684 = vmatpush.bf16.msrb.mxu1 %v1088_v18  ;;  %697 = vmatpush.bf16.msrb.mxu2 %v964_v19  ;;  %v745_v18 = vperm.slane %v740_v11, 3  ;;  %v746_v19 = vrot.slane %v743_v13, 6 }
  0x3f   : > { %710 = vmatpush.bf16.msrb.mxu3 %v1092_v24 }
  0x40   : > { %v748_v22 = vrot.slane %v745_v18, 2 }
  0x41   : > { %672 = vmatpush.bf16.msrb.mxu0 %v944_v25 }
  0x42   : > { %685 = vmatpush.bf16.msrb.mxu1 %v1072_v28  ;;  %698 = vmatpush.bf16.msrb.mxu2 %v948_v29  ;;  %v750_v32 = vsel %vm729_vm0, %v747_v21, %v748_v22 }
  0x43   : > { %711 = vmatpush.bf16.msrb.mxu3 %v1076_v36 }
  0x45   : > { %673 = vmatpush.bf16.msrb.mxu0 %v928_v37 }
  0x46   : > { %686 = vmatpush.bf16.msrb.mxu1 %v1056_v40  ;;  %699 = vmatpush.bf16.msrb.mxu2 %v932_v41 }
  0x47   : > { %712 = vmatpush.bf16.msrb.mxu3 %v1060_v48 }
  0x49   : > { %674 = vmatpush.bf16.msrb.mxu0 %v912_v49 }
  0x4a   : > { %687 = vmatpush.bf16.msrb.mxu1 %v1040_v52  ;;  %700 = vmatpush.bf16.msrb.mxu2 %v916_v53 }
  0x4b   : > { %713 = vmatpush.bf16.msrb.mxu3 %v1044_v60 }
  0x4d   : > { %675 = vmatpush.bf16.msrb.mxu0 %v896_v61 }
  0x4e   : > { %688 = vmatpush.bf16.msrb.mxu1 %v1024_v0  ;;  %701 = vmatpush.bf16.msrb.mxu2 %v900_v1 }
  0x4f   : > { %714 = vmatpush.bf16.msrb.mxu3 %v1028_v2 }
  0x50   : > { %676 = vmatmul.bf16.vlgmr.msrb.gmra.mxu0 %v1646_v16 }
  0x51   : > { %689 = vmatmul.bf16.vlgmr.msrb.gmra.mxu1 %v1648_v17  ;;  %702 = vmatmul.bf16.vlgmr.msrb.gmra.mxu2 %v1646_v16  ;;  %v742_v16 = vperm.slane %v740_v11, 0 }
  0x52   : > { %715 = vmatmul.bf16.vlgmr.msrb.gmra.mxu3 %v1648_v17 }
  0x53   : > { %v749_v26 = vsel %vm727_vm1, %v742_v16, %v746_v19 }
  0x54   : > { %v751_v34 = vsel %vm731_vm2, %v749_v26, %v750_v32 }
  0xb2   : > { %v638_v4 = vpop.f32.mrf.mxu1 }
  0xb4   : > { %v625_v3 = vpop.f32.mrf.mxu0 }
  0xb5   : > { %v639_v25 = vadd.f32 %v638_v4, %v625_v3 }
  0xb7   : > { %v651_v5 = vpop.f32.mrf.mxu2  ;;  %v664_v6 = vpop.f32.mrf.mxu3 }
  0xb8   : > { %v665_v17 = vadd.f32 %v664_v6, %v651_v5 }
  0xba   : > { %v640_v8 = vpop.f32.mrf.mxu1  ;;  %v724_v29 = vrot.slane %v665_v17, 6 }
  0xbc   : > { %v627_v7 = vpop.f32.mrf.mxu0  ;;  %v728_v35 = vsel %vm727_vm1, %v639_v25, %v724_v29 }
  0xbf   : > { %v653_v9 = vpop.f32.mrf.mxu2  ;;  %v666_v10 = vpop.f32.mrf.mxu3 }
  0xcd   : > { %v677_v12 = vpop.f32.mrf.mxu0 }
  0xce   : > { %v690_v14 = vpop.f32.mrf.mxu1 }
  0xcf   : > { %v691_v20 = vadd.f32 %v690_v14, %v677_v12 }
  0xd1   : > { %v725_v30 = vrot.slane %v691_v20, 4 }
  0xd4   : > { %v703_v23 = vpop.f32.mrf.mxu2 }
  0xd5   : > { %v679_v24 = vpop.f32.mrf.mxu0  ;;  %v716_v27 = vpop.f32.mrf.mxu3 }
  0xd6   : > { %v692_v28 = vpop.f32.mrf.mxu1  ;;  %v717_v31 = vadd.f32 %v716_v27, %v703_v23 }
  0xd8   : > { %v726_v33 = vrot.slane %v717_v31, 2 }
  0xda   : > { %v730_v36 = vsel %vm729_vm0, %v725_v30, %v726_v33 }
  0xdb   : > { %v732_v37 = vsel %vm731_vm2, %v728_v35, %v730_v36 }
  0xdc   : > { %v705_v38 = vpop.f32.mrf.mxu2  ;;  %v753_v39 = vadd.f32 %v751_v34, %v732_v37 }
  0xdd   : > { %v718_v40 = vpop.f32.mrf.mxu3 }
  0xde   : > { %vm754_vm3 = vcmp.ge.f32.partialorder %v753_v39, 0.0  ;;  %v755_v41 = vmul.f32 0.1, %v753_v39 }
  0xe0   : > { %v756_v42 = vsel %vm754_vm3, %v753_v39, %v755_v41 }
  0xe1   : > { %758 = vst [vmem:[#allocation1] ss:$4 sm:$0xff] %v756_v42 }
  0xe8   : > { %v759_v43 = vld.sshfl [vmem:[#allocation1] sm:$0xff pattern:$0x73625140]  ;;  %v760_v44 = vld.sshfl [vmem:[#allocation1 + $0x8] sm:$0xff pattern:$0x73625140] }
  0xe9   : > { %v761_v45 = vld.sshfl [vmem:[#allocation1 + $0x10] sm:$0xff pattern:$0x73625140]  ;;  %v762_v46 = vld.sshfl [vmem:[#allocation1 + $0x18] sm:$0xff pattern:$0x73625140]  ;;  %v767_v47 = vpack.c.bf16 %v760_v44, %v759_v43 }
  0xea   : > { %v768_v48 = vpack.c.bf16 %v762_v46, %v761_v45 }
  0xeb   : > { %v771_v49 = vrot.slane %v767_v47, 3 }
  0xec   : > { %v772_v50 = vrot.slane %v768_v48, 6  ;;  %v773_v51 = vrot.slane %v768_v48, 1 }
  0xed   : > { %v777_v52 = vsel %vm774_vm4, %v767_v47, %v771_v49 }
  0xee   : > { %v781_v53 = vsel %vm778_vm5, %v772_v50, %v773_v51 }
  0xef   : > { %v782_v54 = vsel %vm727_vm1, %v777_v52, %v781_v53 }
  0xf0   : > { %784 = vst [vmem:[%s215_s13] sm:$0xf] %v782_v54 }
  0xf1 PF: > { %s13_s16 = sadd.s32 1, %s1285_s16   ;;  %s1777_s12 = smov %s1277_s14 }
  0xf2   : > { %p10_p7 = scmp.ge.s32.totalorder %s13_s16, 6   ;;  %s1778_s13 = smov %s1281_s15 }
  0xf3   : > { %s1779_s14 = smov %s1782_s17  ;;  %s1780_s15 = smov %s1786_s18 }
  0xf4   :  { %12 = sbr.rel (!%p10_p7) target bundleno = 3 (0x3), region = 71 }

// kernel: flownet_encoder_forward.11
= control target key start
LH: loop header
LB: loop body
LE: loop exit
PB: predicated region body
PF: predicated region fallthrough
CT: control target
= control target key end

     0   :  { %s864_s12 = smov 0   ;;  %s866_s13 = smov 0   ;;  %s1000_s0 = inlined_call_operand.vmem [shape: bf16[2,1,1,512], index: 0, kind: input, shape index: {}]   ;;  %s1001_s1 = inlined_call_operand.vmem [shape: bf16[1,1,512,128], index: 1, kind: input, shape index: {}]   ;;  %s1002_s2 = inlined_call_operand.vmem [shape: f32[1,128], index: 2, kind: input, shape index: {}]   ;;  %s1003_s3 = inlined_call_operand.vmem [shape: f32[2,1,1,128], index: 3, kind: output, shape index: {}]  }
   0x1   :  { %s868_s14 = smov 0  }
   0x2 LB: > { %s32_s15 = sadd.s32 1, %s837_s13  ;;  %p630_p0 = scmp.ge.s32.totalorder %s841_s14, 1  ;;  %s841_s14 = sphi %s868_s14, %s13_s14   ;;  %s837_s13 = sphi %s866_s13, %s1005_s13   ;;  %s833_s12 = sphi %s864_s12, %s1004_s12  }
   0x3   : > { %p34_p1 = scmp.ge.s32.totalorder %s32_s15, 2  ;;  %p167_p2 = scmp.lt.s32.totalorder %s841_s14, 3 }
   0x5   : > { %s1007_s15 = smov (%p34_p1, %s32_s15), 0  ;;  %p168_p3 = pnand %p630_p0, %p167_p2 }
   0x6   : > { %p197_p4 = scmp.lt.s32.totalorder (!%p168_p3), %s833_s12, 1 }
   0x7   : > { %171 = sbr.rel (%p168_p3) target bundleno = 197 (0xc5), region = 32 }
   0xc   : > { %v769_v0 = vld [vmem:[%s1001_s1 + $0x38] sm:$0xff]  ;;  %v768_v4 = vld [vmem:[%s1001_s1 + $0x30] sm:$0xff]  ;;  %s1009_s12 = smov (!%p197_p4, %s833_s12), 1  ;;  %v767_v8 = vld [vmem:[%s1001_s1 + $0x28] sm:$0xff]  ;;  %v843_v37 = vmov 0.0  }
   0xd   : > { %v777_v1 = vld [vmem:[%s1001_s1 + $0x78] sm:$0xff]  ;;  %488 = vmatpush.bf16.msra.mxu0 %v769_v0  ;;  %v776_v5 = vld [vmem:[%s1001_s1 + $0x70] sm:$0xff]  ;;  %s631_s5 = sshll.u32 %s1009_s12, 2  ;;  %v775_v9 = vld [vmem:[%s1001_s1 + $0x68] sm:$0xff]  ;;  %216 = vst [vmem:[#allocation2] sm:$0x1] %v843_v37  ;;  %s211_s19 = scalar_lea.vmem %s1003_s3, %s1009_s12 }
   0xe   : > { %v785_v2 = vld [vmem:[%s1001_s1 + $0xb8] sm:$0xff]  ;;  %501 = vmatpush.bf16.msra.mxu1 %v777_v1  ;;  %v784_v6 = vld [vmem:[%s1001_s1 + $0xb0] sm:$0xff]  ;;  %v783_v10 = vld [vmem:[%s1001_s1 + $0xa8] sm:$0xff]  ;;  %s204_s20 = scalar_lea.vmem %s1000_s0, %s631_s5 }
   0xf   : > { %v793_v3 = vld [vmem:[%s1001_s1 + $0xf8] sm:$0xff]  ;;  %514 = vmatpush.bf16.msra.mxu2 %v785_v2  ;;  %v792_v7 = vld [vmem:[%s1001_s1 + $0xf0] sm:$0xff]  ;;  %v791_v11 = vld [vmem:[%s1001_s1 + $0xe8] sm:$0xff] }
  0x10   : > { %527 = vmatpush.bf16.msra.mxu3 %v793_v3  ;;  %v766_v12 = vld [vmem:[%s1001_s1 + $0x20] sm:$0xff]  ;;  %v765_v17 = vld [vmem:[%s1001_s1 + $0x18] sm:$0xff]  ;;  %v764_v21 = vld [vmem:[%s1001_s1 + $0x10] sm:$0xff] }
  0x11   : > { %489 = vmatpush.bf16.msra.mxu0 %v768_v4  ;;  %v774_v13 = vld [vmem:[%s1001_s1 + $0x60] sm:$0xff]  ;;  %v773_v18 = vld [vmem:[%s1001_s1 + $0x58] sm:$0xff]  ;;  %v772_v22 = vld [vmem:[%s1001_s1 + $0x50] sm:$0xff] }
  0x12   : > { %502 = vmatpush.bf16.msra.mxu1 %v776_v5  ;;  %v217_v14 = vld [vmem:[%s204_s20] sm:$0xf]  ;;  %v781_v19 = vld [vmem:[%s1001_s1 + $0x98] sm:$0xff]  ;;  %v780_v23 = vld [vmem:[%s1001_s1 + $0x90] sm:$0xff] }
  0x13   : > { %515 = vmatpush.bf16.msra.mxu2 %v784_v6  ;;  %v782_v15 = vld [vmem:[%s1001_s1 + $0xa0] sm:$0xff]  ;;  %287 = vst [vmem:[#allocation1] ss:$9 sm:$0xff] %v217_v14  ;;  %v789_v20 = vld [vmem:[%s1001_s1 + $0xd8] sm:$0xff]  ;;  %v788_v24 = vld [vmem:[%s1001_s1 + $0xd0] sm:$0xff] }
  0x14   : > { %528 = vmatpush.bf16.msra.mxu3 %v792_v7  ;;  %v790_v16 = vld [vmem:[%s1001_s1 + $0xe0] sm:$0xff]  ;;  %v763_v25 = vld [vmem:[%s1001_s1 + $0x8] sm:$0xff] }
  0x15   : > { %490 = vmatpush.bf16.msra.mxu0 %v767_v8  ;;  %v771_v26 = vld [vmem:[%s1001_s1 + $0x48] sm:$0xff]  ;;  %v762_v29 = vld [vmem:[%s1001_s1] sm:$0xff] }
  0x16   : > { %503 = vmatpush.bf16.msra.mxu1 %v775_v9  ;;  %v779_v27 = vld [vmem:[%s1001_s1 + $0x88] sm:$0xff]  ;;  %v770_v30 = vld [vmem:[%s1001_s1 + $0x40] sm:$0xff] }
  0x17   : > { %516 = vmatpush.bf16.msra.mxu2 %v783_v10  ;;  %v787_v28 = vld [vmem:[%s1001_s1 + $0xc8] sm:$0xff]  ;;  %v778_v31 = vld [vmem:[%s1001_s1 + $0x80] sm:$0xff] }
  0x18   : > { %529 = vmatpush.bf16.msra.mxu3 %v791_v11  ;;  %v786_v32 = vld [vmem:[%s1001_s1 + $0xc0] sm:$0xff]  ;;  %v285_v46 = vld [vmem:[#allocation2] sm:$0x1] }
  0x19   : > { %491 = vmatpush.bf16.msra.mxu0 %v766_v12  ;;  %v546_v51 = vld [vmem:[%s1002_s2] sm:$0x1] }
  0x1a   : > { %504 = vmatpush.bf16.msra.mxu1 %v774_v13  ;;  %v288_v33 = vld [vmem:[#allocation1] sm:$0xff]  ;;  %v289_v34 = vld [vmem:[#allocation1 + $0x9] sm:$0xff]  ;;  %v290_v35 = vld [vmem:[#allocation1 + $0x12] sm:$0xff] }
  0x1b   : > { %517 = vmatpush.bf16.msra.mxu2 %v782_v15  ;;  %v291_v36 = vld [vmem:[#allocation1 + $0x1b] sm:$0xff] }
  0x1c   : > { %530 = vmatpush.bf16.msra.mxu3 %v790_v16 }
  0x1d   : > { %492 = vmatpush.bf16.msra.mxu0 %v765_v17 }
  0x1e   : > { %505 = vmatpush.bf16.msra.mxu1 %v773_v18 }
  0x1f   : > { %518 = vmatpush.bf16.msra.mxu2 %v781_v19 }
  0x20   : > { %531 = vmatpush.bf16.msra.mxu3 %v789_v20 }
  0x21   : > { %493 = vmatpush.bf16.msra.mxu0 %v764_v21 }
  0x22   : > { %506 = vmatpush.bf16.msra.mxu1 %v772_v22 }
  0x23   : > { %519 = vmatpush.bf16.msra.mxu2 %v780_v23 }
  0x24   : > { %532 = vmatpush.bf16.msra.mxu3 %v788_v24 }
  0x25   : > { %494 = vmatpush.bf16.msra.mxu0 %v763_v25 }
  0x26   : > { %507 = vmatpush.bf16.msra.mxu1 %v771_v26 }
  0x27   : > { %520 = vmatpush.bf16.msra.mxu2 %v779_v27 }
  0x28   : > { %533 = vmatpush.bf16.msra.mxu3 %v787_v28 }
  0x29   : > { %495 = vmatpush.bf16.msra.mxu0 %v762_v29 }
  0x2a   : > { %508 = vmatpush.bf16.msra.mxu1 %v770_v30 }
  0x2b   : > { %521 = vmatpush.bf16.msra.mxu2 %v778_v31 }
  0x2c   : > { %534 = vmatpush.bf16.msra.mxu3 %v786_v32  ;;  %496 = vmatmul.bf16.vlgmr.msra.gmra.mxu0 %v288_v33 }
  0x2d   : > { %509 = vmatmul.bf16.vlgmr.msra.gmra.mxu1 %v289_v34 }
  0x2e   : > { %522 = vmatmul.bf16.vlgmr.msra.gmra.mxu2 %v290_v35 }
  0x2f   : > { %535 = vmatmul.bf16.vlgmr.msra.gmra.mxu3 %v291_v36 }
  0xa9   : > { %v497_v38 = vpop.f32.mrf.mxu0 }
  0xaa   : > { %v510_v39 = vpop.f32.mrf.mxu1 }
  0xab   : > { %v511_v40 = vadd.f32 %v510_v39, %v497_v38 }
  0xb1   : > { %v523_v41 = vpop.f32.mrf.mxu2  ;;  %v499_v44 = vpop.f32.mrf.mxu0 }
  0xb2   : > { %v536_v42 = vpop.f32.mrf.mxu3  ;;  %v524_v43 = vadd.f32 %v523_v41, %v511_v40  ;;  %v512_v45 = vpop.f32.mrf.mxu1 }
  0xb4   : > { %v537_v47 = vadd.f32 %v536_v42, %v524_v43 }
  0xb6   : > { %v540_v48 = vadd.f32 %v537_v47, %v285_v46 }
  0xb8   : > { %541 = vst [vmem:[#allocation2] sm:$0x1] %v540_v48 }
  0xb9   : > { %v525_v49 = vpop.f32.mrf.mxu2 }
  0xba   : > { %v538_v50 = vpop.f32.mrf.mxu3 }
  0xbf   : > { %v545_v52 = vld [vmem:[#allocation2] sm:$0x1] }
  0xc0   : > { %v547_v53 = vadd.f32 %v546_v51, %v545_v52 }
  0xc2   : > { %v548_v54 = vmul.f32 20.0, %v547_v53 }
  0xc4   : > { %549 = vst [vmem:[%s211_s19] sm:$0x1] %v548_v54 }
  0xc5 PF: > { %s13_s14 = sadd.s32 1, %s841_s14   ;;  %s1004_s12 = smov %s837_s13 }
  0xc6   : > { %p10_p5 = scmp.ge.s32.totalorder %s13_s14, 4   ;;  %s1005_s13 = smov %s1007_s15 }
  0xc8   :  { %12 = sbr.rel (!%p10_p5) target bundleno = 2 (0x2), region = 71 }

// kernel: flownet_encoder_forward.10
= control target key start
LH: loop header
LB: loop body
LE: loop exit
PB: predicated region body
PF: predicated region fallthrough
CT: control target
= control target key end

     0   :  { %s5754_s12 = smov 0   ;;  %s5756_s13 = smov 0   ;;  %s6745_s0 = inlined_call_operand.vmem [shape: bf16[2,4,4,512], index: 0, kind: input, shape index: {}]   ;;  %s6746_s1 = inlined_call_operand.vmem [shape: bf16[3,3,512,512], index: 1, kind: input, shape index: {}]   ;;  %s6747_s2 = inlined_call_operand.vmem [shape: f32[1,512], index: 2, kind: input, shape index: {}]   ;;  %s6748_s3 = inlined_call_operand.vmem [shape: bf16[2,2,2,512], index: 3, kind: output, shape index: {}]  }
   0x1   :  { %s5758_s14 = smov 0   ;;  %s5760_s15 = smov 0  }
   0x2   :  { %s5762_s16 = smov 0   ;;  %s5764_s17 = smov 0  }
   0x3   :  { %s5766_s18 = smov 0  }
   0x4 LB: > { %s25_s19 = sadd.s32 1, %s5719_s15  ;;  %s28_s20 = sadd.s32 1, %s5723_s16  ;;  %s5731_s18 = sphi %s5766_s18, %s13_s18   ;;  %s5727_s17 = sphi %s5764_s17, %s6754_s17   ;;  %s5723_s16 = sphi %s5762_s16, %s6753_s16   ;;  %s5719_s15 = sphi %s5760_s15, %s6752_s15   ;;  %s5715_s14 = sphi %s5758_s14, %s6751_s14   ;;  %s5711_s13 = sphi %s5756_s13, %s6750_s13   ;;  %s5707_s12 = sphi %s5754_s12, %s6749_s12  }
   0x5   : > { %p26_p0 = scmp.ge.s32.totalorder %s25_s19, 3  ;;  %p3430_p1 = scmp.ge.s32.totalorder %s5731_s18, 1 }
   0x6   : > { %p168_p2 = scmp.lt.s32.totalorder %s5731_s18, 13  ;;  %s32_s21 = sadd.s32 1, %s5727_s17 }
   0x7   : > { %s6756_s19 = smov (%p26_p0, %s25_s19), 0  ;;  %s6758_s20 = smov (!%p26_p0, %s28_s20), %s5723_s16 }
   0x8   : > { %p169_p3 = pnand %p3430_p1, %p168_p2  ;;  %p30_p4 = scmp.ge.s32.totalorder %s6758_s20, 2 }
   0x9   : > { %s200_s22 = sadd.s32 (!%p169_p3), %s5707_s12, %s5711_s13  ;;  %p201_p6 = scmp.lt.s32.totalorder (!%p169_p3), %s5715_s14, 1 }
   0xa   : > { %s6760_s20 = smov (%p30_p4, %s6758_s20), 0  ;;  %s6762_s21 = smov (!%p30_p4, %s32_s21), %s5727_s17 }
   0xb   : > { %p34_p5 = scmp.ge.s32.totalorder %s6762_s21, 2  ;;  %172 = sbr.rel (%p169_p3) target bundleno = 590 (0x24e), region = 32 }
   0xc   : > { %p203_p7 = scmp.lt.s32.totalorder (!%p169_p3), %s200_s22, 3  ;;  %p213_p8 = scmp.lt.s32.totalorder (!%p169_p3), %s5711_s13, 1 }
   0xd   : > { %s6764_s21 = smov (%p34_p5, %s6762_s21), 0  ;;  %p3436_p9 = scmp.ne.s32.totalorder (!%p169_p3), %s5707_s12, 0 }
  0x10   : > { %s6766_s14 = smov (!%p201_p6, %s5715_s14), 1  ;;  %s6768_s22 = smov (!%p203_p7, %s200_s22), 3 }
  0x11   : > { %s3432_s23 = sshll.u32 %s6766_s14, 4  ;;  %s3431_s24 = sshll.u32 %s6768_s22, 2 }
  0x12   : > { %s207_s25 = sadd.s32 %s3432_s23, %s3431_s24  ;;  %s3435_s30 = sshll.u32 %s6766_s14, 3 }
  0x13   : > { %s3433_s26 = sshll.u32 %s207_s25, 1  ;;  %s6770_s13 = smov (!%p213_p8, %s5711_s13), 1 }
  0x14   : > { %s5806_s29 = scalar_lea.vmem %s6745_s0, %s3433_s26  ;;  %s3434_s4 = sshll.u32 %s6770_s13, 2 }
  0x15   : > { %s5809_s5 = sadd.s32 %s3435_s30, %s3434_s4  ;;  %222 = sbr.rel (%p3436_p9) target bundleno = 28 (0x1c), region = 36 }
  0x16   : > { %s218_s8 = scalar_lea.vmem %s6748_s3, %s5809_s5 }
  0x1a   : > { %v5733_v0 = vmov 0.0  }
  0x1b   : > { %223 = vst [vmem:[#allocation2] sm:$0xff] %v5733_v0 }
  0x1c PF: > { %s5235_s9 = smul.u32 3072, %s5707_s12  ;;  %vm1222_vm0 = vcmask 1041408   ;;  %vm1224_vm1 = vcmask 1045508   ;;  %vm1226_vm2 = vcmask 1043456   ;;  %p5232_p10 = scmp.ne.s32.totalorder %s5707_s12, 2 }
  0x1e   : > { %s5820_s14 = scalar_lea.vmem %s6746_s1, %s5235_s9 }
  0x1f   : > { %v3552_v1 = vld [vmem:[%s5820_s14 + $0xe0] sm:$0xf]  ;;  %v5266_v2 = vld [vmem:[%s5820_s14 + $0xec] sm:$0xf0] }
  0x20   : > { %v3680_v3 = vld [vmem:[%s5820_s14 + $0x1e0] sm:$0xf]  ;;  %v3553_v4 = vor.u32 %v5266_v2, %v3552_v1  ;;  %v5298_v5 = vld [vmem:[%s5820_s14 + $0x1ec] sm:$0xf0] }
  0x21   : > { %v3808_v6 = vld [vmem:[%s5820_s14 + $0x2e0] sm:$0xf]  ;;  %v5330_v7 = vld [vmem:[%s5820_s14 + $0x2ec] sm:$0xf0]  ;;  %v3681_v8 = vor.u32 %v5298_v5, %v3680_v3 }
  0x22   : > { %v3809_v9 = vor.u32 %v5330_v7, %v3808_v6  ;;  %v3936_v10 = vld [vmem:[%s5820_s14 + $0x3e0] sm:$0xf]  ;;  %v5362_v11 = vld [vmem:[%s5820_s14 + $0x3ec] sm:$0xf0]  ;;  %1007 = vmatpush.bf16.msra.mxu0 %v3553_v4 }
  0x23   : > { %v3536_v12 = vld [vmem:[%s5820_s14 + $0xc0] sm:$0xf]  ;;  %v3937_v13 = vor.u32 %v5362_v11, %v3936_v10  ;;  %v5262_v14 = vld [vmem:[%s5820_s14 + $0xcc] sm:$0xf0]  ;;  %1020 = vmatpush.bf16.msra.mxu1 %v3681_v8 }
  0x24   : > { %v3664_v15 = vld [vmem:[%s5820_s14 + $0x1c0] sm:$0xf]  ;;  %v5294_v16 = vld [vmem:[%s5820_s14 + $0x1cc] sm:$0xf0]  ;;  %1033 = vmatpush.bf16.msra.mxu2 %v3809_v9  ;;  %v3537_v17 = vor.u32 %v5262_v14, %v3536_v12 }
  0x25   : > { %v3665_v18 = vor.u32 %v5294_v16, %v3664_v15  ;;  %v3792_v19 = vld [vmem:[%s5820_s14 + $0x2c0] sm:$0xf]  ;;  %v5326_v20 = vld [vmem:[%s5820_s14 + $0x2cc] sm:$0xf0]  ;;  %1046 = vmatpush.bf16.msra.mxu3 %v3937_v13 }
  0x26   : > { %v3920_v21 = vld [vmem:[%s5820_s14 + $0x3c0] sm:$0xf]  ;;  %v3793_v22 = vor.u32 %v5326_v20, %v3792_v19  ;;  %v5358_v23 = vld [vmem:[%s5820_s14 + $0x3cc] sm:$0xf0]  ;;  %1008 = vmatpush.bf16.msra.mxu0 %v3537_v17 }
  0x27   : > { %v3520_v24 = vld [vmem:[%s5820_s14 + $0xa0] sm:$0xf]  ;;  %v5258_v25 = vld [vmem:[%s5820_s14 + $0xac] sm:$0xf0]  ;;  %v3921_v26 = vor.u32 %v5358_v23, %v3920_v21  ;;  %1021 = vmatpush.bf16.msra.mxu1 %v3665_v18 }
  0x28   : > { %v3648_v27 = vld [vmem:[%s5820_s14 + $0x1a0] sm:$0xf]  ;;  %v5290_v28 = vld [vmem:[%s5820_s14 + $0x1ac] sm:$0xf0]  ;;  %v3521_v30 = vor.u32 %v5258_v25, %v3520_v24  ;;  %1034 = vmatpush.bf16.msra.mxu2 %v3793_v22 }
  0x29   : > { %v3776_v29 = vld [vmem:[%s5820_s14 + $0x2a0] sm:$0xf]  ;;  %v5322_v31 = vld [vmem:[%s5820_s14 + $0x2ac] sm:$0xf0]  ;;  %v3649_v34 = vor.u32 %v5290_v28, %v3648_v27  ;;  %1047 = vmatpush.bf16.msra.mxu3 %v3921_v26 }
  0x2a   : > { %v3904_v32 = vld [vmem:[%s5820_s14 + $0x3a0] sm:$0xf]  ;;  %v5354_v33 = vld [vmem:[%s5820_s14 + $0x3ac] sm:$0xf0]  ;;  %v3777_v35 = vor.u32 %v5322_v31, %v3776_v29  ;;  %1009 = vmatpush.bf16.msra.mxu0 %v3521_v30  ;;  %v5264_v29 = vld [vmem:[%s5820_s14 + $0xe4] sm:$0xf] }
  0x2b   : > { %v3504_v36 = vld [vmem:[%s5820_s14 + $0x80] sm:$0xf]  ;;  %v5254_v37 = vld [vmem:[%s5820_s14 + $0x8c] sm:$0xf0]  ;;  %v3905_v39 = vor.u32 %v5354_v33, %v3904_v32  ;;  %1022 = vmatpush.bf16.msra.mxu1 %v3649_v34  ;;  %v3554_v30 = vld [vmem:[%s5820_s14 + $0xf0] sm:$0xf0] }
  0x2c   : > { %v3632_v38 = vld [vmem:[%s5820_s14 + $0x180] sm:$0xf]  ;;  %v5286_v40 = vld [vmem:[%s5820_s14 + $0x18c] sm:$0xf0]  ;;  %v3505_v45 = vor.u32 %v5254_v37, %v3504_v36  ;;  %1035 = vmatpush.bf16.msra.mxu2 %v3777_v35  ;;  %v5296_v31 = vld [vmem:[%s5820_s14 + $0x1e4] sm:$0xf] }
  0x2d   : > { %v3760_v41 = vld [vmem:[%s5820_s14 + $0x280] sm:$0xf]  ;;  %v5318_v42 = vld [vmem:[%s5820_s14 + $0x28c] sm:$0xf0]  ;;  %v3633_v46 = vor.u32 %v5286_v40, %v3632_v38  ;;  %1048 = vmatpush.bf16.msra.mxu3 %v3905_v39  ;;  %v3682_v33 = vld [vmem:[%s5820_s14 + $0x1f0] sm:$0xf0] }
  0x2e   : > { %v3888_v43 = vld [vmem:[%s5820_s14 + $0x380] sm:$0xf]  ;;  %v5350_v44 = vld [vmem:[%s5820_s14 + $0x38c] sm:$0xf0]  ;;  %v3761_v47 = vor.u32 %v5318_v42, %v3760_v41  ;;  %1010 = vmatpush.bf16.msra.mxu0 %v3505_v45  ;;  %v5328_v34 = vld [vmem:[%s5820_s14 + $0x2e4] sm:$0xf]  ;;  %v3557_v41 = vor.u32 %v5264_v29, %v3554_v30  ;;  %v3685_v42 = vor.u32 %v5296_v31, %v3682_v33 }
  0x2f   : > { %v3488_v48 = vld [vmem:[%s5820_s14 + $0x60] sm:$0xf]  ;;  %v5250_v49 = vld [vmem:[%s5820_s14 + $0x6c] sm:$0xf0]  ;;  %v3889_v51 = vor.u32 %v5350_v44, %v3888_v43  ;;  %1023 = vmatpush.bf16.msra.mxu1 %v3633_v46  ;;  %v3810_v35 = vld [vmem:[%s5820_s14 + $0x2f0] sm:$0xf0] }
  0x30   : > { %v3616_v50 = vld [vmem:[%s5820_s14 + $0x160] sm:$0xf]  ;;  %v5282_v52 = vld [vmem:[%s5820_s14 + $0x16c] sm:$0xf0]  ;;  %v3489_v57 = vor.u32 %v5250_v49, %v3488_v48  ;;  %1036 = vmatpush.bf16.msra.mxu2 %v3761_v47  ;;  %v5360_v38 = vld [vmem:[%s5820_s14 + $0x3e4] sm:$0xf]  ;;  %v3813_v43 = vor.u32 %v5328_v34, %v3810_v35 }
  0x31   : > { %v3744_v53 = vld [vmem:[%s5820_s14 + $0x260] sm:$0xf]  ;;  %v5314_v54 = vld [vmem:[%s5820_s14 + $0x26c] sm:$0xf0]  ;;  %v3617_v58 = vor.u32 %v5282_v52, %v3616_v50  ;;  %1049 = vmatpush.bf16.msra.mxu3 %v3889_v51  ;;  %v3938_v39 = vld [vmem:[%s5820_s14 + $0x3f0] sm:$0xf0] }
  0x32   : > { %v3872_v55 = vld [vmem:[%s5820_s14 + $0x360] sm:$0xf]  ;;  %v5346_v56 = vld [vmem:[%s5820_s14 + $0x36c] sm:$0xf0]  ;;  %v3745_v59 = vor.u32 %v5314_v54, %v3744_v53  ;;  %1011 = vmatpush.bf16.msra.mxu0 %v3489_v57  ;;  %v5260_v44 = vld [vmem:[%s5820_s14 + $0xc4] sm:$0xf]  ;;  %v3941_v47 = vor.u32 %v5360_v38, %v3938_v39 }
  0x33   : > { %v3472_v60 = vld [vmem:[%s5820_s14 + $0x40] sm:$0xf]  ;;  %v5246_v61 = vld [vmem:[%s5820_s14 + $0x4c] sm:$0xf0]  ;;  %v3873_v63 = vor.u32 %v5346_v56, %v3872_v55  ;;  %1024 = vmatpush.bf16.msra.mxu1 %v3617_v58  ;;  %v3538_v45 = vld [vmem:[%s5820_s14 + $0xd0] sm:$0xf0] }
  0x34   : > { %v3600_v62 = vld [vmem:[%s5820_s14 + $0x140] sm:$0xf]  ;;  %v5278_v0 = vld [vmem:[%s5820_s14 + $0x14c] sm:$0xf0]  ;;  %v3473_v5 = vor.u32 %v5246_v61, %v3472_v60  ;;  %1037 = vmatpush.bf16.msra.mxu2 %v3745_v59  ;;  %v5292_v46 = vld [vmem:[%s5820_s14 + $0x1c4] sm:$0xf]  ;;  %v3541_v54 = vor.u32 %v5260_v44, %v3538_v45 }
  0x35   : > { %v3728_v1 = vld [vmem:[%s5820_s14 + $0x240] sm:$0xf]  ;;  %v5310_v2 = vld [vmem:[%s5820_s14 + $0x24c] sm:$0xf0]  ;;  %v3601_v6 = vor.u32 %v5278_v0, %v3600_v62  ;;  %1050 = vmatpush.bf16.msra.mxu3 %v3873_v63  ;;  %v3666_v48 = vld [vmem:[%s5820_s14 + $0x1d0] sm:$0xf0] }
  0x36   : > { %v3856_v3 = vld [vmem:[%s5820_s14 + $0x340] sm:$0xf]  ;;  %v5342_v4 = vld [vmem:[%s5820_s14 + $0x34c] sm:$0xf0]  ;;  %v3729_v7 = vor.u32 %v5310_v2, %v3728_v1  ;;  %1012 = vmatpush.bf16.msra.mxu0 %v3473_v5  ;;  %v5324_v49 = vld [vmem:[%s5820_s14 + $0x2c4] sm:$0xf]  ;;  %v3669_v55 = vor.u32 %v5292_v46, %v3666_v48 }
  0x37   : > { %v3456_v8 = vld [vmem:[%s5820_s14 + $0x20] sm:$0xf]  ;;  %v5242_v9 = vld [vmem:[%s5820_s14 + $0x2c] sm:$0xf0]  ;;  %v3857_v11 = vor.u32 %v5342_v4, %v3856_v3  ;;  %1025 = vmatpush.bf16.msra.mxu1 %v3601_v6  ;;  %v3794_v50 = vld [vmem:[%s5820_s14 + $0x2d0] sm:$0xf0] }
  0x38   : > { %v3584_v10 = vld [vmem:[%s5820_s14 + $0x120] sm:$0xf]  ;;  %v5274_v12 = vld [vmem:[%s5820_s14 + $0x12c] sm:$0xf0]  ;;  %v3457_v17 = vor.u32 %v5242_v9, %v3456_v8  ;;  %1038 = vmatpush.bf16.msra.mxu2 %v3729_v7  ;;  %v5356_v51 = vld [vmem:[%s5820_s14 + $0x3c4] sm:$0xf]  ;;  %v3797_v56 = vor.u32 %v5324_v49, %v3794_v50 }
  0x39   : > { %v3712_v13 = vld [vmem:[%s5820_s14 + $0x220] sm:$0xf]  ;;  %v5306_v14 = vld [vmem:[%s5820_s14 + $0x22c] sm:$0xf0]  ;;  %v3585_v20 = vor.u32 %v5274_v12, %v3584_v10  ;;  %1051 = vmatpush.bf16.msra.mxu3 %v3857_v11  ;;  %v3922_v52 = vld [vmem:[%s5820_s14 + $0x3d0] sm:$0xf0] }
  0x3a   : > { %v3840_v15 = vld [vmem:[%s5820_s14 + $0x320] sm:$0xf]  ;;  %v5338_v16 = vld [vmem:[%s5820_s14 + $0x32c] sm:$0xf0]  ;;  %v3713_v21 = vor.u32 %v5306_v14, %v3712_v13  ;;  %1013 = vmatpush.bf16.msra.mxu0 %v3457_v17  ;;  %v5256_v57 = vld [vmem:[%s5820_s14 + $0xa4] sm:$0xf]  ;;  %v3925_v60 = vor.u32 %v5356_v51, %v3922_v52 }
  0x3b   : > { %v3440_v18 = vld [vmem:[%s5820_s14] sm:$0xf]  ;;  %v5238_v19 = vld [vmem:[%s5820_s14 + $0xc] sm:$0xf0]  ;;  %v3841_v25 = vor.u32 %v5338_v16, %v3840_v15  ;;  %1026 = vmatpush.bf16.msra.mxu1 %v3585_v20  ;;  %v3522_v58 = vld [vmem:[%s5820_s14 + $0xb0] sm:$0xf0] }
  0x3c   : > { %v3568_v22 = vld [vmem:[%s5820_s14 + $0x100] sm:$0xf]  ;;  %v5270_v23 = vld [vmem:[%s5820_s14 + $0x10c] sm:$0xf0]  ;;  %v3441_v32 = vor.u32 %v5238_v19, %v3440_v18  ;;  %1039 = vmatpush.bf16.msra.mxu2 %v3713_v21  ;;  %v5288_v59 = vld [vmem:[%s5820_s14 + $0x1a4] sm:$0xf]  ;;  %v3525_v2 = vor.u32 %v5256_v57, %v3522_v58 }
  0x3d   : > { %v3696_v24 = vld [vmem:[%s5820_s14 + $0x200] sm:$0xf]  ;;  %v5302_v26 = vld [vmem:[%s5820_s14 + $0x20c] sm:$0xf0]  ;;  %v3569_v36 = vor.u32 %v5270_v23, %v3568_v22  ;;  %1052 = vmatpush.bf16.msra.mxu3 %v3841_v25  ;;  %v3650_v61 = vld [vmem:[%s5820_s14 + $0x1b0] sm:$0xf0] }
  0x3e   : > { %v3824_v27 = vld [vmem:[%s5820_s14 + $0x300] sm:$0xf]  ;;  %v5334_v28 = vld [vmem:[%s5820_s14 + $0x30c] sm:$0xf0]  ;;  %v3697_v37 = vor.u32 %v5302_v26, %v3696_v24  ;;  %1014 = vmatpush.bf16.msra.mxu0 %v3441_v32  ;;  %v5320_v62 = vld [vmem:[%s5820_s14 + $0x2a4] sm:$0xf]  ;;  %v3653_v6 = vor.u32 %v5288_v59, %v3650_v61 }
  0x3f   : > { %v3825_v40 = vor.u32 %v5334_v28, %v3824_v27  ;;  %1027 = vmatpush.bf16.msra.mxu1 %v3569_v36  ;;  %v224_v53 = vld [vmem:[%s5806_s29] sm:$0x55]  ;;  %v3778_v63 = vld [vmem:[%s5820_s14 + $0x2b0] sm:$0xf0] }
  0x40   : > { %1040 = vmatpush.bf16.msra.mxu2 %v3697_v37  ;;  %358 = vst [vmem:[#allocation1] ss:$4 sm:$0xff] %v224_v53  ;;  %v5352_v0 = vld [vmem:[%s5820_s14 + $0x3a4] sm:$0xf]  ;;  %v3906_v1 = vld [vmem:[%s5820_s14 + $0x3b0] sm:$0xf0]  ;;  %v3781_v7 = vor.u32 %v5320_v62, %v3778_v63 }
  0x41   : > { %1053 = vmatpush.bf16.msra.mxu3 %v3825_v40  ;;  %v5252_v3 = vld [vmem:[%s5820_s14 + $0x84] sm:$0xf]  ;;  %v3506_v4 = vld [vmem:[%s5820_s14 + $0x90] sm:$0xf0]  ;;  %v3909_v11 = vor.u32 %v5352_v0, %v3906_v1 }
  0x42   : > { %1059 = vmatpush.bf16.msrb.mxu0 %v3557_v41  ;;  %v5284_v5 = vld [vmem:[%s5820_s14 + $0x184] sm:$0xf]  ;;  %v3634_v8 = vld [vmem:[%s5820_s14 + $0x190] sm:$0xf0]  ;;  %v3509_v18 = vor.u32 %v5252_v3, %v3506_v4  ;;  %v3560_v3 = vld [vmem:[%s5820_s14 + $0xe8] sm:$0xf] }
  0x43   : > { %1072 = vmatpush.bf16.msrb.mxu1 %v3685_v42  ;;  %v5316_v9 = vld [vmem:[%s5820_s14 + $0x284] sm:$0xf]  ;;  %v3762_v10 = vld [vmem:[%s5820_s14 + $0x290] sm:$0xf0]  ;;  %v3637_v21 = vor.u32 %v5284_v5, %v3634_v8  ;;  %v5267_v4 = vld [vmem:[%s5820_s14 + $0xf4] sm:$0xf0] }
  0x44   : > { %1085 = vmatpush.bf16.msrb.mxu2 %v3813_v43  ;;  %v5348_v12 = vld [vmem:[%s5820_s14 + $0x384] sm:$0xf]  ;;  %v3890_v13 = vld [vmem:[%s5820_s14 + $0x390] sm:$0xf0]  ;;  %v3765_v22 = vor.u32 %v5316_v9, %v3762_v10  ;;  %v3688_v5 = vld [vmem:[%s5820_s14 + $0x1e8] sm:$0xf] }
  0x45   : > { %1098 = vmatpush.bf16.msrb.mxu3 %v3941_v47  ;;  %v1231_v14 = vld [vmem:[%s5806_s29] sm:$0xff]  ;;  %v3490_v23 = vld [vmem:[%s5820_s14 + $0x70] sm:$0xf0]  ;;  %v3893_v25 = vor.u32 %v5348_v12, %v3890_v13  ;;  %v3816_v8 = vld [vmem:[%s5820_s14 + $0x2e8] sm:$0xf] }
  0x46   : > { %1060 = vmatpush.bf16.msrb.mxu0 %v3541_v54  ;;  %v5248_v16 = vld [vmem:[%s5820_s14 + $0x64] sm:$0xf]  ;;  %v3618_v26 = vld [vmem:[%s5820_s14 + $0x170] sm:$0xf0]  ;;  %v5331_v9 = vld [vmem:[%s5820_s14 + $0x2f4] sm:$0xf0] }
  0x47   : > { %1073 = vmatpush.bf16.msrb.mxu1 %v3669_v55  ;;  %v5920_v15 = vld.sshfl [vmem:[#allocation1 + $0x10] sm:$0xff pattern:$0x73625140]  ;;  %v5923_v17 = vld.sshfl [vmem:[#allocation1 + $0x18] sm:$0xff pattern:$0x73625140]  ;;  %v3493_v31 = vor.u32 %v5248_v16, %v3490_v23  ;;  %v3561_v16 = vor.u32 %v5267_v4, %v3560_v3 }
  0x48   : > { %1086 = vmatpush.bf16.msrb.mxu2 %v3797_v56  ;;  %v5926_v19 = vld.sshfl [vmem:[#allocation1] sm:$0xff pattern:$0x73625140]  ;;  %v5928_v20 = vld.sshfl [vmem:[#allocation1 + $0x8] sm:$0xff pattern:$0x73625140]  ;;  %1054 = vmatmul.bf16.vlgmr.msra.gmra.mxu3 %v5923_v17 }
  0x49   : > { %1099 = vmatpush.bf16.msrb.mxu3 %v3925_v60  ;;  %1041 = vmatmul.bf16.vlgmr.msra.gmra.mxu2 %v5920_v15  ;;  %v5280_v24 = vld [vmem:[%s5820_s14 + $0x164] sm:$0xf]  ;;  %1365 = vst [vmem:[#allocation1] ss:$4 sm:$0xff] %v1231_v14  ;;  %v3746_v28 = vld [vmem:[%s5820_s14 + $0x270] sm:$0xf0] }
  0x4a   : > { %1061 = vmatpush.bf16.msrb.mxu0 %v3525_v2  ;;  %v5312_v27 = vld [vmem:[%s5820_s14 + $0x264] sm:$0xf]  ;;  %v3874_v30 = vld [vmem:[%s5820_s14 + $0x370] sm:$0xf0]  ;;  %1028 = vmatmul.bf16.vlgmr.msra.gmra.mxu1 %v5928_v20  ;;  %v3621_v32 = vor.u32 %v5280_v24, %v3618_v26  ;;  %v3944_v12 = vld [vmem:[%s5820_s14 + $0x3e8] sm:$0xf] }
  0x4b   : > { %1074 = vmatpush.bf16.msrb.mxu1 %v3653_v6  ;;  %1015 = vmatmul.bf16.vlgmr.msra.gmra.mxu0 %v5926_v19  ;;  %v5344_v29 = vld [vmem:[%s5820_s14 + $0x364] sm:$0xf]  ;;  %v3749_v33 = vor.u32 %v5312_v27, %v3746_v28  ;;  %v3474_v35 = vld [vmem:[%s5820_s14 + $0x50] sm:$0xf0]  ;;  %v5363_v13 = vld [vmem:[%s5820_s14 + $0x3f4] sm:$0xf0] }
  0x4c   : > { %1087 = vmatpush.bf16.msrb.mxu2 %v3781_v7  ;;  %v5244_v34 = vld [vmem:[%s5820_s14 + $0x44] sm:$0xf]  ;;  %v3877_v37 = vor.u32 %v5344_v29, %v3874_v30  ;;  %v3602_v38 = vld [vmem:[%s5820_s14 + $0x150] sm:$0xf0]  ;;  %v5299_v7 = vld [vmem:[%s5820_s14 + $0x1f4] sm:$0xf0] }
  0x4d   : > { %1100 = vmatpush.bf16.msrb.mxu3 %v3909_v11  ;;  %v5276_v36 = vld [vmem:[%s5820_s14 + $0x144] sm:$0xf]  ;;  %v3730_v40 = vld [vmem:[%s5820_s14 + $0x250] sm:$0xf0]  ;;  %v3477_v43 = vor.u32 %v5244_v34, %v3474_v35  ;;  %v5263_v23 = vld [vmem:[%s5820_s14 + $0xd4] sm:$0xf0] }
  0x4e   : > { %1062 = vmatpush.bf16.msrb.mxu0 %v3509_v18  ;;  %v5308_v39 = vld [vmem:[%s5820_s14 + $0x244] sm:$0xf]  ;;  %v3858_v42 = vld [vmem:[%s5820_s14 + $0x350] sm:$0xf0]  ;;  %v3605_v44 = vor.u32 %v5276_v36, %v3602_v38  ;;  %v3689_v18 = vor.u32 %v5299_v7, %v3688_v5  ;;  %v3672_v24 = vld [vmem:[%s5820_s14 + $0x1c8] sm:$0xf] }
  0x4f   : > { %1075 = vmatpush.bf16.msrb.mxu1 %v3637_v21  ;;  %v5340_v41 = vld [vmem:[%s5820_s14 + $0x344] sm:$0xf]  ;;  %v3733_v45 = vor.u32 %v5308_v39, %v3730_v40  ;;  %v3458_v47 = vld [vmem:[%s5820_s14 + $0x30] sm:$0xf0]  ;;  %v3817_v21 = vor.u32 %v5331_v9, %v3816_v8  ;;  %v5295_v26 = vld [vmem:[%s5820_s14 + $0x1d4] sm:$0xf0] }
  0x50   : > { %1088 = vmatpush.bf16.msrb.mxu2 %v3765_v22  ;;  %v5240_v46 = vld [vmem:[%s5820_s14 + $0x24] sm:$0xf]  ;;  %v3861_v49 = vor.u32 %v5340_v41, %v3858_v42  ;;  %v3586_v50 = vld [vmem:[%s5820_s14 + $0x130] sm:$0xf0]  ;;  %v3544_v22 = vld [vmem:[%s5820_s14 + $0xc8] sm:$0xf] }
  0x51   : > { %1101 = vmatpush.bf16.msrb.mxu3 %v3893_v25  ;;  %v5272_v48 = vld [vmem:[%s5820_s14 + $0x124] sm:$0xf]  ;;  %v3714_v52 = vld [vmem:[%s5820_s14 + $0x230] sm:$0xf0]  ;;  %v3461_v55 = vor.u32 %v5240_v46, %v3458_v47  ;;  %v3945_v25 = vor.u32 %v5363_v13, %v3944_v12  ;;  %v3800_v27 = vld [vmem:[%s5820_s14 + $0x2c8] sm:$0xf] }
  0x52   : > { %1063 = vmatpush.bf16.msrb.mxu0 %v3493_v31  ;;  %v5304_v51 = vld [vmem:[%s5820_s14 + $0x224] sm:$0xf]  ;;  %v3842_v54 = vld [vmem:[%s5820_s14 + $0x330] sm:$0xf0]  ;;  %v3589_v58 = vor.u32 %v5272_v48, %v3586_v50  ;;  %v5327_v28 = vld [vmem:[%s5820_s14 + $0x2d4] sm:$0xf0]  ;;  %v3545_v31 = vor.u32 %v5263_v23, %v3544_v22 }
  0x53   : > { %1076 = vmatpush.bf16.msrb.mxu1 %v3621_v32  ;;  %v5336_v53 = vld [vmem:[%s5820_s14 + $0x324] sm:$0xf]  ;;  %v3442_v57 = vld [vmem:[%s5820_s14 + $0x10] sm:$0xf0]  ;;  %v3717_v59 = vor.u32 %v5304_v51, %v3714_v52  ;;  %v3928_v29 = vld [vmem:[%s5820_s14 + $0x3c8] sm:$0xf]  ;;  %v3673_v32 = vor.u32 %v5295_v26, %v3672_v24 }
  0x54   : > { %1089 = vmatpush.bf16.msrb.mxu2 %v3749_v33  ;;  %v5236_v56 = vld [vmem:[%s5820_s14 + $0x4] sm:$0xf]  ;;  %v3570_v61 = vld [vmem:[%s5820_s14 + $0x110] sm:$0xf0]  ;;  %v3845_v63 = vor.u32 %v5336_v53, %v3842_v54  ;;  %v5359_v30 = vld [vmem:[%s5820_s14 + $0x3d4] sm:$0xf0]  ;;  %v3801_v33 = vor.u32 %v5327_v28, %v3800_v27 }
  0x55   : > { %1102 = vmatpush.bf16.msrb.mxu3 %v3877_v37  ;;  %v5268_v60 = vld [vmem:[%s5820_s14 + $0x104] sm:$0xf]  ;;  %v3698_v0 = vld [vmem:[%s5820_s14 + $0x210] sm:$0xf0]  ;;  %v3445_v6 = vor.u32 %v5236_v56, %v3442_v57  ;;  %v3528_v34 = vld [vmem:[%s5820_s14 + $0xa8] sm:$0xf]  ;;  %v3929_v37 = vor.u32 %v5359_v30, %v3928_v29 }
  0x56   : > { %1064 = vmatpush.bf16.msrb.mxu0 %v3477_v43  ;;  %v5300_v62 = vld [vmem:[%s5820_s14 + $0x204] sm:$0xf]  ;;  %v3826_v2 = vld [vmem:[%s5820_s14 + $0x310] sm:$0xf0]  ;;  %v3573_v10 = vor.u32 %v5268_v60, %v3570_v61  ;;  %v5259_v35 = vld [vmem:[%s5820_s14 + $0xb4] sm:$0xf0] }
  0x57   : > { %1077 = vmatpush.bf16.msrb.mxu1 %v3605_v44  ;;  %v5332_v1 = vld [vmem:[%s5820_s14 + $0x304] sm:$0xf]  ;;  %v3701_v11 = vor.u32 %v5300_v62, %v3698_v0  ;;  %v3656_v36 = vld [vmem:[%s5820_s14 + $0x1a8] sm:$0xf]  ;;  %v5291_v38 = vld [vmem:[%s5820_s14 + $0x1b4] sm:$0xf0]  ;;  %v3529_v43 = vor.u32 %v5259_v35, %v3528_v34 }
  0x58   : > { %1090 = vmatpush.bf16.msrb.mxu2 %v3733_v45  ;;  %v3829_v14 = vor.u32 %v5332_v1, %v3826_v2  ;;  %v3784_v39 = vld [vmem:[%s5820_s14 + $0x2a8] sm:$0xf]  ;;  %v5323_v40 = vld [vmem:[%s5820_s14 + $0x2b4] sm:$0xf0]  ;;  %v3657_v44 = vor.u32 %v5291_v38, %v3656_v36 }
  0x59   : > { %1103 = vmatpush.bf16.msrb.mxu3 %v3861_v49  ;;  %v3912_v41 = vld [vmem:[%s5820_s14 + $0x3a8] sm:$0xf]  ;;  %v5355_v42 = vld [vmem:[%s5820_s14 + $0x3b4] sm:$0xf0]  ;;  %v3785_v45 = vor.u32 %v5323_v40, %v3784_v39 }
  0x5a   : > { %1065 = vmatpush.bf16.msrb.mxu0 %v3461_v55  ;;  %v3512_v46 = vld [vmem:[%s5820_s14 + $0x88] sm:$0xf]  ;;  %v5255_v47 = vld [vmem:[%s5820_s14 + $0x94] sm:$0xf0]  ;;  %v3913_v49 = vor.u32 %v5355_v42, %v3912_v41 }
  0x5b   : > { %1078 = vmatpush.bf16.msrb.mxu1 %v3589_v58  ;;  %v3640_v48 = vld [vmem:[%s5820_s14 + $0x188] sm:$0xf]  ;;  %v5287_v50 = vld [vmem:[%s5820_s14 + $0x194] sm:$0xf0]  ;;  %v3513_v55 = vor.u32 %v5255_v47, %v3512_v46  ;;  %v3690_v47 = vld [vmem:[%s5820_s14 + $0x1f8] sm:$0xf0] }
  0x5c   : > { %1091 = vmatpush.bf16.msrb.mxu2 %v3717_v59  ;;  %v3768_v51 = vld [vmem:[%s5820_s14 + $0x288] sm:$0xf]  ;;  %v5319_v52 = vld [vmem:[%s5820_s14 + $0x294] sm:$0xf0]  ;;  %v3641_v56 = vor.u32 %v5287_v50, %v3640_v48  ;;  %v5329_v48 = vld [vmem:[%s5820_s14 + $0x2ec] sm:$0xf] }
  0x5d   : > { %1104 = vmatpush.bf16.msrb.mxu3 %v3845_v63  ;;  %v3896_v53 = vld [vmem:[%s5820_s14 + $0x388] sm:$0xf]  ;;  %v5351_v54 = vld [vmem:[%s5820_s14 + $0x394] sm:$0xf0]  ;;  %v3769_v57 = vor.u32 %v5319_v52, %v3768_v51  ;;  %v5361_v52 = vld [vmem:[%s5820_s14 + $0x3ec] sm:$0xf] }
  0x5e   : > { %1066 = vmatpush.bf16.msrb.mxu0 %v3445_v6  ;;  %v3496_v58 = vld [vmem:[%s5820_s14 + $0x68] sm:$0xf]  ;;  %v5251_v59 = vld [vmem:[%s5820_s14 + $0x74] sm:$0xf0]  ;;  %v3897_v61 = vor.u32 %v5351_v54, %v3896_v53  ;;  %v3946_v53 = vld [vmem:[%s5820_s14 + $0x3f8] sm:$0xf0] }
  0x5f   : > { %1079 = vmatpush.bf16.msrb.mxu1 %v3573_v10  ;;  %v3624_v60 = vld [vmem:[%s5820_s14 + $0x168] sm:$0xf]  ;;  %v5283_v62 = vld [vmem:[%s5820_s14 + $0x174] sm:$0xf0]  ;;  %v3497_v3 = vor.u32 %v5251_v59, %v3496_v58  ;;  %v5261_v58 = vld [vmem:[%s5820_s14 + $0xcc] sm:$0xf] }
  0x60   : > { %1092 = vmatpush.bf16.msrb.mxu2 %v3701_v11  ;;  %v3752_v63 = vld [vmem:[%s5820_s14 + $0x268] sm:$0xf]  ;;  %v5315_v0 = vld [vmem:[%s5820_s14 + $0x274] sm:$0xf0]  ;;  %v3625_v4 = vor.u32 %v5283_v62, %v3624_v60  ;;  %v3546_v59 = vld [vmem:[%s5820_s14 + $0xd8] sm:$0xf0] }
  0x61   : > { %1105 = vmatpush.bf16.msrb.mxu3 %v3829_v14  ;;  %1067 = vmatmul.bf16.vlgmr.msrb.gmra.mxu0 %v5926_v19  ;;  %v3880_v1 = vld [vmem:[%s5820_s14 + $0x368] sm:$0xf]  ;;  %v5347_v2 = vld [vmem:[%s5820_s14 + $0x374] sm:$0xf0]  ;;  %v3753_v5 = vor.u32 %v5315_v0, %v3752_v63  ;;  %v5293_v60 = vld [vmem:[%s5820_s14 + $0x1cc] sm:$0xf] }
  0x62   : > { %1111 = vmatpush.bf16.msra.mxu0 %v3561_v16  ;;  %1080 = vmatmul.bf16.vlgmr.msrb.gmra.mxu1 %v5928_v20  ;;  %v3480_v6 = vld [vmem:[%s5820_s14 + $0x48] sm:$0xf]  ;;  %v5247_v7 = vld [vmem:[%s5820_s14 + $0x54] sm:$0xf0]  ;;  %v3881_v9 = vor.u32 %v5347_v2, %v3880_v1  ;;  %v3674_v62 = vld [vmem:[%s5820_s14 + $0x1d8] sm:$0xf0] }
  0x63   : > { %1124 = vmatpush.bf16.msra.mxu1 %v3689_v18  ;;  %1093 = vmatmul.bf16.vlgmr.msrb.gmra.mxu2 %v5920_v15  ;;  %v3608_v8 = vld [vmem:[%s5820_s14 + $0x148] sm:$0xf]  ;;  %v5279_v10 = vld [vmem:[%s5820_s14 + $0x154] sm:$0xf0]  ;;  %v3481_v16 = vor.u32 %v5247_v7, %v3480_v6  ;;  %v5325_v63 = vld [vmem:[%s5820_s14 + $0x2cc] sm:$0xf] }
  0x64   : > { %1137 = vmatpush.bf16.msra.mxu2 %v3817_v21  ;;  %1106 = vmatmul.bf16.vlgmr.msrb.gmra.mxu3 %v5923_v17  ;;  %v3736_v11 = vld [vmem:[%s5820_s14 + $0x248] sm:$0xf]  ;;  %v5311_v12 = vld [vmem:[%s5820_s14 + $0x254] sm:$0xf0]  ;;  %v3609_v18 = vor.u32 %v5279_v10, %v3608_v8  ;;  %v3802_v0 = vld [vmem:[%s5820_s14 + $0x2d8] sm:$0xf0] }
  0x65   : > { %1150 = vmatpush.bf16.msra.mxu3 %v3945_v25  ;;  %v3864_v13 = vld [vmem:[%s5820_s14 + $0x348] sm:$0xf]  ;;  %v5343_v14 = vld [vmem:[%s5820_s14 + $0x354] sm:$0xf0]  ;;  %v3737_v21 = vor.u32 %v5311_v12, %v3736_v11  ;;  %v5357_v1 = vld [vmem:[%s5820_s14 + $0x3cc] sm:$0xf] }
  0x66   : > { %1112 = vmatpush.bf16.msra.mxu0 %v3545_v31  ;;  %v3464_v22 = vld [vmem:[%s5820_s14 + $0x28] sm:$0xf]  ;;  %v5243_v23 = vld [vmem:[%s5820_s14 + $0x34] sm:$0xf0]  ;;  %v3865_v25 = vor.u32 %v5343_v14, %v3864_v13  ;;  %v3930_v2 = vld [vmem:[%s5820_s14 + $0x3d8] sm:$0xf0] }
  0x67   : > { %1125 = vmatpush.bf16.msra.mxu1 %v3673_v32  ;;  %v3592_v24 = vld [vmem:[%s5820_s14 + $0x128] sm:$0xf]  ;;  %v5275_v26 = vld [vmem:[%s5820_s14 + $0x134] sm:$0xf0]  ;;  %v3465_v31 = vor.u32 %v5243_v23, %v3464_v22  ;;  %v5257_v6 = vld [vmem:[%s5820_s14 + $0xac] sm:$0xf] }
  0x68   : > { %1138 = vmatpush.bf16.msra.mxu2 %v3801_v33  ;;  %v3720_v27 = vld [vmem:[%s5820_s14 + $0x228] sm:$0xf]  ;;  %v5307_v28 = vld [vmem:[%s5820_s14 + $0x234] sm:$0xf0]  ;;  %v3593_v34 = vor.u32 %v5275_v26, %v3592_v24  ;;  %v3530_v7 = vld [vmem:[%s5820_s14 + $0xb8] sm:$0xf0] }
  0x69   : > { %1151 = vmatpush.bf16.msra.mxu3 %v3929_v37  ;;  %v3848_v29 = vld [vmem:[%s5820_s14 + $0x328] sm:$0xf]  ;;  %v5339_v30 = vld [vmem:[%s5820_s14 + $0x334] sm:$0xf0]  ;;  %v3721_v35 = vor.u32 %v5307_v28, %v3720_v27  ;;  %v5289_v8 = vld [vmem:[%s5820_s14 + $0x1ac] sm:$0xf] }
  0x6a   : > { %1113 = vmatpush.bf16.msra.mxu0 %v3529_v43  ;;  %v3448_v32 = vld [vmem:[%s5820_s14 + $0x8] sm:$0xf]  ;;  %v5239_v33 = vld [vmem:[%s5820_s14 + $0x14] sm:$0xf0]  ;;  %v3849_v39 = vor.u32 %v5339_v30, %v3848_v29  ;;  %v5265_v43 = vld [vmem:[%s5820_s14 + $0xec] sm:$0xf] }
  0x6b   : > { %1126 = vmatpush.bf16.msra.mxu1 %v3657_v44  ;;  %v3576_v36 = vld [vmem:[%s5820_s14 + $0x108] sm:$0xf]  ;;  %v5271_v37 = vld [vmem:[%s5820_s14 + $0x114] sm:$0xf0]  ;;  %v3562_v44 = vld [vmem:[%s5820_s14 + $0xf8] sm:$0xf0]  ;;  %v3449_v46 = vor.u32 %v5239_v33, %v3448_v32 }
  0x6c   : > { %1139 = vmatpush.bf16.msra.mxu2 %v3785_v45  ;;  %v3704_v38 = vld [vmem:[%s5820_s14 + $0x208] sm:$0xf]  ;;  %v5303_v40 = vld [vmem:[%s5820_s14 + $0x214] sm:$0xf0]  ;;  %v5297_v45 = vld [vmem:[%s5820_s14 + $0x1ec] sm:$0xf]  ;;  %v3577_v50 = vor.u32 %v5271_v37, %v3576_v36 }
  0x6d   : > { %1152 = vmatpush.bf16.msra.mxu3 %v3913_v49  ;;  %v3832_v41 = vld [vmem:[%s5820_s14 + $0x308] sm:$0xf]  ;;  %v5335_v42 = vld [vmem:[%s5820_s14 + $0x314] sm:$0xf0]  ;;  %v3818_v49 = vld [vmem:[%s5820_s14 + $0x2f8] sm:$0xf0]  ;;  %v3705_v51 = vor.u32 %v5303_v40, %v3704_v38 }
  0x6e   : > { %1114 = vmatpush.bf16.msra.mxu0 %v3513_v55  ;;  %v3833_v54 = vor.u32 %v5335_v42, %v3832_v41  ;;  %v3565_v55 = vor.u32 %v5265_v43, %v3562_v44  ;;  %v3658_v10 = vld [vmem:[%s5820_s14 + $0x1b8] sm:$0xf0]  ;;  %v5321_v11 = vld [vmem:[%s5820_s14 + $0x2ac] sm:$0xf] }
  0x6f   : > { %1127 = vmatpush.bf16.msra.mxu1 %v3641_v56  ;;  %v3693_v56 = vor.u32 %v5297_v45, %v3690_v47  ;;  %v3786_v12 = vld [vmem:[%s5820_s14 + $0x2b8] sm:$0xf0]  ;;  %v5353_v13 = vld [vmem:[%s5820_s14 + $0x3ac] sm:$0xf] }
  0x70   : > { %1140 = vmatpush.bf16.msra.mxu2 %v3769_v57  ;;  %v3821_v57 = vor.u32 %v5329_v48, %v3818_v49  ;;  %v3914_v14 = vld [vmem:[%s5820_s14 + $0x3b8] sm:$0xf0]  ;;  %v5253_v22 = vld [vmem:[%s5820_s14 + $0x8c] sm:$0xf] }
  0x71   : > { %1153 = vmatpush.bf16.msra.mxu3 %v3897_v61  ;;  %v3949_v61 = vor.u32 %v5361_v52, %v3946_v53  ;;  %v3514_v23 = vld [vmem:[%s5820_s14 + $0x98] sm:$0xf0]  ;;  %v5285_v24 = vld [vmem:[%s5820_s14 + $0x18c] sm:$0xf] }
  0x72   : > { %1115 = vmatpush.bf16.msra.mxu0 %v3497_v3  ;;  %v3549_v3 = vor.u32 %v5261_v58, %v3546_v59  ;;  %v3642_v26 = vld [vmem:[%s5820_s14 + $0x198] sm:$0xf0]  ;;  %v5317_v27 = vld [vmem:[%s5820_s14 + $0x28c] sm:$0xf] }
  0x73   : > { %1128 = vmatpush.bf16.msra.mxu1 %v3625_v4  ;;  %v3677_v4 = vor.u32 %v5293_v60, %v3674_v62  ;;  %v3770_v28 = vld [vmem:[%s5820_s14 + $0x298] sm:$0xf0]  ;;  %v5349_v29 = vld [vmem:[%s5820_s14 + $0x38c] sm:$0xf]  ;;  %v3645_v32 = vor.u32 %v5285_v24, %v3642_v26  ;;  %v4449_v24 = vld [vmem:[%s5820_s14 + $0x6e0] sm:$0xf] }
  0x74   : > { %1141 = vmatpush.bf16.msra.mxu2 %v3753_v5  ;;  %v3805_v5 = vor.u32 %v5325_v63, %v3802_v0  ;;  %v3898_v30 = vld [vmem:[%s5820_s14 + $0x398] sm:$0xf0]  ;;  %v3773_v33 = vor.u32 %v5317_v27, %v3770_v28  ;;  %v5281_v36 = vld [vmem:[%s5820_s14 + $0x16c] sm:$0xf]  ;;  %v4577_v28 = vld [vmem:[%s5820_s14 + $0x7e0] sm:$0xf] }
  0x75   : > { %1154 = vmatpush.bf16.msra.mxu3 %v3881_v9  ;;  %v3933_v9 = vor.u32 %v5357_v1, %v3930_v2  ;;  %v3901_v37 = vor.u32 %v5349_v29, %v3898_v30  ;;  %v3626_v38 = vld [vmem:[%s5820_s14 + $0x178] sm:$0xf0]  ;;  %v5345_v41 = vld [vmem:[%s5820_s14 + $0x36c] sm:$0xf]  ;;  %v5490_v29 = vld [vmem:[%s5820_s14 + $0x7ec] sm:$0xf0] }
  0x76   : > { %1116 = vmatpush.bf16.msra.mxu0 %v3481_v16  ;;  %v3533_v16 = vor.u32 %v5257_v6, %v3530_v7  ;;  %v3754_v40 = vld [vmem:[%s5820_s14 + $0x278] sm:$0xf0]  ;;  %v3629_v44 = vor.u32 %v5281_v36, %v3626_v38  ;;  %v5277_v48 = vld [vmem:[%s5820_s14 + $0x14c] sm:$0xf]  ;;  %v4305_v36 = vld [vmem:[%s5820_s14 + $0x5c0] sm:$0xf] }
  0x77   : > { %1129 = vmatpush.bf16.msra.mxu1 %v3609_v18  ;;  %v3661_v18 = vor.u32 %v5289_v8, %v3658_v10  ;;  %v3882_v42 = vld [vmem:[%s5820_s14 + $0x378] sm:$0xf0]  ;;  %v5341_v53 = vld [vmem:[%s5820_s14 + $0x34c] sm:$0xf]  ;;  %v5422_v38 = vld [vmem:[%s5820_s14 + $0x5cc] sm:$0xf0] }
  0x78   : > { %1142 = vmatpush.bf16.msra.mxu2 %v3737_v21  ;;  %v3789_v21 = vor.u32 %v5321_v11, %v3786_v12  ;;  %v3482_v47 = vld [vmem:[%s5820_s14 + $0x58] sm:$0xf0]  ;;  %v3885_v49 = vor.u32 %v5345_v41, %v3882_v42  ;;  %v5241_v58 = vld [vmem:[%s5820_s14 + $0x2c] sm:$0xf]  ;;  %v4561_v41 = vld [vmem:[%s5820_s14 + $0x7c0] sm:$0xf] }
  0x79   : > { %1155 = vmatpush.bf16.msra.mxu3 %v3865_v25  ;;  %v3917_v25 = vor.u32 %v5353_v13, %v3914_v14  ;;  %v3738_v52 = vld [vmem:[%s5820_s14 + $0x258] sm:$0xf0]  ;;  %v5273_v60 = vld [vmem:[%s5820_s14 + $0x12c] sm:$0xf]  ;;  %v5486_v42 = vld [vmem:[%s5820_s14 + $0x7cc] sm:$0xf0] }
  0x7a   : > { %1117 = vmatpush.bf16.msra.mxu0 %v3465_v31  ;;  %v3517_v31 = vor.u32 %v5253_v22, %v3514_v23  ;;  %v3466_v59 = vld [vmem:[%s5820_s14 + $0x38] sm:$0xf0]  ;;  %v5305_v63 = vld [vmem:[%s5820_s14 + $0x22c] sm:$0xf]  ;;  %v5426_v23 = vld [vmem:[%s5820_s14 + $0x5ec] sm:$0xf0] }
  0x7b   : > { %1130 = vmatpush.bf16.msra.mxu1 %v3593_v34  ;;  %v5249_v34 = vld [vmem:[%s5820_s14 + $0x6c] sm:$0xf]  ;;  %v3594_v62 = vld [vmem:[%s5820_s14 + $0x138] sm:$0xf0] }
  0x7c   : > { %1143 = vmatpush.bf16.msra.mxu2 %v3721_v35  ;;  %v3498_v35 = vld [vmem:[%s5820_s14 + $0x78] sm:$0xf0]  ;;  %v5337_v1 = vld [vmem:[%s5820_s14 + $0x32c] sm:$0xf]  ;;  %v3597_v6 = vor.u32 %v5273_v60, %v3594_v62  ;;  %v4401_v60 = vld [vmem:[%s5820_s14 + $0x680] sm:$0xf] }
  0x7d   : > { %1156 = vmatpush.bf16.msra.mxu3 %v3849_v39  ;;  %v5313_v39 = vld [vmem:[%s5820_s14 + $0x26c] sm:$0xf]  ;;  %v3501_v43 = vor.u32 %v5249_v34, %v3498_v35  ;;  %v3722_v0 = vld [vmem:[%s5820_s14 + $0x238] sm:$0xf0]  ;;  %v4177_v34 = vld [vmem:[%s5820_s14 + $0x4c0] sm:$0xf] }
  0x7e   : > { %1118 = vmatpush.bf16.msra.mxu0 %v3449_v46  ;;  %v3757_v45 = vor.u32 %v5313_v39, %v3754_v40  ;;  %v5245_v46 = vld [vmem:[%s5820_s14 + $0x4c] sm:$0xf]  ;;  %v3850_v2 = vld [vmem:[%s5820_s14 + $0x338] sm:$0xf0]  ;;  %v3725_v7 = vor.u32 %v5305_v63, %v3722_v0  ;;  %v5390_v35 = vld [vmem:[%s5820_s14 + $0x4cc] sm:$0xf0] }
  0x7f   : > { %1131 = vmatpush.bf16.msra.mxu1 %v3577_v50  ;;  %v3610_v50 = vld [vmem:[%s5820_s14 + $0x158] sm:$0xf0]  ;;  %v5269_v8 = vld [vmem:[%s5820_s14 + $0x10c] sm:$0xf]  ;;  %v3853_v11 = vor.u32 %v5337_v1, %v3850_v2  ;;  %v4433_v39 = vld [vmem:[%s5820_s14 + $0x6c0] sm:$0xf] }
  0x80   : > { %1144 = vmatpush.bf16.msra.mxu2 %v3705_v51  ;;  %v5309_v51 = vld [vmem:[%s5820_s14 + $0x24c] sm:$0xf]  ;;  %v3706_v12 = vld [vmem:[%s5820_s14 + $0x218] sm:$0xf0]  ;;  %v5454_v40 = vld [vmem:[%s5820_s14 + $0x6cc] sm:$0xf0] }
  0x81   : > { %1157 = vmatpush.bf16.msra.mxu3 %v3833_v54  ;;  %1119 = vmatmul.bf16.vlgmr.msra.gmra.mxu0 %v5926_v19  ;;  %v3866_v54 = vld [vmem:[%s5820_s14 + $0x358] sm:$0xf0]  ;;  %v5301_v10 = vld [vmem:[%s5820_s14 + $0x20c] sm:$0xf]  ;;  %v5478_v62 = vld [vmem:[%s5820_s14 + $0x78c] sm:$0xf0] }
  0x82   : > { %1163 = vmatpush.bf16.msrb.mxu0 %v3565_v55  ;;  %1132 = vmatmul.bf16.vlgmr.msra.gmra.mxu1 %v5928_v20  ;;  %v3485_v55 = vor.u32 %v5245_v46, %v3482_v47  ;;  %v5333_v13 = vld [vmem:[%s5820_s14 + $0x30c] sm:$0xf]  ;;  %v3834_v14 = vld [vmem:[%s5820_s14 + $0x318] sm:$0xf0]  ;;  %v3709_v27 = vor.u32 %v5301_v10, %v3706_v12  ;;  %v4161_v46 = vld [vmem:[%s5820_s14 + $0x4a0] sm:$0xf] }
  0x83   : > { %1176 = vmatpush.bf16.msrb.mxu1 %v3693_v56  ;;  %1145 = vmatmul.bf16.vlgmr.msra.gmra.mxu2 %v5920_v15  ;;  %v3613_v56 = vor.u32 %v5277_v48, %v3610_v50  ;;  %v3837_v30 = vor.u32 %v5333_v13, %v3834_v14  ;;  %v5386_v47 = vld [vmem:[%s5820_s14 + $0x4ac] sm:$0xf0]  ;;  %v4289_v48 = vld [vmem:[%s5820_s14 + $0x5a0] sm:$0xf] }
  0x84   : > { %1189 = vmatpush.bf16.msrb.mxu2 %v3821_v57  ;;  %1158 = vmatmul.bf16.vlgmr.msra.gmra.mxu3 %v5923_v17  ;;  %v3741_v57 = vor.u32 %v5309_v51, %v3738_v52  ;;  %v5418_v50 = vld [vmem:[%s5820_s14 + $0x5ac] sm:$0xf0]  ;;  %v4417_v51 = vld [vmem:[%s5820_s14 + $0x6a0] sm:$0xf] }
  0x85   : > { %1202 = vmatpush.bf16.msrb.mxu3 %v3949_v61  ;;  %v3869_v61 = vor.u32 %v5341_v53, %v3866_v54  ;;  %v5450_v52 = vld [vmem:[%s5820_s14 + $0x6ac] sm:$0xf0]  ;;  %v4545_v53 = vld [vmem:[%s5820_s14 + $0x7a0] sm:$0xf] }
  0x86   : > { %1164 = vmatpush.bf16.msrb.mxu0 %v3549_v3  ;;  %v3469_v3 = vor.u32 %v5241_v58, %v3466_v59  ;;  %v5482_v54 = vld [vmem:[%s5820_s14 + $0x7ac] sm:$0xf0]  ;;  %v4273_v58 = vld [vmem:[%s5820_s14 + $0x580] sm:$0xf] }
  0x87   : > { %1177 = vmatpush.bf16.msrb.mxu1 %v3677_v4  ;;  %v5237_v4 = vld [vmem:[%s5820_s14 + $0xc] sm:$0xf]  ;;  %v5414_v59 = vld [vmem:[%s5820_s14 + $0x58c] sm:$0xf0]  ;;  %v4129_v2 = vld [vmem:[%s5820_s14 + $0x460] sm:$0xf] }
  0x88   : > { %1190 = vmatpush.bf16.msrb.mxu2 %v3805_v5  ;;  %v3450_v5 = vld [vmem:[%s5820_s14 + $0x18] sm:$0xf0]  ;;  %v4274_v0 = vor.u32 %v5414_v59, %v4273_v58  ;;  %v5474_v10 = vld [vmem:[%s5820_s14 + $0x76c] sm:$0xf0]  ;;  %v4113_v12 = vld [vmem:[%s5820_s14 + $0x440] sm:$0xf] }
  0x89   : > { %1203 = vmatpush.bf16.msrb.mxu3 %v3933_v9  ;;  %v3578_v9 = vld [vmem:[%s5820_s14 + $0x118] sm:$0xf0]  ;;  %v3453_v22 = vor.u32 %v5237_v4, %v3450_v5  ;;  %v4257_v4 = vld [vmem:[%s5820_s14 + $0x560] sm:$0xf]  ;;  %v5374_v13 = vld [vmem:[%s5820_s14 + $0x44c] sm:$0xf0] }
  0x8a   : > { %1165 = vmatpush.bf16.msrb.mxu0 %v3533_v16  ;;  %v4193_v16 = vld [vmem:[%s5820_s14 + $0x4e0] sm:$0xf]  ;;  %v3581_v26 = vor.u32 %v5269_v8, %v3578_v9  ;;  %v5442_v8 = vld [vmem:[%s5820_s14 + $0x66c] sm:$0xf0]  ;;  %v4195_v58 = vld [vmem:[%s5820_s14 + $0x4f0] sm:$0xf0] }
  0x8b   : > { %1178 = vmatpush.bf16.msrb.mxu1 %v3661_v18  ;;  %v5394_v18 = vld [vmem:[%s5820_s14 + $0x4ec] sm:$0xf0]  ;;  %v4513_v9 = vld [vmem:[%s5820_s14 + $0x760] sm:$0xf] }
  0x8c   : > { %1191 = vmatpush.bf16.msrb.mxu2 %v3789_v21  ;;  %v4321_v21 = vld [vmem:[%s5820_s14 + $0x5e0] sm:$0xf] }
  0x8d   : > { %1204 = vmatpush.bf16.msrb.mxu3 %v3917_v25  ;;  %v5458_v25 = vld [vmem:[%s5820_s14 + $0x6ec] sm:$0xf0] }
  0x8e   : > { %1166 = vmatpush.bf16.msrb.mxu0 %v3517_v31  ;;  %v4194_v31 = vor.u32 %v5394_v18, %v4193_v16  ;;  %v4241_v18 = vld [vmem:[%s5820_s14 + $0x540] sm:$0xf] }
  0x8f   : > { %1179 = vmatpush.bf16.msrb.mxu1 %v3645_v32  ;;  %v4322_v32 = vor.u32 %v5426_v23, %v4321_v21  ;;  %v5406_v21 = vld [vmem:[%s5820_s14 + $0x54c] sm:$0xf0]  ;;  %v4514_v23 = vor.u32 %v5474_v10, %v4513_v9 }
  0x90   : > { %1192 = vmatpush.bf16.msrb.mxu2 %v3773_v33  ;;  %v4450_v33 = vor.u32 %v5458_v25, %v4449_v24  ;;  %v5438_v24 = vld [vmem:[%s5820_s14 + $0x64c] sm:$0xf0]  ;;  %v4497_v25 = vld [vmem:[%s5820_s14 + $0x740] sm:$0xf] }
  0x91   : > { %1205 = vmatpush.bf16.msrb.mxu3 %v3901_v37  ;;  %v4578_v37 = vor.u32 %v5490_v29, %v4577_v28  ;;  %v5370_v28 = vld [vmem:[%s5820_s14 + $0x42c] sm:$0xf0] }
  0x92   : > { %1167 = vmatpush.bf16.msrb.mxu0 %v3501_v43  ;;  %v4178_v43 = vor.u32 %v5390_v35, %v4177_v34  ;;  %v6154_v29 = vld.sshfl [vmem:[#allocation1 + $0x10] sm:$0xff pattern:$0x73625140]  ;;  %v6160_v35 = vld.sshfl [vmem:[#allocation1 + $0x18] sm:$0xff pattern:$0x73625140] }
  0x93   : > { %1180 = vmatpush.bf16.msrb.mxu1 %v3629_v44  ;;  %v4306_v44 = vor.u32 %v5422_v38, %v4305_v36  ;;  %v5434_v34 = vld [vmem:[%s5820_s14 + $0x62c] sm:$0xf0]  ;;  %v6162_v36 = vld.sshfl [vmem:[#allocation1] sm:$0xff pattern:$0x73625140] }
  0x94   : > { %1193 = vmatpush.bf16.msrb.mxu2 %v3757_v45  ;;  %v4434_v45 = vor.u32 %v5454_v40, %v4433_v39  ;;  %v4481_v39 = vld [vmem:[%s5820_s14 + $0x720] sm:$0xf]  ;;  %v6165_v40 = vld.sshfl [vmem:[#allocation1 + $0x8] sm:$0xff pattern:$0x73625140] }
  0x95   : > { %1206 = vmatpush.bf16.msrb.mxu3 %v3885_v49  ;;  %v4562_v49 = vor.u32 %v5486_v42, %v4561_v41  ;;  %v2259_v41 = vld [vmem:[%s5806_s29] sm:$0xaa] }
  0x96   : > { %1168 = vmatpush.bf16.msrb.mxu0 %v3485_v55  ;;  %v4290_v55 = vor.u32 %v5418_v50, %v4289_v48  ;;  %2393 = vst [vmem:[#allocation1] ss:$4 sm:$0xff] %v2259_v41  ;;  %v5430_v50 = vld [vmem:[%s5820_s14 + $0x60c] sm:$0xf0]  ;;  %v4419_v41 = vld [vmem:[%s5820_s14 + $0x6b0] sm:$0xf0] }
  0x97   : > { %1181 = vmatpush.bf16.msrb.mxu1 %v3613_v56  ;;  %v4418_v56 = vor.u32 %v5450_v52, %v4417_v51  ;;  %v1384_v51 = vshll.u32 %v6154_v29, 16 }
  0x98   : > { %1194 = vmatpush.bf16.msrb.mxu2 %v3741_v57  ;;  %v4145_v57 = vld [vmem:[%s5820_s14 + $0x480] sm:$0xf] }
  0x99   : > { %1207 = vmatpush.bf16.msrb.mxu3 %v3869_v61  ;;  %v5446_v61 = vld [vmem:[%s5820_s14 + $0x68c] sm:$0xf0] }
  0x9a   : > { %1169 = vmatpush.bf16.msrb.mxu0 %v3469_v3  ;;  %v4402_v1 = vor.u32 %v5446_v61, %v4401_v60  ;;  %v5378_v3 = vld [vmem:[%s5820_s14 + $0x46c] sm:$0xf0]  ;;  %v5424_v60 = vld [vmem:[%s5820_s14 + $0x5e4] sm:$0xf]  ;;  %v4323_v61 = vld [vmem:[%s5820_s14 + $0x5f0] sm:$0xf0] }
  0x9b   : > { %1182 = vmatpush.bf16.msrb.mxu1 %v3597_v6  ;;  %v5410_v6 = vld [vmem:[%s5820_s14 + $0x56c] sm:$0xf0] }
  0x9c   : > { %1195 = vmatpush.bf16.msrb.mxu2 %v3725_v7  ;;  %v4385_v7 = vld [vmem:[%s5820_s14 + $0x660] sm:$0xf]  ;;  %v4258_v14 = vor.u32 %v5410_v6, %v4257_v4  ;;  %v4579_v4 = vld [vmem:[%s5820_s14 + $0x7f0] sm:$0xf0] }
  0x9d   : > { %1208 = vmatpush.bf16.msrb.mxu3 %v3853_v11  ;;  %v4130_v11 = vor.u32 %v5378_v3, %v4129_v2  ;;  %v4386_v16 = vor.u32 %v5442_v8, %v4385_v7  ;;  %v1382_v2 = vshrl.u32 %v6154_v29, 16  ;;  %v1386_v3 = vrot.slane %v1384_v51, 1  ;;  %v4275_v51 = vld [vmem:[%s5820_s14 + $0x590] sm:$0xf0] }
  0x9e   : > { %1170 = vmatpush.bf16.msrb.mxu0 %v3453_v22  ;;  %v4369_v22 = vld [vmem:[%s5820_s14 + $0x640] sm:$0xf]  ;;  %v1370_v7 = vshrl.u32 %v6162_v36, 16 }
  0x9f   : > { %1183 = vmatpush.bf16.msrb.mxu1 %v3581_v26  ;;  %v5470_v26 = vld [vmem:[%s5820_s14 + $0x74c] sm:$0xf0]  ;;  %v4370_v38 = vor.u32 %v5438_v24, %v4369_v22  ;;  %v5452_v24 = vld [vmem:[%s5820_s14 + $0x6c4] sm:$0xf] }
  0xa0   : > { %1196 = vmatpush.bf16.msrb.mxu2 %v3709_v27  ;;  %v4097_v27 = vld [vmem:[%s5820_s14 + $0x420] sm:$0xf]  ;;  %v4498_v42 = vor.u32 %v5470_v26, %v4497_v25  ;;  %v4435_v25 = vld [vmem:[%s5820_s14 + $0x6d0] sm:$0xf0]  ;;  %v6199_v26 = vor.u32 %v1386_v3, %v1382_v2  ;;  %v5372_v3 = vld [vmem:[%s5820_s14 + $0x444] sm:$0xf] }
  0xa1   : > { %1209 = vmatpush.bf16.msrb.mxu3 %v3837_v30  ;;  %1171 = vmatmul.bf16.vlgmr.msrb.gmra.mxu0 %v5926_v19  ;;  %v4546_v19 = vor.u32 %v5482_v54, %v4545_v53  ;;  %v4114_v30 = vor.u32 %v5374_v13, %v4113_v12  ;;  %v4098_v48 = vor.u32 %v5370_v28, %v4097_v27  ;;  %v4465_v54 = vld [vmem:[%s5820_s14 + $0x700] sm:$0xf]  ;;  %v5484_v27 = vld [vmem:[%s5820_s14 + $0x7c4] sm:$0xf]  ;;  %v4563_v28 = vld [vmem:[%s5820_s14 + $0x7d0] sm:$0xf0] }
  0xa2   : > { %2038 = vmatpush.bf16.msra.mxu0 %v4194_v31  ;;  %1184 = vmatmul.bf16.vlgmr.msrb.gmra.mxu1 %v5928_v20  ;;  %v4529_v20 = vld [vmem:[%s5820_s14 + $0x780] sm:$0xf]  ;;  %v4326_v13 = vor.u32 %v5424_v60, %v4323_v61  ;;  %v4259_v60 = vld [vmem:[%s5820_s14 + $0x570] sm:$0xf0]  ;;  %v5440_v61 = vld [vmem:[%s5820_s14 + $0x664] sm:$0xf] }
  0xa3   : > { %2051 = vmatpush.bf16.msra.mxu1 %v4322_v32  ;;  %1197 = vmatmul.bf16.vlgmr.msrb.gmra.mxu2 %v5920_v15  ;;  %v4162_v15 = vor.u32 %v5386_v47, %v4161_v46  ;;  %v4530_v5 = vor.u32 %v5478_v62, %v4529_v20  ;;  %v4225_v31 = vld [vmem:[%s5820_s14 + $0x520] sm:$0xf]  ;;  %v5402_v32 = vld [vmem:[%s5820_s14 + $0x52c] sm:$0xf0]  ;;  %v5456_v20 = vld [vmem:[%s5820_s14 + $0x6e4] sm:$0xf] }
  0xa4   : > { %2064 = vmatpush.bf16.msra.mxu2 %v4450_v33  ;;  %1210 = vmatmul.bf16.vlgmr.msrb.gmra.mxu3 %v5923_v17  ;;  %v5382_v17 = vld [vmem:[%s5820_s14 + $0x48c] sm:$0xf0]  ;;  %v4353_v33 = vld [vmem:[%s5820_s14 + $0x620] sm:$0xf]  ;;  %v4226_v52 = vor.u32 %v5402_v32, %v4225_v31 }
  0xa5   : > { %2077 = vmatpush.bf16.msra.mxu3 %v4578_v37  ;;  %v4146_v63 = vor.u32 %v5382_v17, %v4145_v57  ;;  %v4242_v37 = vor.u32 %v5406_v21, %v4241_v18  ;;  %v4209_v46 = vld [vmem:[%s5820_s14 + $0x500] sm:$0xf]  ;;  %v5398_v47 = vld [vmem:[%s5820_s14 + $0x50c] sm:$0xf0]  ;;  %v4354_v53 = vor.u32 %v5434_v34, %v4353_v33  ;;  %v5392_v17 = vld [vmem:[%s5820_s14 + $0x4e4] sm:$0xf]  ;;  %v4438_v34 = vor.u32 %v5452_v24, %v4435_v25 }
  0xa6   : > { %2039 = vmatpush.bf16.msra.mxu0 %v4178_v43  ;;  %v5466_v43 = vld [vmem:[%s5820_s14 + $0x72c] sm:$0xf0]  ;;  %v4210_v62 = vor.u32 %v5398_v47, %v4209_v46  ;;  %v4198_v10 = vor.u32 %v5392_v17, %v4195_v58  ;;  %v4179_v18 = vld [vmem:[%s5820_s14 + $0x4d0] sm:$0xf0]  ;;  %v5420_v21 = vld [vmem:[%s5820_s14 + $0x5c4] sm:$0xf] }
  0xa7   : > { %2052 = vmatpush.bf16.msra.mxu1 %v4306_v44  ;;  %v4081_v44 = vld [vmem:[%s5820_s14 + $0x400] sm:$0xf]  ;;  %v4482_v57 = vor.u32 %v5466_v43, %v4481_v39  ;;  %v4291_v39 = vld [vmem:[%s5820_s14 + $0x5b0] sm:$0xf0]  ;;  %v5380_v47 = vld [vmem:[%s5820_s14 + $0x484] sm:$0xf] }
  0xa8   : > { %2065 = vmatpush.bf16.msra.mxu2 %v4434_v45  ;;  %v5366_v45 = vld [vmem:[%s5820_s14 + $0x40c] sm:$0xf0]  ;;  %v4547_v43 = vld [vmem:[%s5820_s14 + $0x7b0] sm:$0xf0]  ;;  %v5376_v17 = vld [vmem:[%s5820_s14 + $0x464] sm:$0xf] }
  0xa9   : > { %2078 = vmatpush.bf16.msra.mxu3 %v4562_v49  ;;  %v4337_v49 = vld [vmem:[%s5820_s14 + $0x600] sm:$0xf]  ;;  %v4082_v59 = vor.u32 %v5366_v45, %v4081_v44  ;;  %v4131_v58 = vld [vmem:[%s5820_s14 + $0x470] sm:$0xf0] }
  0xaa   : > { %2040 = vmatpush.bf16.msra.mxu0 %v4162_v15  ;;  %v5462_v15 = vld [vmem:[%s5820_s14 + $0x70c] sm:$0xf0] }
  0xab   : > { %2053 = vmatpush.bf16.msra.mxu1 %v4290_v55  ;;  %v1390_v55 = vshll.u32 %v6160_v35, 16  ;;  %v4466_v9 = vor.u32 %v5462_v15, %v4465_v54  ;;  %v5476_v54 = vld [vmem:[%s5820_s14 + $0x784] sm:$0xf]  ;;  %v4531_v15 = vld [vmem:[%s5820_s14 + $0x790] sm:$0xf0] }
  0xac   : > { %2066 = vmatpush.bf16.msra.mxu2 %v4418_v56  ;;  %v1372_v56 = vshll.u32 %v6162_v36, 16  ;;  %v4163_v36 = vld [vmem:[%s5820_s14 + $0x4b0] sm:$0xf0] }
  0xad   : > { %2079 = vmatpush.bf16.msra.mxu3 %v4546_v19  ;;  %v1378_v19 = vshll.u32 %v6165_v40, 16  ;;  %v1392_v6 = vrot.slane %v1390_v55, 1 }
  0xae   : > { %2041 = vmatpush.bf16.msra.mxu0 %v4146_v63  ;;  %v4338_v63 = vor.u32 %v5430_v50, %v4337_v49  ;;  %v1374_v8 = vrot.slane %v1372_v56, 1  ;;  %v5412_v49 = vld [vmem:[%s5820_s14 + $0x584] sm:$0xf] }
  0xaf   : > { %2054 = vmatpush.bf16.msra.mxu1 %v4274_v0  ;;  %v4451_v0 = vld [vmem:[%s5820_s14 + $0x6f0] sm:$0xf0]  ;;  %v1380_v12 = vrot.slane %v1378_v19, 1  ;;  %v4278_v56 = vor.u32 %v5412_v49, %v4275_v51  ;;  %v5408_v19 = vld [vmem:[%s5820_s14 + $0x564] sm:$0xf] }
  0xb0   : > { %2067 = vmatpush.bf16.msra.mxu2 %v4402_v1  ;;  %v5488_v1 = vld [vmem:[%s5820_s14 + $0x7e4] sm:$0xf]  ;;  %v5395_v51 = vld [vmem:[%s5820_s14 + $0x4f4] sm:$0xf0] }
  0xb1   : > { %2080 = vmatpush.bf16.msra.mxu3 %v4530_v5  ;;  %v1388_v5 = vshrl.u32 %v6160_v35, 16  ;;  %v4582_v22 = vor.u32 %v5488_v1, %v4579_v4  ;;  %v5384_v35 = vld [vmem:[%s5820_s14 + $0x4a4] sm:$0xf]  ;;  %v4262_v1 = vor.u32 %v5408_v19, %v4259_v60  ;;  %v4115_v4 = vld [vmem:[%s5820_s14 + $0x450] sm:$0xf0] }
  0xb2   : > { %2042 = vmatpush.bf16.msra.mxu0 %v4130_v11  ;;  %v1376_v11 = vshrl.u32 %v6165_v40, 16  ;;  %v5448_v40 = vld [vmem:[%s5820_s14 + $0x6a4] sm:$0xf]  ;;  %v4166_v44 = vor.u32 %v5384_v35, %v4163_v36  ;;  %v5491_v60 = vld [vmem:[%s5820_s14 + $0x7f4] sm:$0xf0] }
  0xb3   : > { %2055 = vmatpush.bf16.msra.mxu1 %v4258_v14  ;;  %v4454_v14 = vor.u32 %v5456_v20, %v4451_v0  ;;  %v6203_v29 = vor.u32 %v1392_v6, %v1388_v5  ;;  %v4422_v46 = vor.u32 %v5448_v40, %v4419_v41  ;;  %v4387_v20 = vld [vmem:[%s5820_s14 + $0x670] sm:$0xf0]  ;;  %v4134_v0 = vor.u32 %v5376_v17, %v4131_v58  ;;  %v5404_v5 = vld [vmem:[%s5820_s14 + $0x544] sm:$0xf] }
  0xb4   : > { %2068 = vmatpush.bf16.msra.mxu2 %v4386_v16  ;;  %v5388_v16 = vld [vmem:[%s5820_s14 + $0x4c4] sm:$0xf]  ;;  %v6207_v32 = vor.u32 %v1380_v12, %v1376_v11  ;;  %v4390_v2 = vor.u32 %v5440_v61, %v4387_v20  ;;  %v4499_v11 = vld [vmem:[%s5820_s14 + $0x750] sm:$0xf0] }
  0xb5   : > { %2081 = vmatpush.bf16.msra.mxu3 %v4514_v23  ;;  %v4307_v23 = vld [vmem:[%s5820_s14 + $0x5d0] sm:$0xf0]  ;;  %v4182_v31 = vor.u32 %v5388_v16, %v4179_v18 }
  0xb6   : > { %2043 = vmatpush.bf16.msra.mxu0 %v4114_v30  ;;  %v6205_v30 = vor.u32 %v1374_v8, %v1370_v7  ;;  %v4310_v33 = vor.u32 %v5420_v21, %v4307_v23  ;;  %v4243_v7 = vld [vmem:[%s5820_s14 + $0x550] sm:$0xf0]  ;;  %v5436_v8 = vld [vmem:[%s5820_s14 + $0x644] sm:$0xf] }
  0xb7   : > { %2056 = vmatpush.bf16.msra.mxu1 %v4242_v37  ;;  %v5416_v37 = vld [vmem:[%s5820_s14 + $0x5a4] sm:$0xf]  ;;  %v4246_v16 = vor.u32 %v5404_v5, %v4243_v7  ;;  %v5423_v5 = vld [vmem:[%s5820_s14 + $0x5d4] sm:$0xf0] }
  0xb8   : > { %2069 = vmatpush.bf16.msra.mxu2 %v4370_v38  ;;  %v4566_v38 = vor.u32 %v5484_v27, %v4563_v28  ;;  %v4294_v45 = vor.u32 %v5416_v37, %v4291_v39  ;;  %v5368_v21 = vld [vmem:[%s5820_s14 + $0x424] sm:$0xf]  ;;  %v4227_v27 = vld [vmem:[%s5820_s14 + $0x530] sm:$0xf0]  ;;  %v5455_v7 = vld [vmem:[%s5820_s14 + $0x6d4] sm:$0xf0] }
  0xb9   : > { %2082 = vmatpush.bf16.msra.mxu3 %v4498_v42  ;;  %v5480_v42 = vld [vmem:[%s5820_s14 + $0x7a4] sm:$0xf] }
  0xba   : > { %2044 = vmatpush.bf16.msra.mxu0 %v4098_v48  ;;  %v4147_v48 = vld [vmem:[%s5820_s14 + $0x490] sm:$0xf0]  ;;  %v4550_v50 = vor.u32 %v5480_v42, %v4547_v43  ;;  %v5400_v23 = vld [vmem:[%s5820_s14 + $0x524] sm:$0xf] }
  0xbb   : > { %2057 = vmatpush.bf16.msra.mxu1 %v4226_v52  ;;  %v5444_v52 = vld [vmem:[%s5820_s14 + $0x684] sm:$0xf]  ;;  %v4150_v55 = vor.u32 %v5380_v47, %v4147_v48  ;;  %v4230_v40 = vor.u32 %v5400_v23, %v4227_v27  ;;  %v4211_v43 = vld [vmem:[%s5820_s14 + $0x510] sm:$0xf0]  ;;  %v4425_v23 = vld [vmem:[%s5820_s14 + $0x6a8] sm:$0xf] }
  0xbc   : > { %2070 = vmatpush.bf16.msra.mxu2 %v4354_v53  ;;  %v4403_v53 = vld [vmem:[%s5820_s14 + $0x690] sm:$0xf0]  ;;  %v5432_v28 = vld [vmem:[%s5820_s14 + $0x624] sm:$0xf]  ;;  %v5483_v27 = vld [vmem:[%s5820_s14 + $0x7b4] sm:$0xf0] }
  0xbd   : > { %2083 = vmatpush.bf16.msra.mxu3 %v4482_v57  ;;  %v4406_v57 = vor.u32 %v5444_v52, %v4403_v53  ;;  %v5364_v37 = vld [vmem:[%s5820_s14 + $0x404] sm:$0xf]  ;;  %v4467_v48 = vld [vmem:[%s5820_s14 + $0x710] sm:$0xf0]  ;;  %v4329_v52 = vld [vmem:[%s5820_s14 + $0x5e8] sm:$0xf] }
  0xbe   : > { %2045 = vmatpush.bf16.msra.mxu0 %v4082_v59  ;;  %v4534_v59 = vor.u32 %v5476_v54, %v4531_v15  ;;  %v5396_v42 = vld [vmem:[%s5820_s14 + $0x504] sm:$0xf] }
  0xbf   : > { %2058 = vmatpush.bf16.msra.mxu1 %v4210_v62  ;;  %v5472_v62 = vld [vmem:[%s5820_s14 + $0x764] sm:$0xf]  ;;  %v4214_v58 = vor.u32 %v5396_v42, %v4211_v43  ;;  %v5479_v42 = vld [vmem:[%s5820_s14 + $0x794] sm:$0xf0] }
  0xc0   : > { %2071 = vmatpush.bf16.msra.mxu2 %v4338_v63  ;;  %v4515_v63 = vld [vmem:[%s5820_s14 + $0x770] sm:$0xf0]  ;;  %v5460_v47 = vld [vmem:[%s5820_s14 + $0x704] sm:$0xf] }
  0xc1   : > { %2084 = vmatpush.bf16.msra.mxu3 %v4466_v9  ;;  %2046 = vmatmul.bf16.vlgmr.msra.gmra.mxu0 %v6205_v30  ;;  %v4518_v6 = vor.u32 %v5472_v62, %v4515_v63  ;;  %v4371_v9 = vld [vmem:[%s5820_s14 + $0x650] sm:$0xf0]  ;;  %v4470_v61 = vor.u32 %v5460_v47, %v4467_v48  ;;  %v4137_v48 = vld [vmem:[%s5820_s14 + $0x468] sm:$0xf] }
  0xc2   : > { %2090 = vmatpush.bf16.msrb.mxu0 %v4198_v10  ;;  %2059 = vmatmul.bf16.vlgmr.msra.gmra.mxu1 %v6207_v32  ;;  %v5468_v10 = vld [vmem:[%s5820_s14 + $0x744] sm:$0xf]  ;;  %v4374_v18 = vor.u32 %v5436_v8, %v4371_v9  ;;  %v4569_v8 = vld [vmem:[%s5820_s14 + $0x7c8] sm:$0xf]  ;;  %v5487_v9 = vld [vmem:[%s5820_s14 + $0x7d4] sm:$0xf0] }
  0xc3   : > { %2103 = vmatpush.bf16.msrb.mxu1 %v4326_v13  ;;  %2072 = vmatmul.bf16.vlgmr.msra.gmra.mxu2 %v6199_v26  ;;  %v4118_v13 = vor.u32 %v5372_v3, %v4115_v4  ;;  %v4502_v25 = vor.u32 %v5468_v10, %v4499_v11 }
  0xc4   : > { %2116 = vmatpush.bf16.msrb.mxu2 %v4454_v14  ;;  %2085 = vmatmul.bf16.vlgmr.msra.gmra.mxu3 %v6203_v29 }
  0xc5   : > { %2129 = vmatpush.bf16.msrb.mxu3 %v4582_v22  ;;  %v4099_v22 = vld [vmem:[%s5820_s14 + $0x430] sm:$0xf0] }
  0xc6   : > { %2091 = vmatpush.bf16.msrb.mxu0 %v4182_v31  ;;  %v4355_v31 = vld [vmem:[%s5820_s14 + $0x630] sm:$0xf0]  ;;  %v4102_v36 = vor.u32 %v5368_v21, %v4099_v22  ;;  %v4570_v21 = vor.u32 %v5487_v9, %v4569_v8  ;;  %v5419_v22 = vld [vmem:[%s5820_s14 + $0x5b4] sm:$0xf0]  ;;  %v4105_v8 = vld [vmem:[%s5820_s14 + $0x428] sm:$0xf] }
  0xc7   : > { %2104 = vmatpush.bf16.msrb.mxu1 %v4310_v33  ;;  %v1029_v14 = vpop.f32.mrf.mxu1  ;;  %v5464_v33 = vld [vmem:[%s5820_s14 + $0x724] sm:$0xf]  ;;  %v4358_v41 = vor.u32 %v5432_v28, %v4355_v31 }
  0xc8   : > { %2117 = vmatpush.bf16.msrb.mxu2 %v4438_v34  ;;  %v1016_v12 = vpop.f32.mrf.mxu0  ;;  %v4483_v34 = vld [vmem:[%s5820_s14 + $0x730] sm:$0xf0] }
  0xc9   : > { %2130 = vmatpush.bf16.msrb.mxu3 %v4566_v38  ;;  %v1030_v24 = vadd.f32 %v1029_v14, %v1016_v12  ;;  %v4083_v38 = vld [vmem:[%s5820_s14 + $0x410] sm:$0xf0]  ;;  %v4169_v14 = vld [vmem:[%s5820_s14 + $0x4a8] sm:$0xf] }
  0xca   : > { %2092 = vmatpush.bf16.msrb.mxu0 %v4166_v44  ;;  %v5428_v44 = vld [vmem:[%s5820_s14 + $0x604] sm:$0xf]  ;;  %v4086_v15 = vor.u32 %v5364_v37, %v4083_v38  ;;  %v5415_v38 = vld [vmem:[%s5820_s14 + $0x594] sm:$0xf0] }
  0xcb   : > { %2105 = vmatpush.bf16.msrb.mxu1 %v4294_v45  ;;  %v4486_v45 = vor.u32 %v5464_v33, %v4483_v34  ;;  %v1055_v49 = vpop.f32.mrf.mxu3  ;;  %v4153_v34 = vld [vmem:[%s5820_s14 + $0x488] sm:$0xf] }
  0xcc   : > { %2118 = vmatpush.bf16.msrb.mxu2 %v4422_v46  ;;  %v1042_v35 = vpop.f32.mrf.mxu2  ;;  %v4339_v46 = vld [vmem:[%s5820_s14 + $0x610] sm:$0xf0] }
  0xcd   : > { %2131 = vmatpush.bf16.msrb.mxu3 %v4550_v50  ;;  %v1043_v39 = vadd.f32 %v1042_v35, %v1030_v24  ;;  %v4201_v50 = vld [vmem:[%s5820_s14 + $0x4e8] sm:$0xf]  ;;  %v4342_v19 = vor.u32 %v5428_v44, %v4339_v46  ;;  %v5451_v24 = vld [vmem:[%s5820_s14 + $0x6b4] sm:$0xf0] }
  0xce   : > { %2093 = vmatpush.bf16.msrb.mxu0 %v4150_v55  ;;  %v5427_v55 = vld [vmem:[%s5820_s14 + $0x5f4] sm:$0xf0]  ;;  %v4202_v20 = vor.u32 %v5395_v51, %v4201_v50  ;;  %v4426_v33 = vor.u32 %v5451_v24, %v4425_v23  ;;  %v4265_v50 = vld [vmem:[%s5820_s14 + $0x568] sm:$0xf] }
  0xcf   : > { %2106 = vmatpush.bf16.msrb.mxu1 %v4278_v56  ;;  %v6264_v53 = vadd.f32 %v1055_v49, %v1043_v39  ;;  %v4457_v56 = vld [vmem:[%s5820_s14 + $0x6e8] sm:$0xf]  ;;  %v1031_v17 = vpop.f32.mrf.mxu1  ;;  %v4330_v62 = vor.u32 %v5427_v55, %v4329_v52  ;;  %v5383_v35 = vld [vmem:[%s5820_s14 + $0x494] sm:$0xf0] }
  0xd0   : > { %2119 = vmatpush.bf16.msrb.mxu2 %v4406_v57  ;;  %v1018_v54 = vpop.f32.mrf.mxu0  ;;  %v5459_v57 = vld [vmem:[%s5820_s14 + $0x6f4] sm:$0xf0]  ;;  %v4409_v39 = vld [vmem:[%s5820_s14 + $0x688] sm:$0xf]  ;;  %v4154_v43 = vor.u32 %v5383_v35, %v4153_v34 }
  0xd1   : > { %2132 = vmatpush.bf16.msrb.mxu3 %v4534_v59  ;;  %v4585_v59 = vld [vmem:[%s5820_s14 + $0x7e8] sm:$0xf]  ;;  %v4458_v63 = vor.u32 %v5459_v57, %v4457_v56  ;;  %v5379_v49 = vld [vmem:[%s5820_s14 + $0x474] sm:$0xf0] }
  0xd2   : > { %2094 = vmatpush.bf16.msrb.mxu0 %v4134_v0  ;;  %v4185_v0 = vld [vmem:[%s5820_s14 + $0x4c8] sm:$0xf]  ;;  %v4586_v4 = vor.u32 %v5491_v60, %v4585_v59  ;;  %v5411_v54 = vld [vmem:[%s5820_s14 + $0x574] sm:$0xf0]  ;;  %v4138_v17 = vor.u32 %v5379_v49, %v4137_v48  ;;  %v4331_v48 = vld [vmem:[%s5820_s14 + $0x5f8] sm:$0xf0] }
  0xd3   : > { %2107 = vmatpush.bf16.msrb.mxu1 %v4262_v1  ;;  %v5391_v1 = vld [vmem:[%s5820_s14 + $0x4d4] sm:$0xf0]  ;;  %v1057_v11 = vpop.f32.mrf.mxu3  ;;  %v4521_v56 = vld [vmem:[%s5820_s14 + $0x768] sm:$0xf]  ;;  %v5457_v49 = vld [vmem:[%s5820_s14 + $0x6ec] sm:$0xf] }
  0xd4   : > { %2120 = vmatpush.bf16.msrb.mxu2 %v4390_v2  ;;  %v4313_v2 = vld [vmem:[%s5820_s14 + $0x5c8] sm:$0xf]  ;;  %v1044_v3 = vpop.f32.mrf.mxu2  ;;  %v4186_v10 = vor.u32 %v5391_v1, %v4185_v0  ;;  %v5443_v55 = vld [vmem:[%s5820_s14 + $0x674] sm:$0xf0] }
  0xd5   : > { %2133 = vmatpush.bf16.msrb.mxu3 %v4518_v6  ;;  %v4441_v6 = vld [vmem:[%s5820_s14 + $0x6c8] sm:$0xf]  ;;  %v4314_v12 = vor.u32 %v5423_v5, %v4313_v2  ;;  %v5475_v57 = vld [vmem:[%s5820_s14 + $0x774] sm:$0xf0] }
  0xd6   : > { %2095 = vmatpush.bf16.msrb.mxu0 %v4118_v13  ;;  %v4442_v13 = vor.u32 %v5455_v7, %v4441_v6  ;;  %v4121_v60 = vld [vmem:[%s5820_s14 + $0x448] sm:$0xf]  ;;  %v5407_v1 = vld [vmem:[%s5820_s14 + $0x554] sm:$0xf0] }
  0xd7   : > { %2108 = vmatpush.bf16.msrb.mxu1 %v4246_v16  ;;  %v5387_v16 = vld [vmem:[%s5820_s14 + $0x4b4] sm:$0xf0]  ;;  %v4377_v2 = vld [vmem:[%s5820_s14 + $0x648] sm:$0xf] }
  0xd8   : > { %2121 = vmatpush.bf16.msrb.mxu2 %v4374_v18  ;;  %v4297_v18 = vld [vmem:[%s5820_s14 + $0x5a8] sm:$0xf]  ;;  %v4170_v28 = vor.u32 %v5387_v16, %v4169_v14  ;;  %v5439_v3 = vld [vmem:[%s5820_s14 + $0x654] sm:$0xf0] }
  0xd9   : > { %2134 = vmatpush.bf16.msrb.mxu3 %v4502_v25  ;;  %v4553_v25 = vld [vmem:[%s5820_s14 + $0x7a8] sm:$0xf]  ;;  %v4298_v31 = vor.u32 %v5419_v22, %v4297_v18  ;;  %v5471_v5 = vld [vmem:[%s5820_s14 + $0x754] sm:$0xf0]  ;;  %v4378_v11 = vor.u32 %v5439_v3, %v4377_v2 }
  0xda   : > { %2096 = vmatpush.bf16.msrb.mxu0 %v4102_v36  ;;  %v4281_v36 = vld [vmem:[%s5820_s14 + $0x588] sm:$0xf]  ;;  %v4554_v37 = vor.u32 %v5483_v27, %v4553_v25  ;;  %v5403_v14 = vld [vmem:[%s5820_s14 + $0x534] sm:$0xf0] }
  0xdb   : > { %2109 = vmatpush.bf16.msrb.mxu1 %v4230_v40  ;;  %v5447_v40 = vld [vmem:[%s5820_s14 + $0x694] sm:$0xf0]  ;;  %v4361_v22 = vld [vmem:[%s5820_s14 + $0x628] sm:$0xf] }
  0xdc   : > { %2122 = vmatpush.bf16.msrb.mxu2 %v4358_v41  ;;  %v4537_v41 = vld [vmem:[%s5820_s14 + $0x788] sm:$0xf]  ;;  %v4410_v46 = vor.u32 %v5447_v40, %v4409_v39  ;;  %v5435_v23 = vld [vmem:[%s5820_s14 + $0x634] sm:$0xf0] }
  0xdd   : > { %2135 = vmatpush.bf16.msrb.mxu3 %v4486_v45  ;;  %v4282_v45 = vor.u32 %v5415_v38, %v4281_v36  ;;  %v4538_v51 = vor.u32 %v5479_v42, %v4537_v41  ;;  %v4489_v24 = vld [vmem:[%s5820_s14 + $0x728] sm:$0xf]  ;;  %v5467_v25 = vld [vmem:[%s5820_s14 + $0x734] sm:$0xf0]  ;;  %v4362_v35 = vor.u32 %v5435_v23, %v4361_v22  ;;  %v5413_v22 = vld [vmem:[%s5820_s14 + $0x58c] sm:$0xf] }
  0xde   : > { %2097 = vmatpush.bf16.msrb.mxu0 %v4086_v15  ;;  %v1068_v44 = vpop.f32.mrf.mxu0  ;;  %v4393_v15 = vld [vmem:[%s5820_s14 + $0x668] sm:$0xf]  ;;  %v4490_v39 = vor.u32 %v5467_v25, %v4489_v24  ;;  %v5431_v40 = vld [vmem:[%s5820_s14 + $0x614] sm:$0xf0]  ;;  %v4283_v24 = vld [vmem:[%s5820_s14 + $0x598] sm:$0xf0] }
  0xdf   : > { %2110 = vmatpush.bf16.msrb.mxu1 %v4214_v58  ;;  %v1081_v47 = vpop.f32.mrf.mxu1  ;;  %v4266_v58 = vor.u32 %v5411_v54, %v4265_v50  ;;  %v4217_v36 = vld [vmem:[%s5820_s14 + $0x508] sm:$0xf]  ;;  %v5463_v42 = vld [vmem:[%s5820_s14 + $0x714] sm:$0xf0]  ;;  %v4459_v50 = vld [vmem:[%s5820_s14 + $0x6f8] sm:$0xf0] }
  0xe0   : > { %2123 = vmatpush.bf16.msrb.mxu2 %v4342_v19  ;;  %v1082_v52 = vadd.f32 %v1081_v47, %v1068_v44  ;;  %v4394_v19 = vor.u32 %v5443_v55, %v4393_v15  ;;  %v4473_v41 = vld [vmem:[%s5820_s14 + $0x708] sm:$0xf]  ;;  %v5393_v44 = vld [vmem:[%s5820_s14 + $0x4ec] sm:$0xf]  ;;  %v4587_v15 = vld [vmem:[%s5820_s14 + $0x7f8] sm:$0xf0] }
  0xe1   : > { %2136 = vmatpush.bf16.msrb.mxu3 %v4470_v61  ;;  %2098 = vmatmul.bf16.vlgmr.msrb.gmra.mxu0 %v6205_v30  ;;  %v5375_v61 = vld [vmem:[%s5820_s14 + $0x454] sm:$0xf0]  ;;  %v5489_v54 = vld [vmem:[%s5820_s14 + $0x7ec] sm:$0xf]  ;;  %v4474_v55 = vor.u32 %v5463_v42, %v4473_v41  ;;  %v4267_v42 = vld [vmem:[%s5820_s14 + $0x578] sm:$0xf0] }
  0xe2   : > { %2142 = vmatpush.bf16.msra.mxu0 %v4202_v20  ;;  %2111 = vmatmul.bf16.vlgmr.msrb.gmra.mxu1 %v6207_v32  ;;  %v4249_v20 = vld [vmem:[%s5820_s14 + $0x548] sm:$0xf]  ;;  %v4122_v7 = vor.u32 %v5375_v61, %v4121_v60  ;;  %v4590_v60 = vor.u32 %v5489_v54, %v4587_v15  ;;  %v4315_v61 = vld [vmem:[%s5820_s14 + $0x5d8] sm:$0xf0]  ;;  %v5445_v25 = vld [vmem:[%s5820_s14 + $0x68c] sm:$0xf] }
  0xe3   : > { %2155 = vmatpush.bf16.msra.mxu1 %v4330_v62  ;;  %2124 = vmatmul.bf16.vlgmr.msrb.gmra.mxu2 %v6199_v26  ;;  %v4522_v62 = vor.u32 %v5475_v57, %v4521_v56  ;;  %v5405_v54 = vld [vmem:[%s5820_s14 + $0x54c] sm:$0xf] }
  0xe4   : > { %2168 = vmatpush.bf16.msra.mxu2 %v4458_v63  ;;  %2137 = vmatmul.bf16.vlgmr.msrb.gmra.mxu3 %v6203_v29 }
  0xe5   : > { %2181 = vmatpush.bf16.msra.mxu3 %v4586_v4  ;;  %v4505_v4 = vld [vmem:[%s5820_s14 + $0x748] sm:$0xf] }
  0xe6   : > { %2143 = vmatpush.bf16.msra.mxu0 %v4186_v10  ;;  %v1094_v59 = vpop.f32.mrf.mxu2  ;;  %v1070_v9 = vpop.f32.mrf.mxu0  ;;  %v4250_v10 = vor.u32 %v5407_v1, %v4249_v20  ;;  %v5453_v20 = vld [vmem:[%s5820_s14 + $0x6cc] sm:$0xf] }
  0xe7   : > { %2156 = vmatpush.bf16.msra.mxu1 %v4314_v12  ;;  %v1095_v63 = vadd.f32 %v1094_v59, %v1082_v52  ;;  %v1107_v0 = vpop.f32.mrf.mxu3  ;;  %v5371_v12 = vld [vmem:[%s5820_s14 + $0x434] sm:$0xf0]  ;;  %v1083_v16 = vpop.f32.mrf.mxu1  ;;  %v5421_v59 = vld [vmem:[%s5820_s14 + $0x5cc] sm:$0xf] }
  0xe8   : > { %2169 = vmatpush.bf16.msra.mxu2 %v4442_v13  ;;  %v4233_v13 = vld [vmem:[%s5820_s14 + $0x528] sm:$0xf]  ;;  %v4318_v2 = vor.u32 %v5421_v59, %v4315_v61  ;;  %v5449_v9 = vld [vmem:[%s5820_s14 + $0x6ac] sm:$0xf] }
  0xe9   : > { %2182 = vmatpush.bf16.msra.mxu3 %v4570_v21  ;;  %v1108_v6 = vadd.f32 %v1107_v0, %v1095_v63  ;;  %v4506_v21 = vor.u32 %v5471_v5, %v4505_v4  ;;  %v4234_v34 = vor.u32 %v5403_v14, %v4233_v13  ;;  %v5485_v63 = vld [vmem:[%s5820_s14 + $0x7cc] sm:$0xf]  ;;  %v4571_v0 = vld [vmem:[%s5820_s14 + $0x7d8] sm:$0xf0] }
  0xea   : > { %2144 = vmatpush.bf16.msra.mxu0 %v4170_v28  ;;  %v4106_v28 = vor.u32 %v5371_v12, %v4105_v8  ;;  %v5385_v4 = vld [vmem:[%s5820_s14 + $0x4ac] sm:$0xf]  ;;  %v4171_v5 = vld [vmem:[%s5820_s14 + $0x4b8] sm:$0xf0] }
  0xeb   : > { %2157 = vmatpush.bf16.msra.mxu1 %v4298_v31  ;;  %v1219_v18 = vrot.slane %v1108_v6, 6  ;;  %v4089_v31 = vld [vmem:[%s5820_s14 + $0x408] sm:$0xf]  ;;  %v5417_v6 = vld [vmem:[%s5820_s14 + $0x5ac] sm:$0xf]  ;;  %v4174_v13 = vor.u32 %v5385_v4, %v4171_v5 }
  0xec   : > { %2170 = vmatpush.bf16.msra.mxu2 %v4426_v33  ;;  %v5367_v33 = vld [vmem:[%s5820_s14 + $0x414] sm:$0xf0]  ;;  %v4299_v8 = vld [vmem:[%s5820_s14 + $0x5b8] sm:$0xf0]  ;;  %v5469_v59 = vld [vmem:[%s5820_s14 + $0x74c] sm:$0xf] }
  0xed   : > { %2183 = vmatpush.bf16.msra.mxu3 %v4554_v37  ;;  %v6325_v27 = vsel %vm1222_vm0, %v6264_v53, %v1219_v18  ;;  %v5399_v37 = vld [vmem:[%s5820_s14 + $0x514] sm:$0xf0]  ;;  %v4345_v53 = vld [vmem:[%s5820_s14 + $0x608] sm:$0xf]  ;;  %v4090_v47 = vor.u32 %v5367_v33, %v4089_v31  ;;  %v4555_v12 = vld [vmem:[%s5820_s14 + $0x7b8] sm:$0xf0]  ;;  %v4302_v14 = vor.u32 %v5417_v6, %v4299_v8 }
  0xee   : > { %2145 = vmatpush.bf16.msra.mxu0 %v4154_v43  ;;  %v1096_v38 = vpop.f32.mrf.mxu2  ;;  %v4346_v52 = vor.u32 %v5431_v40, %v4345_v53  ;;  %v5381_v18 = vld [vmem:[%s5820_s14 + $0x48c] sm:$0xf]  ;;  %v4539_v33 = vld [vmem:[%s5820_s14 + $0x798] sm:$0xf0] }
  0xef   : > { %2158 = vmatpush.bf16.msra.mxu1 %v4282_v45  ;;  %v1109_v43 = vpop.f32.mrf.mxu3  ;;  %v4203_v45 = vld [vmem:[%s5820_s14 + $0x4f8] sm:$0xf0]  ;;  %v5477_v31 = vld [vmem:[%s5820_s14 + $0x78c] sm:$0xf] }
  0xf0   : > { %2171 = vmatpush.bf16.msra.mxu2 %v4410_v46  ;;  %v5425_v46 = vld [vmem:[%s5820_s14 + $0x5ec] sm:$0xf]  ;;  %v4206_v56 = vor.u32 %v5393_v44, %v4203_v45  ;;  %v4139_v38 = vld [vmem:[%s5820_s14 + $0x478] sm:$0xf0]  ;;  %v4542_v41 = vor.u32 %v5477_v31, %v4539_v33 }
  0xf1   : > { %2184 = vmatpush.bf16.msra.mxu3 %v4538_v51  ;;  %v4218_v51 = vor.u32 %v5399_v37, %v4217_v36  ;;  %v4334_v57 = vor.u32 %v5425_v46, %v4331_v48  ;;  %v4286_v36 = vor.u32 %v5413_v22, %v4283_v24  ;;  %v5377_v53 = vld [vmem:[%s5820_s14 + $0x46c] sm:$0xf]  ;;  %v4395_v44 = vld [vmem:[%s5820_s14 + $0x678] sm:$0xf0] }
  0xf2   : > { %2146 = vmatpush.bf16.msra.mxu0 %v4138_v17  ;;  %v4462_v17 = vor.u32 %v5457_v49, %v4459_v50  ;;  %v5441_v43 = vld [vmem:[%s5820_s14 + $0x66c] sm:$0xf]  ;;  %v4142_v48 = vor.u32 %v5377_v53, %v4139_v38  ;;  %v4235_v6 = vld [vmem:[%s5820_s14 + $0x538] sm:$0xf0]  ;;  %v5554_v53 = vld [vmem:[%s5820_s14 + $0x9ec] sm:$0xf0] }
  0xf3   : > { %2159 = vmatpush.bf16.msra.mxu1 %v4266_v58  ;;  %v5389_v58 = vld [vmem:[%s5820_s14 + $0x4cc] sm:$0xf]  ;;  %v4398_v50 = vor.u32 %v5441_v43, %v4395_v44  ;;  %v4363_v8 = vld [vmem:[%s5820_s14 + $0x638] sm:$0xf0]  ;;  %v5090_v38 = vld [vmem:[%s5820_s14 + $0xae0] sm:$0xf] }
  0xf4   : > { %2172 = vmatpush.bf16.msra.mxu2 %v4394_v19  ;;  %v4187_v19 = vld [vmem:[%s5820_s14 + $0x4d8] sm:$0xf0]  ;;  %v5473_v46 = vld [vmem:[%s5820_s14 + $0x76c] sm:$0xf]  ;;  %v5618_v43 = vld [vmem:[%s5820_s14 + $0xbec] sm:$0xf0] }
  0xf5   : > { %2185 = vmatpush.bf16.msra.mxu3 %v4522_v62  ;;  %v4443_v62 = vld [vmem:[%s5820_s14 + $0x6d8] sm:$0xf0]  ;;  %v4190_v1 = vor.u32 %v5389_v58, %v4187_v19  ;;  %v5429_v22 = vld [vmem:[%s5820_s14 + $0x60c] sm:$0xf] }
  0xf6   : > { %2147 = vmatpush.bf16.msra.mxu0 %v4122_v7  ;;  %v4446_v3 = vor.u32 %v5453_v20, %v4443_v62  ;;  %v4574_v7 = vor.u32 %v5485_v63, %v4571_v0  ;;  %v4475_v31 = vld [vmem:[%s5820_s14 + $0x718] sm:$0xf0] }
  0xf7   : > { %2160 = vmatpush.bf16.msra.mxu1 %v4250_v10  ;;  %v4427_v10 = vld [vmem:[%s5820_s14 + $0x6b8] sm:$0xf0] }
  0xf8   : > { %2173 = vmatpush.bf16.msra.mxu2 %v4378_v11  ;;  %v5481_v11 = vld [vmem:[%s5820_s14 + $0x7ac] sm:$0xf]  ;;  %v4430_v16 = vor.u32 %v5449_v9, %v4427_v10  ;;  %v4491_v10 = vld [vmem:[%s5820_s14 + $0x738] sm:$0xf0] }
  0xf9   : > { %2186 = vmatpush.bf16.msra.mxu3 %v4506_v21  ;;  %v4155_v21 = vld [vmem:[%s5820_s14 + $0x498] sm:$0xf0]  ;;  %v4558_v23 = vor.u32 %v5481_v11, %v4555_v12  ;;  %v5465_v9 = vld [vmem:[%s5820_s14 + $0x72c] sm:$0xf] }
  0xfa   : > { %2148 = vmatpush.bf16.msra.mxu0 %v4106_v28  ;;  %v4411_v28 = vld [vmem:[%s5820_s14 + $0x698] sm:$0xf0]  ;;  %v5365_v12 = vld [vmem:[%s5820_s14 + $0x40c] sm:$0xf]  ;;  %v4494_v24 = vor.u32 %v5465_v9, %v4491_v10  ;;  %v5574_v9 = vld [vmem:[%s5820_s14 + $0xa8c] sm:$0xf0] }
  0xfb   : > { %2161 = vmatpush.bf16.msra.mxu1 %v4234_v34  ;;  %v4158_v34 = vor.u32 %v5381_v18, %v4155_v21  ;;  %v4414_v37 = vor.u32 %v5445_v25, %v4411_v28  ;;  %v5397_v18 = vld [vmem:[%s5820_s14 + $0x50c] sm:$0xf]  ;;  %v4219_v21 = vld [vmem:[%s5820_s14 + $0x518] sm:$0xf0]  ;;  %v5170_v10 = vld [vmem:[%s5820_s14 + $0xb80] sm:$0xf] }
  0xfc   : > { %2174 = vmatpush.bf16.msra.mxu2 %v4362_v35  ;;  %v4347_v25 = vld [vmem:[%s5820_s14 + $0x618] sm:$0xf0]  ;;  %v5461_v28 = vld [vmem:[%s5820_s14 + $0x70c] sm:$0xf] }
  0xfd   : > { %2187 = vmatpush.bf16.msra.mxu3 %v4490_v39  ;;  %v5409_v39 = vld [vmem:[%s5820_s14 + $0x56c] sm:$0xf]  ;;  %v4478_v44 = vor.u32 %v5461_v28, %v4475_v31  ;;  %v5026_v28 = vld [vmem:[%s5820_s14 + $0xa60] sm:$0xf]  ;;  %v5570_v31 = vld [vmem:[%s5820_s14 + $0xa6c] sm:$0xf0] }
  0xfe   : > { %2149 = vmatpush.bf16.msra.mxu0 %v4090_v47  ;;  %v1120_v35 = vpop.f32.mrf.mxu0  ;;  %v4523_v47 = vld [vmem:[%s5820_s14 + $0x778] sm:$0xf0]  ;;  %v4270_v49 = vor.u32 %v5409_v39, %v4267_v42  ;;  %v5586_v39 = vld [vmem:[%s5820_s14 + $0xaec] sm:$0xf0]  ;;  %v5218_v42 = vld [vmem:[%s5820_s14 + $0xbe0] sm:$0xf] }
  0xff   : > { %2162 = vmatpush.bf16.msra.mxu1 %v4218_v51  ;;  %v1133_v40 = vpop.f32.mrf.mxu1  ;;  %v5373_v51 = vld [vmem:[%s5820_s14 + $0x44c] sm:$0xf] }
 0x100   : > { %2175 = vmatpush.bf16.msra.mxu2 %v4346_v52  ;;  %v1134_v45 = vadd.f32 %v1133_v40, %v1120_v35  ;;  %v4123_v52 = vld [vmem:[%s5820_s14 + $0x458] sm:$0xf0]  ;;  %v5522_v35 = vld [vmem:[%s5820_s14 + $0x8ec] sm:$0xf0]  ;;  %v4222_v40 = vor.u32 %v5397_v18, %v4219_v21  ;;  %v4770_v18 = vld [vmem:[%s5820_s14 + $0x860] sm:$0xf] }
 0x101   : > { %2188 = vmatpush.bf16.msra.mxu3 %v4474_v55  ;;  %2150 = vmatmul.bf16.vlgmr.msra.gmra.mxu0 %v6205_v30  ;;  %v4526_v55 = vor.u32 %v5473_v46, %v4523_v47  ;;  %v4126_v61 = vor.u32 %v5373_v51, %v4123_v52  ;;  %v5091_v47 = vor.u32 %v5586_v39, %v5090_v38  ;;  %v5550_v52 = vld [vmem:[%s5820_s14 + $0x9cc] sm:$0xf0]  ;;  %v4754_v38 = vld [vmem:[%s5820_s14 + $0x840] sm:$0xf] }
 0x102   : > { %2194 = vmatpush.bf16.msrb.mxu0 %v4206_v56  ;;  %2163 = vmatmul.bf16.vlgmr.msra.gmra.mxu1 %v6207_v32  ;;  %v4251_v56 = vld [vmem:[%s5820_s14 + $0x558] sm:$0xf0]  ;;  %v5219_v51 = vor.u32 %v5618_v43, %v5218_v42  ;;  %v5506_v21 = vld [vmem:[%s5820_s14 + $0x86c] sm:$0xf0] }
 0x103   : > { %2207 = vmatpush.bf16.msrb.mxu1 %v4334_v57  ;;  %2176 = vmatmul.bf16.vlgmr.msra.gmra.mxu2 %v6199_v26  ;;  %v5437_v57 = vld [vmem:[%s5820_s14 + $0x64c] sm:$0xf]  ;;  %v4254_v63 = vor.u32 %v5405_v54, %v4251_v56  ;;  %v5074_v54 = vld [vmem:[%s5820_s14 + $0xac0] sm:$0xf]  ;;  %v5614_v56 = vld [vmem:[%s5820_s14 + $0xbcc] sm:$0xf0] }
 0x104   : > { %2220 = vmatpush.bf16.msrb.mxu2 %v4462_v17  ;;  %2189 = vmatmul.bf16.vlgmr.msra.gmra.mxu3 %v6203_v29  ;;  %v4379_v17 = vld [vmem:[%s5820_s14 + $0x658] sm:$0xf0]  ;;  %v5502_v39 = vld [vmem:[%s5820_s14 + $0x84c] sm:$0xf0] }
 0x105   : > { %2233 = vmatpush.bf16.msrb.mxu3 %v4590_v60  ;;  %v4507_v60 = vld [vmem:[%s5820_s14 + $0x758] sm:$0xf0]  ;;  %v4382_v0 = vor.u32 %v5437_v57, %v4379_v17 }
 0x106   : > { %2195 = vmatpush.bf16.msrb.mxu0 %v4190_v1  ;;  %v1146_v15 = vpop.f32.mrf.mxu2  ;;  %v1122_v62 = vpop.f32.mrf.mxu0  ;;  %v5369_v1 = vld [vmem:[%s5820_s14 + $0x42c] sm:$0xf]  ;;  %v4510_v5 = vor.u32 %v5469_v59, %v4507_v60  ;;  %v5514_v59 = vld [vmem:[%s5820_s14 + $0x8ac] sm:$0xf0]  ;;  %v4930_v60 = vld [vmem:[%s5820_s14 + $0x9a0] sm:$0xf] }
 0x107   : > { %2208 = vmatpush.bf16.msrb.mxu1 %v4318_v2  ;;  %v1147_v58 = vadd.f32 %v1146_v15, %v1134_v45  ;;  %v1159_v19 = vpop.f32.mrf.mxu3  ;;  %v4107_v2 = vld [vmem:[%s5820_s14 + $0x438] sm:$0xf0]  ;;  %v1135_v4 = vpop.f32.mrf.mxu1  ;;  %v5582_v15 = vld [vmem:[%s5820_s14 + $0xacc] sm:$0xf0] }
 0x108   : > { %2221 = vmatpush.bf16.msrb.mxu2 %v4446_v3  ;;  %v5401_v3 = vld [vmem:[%s5820_s14 + $0x52c] sm:$0xf]  ;;  %v4110_v11 = vor.u32 %v5369_v1, %v4107_v2  ;;  %v5546_v62 = vld [vmem:[%s5820_s14 + $0x9ac] sm:$0xf0]  ;;  %v5186_v1 = vld [vmem:[%s5820_s14 + $0xba0] sm:$0xf] }
 0x109   : > { %2234 = vmatpush.bf16.msrb.mxu3 %v4574_v7  ;;  %v6387_v20 = vadd.f32 %v1159_v19, %v1147_v58  ;;  %v5433_v7 = vld [vmem:[%s5820_s14 + $0x62c] sm:$0xf]  ;;  %v5075_v58 = vor.u32 %v5582_v15, %v5074_v54  ;;  %v4802_v19 = vld [vmem:[%s5820_s14 + $0x8a0] sm:$0xf]  ;;  %v5610_v2 = vld [vmem:[%s5820_s14 + $0xbac] sm:$0xf0] }
 0x10a   : > { %2196 = vmatpush.bf16.msrb.mxu0 %v4174_v13  ;;  %v4091_v13 = vld [vmem:[%s5820_s14 + $0x418] sm:$0xf0] }
 0x10b   : > { %2209 = vmatpush.bf16.msrb.mxu1 %v4302_v14  ;;  %v4238_v14 = vor.u32 %v5401_v3, %v4235_v6  ;;  %v4931_v3 = vor.u32 %v5546_v62, %v4930_v60  ;;  %v5510_v6 = vld [vmem:[%s5820_s14 + $0x88c] sm:$0xf0] }
 0x10c   : > { %2222 = vmatpush.bf16.msrb.mxu2 %v4430_v16  ;;  %v4366_v16 = vor.u32 %v5433_v7, %v4363_v8  ;;  %v5542_v7 = vld [vmem:[%s5820_s14 + $0x98c] sm:$0xf0]  ;;  %v5042_v8 = vld [vmem:[%s5820_s14 + $0xa80] sm:$0xf] }
 0x10d   : > { %2235 = vmatpush.bf16.msrb.mxu3 %v4558_v23  ;;  %v5562_v60 = vld [vmem:[%s5820_s14 + $0xa2c] sm:$0xf0] }
 0x10e   : > { %2197 = vmatpush.bf16.msrb.mxu0 %v4158_v34  ;;  %v1148_v23 = vpop.f32.mrf.mxu2  ;;  %v4834_v34 = vld [vmem:[%s5820_s14 + $0x8e0] sm:$0xf]  ;;  %v5594_v62 = vld [vmem:[%s5820_s14 + $0xb2c] sm:$0xf0] }
 0x10f   : > { %2210 = vmatpush.bf16.msrb.mxu1 %v4286_v36  ;;  %v1161_v33 = vpop.f32.mrf.mxu3  ;;  %v4962_v36 = vld [vmem:[%s5820_s14 + $0x9e0] sm:$0xf]  ;;  %v4835_v45 = vor.u32 %v5522_v35, %v4834_v34  ;;  %v5602_v34 = vld [vmem:[%s5820_s14 + $0xb6c] sm:$0xf0]  ;;  %v4771_v35 = vor.u32 %v5506_v21, %v4770_v18  ;;  %v5092_v18 = vld [vmem:[%s5820_s14 + $0xaf0] sm:$0xf0] }
 0x110   : > { %2223 = vmatpush.bf16.msrb.mxu2 %v4414_v37  ;;  %v4094_v37 = vor.u32 %v5365_v12, %v4091_v13  ;;  %v4963_v46 = vor.u32 %v5554_v53, %v4962_v36  ;;  %v5154_v33 = vld [vmem:[%s5820_s14 + $0xb60] sm:$0xf]  ;;  %v5616_v21 = vld [vmem:[%s5820_s14 + $0xbe4] sm:$0xf] }
 0x111   : > { %2236 = vmatpush.bf16.msrb.mxu3 %v4542_v41  ;;  %v4350_v41 = vor.u32 %v5429_v22, %v4347_v25  ;;  %v4898_v22 = vld [vmem:[%s5820_s14 + $0x960] sm:$0xf]  ;;  %v5538_v25 = vld [vmem:[%s5820_s14 + $0x96c] sm:$0xf0] }
 0x112   : > { %2198 = vmatpush.bf16.msrb.mxu0 %v4142_v48  ;;  %v4818_v48 = vld [vmem:[%s5820_s14 + $0x8c0] sm:$0xf]  ;;  %v4899_v36 = vor.u32 %v5538_v25, %v4898_v22  ;;  %v5220_v22 = vld [vmem:[%s5820_s14 + $0xbf0] sm:$0xf0]  ;;  %v5516_v25 = vld [vmem:[%s5820_s14 + $0x8c4] sm:$0xf] }
 0x113   : > { %2211 = vmatpush.bf16.msrb.mxu1 %v4270_v49  ;;  %v5518_v49 = vld [vmem:[%s5820_s14 + $0x8cc] sm:$0xf0] }
 0x114   : > { %2224 = vmatpush.bf16.msrb.mxu2 %v4398_v50  ;;  %v4946_v50 = vld [vmem:[%s5820_s14 + $0x9c0] sm:$0xf]  ;;  %v4819_v57 = vor.u32 %v5518_v49, %v4818_v48  ;;  %v5598_v48 = vld [vmem:[%s5820_s14 + $0xb4c] sm:$0xf0]  ;;  %v1220_v49 = vrot.slane %v6387_v20, 4 }
 0x115   : > { %2237 = vmatpush.bf16.msrb.mxu3 %v4526_v55  ;;  %v5202_v55 = vld [vmem:[%s5820_s14 + $0xbc0] sm:$0xf]  ;;  %v4947_v17 = vor.u32 %v5550_v52, %v4946_v50  ;;  %v5530_v20 = vld [vmem:[%s5820_s14 + $0x92c] sm:$0xf0] }
 0x116   : > { %2199 = vmatpush.bf16.msrb.mxu0 %v4126_v61  ;;  %v5203_v61 = vor.u32 %v5614_v56, %v5202_v55  ;;  %v4738_v52 = vld [vmem:[%s5820_s14 + $0x820] sm:$0xf]  ;;  %v5498_v56 = vld [vmem:[%s5820_s14 + $0x82c] sm:$0xf0] }
 0x117   : > { %2212 = vmatpush.bf16.msrb.mxu1 %v4254_v63  ;;  %v5058_v63 = vld [vmem:[%s5820_s14 + $0xaa0] sm:$0xf] }
 0x118   : > { %2225 = vmatpush.bf16.msrb.mxu2 %v4382_v0  ;;  %v5578_v0 = vld [vmem:[%s5820_s14 + $0xaac] sm:$0xf0] }
 0x119   : > { %2238 = vmatpush.bf16.msrb.mxu3 %v4510_v5  ;;  %v5059_v4 = vor.u32 %v5578_v0, %v5058_v63  ;;  %v4786_v5 = vld [vmem:[%s5820_s14 + $0x880] sm:$0xf] }
 0x11a   : > { %2200 = vmatpush.bf16.msrb.mxu0 %v4110_v11  ;;  %v5606_v11 = vld [vmem:[%s5820_s14 + $0xb8c] sm:$0xf0]  ;;  %v4722_v63 = vld [vmem:[%s5820_s14 + $0x800] sm:$0xf] }
 0x11b   : > { %2213 = vmatpush.bf16.msrb.mxu1 %v4238_v14  ;;  %v5043_v14 = vor.u32 %v5574_v9, %v5042_v8  ;;  %v5171_v23 = vor.u32 %v5606_v11, %v5170_v10  ;;  %v5590_v10 = vld [vmem:[%s5820_s14 + $0xb0c] sm:$0xf0]  ;;  %v5520_v11 = vld [vmem:[%s5820_s14 + $0x8e4] sm:$0xf] }
 0x11c   : > { %2226 = vmatpush.bf16.msrb.mxu2 %v4366_v16 }
 0x11d   : > { %2239 = vmatpush.bf16.msrb.mxu3 %v4494_v24 }
 0x11e   : > { %2201 = vmatpush.bf16.msrb.mxu0 %v4094_v37  ;;  %v1172_v12 = vpop.f32.mrf.mxu0  ;;  %v5027_v37 = vor.u32 %v5570_v31, %v5026_v28  ;;  %v4820_v28 = vld [vmem:[%s5820_s14 + $0x8d0] sm:$0xf0] }
 0x11f   : > { %2214 = vmatpush.bf16.msrb.mxu1 %v4222_v40  ;;  %v1185_v16 = vpop.f32.mrf.mxu1  ;;  %v4882_v40 = vld [vmem:[%s5820_s14 + $0x940] sm:$0xf]  ;;  %v2398_v31 = vld.sshfl [vmem:[#allocation1 + $0x10] sm:$0xff pattern:$0x73625140] }
 0x120   : > { %2227 = vmatpush.bf16.msrb.mxu2 %v4350_v41  ;;  %v1186_v24 = vadd.f32 %v1185_v16, %v1172_v12  ;;  %v5155_v41 = vor.u32 %v5602_v34, %v5154_v33  ;;  %v5552_v12 = vld [vmem:[%s5820_s14 + $0x9e4] sm:$0xf] }
 0x121   : > { %2240 = vmatpush.bf16.msrb.mxu3 %v4478_v44  ;;  %2202 = vmatmul.bf16.vlgmr.msrb.gmra.mxu0 %v6205_v30  ;;  %v5187_v30 = vor.u32 %v5610_v2, %v5186_v1  ;;  %v5534_v44 = vld [vmem:[%s5820_s14 + $0x94c] sm:$0xf0]  ;;  %v4739_v1 = vor.u32 %v5498_v56, %v4738_v52 }
 0x122   : > { %3050 = vmatpush.bf16.msra.mxu0 %v4835_v45  ;;  %2215 = vmatmul.bf16.vlgmr.msrb.gmra.mxu1 %v6207_v32  ;;  %v4787_v32 = vor.u32 %v5510_v6, %v4786_v5  ;;  %v5010_v45 = vld [vmem:[%s5820_s14 + $0xa40] sm:$0xf]  ;;  %v4883_v15 = vor.u32 %v5534_v44, %v4882_v40  ;;  %v5494_v2 = vld [vmem:[%s5820_s14 + $0x80c] sm:$0xf0]  ;;  %v6493_v44 = vrot.slane %v2398_v31, 1 }
 0x123   : > { %3063 = vmatpush.bf16.msra.mxu1 %v4963_v46  ;;  %2228 = vmatmul.bf16.vlgmr.msrb.gmra.mxu2 %v6199_v26  ;;  %v4803_v26 = vor.u32 %v5514_v59, %v4802_v19  ;;  %v5566_v46 = vld [vmem:[%s5820_s14 + $0xa4c] sm:$0xf0]  ;;  %v4994_v59 = vld [vmem:[%s5820_s14 + $0xa20] sm:$0xf]  ;;  %v4723_v16 = vor.u32 %v5494_v2, %v4722_v63  ;;  %v4788_v63 = vld [vmem:[%s5820_s14 + $0x890] sm:$0xf0] }
 0x124   : > { %3076 = vmatpush.bf16.msra.mxu2 %v5091_v47  ;;  %2241 = vmatmul.bf16.vlgmr.msrb.gmra.mxu3 %v6203_v29  ;;  %v4914_v29 = vld [vmem:[%s5820_s14 + $0x980] sm:$0xf]  ;;  %v5011_v55 = vor.u32 %v5566_v46, %v5010_v45  ;;  %v4995_v6 = vor.u32 %v5562_v60, %v4994_v59  ;;  %v2396_v40 = vld.sshfl [vmem:[#allocation1 + $0x8] sm:$0xff pattern:$0x73625140] }
 0x125   : > { %3089 = vmatpush.bf16.msra.mxu3 %v5219_v51  ;;  %v4915_v13 = vor.u32 %v5542_v7, %v4914_v29  ;;  %v5138_v47 = vld [vmem:[%s5820_s14 + $0xb40] sm:$0xf]  ;;  %v4755_v51 = vor.u32 %v5502_v39, %v4754_v38  ;;  %v4948_v39 = vld [vmem:[%s5820_s14 + $0x9d0] sm:$0xf0]  ;;  %v5612_v45 = vld [vmem:[%s5820_s14 + $0xbc4] sm:$0xf] }
 0x126   : > { %3051 = vmatpush.bf16.msra.mxu0 %v4819_v57  ;;  %v1198_v53 = vpop.f32.mrf.mxu2  ;;  %v1174_v54 = vpop.f32.mrf.mxu0  ;;  %v4866_v57 = vld [vmem:[%s5820_s14 + $0x920] sm:$0xf]  ;;  %v5139_v19 = vor.u32 %v5598_v48, %v5138_v47  ;;  %v5204_v46 = vld [vmem:[%s5820_s14 + $0xbd0] sm:$0xf0]  ;;  %v5532_v31 = vld [vmem:[%s5820_s14 + $0x944] sm:$0xf] }
 0x127   : > { %3064 = vmatpush.bf16.msra.mxu1 %v4947_v17  ;;  %v1199_v42 = vadd.f32 %v1198_v53, %v1186_v24  ;;  %v1211_v43 = vpop.f32.mrf.mxu3  ;;  %v1187_v17 = vpop.f32.mrf.mxu1  ;;  %v4867_v5 = vor.u32 %v5530_v20, %v4866_v57  ;;  %v4978_v29 = vld [vmem:[%s5820_s14 + $0xa00] sm:$0xf]  ;;  %v5512_v54 = vld [vmem:[%s5820_s14 + $0x8a4] sm:$0xf]  ;;  %v5207_v56 = vor.u32 %v5612_v45, %v5204_v46  ;;  %v4932_v57 = vld [vmem:[%s5820_s14 + $0x9b0] sm:$0xf0] }
 0x128   : > { %3077 = vmatpush.bf16.msra.mxu2 %v5075_v58  ;;  %v5106_v7 = vld [vmem:[%s5820_s14 + $0xb00] sm:$0xf]  ;;  %v5576_v20 = vld [vmem:[%s5820_s14 + $0xaa4] sm:$0xf]  ;;  %v5060_v17 = vld [vmem:[%s5820_s14 + $0xab0] sm:$0xf0] }
 0x129   : > { %3090 = vmatpush.bf16.msra.mxu3 %v5203_v61  ;;  %v1212_v50 = vadd.f32 %v1211_v43, %v1199_v42  ;;  %v5122_v61 = vld [vmem:[%s5820_s14 + $0xb20] sm:$0xf]  ;;  %v5107_v33 = vor.u32 %v5590_v10, %v5106_v7  ;;  %v5580_v42 = vld [vmem:[%s5820_s14 + $0xac4] sm:$0xf]  ;;  %v5076_v43 = vld [vmem:[%s5820_s14 + $0xad0] sm:$0xf0] }
 0x12a   : > { %3052 = vmatpush.bf16.msra.mxu0 %v4803_v26  ;;  %v4850_v26 = vld [vmem:[%s5820_s14 + $0x900] sm:$0xf]  ;;  %v5123_v9 = vor.u32 %v5594_v62, %v5122_v61  ;;  %v5079_v52 = vor.u32 %v5580_v42, %v5076_v43  ;;  %v5063_v61 = vor.u32 %v5576_v20, %v5060_v17  ;;  %v5508_v62 = vld [vmem:[%s5820_s14 + $0x884] sm:$0xf]  ;;  %v4916_v2 = vld [vmem:[%s5820_s14 + $0x990] sm:$0xf0] }
 0x12b   : > { %3065 = vmatpush.bf16.msra.mxu1 %v4931_v3  ;;  %v1221_v58 = vrot.slane %v1212_v50, 2  ;;  %v5526_v3 = vld [vmem:[%s5820_s14 + $0x90c] sm:$0xf0]  ;;  %v6501_v50 = vrot.slane %v2396_v40, 1  ;;  %v4772_v10 = vld [vmem:[%s5820_s14 + $0x870] sm:$0xf0] }
 0x12c   : > { %3078 = vmatpush.bf16.msra.mxu2 %v5059_v4  ;;  %v5140_v40 = vld [vmem:[%s5820_s14 + $0xb50] sm:$0xf0]  ;;  %v5592_v20 = vld [vmem:[%s5820_s14 + $0xb24] sm:$0xf] }
 0x12d   : > { %3091 = vmatpush.bf16.msra.mxu3 %v5187_v30  ;;  %v1225_v0 = vsel %vm1224_vm1, %v1220_v49, %v1221_v58  ;;  %v5558_v30 = vld [vmem:[%s5820_s14 + $0xa0c] sm:$0xf0]  ;;  %v4823_v49 = vor.u32 %v5516_v25, %v4820_v28  ;;  %v5608_v58 = vld [vmem:[%s5820_s14 + $0xba4] sm:$0xf]  ;;  %v4756_v28 = vld [vmem:[%s5820_s14 + $0x850] sm:$0xf0] }
 0x12e   : > { %3053 = vmatpush.bf16.msra.mxu0 %v4787_v32  ;;  %v6473_v4 = vsel %vm1226_vm2, %v6325_v27, %v1225_v0  ;;  %v1200_v8 = vpop.f32.mrf.mxu2  ;;  %v4836_v27 = vld [vmem:[%s5820_s14 + $0x8f0] sm:$0xf0]  ;;  %v4979_v24 = vor.u32 %v5558_v30, %v4978_v29  ;;  %v5540_v0 = vld [vmem:[%s5820_s14 + $0x984] sm:$0xf]  ;;  %v4791_v29 = vor.u32 %v5508_v62, %v4788_v63 }
 0x12f   : > { %3066 = vmatpush.bf16.msra.mxu1 %v4915_v13  ;;  %v1213_v32 = vpop.f32.mrf.mxu3  ;;  %v4964_v13 = vld [vmem:[%s5820_s14 + $0x9f0] sm:$0xf0]  ;;  %v4839_v34 = vor.u32 %v5520_v11, %v4836_v27  ;;  %v4919_v7 = vor.u32 %v5540_v0, %v4916_v2  ;;  %v5536_v11 = vld [vmem:[%s5820_s14 + $0x964] sm:$0xf] }
 0x130   : > { %3079 = vmatpush.bf16.msra.mxu2 %v5043_v14  ;;  %v5584_v14 = vld [vmem:[%s5820_s14 + $0xae4] sm:$0xf]  ;;  %v4967_v53 = vor.u32 %v5552_v12, %v4964_v13  ;;  %v4900_v12 = vld [vmem:[%s5820_s14 + $0x970] sm:$0xf0] }
 0x131   : > { %3092 = vmatpush.bf16.msra.mxu3 %v5171_v23  ;;  %v4851_v23 = vor.u32 %v5526_v3, %v4850_v26  ;;  %v5095_v38 = vor.u32 %v5584_v14, %v5092_v18  ;;  %v5572_v26 = vld [vmem:[%s5820_s14 + $0xa84] sm:$0xf]  ;;  %v5044_v3 = vld [vmem:[%s5820_s14 + $0xa90] sm:$0xf0] }
 0x132   : > { %3054 = vmatpush.bf16.msra.mxu0 %v4771_v35  ;;  %v5548_v35 = vld [vmem:[%s5820_s14 + $0x9c4] sm:$0xf]  ;;  %v5047_v8 = vor.u32 %v5572_v26, %v5044_v3  ;;  %v5028_v14 = vld [vmem:[%s5820_s14 + $0xa70] sm:$0xf0] }
 0x133   : > { %3067 = vmatpush.bf16.msra.mxu1 %v4899_v36  ;;  %v2400_v36 = vld.sshfl [vmem:[#allocation1 + $0x18] sm:$0xff pattern:$0x73625140]  ;;  %v5568_v13 = vld [vmem:[%s5820_s14 + $0xa64] sm:$0xf] }
 0x134   : > { %3080 = vmatpush.bf16.msra.mxu2 %v5027_v37  ;;  %v2394_v37 = vld.sshfl [vmem:[#allocation1] sm:$0xff pattern:$0x73625140]  ;;  %v6497_v47 = vrot.slane %v2400_v36, 1  ;;  %v5124_v17 = vld [vmem:[%s5820_s14 + $0xb30] sm:$0xf0] }
 0x135   : > { %3093 = vmatpush.bf16.msra.mxu3 %v5155_v41  ;;  %v5223_v41 = vor.u32 %v5616_v21, %v5220_v22  ;;  %v6499_v48 = vrot.slane %v2394_v37, 1  ;;  %v5600_v18 = vld [vmem:[%s5820_s14 + $0xb64] sm:$0xf]  ;;  %v5156_v21 = vld [vmem:[%s5820_s14 + $0xb70] sm:$0xf0]  ;;  %v5127_v2 = vor.u32 %v5592_v20, %v5124_v17 }
 0x136   : > { %3055 = vmatpush.bf16.msra.mxu0 %v4755_v51  ;;  %v4951_v51 = vor.u32 %v5548_v35, %v4948_v39  ;;  %v5500_v25 = vld [vmem:[%s5820_s14 + $0x844] sm:$0xf]  ;;  %v4884_v35 = vld [vmem:[%s5820_s14 + $0x950] sm:$0xf0]  ;;  %v5543_v17 = vld [vmem:[%s5820_s14 + $0x994] sm:$0xf0] }
 0x137   : > { %3068 = vmatpush.bf16.msra.mxu1 %v4883_v15  ;;  %v4804_v15 = vld [vmem:[%s5820_s14 + $0x8b0] sm:$0xf0]  ;;  %v5564_v36 = vld [vmem:[%s5820_s14 + $0xa44] sm:$0xf]  ;;  %v4887_v45 = vor.u32 %v5532_v31, %v4884_v35  ;;  %v5082_v31 = vld [vmem:[%s5820_s14 + $0xac8] sm:$0xf] }
 0x138   : > { %3081 = vmatpush.bf16.msra.mxu2 %v5011_v55  ;;  %v5544_v55 = vld [vmem:[%s5820_s14 + $0x9a4] sm:$0xf]  ;;  %v4807_v59 = vor.u32 %v5512_v54, %v4804_v15  ;;  %v5012_v37 = vld [vmem:[%s5820_s14 + $0xa50] sm:$0xf0]  ;;  %v5615_v35 = vld [vmem:[%s5820_s14 + $0xbd4] sm:$0xf0] }
 0x139   : > { %3094 = vmatpush.bf16.msra.mxu3 %v5139_v19  ;;  %v5188_v19 = vld [vmem:[%s5820_s14 + $0xbb0] sm:$0xf0]  ;;  %v4935_v60 = vor.u32 %v5544_v55, %v4932_v57  ;;  %v5596_v39 = vld [vmem:[%s5820_s14 + $0xb44] sm:$0xf]  ;;  %v5015_v46 = vor.u32 %v5564_v36, %v5012_v37 }
 0x13a   : > { %3056 = vmatpush.bf16.msra.mxu0 %v4739_v1  ;;  %v5191_v1 = vor.u32 %v5608_v58, %v5188_v19  ;;  %v5143_v15 = vor.u32 %v5596_v39, %v5140_v40  ;;  %v4868_v55 = vld [vmem:[%s5820_s14 + $0x930] sm:$0xf0]  ;;  %v5492_v19 = vld [vmem:[%s5820_s14 + $0x804] sm:$0xf]  ;;  %v5515_v39 = vld [vmem:[%s5820_s14 + $0x8b4] sm:$0xf0] }
 0x13b   : > { %3069 = vmatpush.bf16.msra.mxu1 %v4867_v5  ;;  %v5604_v5 = vld [vmem:[%s5820_s14 + $0xb84] sm:$0xf]  ;;  %v4996_v57 = vld [vmem:[%s5820_s14 + $0xa30] sm:$0xf0]  ;;  %v4938_v40 = vld [vmem:[%s5820_s14 + $0x9a8] sm:$0xf] }
 0x13c   : > { %3082 = vmatpush.bf16.msra.mxu2 %v4995_v6  ;;  %v5172_v6 = vld [vmem:[%s5820_s14 + $0xb90] sm:$0xf0]  ;;  %v5524_v62 = vld [vmem:[%s5820_s14 + $0x904] sm:$0xf] }
 0x13d   : > { %3095 = vmatpush.bf16.msra.mxu3 %v5123_v9  ;;  %v5504_v9 = vld [vmem:[%s5820_s14 + $0x864] sm:$0xf]  ;;  %v5175_v32 = vor.u32 %v5604_v5, %v5172_v6  ;;  %v4852_v63 = vld [vmem:[%s5820_s14 + $0x910] sm:$0xf0] }
 0x13e   : > { %3057 = vmatpush.bf16.msra.mxu0 %v4723_v16  ;;  %v2047_v30 = vpop.f32.mrf.mxu0  ;;  %v4775_v22 = vor.u32 %v5504_v9, %v4772_v10  ;;  %v5556_v0 = vld [vmem:[%s5820_s14 + $0xa04] sm:$0xf]  ;;  %v4980_v26 = vld [vmem:[%s5820_s14 + $0xa10] sm:$0xf0]  ;;  %v5555_v9 = vld [vmem:[%s5820_s14 + $0x9f4] sm:$0xf0] }
 0x13f   : > { %3070 = vmatpush.bf16.msra.mxu1 %v4851_v23  ;;  %v2060_v27 = vpop.f32.mrf.mxu1  ;;  %v4903_v23 = vor.u32 %v5536_v11, %v4900_v12  ;;  %v5588_v3 = vld [vmem:[%s5820_s14 + $0xb04] sm:$0xf]  ;;  %v5108_v5 = vld [vmem:[%s5820_s14 + $0xb10] sm:$0xf0]  ;;  %v5098_v10 = vld [vmem:[%s5820_s14 + $0xae8] sm:$0xf] }
 0x140   : > { %3083 = vmatpush.bf16.msra.mxu2 %v4979_v24  ;;  %v2061_v16 = vadd.f32 %v2060_v27, %v2047_v30  ;;  %v5031_v24 = vor.u32 %v5568_v13, %v5028_v14  ;;  %v5523_v30 = vld [vmem:[%s5820_s14 + $0x8f4] sm:$0xf0]  ;;  %v4855_v27 = vor.u32 %v5524_v62, %v4852_v63  ;;  %v5226_v12 = vld [vmem:[%s5820_s14 + $0xbe8] sm:$0xf]  ;;  %v5111_v14 = vor.u32 %v5588_v3, %v5108_v5 }
 0x141   : > { %3096 = vmatpush.bf16.msra.mxu3 %v5107_v33  ;;  %3058 = vmatmul.bf16.vlgmr.msra.gmra.mxu0 %v6499_v48  ;;  %v5587_v11 = vld [vmem:[%s5820_s14 + $0xaf4] sm:$0xf0]  ;;  %v4906_v3 = vld [vmem:[%s5820_s14 + $0x968] sm:$0xf] }
 0x142   : > { %3102 = vmatpush.bf16.msrb.mxu0 %v4839_v34  ;;  %3071 = vmatmul.bf16.vlgmr.msra.gmra.mxu1 %v6501_v50  ;;  %v5159_v34 = vor.u32 %v5600_v18, %v5156_v21  ;;  %v5619_v13 = vld [vmem:[%s5820_s14 + $0xbf4] sm:$0xf0]  ;;  %v5099_v21 = vor.u32 %v5587_v11, %v5098_v10 }
 0x143   : > { %3115 = vmatpush.bf16.msrb.mxu1 %v4967_v53  ;;  %3084 = vmatmul.bf16.vlgmr.msra.gmra.mxu2 %v6493_v44 }
 0x144   : > { %3128 = vmatpush.bf16.msrb.mxu2 %v5095_v38  ;;  %3097 = vmatmul.bf16.vlgmr.msra.gmra.mxu3 %v6497_v47 }
 0x145   : > { %3141 = vmatpush.bf16.msrb.mxu3 %v5223_v41  ;;  %v4759_v41 = vor.u32 %v5500_v25, %v4756_v28  ;;  %v5227_v25 = vor.u32 %v5619_v13, %v5226_v12  ;;  %v5551_v28 = vld [vmem:[%s5820_s14 + $0x9d4] sm:$0xf0]  ;;  %v4762_v12 = vld [vmem:[%s5820_s14 + $0x848] sm:$0xf] }
 0x146   : > { %3103 = vmatpush.bf16.msrb.mxu0 %v4823_v49  ;;  %v2073_v33 = vpop.f32.mrf.mxu2  ;;  %v2049_v43 = vpop.f32.mrf.mxu0  ;;  %v5496_v49 = vld [vmem:[%s5820_s14 + $0x824] sm:$0xf]  ;;  %v5503_v13 = vld [vmem:[%s5820_s14 + $0x854] sm:$0xf0] }
 0x147   : > { %3116 = vmatpush.bf16.msrb.mxu1 %v4951_v51  ;;  %v2074_v53 = vadd.f32 %v2073_v33, %v2061_v16  ;;  %v2086_v38 = vpop.f32.mrf.mxu3  ;;  %v4740_v51 = vld [vmem:[%s5820_s14 + $0x830] sm:$0xf0]  ;;  %v2062_v54 = vpop.f32.mrf.mxu1  ;;  %v5583_v33 = vld [vmem:[%s5820_s14 + $0xad4] sm:$0xf0] }
 0x148   : > { %3129 = vmatpush.bf16.msrb.mxu2 %v5079_v52  ;;  %v5528_v52 = vld [vmem:[%s5820_s14 + $0x924] sm:$0xf]  ;;  %v4743_v58 = vor.u32 %v5496_v49, %v4740_v51  ;;  %v5547_v43 = vld [vmem:[%s5820_s14 + $0x9b4] sm:$0xf0]  ;;  %v5194_v49 = vld [vmem:[%s5820_s14 + $0xba8] sm:$0xf] }
 0x149   : > { %3142 = vmatpush.bf16.msrb.mxu3 %v5207_v56  ;;  %v6539_v42 = vadd.f32 %v2086_v38, %v2074_v53  ;;  %v5560_v56 = vld [vmem:[%s5820_s14 + $0xa24] sm:$0xf]  ;;  %v5083_v53 = vor.u32 %v5583_v33, %v5082_v31  ;;  %v4810_v38 = vld [vmem:[%s5820_s14 + $0x8a8] sm:$0xf]  ;;  %v5611_v51 = vld [vmem:[%s5820_s14 + $0xbb4] sm:$0xf0]  ;;  %v4939_v54 = vor.u32 %v5547_v43, %v4938_v40  ;;  %v4763_v33 = vor.u32 %v5503_v13, %v4762_v12 }
 0x14a   : > { %3104 = vmatpush.bf16.msrb.mxu0 %v4807_v59  ;;  %v4724_v59 = vld [vmem:[%s5820_s14 + $0x810] sm:$0xf0]  ;;  %v5195_v20 = vor.u32 %v5611_v51, %v5194_v49  ;;  %v5130_v49 = vld [vmem:[%s5820_s14 + $0xb28] sm:$0xf]  ;;  %v5595_v51 = vld [vmem:[%s5820_s14 + $0xb34] sm:$0xf0] }
 0x14b   : > { %3117 = vmatpush.bf16.msrb.mxu1 %v4935_v60  ;;  %v4871_v60 = vor.u32 %v5528_v52, %v4868_v55  ;;  %v4811_v52 = vor.u32 %v5515_v39, %v4810_v38  ;;  %v4794_v55 = vld [vmem:[%s5820_s14 + $0x888] sm:$0xf]  ;;  %v5531_v39 = vld [vmem:[%s5820_s14 + $0x934] sm:$0xf0]  ;;  %v5549_v12 = vld [vmem:[%s5820_s14 + $0x9cc] sm:$0xf] }
 0x14c   : > { %3130 = vmatpush.bf16.msrb.mxu2 %v5063_v61  ;;  %v4999_v61 = vor.u32 %v5560_v56, %v4996_v57  ;;  %v5511_v56 = vld [vmem:[%s5820_s14 + $0x894] sm:$0xf0]  ;;  %v4922_v57 = vld [vmem:[%s5820_s14 + $0x988] sm:$0xf] }
 0x14d   : > { %3143 = vmatpush.bf16.msrb.mxu3 %v5191_v1  ;;  %v4923_v63 = vor.u32 %v5543_v17, %v4922_v57  ;;  %v4874_v38 = vld [vmem:[%s5820_s14 + $0x928] sm:$0xf]  ;;  %v5527_v17 = vld [vmem:[%s5820_s14 + $0x914] sm:$0xf0] }
 0x14e   : > { %3105 = vmatpush.bf16.msrb.mxu0 %v4791_v29  ;;  %v2075_v1 = vpop.f32.mrf.mxu2  ;;  %v4842_v29 = vld [vmem:[%s5820_s14 + $0x8e8] sm:$0xf] }
 0x14f   : > { %3118 = vmatpush.bf16.msrb.mxu1 %v4919_v7  ;;  %v2088_v6 = vpop.f32.mrf.mxu3  ;;  %v4970_v7 = vld [vmem:[%s5820_s14 + $0x9e8] sm:$0xf]  ;;  %v4843_v16 = vor.u32 %v5523_v30, %v4842_v29  ;;  %v5539_v29 = vld [vmem:[%s5820_s14 + $0x974] sm:$0xf0] }
 0x150   : > { %3131 = vmatpush.bf16.msrb.mxu2 %v5047_v8  ;;  %v4727_v8 = vor.u32 %v5492_v19, %v4724_v59  ;;  %v4971_v18 = vor.u32 %v5555_v9, %v4970_v7  ;;  %v5575_v19 = vld [vmem:[%s5820_s14 + $0xa94] sm:$0xf0]  ;;  %v5178_v59 = vld [vmem:[%s5820_s14 + $0xb88] sm:$0xf]  ;;  %v4907_v11 = vor.u32 %v5539_v29, %v4906_v3  ;;  %v5585_v3 = vld [vmem:[%s5820_s14 + $0xaec] sm:$0xf] }
 0x151   : > { %3144 = vmatpush.bf16.msrb.mxu3 %v5175_v32  ;;  %v4983_v32 = vor.u32 %v5556_v0, %v4980_v26  ;;  %v5507_v26 = vld [vmem:[%s5820_s14 + $0x874] sm:$0xf0]  ;;  %v5034_v30 = vld [vmem:[%s5820_s14 + $0xa68] sm:$0xf] }
 0x152   : > { %3106 = vmatpush.bf16.msrb.mxu0 %v4775_v22  ;;  %v4826_v22 = vld [vmem:[%s5820_s14 + $0x8c8] sm:$0xf]  ;;  %v5571_v7 = vld [vmem:[%s5820_s14 + $0xa74] sm:$0xf0] }
 0x153   : > { %3119 = vmatpush.bf16.msrb.mxu1 %v4903_v23  ;;  %v5519_v23 = vld [vmem:[%s5820_s14 + $0x8d4] sm:$0xf0] }
 0x154   : > { %3132 = vmatpush.bf16.msrb.mxu2 %v5031_v24  ;;  %v4954_v24 = vld [vmem:[%s5820_s14 + $0x9c8] sm:$0xf]  ;;  %v4827_v36 = vor.u32 %v5519_v23, %v4826_v22  ;;  %v5603_v9 = vld [vmem:[%s5820_s14 + $0xb74] sm:$0xf0] }
 0x155   : > { %3145 = vmatpush.bf16.msrb.mxu3 %v5159_v34  ;;  %v5210_v34 = vld [vmem:[%s5820_s14 + $0xbc8] sm:$0xf]  ;;  %v4955_v37 = vor.u32 %v5551_v28, %v4954_v24  ;;  %v5535_v22 = vld [vmem:[%s5820_s14 + $0x954] sm:$0xf0] }
 0x156   : > { %3107 = vmatpush.bf16.msrb.mxu0 %v4759_v41  ;;  %v5211_v41 = vor.u32 %v5615_v35, %v5210_v34  ;;  %v5018_v23 = vld [vmem:[%s5820_s14 + $0xa48] sm:$0xf]  ;;  %v5567_v24 = vld [vmem:[%s5820_s14 + $0xa54] sm:$0xf0] }
 0x157   : > { %3120 = vmatpush.bf16.msrb.mxu1 %v4887_v45  ;;  %v5066_v45 = vld [vmem:[%s5820_s14 + $0xaa8] sm:$0xf]  ;;  %v5599_v28 = vld [vmem:[%s5820_s14 + $0xb54] sm:$0xf0] }
 0x158   : > { %3133 = vmatpush.bf16.msrb.mxu2 %v5015_v46  ;;  %v5579_v46 = vld [vmem:[%s5820_s14 + $0xab4] sm:$0xf0]  ;;  %v4746_v34 = vld [vmem:[%s5820_s14 + $0x828] sm:$0xf] }
 0x159   : > { %3146 = vmatpush.bf16.msrb.mxu3 %v5143_v15  ;;  %v5067_v15 = vor.u32 %v5579_v46, %v5066_v45  ;;  %v5002_v45 = vld [vmem:[%s5820_s14 + $0xa28] sm:$0xf]  ;;  %v5563_v46 = vld [vmem:[%s5820_s14 + $0xa34] sm:$0xf0] }
 0x15a   : > { %3108 = vmatpush.bf16.msrb.mxu0 %v4743_v58  ;;  %v5050_v58 = vld [vmem:[%s5820_s14 + $0xa88] sm:$0xf]  ;;  %v5003_v57 = vor.u32 %v5563_v46, %v5002_v45  ;;  %v4796_v45 = vld [vmem:[%s5820_s14 + $0x898] sm:$0xf0]  ;;  %v5541_v46 = vld [vmem:[%s5820_s14 + $0x98c] sm:$0xf] }
 0x15b   : > { %3121 = vmatpush.bf16.msrb.mxu1 %v4871_v60  ;;  %v5607_v60 = vld [vmem:[%s5820_s14 + $0xb94] sm:$0xf0]  ;;  %v5051_v0 = vor.u32 %v5575_v19, %v5050_v58  ;;  %v5131_v19 = vor.u32 %v5595_v51, %v5130_v49  ;;  %v4924_v51 = vld [vmem:[%s5820_s14 + $0x998] sm:$0xf0] }
 0x15c   : > { %3134 = vmatpush.bf16.msrb.mxu2 %v4999_v61  ;;  %v4795_v61 = vor.u32 %v5511_v56, %v4794_v55  ;;  %v5179_v5 = vor.u32 %v5607_v60, %v5178_v59  ;;  %v5495_v55 = vld [vmem:[%s5820_s14 + $0x814] sm:$0xf0]  ;;  %v4875_v56 = vor.u32 %v5531_v39, %v4874_v38  ;;  %v5114_v60 = vld [vmem:[%s5820_s14 + $0xb08] sm:$0xf]  ;;  %v5196_v38 = vld [vmem:[%s5820_s14 + $0xbb8] sm:$0xf0] }
 0x15d   : > { %3147 = vmatpush.bf16.msrb.mxu3 %v5127_v2  ;;  %v4778_v2 = vld [vmem:[%s5820_s14 + $0x868] sm:$0xf]  ;;  %v5559_v59 = vld [vmem:[%s5820_s14 + $0xa14] sm:$0xf0] }
 0x15e   : > { %3109 = vmatpush.bf16.msrb.mxu0 %v4727_v8  ;;  %v2099_v62 = vpop.f32.mrf.mxu0  ;;  %v5162_v8 = vld [vmem:[%s5820_s14 + $0xb68] sm:$0xf]  ;;  %v4779_v10 = vor.u32 %v5507_v26, %v4778_v2  ;;  %v4972_v26 = vld [vmem:[%s5820_s14 + $0x9f8] sm:$0xf0] }
 0x15f   : > { %3122 = vmatpush.bf16.msrb.mxu1 %v4855_v27  ;;  %v2112_v1 = vpop.f32.mrf.mxu1  ;;  %v5035_v27 = vor.u32 %v5571_v7, %v5034_v30  ;;  %v5617_v30 = vld [vmem:[%s5820_s14 + $0xbec] sm:$0xf]  ;;  %v5228_v7 = vld [vmem:[%s5820_s14 + $0xbf8] sm:$0xf0] }
 0x160   : > { %3135 = vmatpush.bf16.msrb.mxu2 %v4983_v32  ;;  %v2113_v6 = vadd.f32 %v2112_v1, %v2099_v62  ;;  %v5553_v1 = vld [vmem:[%s5820_s14 + $0x9ec] sm:$0xf]  ;;  %v5231_v13 = vor.u32 %v5617_v30, %v5228_v7  ;;  %v4764_v30 = vld [vmem:[%s5820_s14 + $0x858] sm:$0xf0] }
 0x161   : > { %3148 = vmatpush.bf16.msrb.mxu3 %v5111_v14  ;;  %3110 = vmatmul.bf16.vlgmr.msrb.gmra.mxu0 %v6499_v48  ;;  %v4890_v14 = vld [vmem:[%s5820_s14 + $0x948] sm:$0xf]  ;;  %v5533_v7 = vld [vmem:[%s5820_s14 + $0x94c] sm:$0xf] }
 0x162   : > { %3154 = vmatpush.bf16.msra.mxu0 %v4843_v16  ;;  %3123 = vmatmul.bf16.vlgmr.msrb.gmra.mxu1 %v6501_v50  ;;  %v5163_v16 = vor.u32 %v5603_v9, %v5162_v8 }
 0x163   : > { %3167 = vmatpush.bf16.msra.mxu1 %v4971_v18  ;;  %3136 = vmatmul.bf16.vlgmr.msrb.gmra.mxu2 %v6493_v44 }
 0x164   : > { %3180 = vmatpush.bf16.msra.mxu2 %v5099_v21  ;;  %3149 = vmatmul.bf16.vlgmr.msrb.gmra.mxu3 %v6497_v47 }
 0x165   : > { %3193 = vmatpush.bf16.msra.mxu3 %v5227_v25  ;;  %v5146_v25 = vld [vmem:[%s5820_s14 + $0xb48] sm:$0xf] }
 0x166   : > { %3155 = vmatpush.bf16.msra.mxu0 %v4827_v36  ;;  %v2125_v32 = vpop.f32.mrf.mxu2  ;;  %v2101_v35 = vpop.f32.mrf.mxu0  ;;  %v4891_v36 = vor.u32 %v5535_v22, %v4890_v14  ;;  %v5147_v43 = vor.u32 %v5599_v28, %v5146_v25  ;;  %v4956_v14 = vld [vmem:[%s5820_s14 + $0x9d8] sm:$0xf0]  ;;  %v5513_v28 = vld [vmem:[%s5820_s14 + $0x8ac] sm:$0xf] }
 0x167   : > { %3168 = vmatpush.bf16.msra.mxu1 %v4955_v37  ;;  %v2126_v18 = vadd.f32 %v2125_v32, %v2113_v6  ;;  %v2138_v21 = vpop.f32.mrf.mxu3  ;;  %v5019_v37 = vor.u32 %v5567_v24, %v5018_v23  ;;  %v2114_v40 = vpop.f32.mrf.mxu1  ;;  %v4828_v32 = vld [vmem:[%s5820_s14 + $0x8d8] sm:$0xf0]  ;;  %v4959_v24 = vor.u32 %v5549_v12, %v4956_v14 }
 0x168   : > { %3181 = vmatpush.bf16.msra.mxu2 %v5083_v53  ;;  %v5499_v53 = vld [vmem:[%s5820_s14 + $0x834] sm:$0xf0]  ;;  %v5212_v22 = vld [vmem:[%s5820_s14 + $0xbd8] sm:$0xf0] }
 0x169   : > { %3194 = vmatpush.bf16.msra.mxu3 %v5211_v41  ;;  %v2139_v31 = vadd.f32 %v2138_v21, %v2126_v18  ;;  %v5084_v18 = vld [vmem:[%s5820_s14 + $0xad8] sm:$0xf0]  ;;  %v5613_v21 = vld [vmem:[%s5820_s14 + $0xbcc] sm:$0xf] }
 0x16a   : > { %3156 = vmatpush.bf16.msra.mxu0 %v4811_v52  ;;  %v4940_v35 = vld [vmem:[%s5820_s14 + $0x9b8] sm:$0xf0] }
 0x16b   : > { %3169 = vmatpush.bf16.msra.mxu1 %v4939_v54  ;;  %v2250_v41 = vrot.slane %v2139_v31, 6  ;;  %v4747_v54 = vor.u32 %v5499_v53, %v4746_v34  ;;  %v4812_v31 = vld [vmem:[%s5820_s14 + $0x8b8] sm:$0xf0]  ;;  %v5215_v34 = vor.u32 %v5613_v21, %v5212_v22  ;;  %v5609_v53 = vld [vmem:[%s5820_s14 + $0xbac] sm:$0xf] }
 0x16c   : > { %3182 = vmatpush.bf16.msra.mxu2 %v5067_v15  ;;  %v4730_v15 = vld [vmem:[%s5820_s14 + $0x808] sm:$0xf]  ;;  %v4815_v39 = vor.u32 %v5513_v28, %v4812_v31  ;;  %v5199_v49 = vor.u32 %v5609_v53, %v5196_v38  ;;  %v5148_v14 = vld [vmem:[%s5820_s14 + $0xb58] sm:$0xf0]  ;;  %v5529_v28 = vld [vmem:[%s5820_s14 + $0x92c] sm:$0xf] }
 0x16d   : > { %3195 = vmatpush.bf16.msra.mxu3 %v5195_v20  ;;  %v6619_v52 = vsel %vm1222_vm0, %v6539_v42, %v2250_v41  ;;  %v4858_v20 = vld [vmem:[%s5820_s14 + $0x908] sm:$0xf]  ;;  %v4731_v2 = vor.u32 %v5495_v55, %v4730_v15  ;;  %v5052_v15 = vld [vmem:[%s5820_s14 + $0xa98] sm:$0xf0]  ;;  %v5605_v55 = vld [vmem:[%s5820_s14 + $0xb8c] sm:$0xf] }
 0x16e   : > { %3157 = vmatpush.bf16.msra.mxu0 %v4795_v61  ;;  %v4986_v42 = vld [vmem:[%s5820_s14 + $0xa08] sm:$0xf]  ;;  %v2127_v58 = vpop.f32.mrf.mxu2  ;;  %v5591_v61 = vld [vmem:[%s5820_s14 + $0xb14] sm:$0xf0]  ;;  %v4859_v6 = vor.u32 %v5527_v17, %v4858_v20  ;;  %v4927_v17 = vor.u32 %v5541_v46, %v4924_v51  ;;  %v5132_v53 = vld [vmem:[%s5820_s14 + $0xb38] sm:$0xf0] }
 0x16f   : > { %3170 = vmatpush.bf16.msra.mxu1 %v4923_v63  ;;  %v2140_v62 = vpop.f32.mrf.mxu3  ;;  %v5521_v63 = vld [vmem:[%s5820_s14 + $0x8ec] sm:$0xf]  ;;  %v4987_v29 = vor.u32 %v5559_v59, %v4986_v42  ;;  %v5115_v8 = vor.u32 %v5591_v61, %v5114_v60  ;;  %v4860_v51 = vld [vmem:[%s5820_s14 + $0x918] sm:$0xf0] }
 0x170   : > { %3183 = vmatpush.bf16.msra.mxu2 %v5051_v0  ;;  %v4844_v0 = vld [vmem:[%s5820_s14 + $0x8f8] sm:$0xf0]  ;;  %v5505_v58 = vld [vmem:[%s5820_s14 + $0x86c] sm:$0xf] }
 0x171   : > { %3196 = vmatpush.bf16.msra.mxu3 %v5179_v5  ;;  %v5100_v5 = vld [vmem:[%s5820_s14 + $0xaf8] sm:$0xf0]  ;;  %v4847_v9 = vor.u32 %v5521_v63, %v4844_v0  ;;  %v5537_v59 = vld [vmem:[%s5820_s14 + $0x96c] sm:$0xf] }
 0x172   : > { %3158 = vmatpush.bf16.msra.mxu0 %v4779_v10  ;;  %v4975_v10 = vor.u32 %v5553_v1, %v4972_v26  ;;  %v4908_v62 = vld [vmem:[%s5820_s14 + $0x978] sm:$0xf0]  ;;  %v5569_v63 = vld [vmem:[%s5820_s14 + $0xa6c] sm:$0xf] }
 0x173   : > { %3171 = vmatpush.bf16.msra.mxu1 %v4907_v11  ;;  %v5103_v11 = vor.u32 %v5585_v3, %v5100_v5  ;;  %v5036_v0 = vld [vmem:[%s5820_s14 + $0xa78] sm:$0xf0]  ;;  %v4911_v5 = vor.u32 %v5537_v59, %v4908_v62 }
 0x174   : > { %3184 = vmatpush.bf16.msra.mxu2 %v5035_v27  ;;  %v5517_v27 = vld [vmem:[%s5820_s14 + $0x8cc] sm:$0xf]  ;;  %v5164_v26 = vld [vmem:[%s5820_s14 + $0xb78] sm:$0xf0] }
 0x175   : > { %3197 = vmatpush.bf16.msra.mxu3 %v5163_v16  ;;  %v5581_v16 = vld [vmem:[%s5820_s14 + $0xacc] sm:$0xf]  ;;  %v4831_v23 = vor.u32 %v5517_v27, %v4828_v32  ;;  %v5020_v27 = vld [vmem:[%s5820_s14 + $0xa58] sm:$0xf0] }
 0x176   : > { %3159 = vmatpush.bf16.msra.mxu0 %v4763_v33  ;;  %v5087_v25 = vor.u32 %v5581_v16, %v5084_v18  ;;  %v5545_v33 = vld [vmem:[%s5820_s14 + $0x9ac] sm:$0xf] }
 0x177   : > { %3172 = vmatpush.bf16.msra.mxu1 %v4891_v36  ;;  %v5577_v36 = vld [vmem:[%s5820_s14 + $0xaac] sm:$0xf]  ;;  %v4943_v40 = vor.u32 %v5545_v33, %v4940_v35 }
 0x178   : > { %3185 = vmatpush.bf16.msra.mxu2 %v5019_v37  ;;  %v5068_v37 = vld [vmem:[%s5820_s14 + $0xab8] sm:$0xf0]  ;;  %v5561_v35 = vld [vmem:[%s5820_s14 + $0xa2c] sm:$0xf] }
 0x179   : > { %3198 = vmatpush.bf16.msra.mxu3 %v5147_v43  ;;  %v5071_v41 = vor.u32 %v5577_v36, %v5068_v37  ;;  %v5509_v43 = vld [vmem:[%s5820_s14 + $0x88c] sm:$0xf]  ;;  %v5004_v36 = vld [vmem:[%s5820_s14 + $0xa38] sm:$0xf0] }
 0x17a   : > { %3160 = vmatpush.bf16.msra.mxu0 %v4747_v54  ;;  %v5573_v54 = vld [vmem:[%s5820_s14 + $0xa8c] sm:$0xf] }
 0x17b   : > { %3173 = vmatpush.bf16.msra.mxu1 %v4875_v56  ;;  %v5180_v56 = vld [vmem:[%s5820_s14 + $0xb98] sm:$0xf0]  ;;  %v5055_v42 = vor.u32 %v5573_v54, %v5052_v15  ;;  %v5593_v37 = vld [vmem:[%s5820_s14 + $0xb2c] sm:$0xf] }
 0x17c   : > { %3186 = vmatpush.bf16.msra.mxu2 %v5003_v57  ;;  %v4799_v57 = vor.u32 %v5509_v43, %v4796_v45  ;;  %v5183_v61 = vor.u32 %v5605_v55, %v5180_v56  ;;  %v4732_v43 = vld [vmem:[%s5820_s14 + $0x818] sm:$0xf0]  ;;  %v5525_v45 = vld [vmem:[%s5820_s14 + $0x90c] sm:$0xf] }
 0x17d   : > { %3199 = vmatpush.bf16.msra.mxu3 %v5131_v19  ;;  %v4780_v19 = vld [vmem:[%s5820_s14 + $0x878] sm:$0xf0]  ;;  %v5557_v54 = vld [vmem:[%s5820_s14 + $0xa0c] sm:$0xf] }
 0x17e   : > { %3161 = vmatpush.bf16.msra.mxu0 %v4731_v2  ;;  %v2151_v20 = vpop.f32.mrf.mxu0  ;;  %v5601_v2 = vld [vmem:[%s5820_s14 + $0xb6c] sm:$0xf]  ;;  %v4783_v3 = vor.u32 %v5505_v58, %v4780_v19  ;;  %v4988_v15 = vld [vmem:[%s5820_s14 + $0xa18] sm:$0xf0] }
 0x17f   : > { %3174 = vmatpush.bf16.msra.mxu1 %v4859_v6  ;;  %v2164_v60 = vpop.f32.mrf.mxu1  ;;  %v5039_v6 = vor.u32 %v5569_v63, %v5036_v0  ;;  %v5589_v56 = vld [vmem:[%s5820_s14 + $0xb0c] sm:$0xf] }
 0x180   : > { %3187 = vmatpush.bf16.msra.mxu2 %v4987_v29  ;;  %v2165_v1 = vadd.f32 %v2164_v60, %v2151_v20  ;;  %v5501_v29 = vld [vmem:[%s5820_s14 + $0x84c] sm:$0xf] }
 0x181   : > { %3200 = vmatpush.bf16.msra.mxu3 %v5115_v8  ;;  %3162 = vmatmul.bf16.vlgmr.msra.gmra.mxu0 %v6499_v48  ;;  %v4767_v16 = vor.u32 %v5501_v29, %v4764_v30 }
 0x182   : > { %3206 = vmatpush.bf16.msrb.mxu0 %v4847_v9  ;;  %3175 = vmatmul.bf16.vlgmr.msra.gmra.mxu1 %v6501_v50  ;;  %v5167_v9 = vor.u32 %v5601_v2, %v5164_v26  ;;  %v356_v2 = vld [vmem:[#allocation2] sm:$0xff] }
 0x183   : > { %3219 = vmatpush.bf16.msrb.mxu1 %v4975_v10  ;;  %3188 = vmatmul.bf16.vlgmr.msra.gmra.mxu2 %v6493_v44  ;;  %v4892_v10 = vld [vmem:[%s5820_s14 + $0x958] sm:$0xf0] }
 0x184   : > { %3232 = vmatpush.bf16.msrb.mxu2 %v5103_v11  ;;  %3201 = vmatmul.bf16.vlgmr.msra.gmra.mxu3 %v6497_v47  ;;  %v5565_v11 = vld [vmem:[%s5820_s14 + $0xa4c] sm:$0xf]  ;;  %v4895_v22 = vor.u32 %v5533_v7, %v4892_v10 }
 0x185   : > { %3245 = vmatpush.bf16.msrb.mxu3 %v5231_v13  ;;  %v5597_v13 = vld [vmem:[%s5820_s14 + $0xb4c] sm:$0xf] }
 0x186   : > { %3207 = vmatpush.bf16.msrb.mxu0 %v4831_v23  ;;  %v2177_v8 = vpop.f32.mrf.mxu2  ;;  %v2153_v21 = vpop.f32.mrf.mxu0  ;;  %v5023_v23 = vor.u32 %v5565_v11, %v5020_v27  ;;  %v5151_v33 = vor.u32 %v5597_v13, %v5148_v14 }
 0x187   : > { %3220 = vmatpush.bf16.msrb.mxu1 %v4959_v24  ;;  %v2178_v32 = vadd.f32 %v2177_v8, %v2165_v1  ;;  %v2190_v12 = vpop.f32.mrf.mxu3  ;;  %v5497_v24 = vld [vmem:[%s5820_s14 + $0x82c] sm:$0xf]  ;;  %v2166_v31 = vpop.f32.mrf.mxu1 }
 0x188   : > { %3233 = vmatpush.bf16.msrb.mxu2 %v5087_v25  ;;  %v4748_v25 = vld [vmem:[%s5820_s14 + $0x838] sm:$0xf0] }
 0x189   : > { %3246 = vmatpush.bf16.msrb.mxu3 %v5215_v34  ;;  %v6681_v18 = vadd.f32 %v2190_v12, %v2178_v32  ;;  %v4876_v34 = vld [vmem:[%s5820_s14 + $0x938] sm:$0xf0]  ;;  %v4751_v38 = vor.u32 %v5497_v24, %v4748_v25 }
 0x18a   : > { %3208 = vmatpush.bf16.msrb.mxu0 %v4815_v39  ;;  %v4879_v39 = vor.u32 %v5529_v28, %v4876_v34 }
 0x18b   : > { %3221 = vmatpush.bf16.msrb.mxu1 %v4943_v40  ;;  %v5007_v40 = vor.u32 %v5561_v35, %v5004_v36 }
 0x18c   : > { %3234 = vmatpush.bf16.msrb.mxu2 %v5071_v41  ;;  %v5493_v41 = vld [vmem:[%s5820_s14 + $0x80c] sm:$0xf] }
 0x18d   : > { %3247 = vmatpush.bf16.msrb.mxu3 %v5199_v49  ;;  %v5135_v49 = vor.u32 %v5593_v37, %v5132_v53  ;;  %v4735_v20 = vor.u32 %v5493_v41, %v4732_v43 }
 0x18e   : > { %3209 = vmatpush.bf16.msrb.mxu0 %v4799_v57  ;;  %v2179_v46 = vpop.f32.mrf.mxu2  ;;  %v5116_v57 = vld [vmem:[%s5820_s14 + $0xb18] sm:$0xf0] }
 0x18f   : > { %3222 = vmatpush.bf16.msrb.mxu1 %v4927_v17  ;;  %v2192_v55 = vpop.f32.mrf.mxu3  ;;  %v4863_v17 = vor.u32 %v5525_v45, %v4860_v51  ;;  %v5119_v58 = vor.u32 %v5589_v56, %v5116_v57 }
 0x190   : > { %3235 = vmatpush.bf16.msrb.mxu2 %v5055_v42  ;;  %v4991_v42 = vor.u32 %v5557_v54, %v4988_v15 }
 0x191   : > { %3248 = vmatpush.bf16.msrb.mxu3 %v5183_v61 }
 0x192   : > { %3210 = vmatpush.bf16.msrb.mxu0 %v4783_v3  ;;  %v2251_v3 = vrot.slane %v6681_v18, 4 }
 0x193   : > { %3223 = vmatpush.bf16.msrb.mxu1 %v4911_v5 }
 0x194   : > { %3236 = vmatpush.bf16.msrb.mxu2 %v5039_v6 }
 0x195   : > { %3249 = vmatpush.bf16.msrb.mxu3 %v5167_v9 }
 0x196   : > { %3211 = vmatpush.bf16.msrb.mxu0 %v4767_v16 }
 0x197   : > { %3224 = vmatpush.bf16.msrb.mxu1 %v4895_v22 }
 0x198   : > { %3237 = vmatpush.bf16.msrb.mxu2 %v5023_v23 }
 0x199   : > { %3250 = vmatpush.bf16.msrb.mxu3 %v5151_v33 }
 0x19a   : > { %3212 = vmatpush.bf16.msrb.mxu0 %v4751_v38 }
 0x19b   : > { %3225 = vmatpush.bf16.msrb.mxu1 %v4879_v39 }
 0x19c   : > { %3238 = vmatpush.bf16.msrb.mxu2 %v5007_v40 }
 0x19d   : > { %3251 = vmatpush.bf16.msrb.mxu3 %v5135_v49 }
 0x19e   : > { %3213 = vmatpush.bf16.msrb.mxu0 %v4735_v20  ;;  %v2203_v19 = vpop.f32.mrf.mxu0 }
 0x19f   : > { %3226 = vmatpush.bf16.msrb.mxu1 %v4863_v17  ;;  %v2216_v59 = vpop.f32.mrf.mxu1 }
 0x1a0   : > { %3239 = vmatpush.bf16.msrb.mxu2 %v4991_v42  ;;  %v2217_v60 = vadd.f32 %v2216_v59, %v2203_v19 }
 0x1a1   : > { %3252 = vmatpush.bf16.msrb.mxu3 %v5119_v58  ;;  %3214 = vmatmul.bf16.vlgmr.msrb.gmra.mxu0 %v6499_v48  ;;  %v1229_v48 = vadd.f32 %v6473_v4, %v356_v2 }
 0x1a2   : > { %3227 = vmatmul.bf16.vlgmr.msrb.gmra.mxu1 %v6501_v50 }
 0x1a3   : > { %3240 = vmatmul.bf16.vlgmr.msrb.gmra.mxu2 %v6493_v44 }
 0x1a4   : > { %3253 = vmatmul.bf16.vlgmr.msrb.gmra.mxu3 %v6497_v47 }
 0x1a6   : > { %v2229_v61 = vpop.f32.mrf.mxu2  ;;  %v2205_v1 = vpop.f32.mrf.mxu0 }
 0x1a7   : > { %v2230_v62 = vadd.f32 %v2229_v61, %v2217_v60  ;;  %v2242_v63 = vpop.f32.mrf.mxu3  ;;  %v2218_v26 = vpop.f32.mrf.mxu1 }
 0x1a9   : > { %v2243_v0 = vadd.f32 %v2242_v63, %v2230_v62 }
 0x1ab   : > { %v2252_v5 = vrot.slane %v2243_v0, 2 }
 0x1ad   : > { %v2254_v50 = vsel %vm1224_vm1, %v2251_v3, %v2252_v5 }
 0x1ae   : > { %v2255_v44 = vsel %vm1226_vm2, %v6619_v52, %v2254_v50  ;;  %v2231_v47 = vpop.f32.mrf.mxu2 }
 0x1af   : > { %v2257_v6 = vadd.f32 %v2255_v44, %v1229_v48  ;;  %v2244_v29 = vpop.f32.mrf.mxu3 }
 0x1be   : > { %v3059_v30 = vpop.f32.mrf.mxu0 }
 0x1bf   : > { %v3072_v7 = vpop.f32.mrf.mxu1 }
 0x1c0   : > { %v3073_v8 = vadd.f32 %v3072_v7, %v3059_v30 }
 0x1c6   : > { %v3085_v9 = vpop.f32.mrf.mxu2  ;;  %v3061_v32 = vpop.f32.mrf.mxu0 }
 0x1c7   : > { %v3086_v10 = vadd.f32 %v3085_v9, %v3073_v8  ;;  %v3098_v11 = vpop.f32.mrf.mxu3  ;;  %v3074_v12 = vpop.f32.mrf.mxu1 }
 0x1c9   : > { %v3099_v27 = vadd.f32 %v3098_v11, %v3086_v10 }
 0x1ce   : > { %v3087_v13 = vpop.f32.mrf.mxu2 }
 0x1cf   : > { %v3100_v14 = vpop.f32.mrf.mxu3 }
 0x1de   : > { %v3111_v4 = vpop.f32.mrf.mxu0 }
 0x1df   : > { %v3124_v16 = vpop.f32.mrf.mxu1 }
 0x1e0   : > { %v3125_v53 = vadd.f32 %v3124_v16, %v3111_v4 }
 0x1e6   : > { %v3137_v18 = vpop.f32.mrf.mxu2  ;;  %v3113_v22 = vpop.f32.mrf.mxu0 }
 0x1e7   : > { %v3150_v21 = vpop.f32.mrf.mxu3  ;;  %v3126_v52 = vpop.f32.mrf.mxu1  ;;  %v3138_v41 = vadd.f32 %v3137_v18, %v3125_v53 }
 0x1e9   : > { %v3151_v46 = vadd.f32 %v3150_v21, %v3138_v41 }
 0x1eb   : > { %v3262_v57 = vrot.slane %v3151_v46, 6 }
 0x1ed   : > { %v3265_v58 = vsel %vm1222_vm0, %v3099_v27, %v3262_v57 }
 0x1ee   : > { %v3139_v23 = vpop.f32.mrf.mxu2 }
 0x1ef   : > { %v3152_v24 = vpop.f32.mrf.mxu3 }
 0x1fe   : > { %v3163_v25 = vpop.f32.mrf.mxu0 }
 0x1ff   : > { %v3176_v28 = vpop.f32.mrf.mxu1 }
 0x200   : > { %v3177_v38 = vadd.f32 %v3176_v28, %v3163_v25 }
 0x206   : > { %v3189_v31 = vpop.f32.mrf.mxu2  ;;  %v3165_v34 = vpop.f32.mrf.mxu0 }
 0x207   : > { %v3202_v33 = vpop.f32.mrf.mxu3  ;;  %v3178_v35 = vpop.f32.mrf.mxu1  ;;  %v3190_v43 = vadd.f32 %v3189_v31, %v3177_v38 }
 0x209   : > { %v3203_v51 = vadd.f32 %v3202_v33, %v3190_v43 }
 0x20b   : > { %v3263_v17 = vrot.slane %v3203_v51, 4 }
 0x20e   : > { %v3191_v36 = vpop.f32.mrf.mxu2 }
 0x20f   : > { %v3204_v37 = vpop.f32.mrf.mxu3 }
 0x21e   : > { %v3215_v39 = vpop.f32.mrf.mxu0 }
 0x21f   : > { %v3228_v40 = vpop.f32.mrf.mxu1 }
 0x220   : > { %v3229_v45 = vadd.f32 %v3228_v40, %v3215_v39 }
 0x226   : > { %v3241_v49 = vpop.f32.mrf.mxu2  ;;  %v3217_v55 = vpop.f32.mrf.mxu0 }
 0x227   : > { %v3242_v54 = vadd.f32 %v3241_v49, %v3229_v45  ;;  %v3254_v15 = vpop.f32.mrf.mxu3  ;;  %v3230_v56 = vpop.f32.mrf.mxu1 }
 0x229   : > { %v3255_v20 = vadd.f32 %v3254_v15, %v3242_v54 }
 0x22b   : > { %v3264_v42 = vrot.slane %v3255_v20, 2 }
 0x22d   : > { %v3266_v19 = vsel %vm1224_vm1, %v3263_v17, %v3264_v42  ;;  %3274 = sbr.rel (%p5232_p10) target bundleno = 590 (0x24e), region = 40 }
 0x22e   : > { %v3267_v59 = vsel %vm1226_vm2, %v3265_v58, %v3266_v19  ;;  %v3243_v60 = vpop.f32.mrf.mxu2 }
 0x22f   : > { %v3269_v61 = vadd.f32 %v3267_v59, %v2257_v6  ;;  %v3256_v62 = vpop.f32.mrf.mxu3 }
 0x231   : > { %3270 = vst [vmem:[#allocation2] sm:$0xff] %v3269_v61 }
 0x232   : > { %v3276_v63 = vld [vmem:[%s6747_s2] sm:$0xf]  ;;  %vm3310_vm4 = vcmask 1040384   ;;  %vm3314_vm5 = vcmask 1042434  }
 0x233   : > { %v3278_v0 = vperm.slane %v3276_v63, 0  ;;  %v3279_v1 = vperm.slane %v3276_v63, 1  ;;  %v3280_v2 = vperm.slane %v3276_v63, 2  ;;  %v3281_v26 = vperm.slane %v3276_v63, 3 }
 0x235   : > { %v3282_v3 = vrot.slane %v3279_v1, 6  ;;  %v3283_v5 = vrot.slane %v3280_v2, 4  ;;  %v3284_v48 = vrot.slane %v3281_v26, 2 }
 0x237   : > { %v3285_v44 = vsel %vm1222_vm0, %v3278_v0, %v3282_v3  ;;  %v3286_v47 = vsel %vm1224_vm1, %v3283_v5, %v3284_v48 }
 0x238   : > { %v3275_v50 = vld [vmem:[#allocation2] sm:$0xff]  ;;  %v3287_v6 = vsel %vm1226_vm2, %v3285_v44, %v3286_v47 }
 0x239   : > { %v3289_v29 = vadd.f32 %v3287_v6, %v3275_v50 }
 0x23b   : > { %vm3290_vm3 = vcmp.ge.f32.partialorder %v3289_v29, 0.0  ;;  %v3291_v30 = vmul.f32 0.1, %v3289_v29 }
 0x23d   : > { %v3292_v7 = vsel %vm3290_vm3, %v3289_v29, %v3291_v30 }
 0x23e   : > { %3294 = vst [vmem:[#allocation1] ss:$4 sm:$0xff] %v3292_v7 }
 0x245   : > { %v3295_v8 = vld.sshfl [vmem:[#allocation1] sm:$0xff pattern:$0x73625140]  ;;  %v3296_v9 = vld.sshfl [vmem:[#allocation1 + $0x8] sm:$0xff pattern:$0x73625140] }
 0x246   : > { %v3297_v10 = vld.sshfl [vmem:[#allocation1 + $0x10] sm:$0xff pattern:$0x73625140]  ;;  %v3298_v11 = vld.sshfl [vmem:[#allocation1 + $0x18] sm:$0xff pattern:$0x73625140]  ;;  %v3303_v27 = vpack.c.bf16 %v3296_v9, %v3295_v8 }
 0x247   : > { %v3304_v32 = vpack.c.bf16 %v3298_v11, %v3297_v10 }
 0x248   : > { %v3307_v12 = vrot.slane %v3303_v27, 3 }
 0x249   : > { %v3308_v13 = vrot.slane %v3304_v32, 6  ;;  %v3309_v14 = vrot.slane %v3304_v32, 1 }
 0x24a   : > { %v3313_v4 = vsel %vm3310_vm4, %v3303_v27, %v3307_v12 }
 0x24b   : > { %v3317_v16 = vsel %vm3314_vm5, %v3308_v13, %v3309_v14 }
 0x24c   : > { %v3318_v18 = vsel %vm1222_vm0, %v3313_v4, %v3317_v16 }
 0x24d   : > { %3320 = vst [vmem:[%s218_s8] sm:$0xf] %v3318_v18 }
 0x24e PF: > { %s13_s18 = sadd.s32 1, %s5731_s18   ;;  %s6749_s12 = smov %s5719_s15 }
 0x24f   : > { %p10_p11 = scmp.ge.s32.totalorder %s13_s18, 14   ;;  %s6750_s13 = smov %s5723_s16 }
 0x250   : > { %s6751_s14 = smov %s5727_s17  ;;  %s6752_s15 = smov %s6756_s19 }
 0x251   : > { %s6753_s16 = smov %s6760_s20  ;;  %s6754_s17 = smov %s6764_s21 }
 0x252   :  { %12 = sbr.rel (!%p10_p11) target bundleno = 4 (0x4), region = 73 }

</bundles_post_ra>
